<compile_context>
chip_gen: v7x
topology: tpu7x:2x2x1
jax: 0.10.0
libtpu: 0.0.40
codegen_flags: <defaults>
</compile_context>

<pallas_src>
import jax
import jax.numpy as jnp
from jax import lax
from jax.experimental import pallas as pl
from jax.experimental.pallas import tpu as pltpu

# Flat-grid row counts (spatial positions kept on a 21-wide flat grid).
_R1 = 419   # conv1 output rows  (valid rows: 21*oh + ow, oh, ow in [0, 20))
_R2 = 177   # conv2 output rows  (valid rows: 21*a  + b,  a,  b  in [0, 9))
_R3 = 133   # conv3 output rows  (valid rows: 21*a' + b', a', b' in [0, 7))


# ----------------------------------------------------------------------------
# Kernel 1: fused conv1 + conv2 + conv3 (bias + ReLU), one image per grid step
# ----------------------------------------------------------------------------
def _convnet_kernel(x_ref, w1_ref, b1_ref, w2_ref, b2_ref, w3_ref, b3_ref,
                    out_ref, a1_s, a2_s):
    """x_ref: (441, 64) f32 space-to-depth(4) input (flat 21x21 spatial grid).
       wN_ref: (taps, Cin_pad, 128) bf16, bN_ref: (1, 128) f32.
       out_ref: (49, 64) f32 = valid 7x7 spatial rows x 64 channels, (h,w,c).
       a1_s: (424, 128) f32 scratch, a2_s: (177, 128) f32 scratch."""
    f32 = jnp.float32
    bf16 = jnp.bfloat16

    # conv1: 8x8 stride-4 conv == 2x2 stride-1 conv on the space-to-depth input.
    acc = jnp.zeros((_R1, 128), f32)
    for di in range(2):
        for dj in range(2):
            xs = x_ref[pl.ds(21 * di + dj, _R1), :].astype(bf16)
            acc += jnp.dot(xs, w1_ref[2 * di + dj], preferred_element_type=f32)
    a1_s[pl.ds(0, _R1), :] = jnp.maximum(acc + b1_ref[...], 0.0)

    # conv2: 4x4 stride-2 conv; the stride becomes stride-2 row loads.
    acc = jnp.zeros((_R2, 128), f32)
    t = 0
    for di in range(2):
        for dj in range(2):
            for ri in range(2):
                for rj in range(2):
                    start = 42 * di + 2 * dj + 21 * ri + rj
                    xs = a1_s[pl.ds(start, _R2, stride=2), :].astype(bf16)
                    acc += jnp.dot(xs, w2_ref[t], preferred_element_type=f32)
                    t += 1
    a2_s[...] = jnp.maximum(acc + b2_ref[...], 0.0)

    # conv3: 3x3 stride-1 conv; taps are contiguous row loads.
    acc = jnp.zeros((_R3, 128), f32)
    for i in range(3):
        for j in range(3):
            xs = a2_s[pl.ds(21 * i + j, _R3), :].astype(bf16)
            acc += jnp.dot(xs, w3_ref[3 * i + j], preferred_element_type=f32)
    a3 = jnp.maximum(acc + b3_ref[...], 0.0)

    # Compact the valid 7x7 spatial rows and the first 64 (real) channels.
    for h in range(7):
        out_ref[pl.ds(7 * h, 7), :] = a3[21 * h:21 * h + 7, :64]


# ----------------------------------------------------------------------------
# Kernel 2: fused fc1 (ReLU) + fc2, whole batch in one step
# ----------------------------------------------------------------------------
def _fc_kernel(x_ref, w1_ref, b1_ref, w2_ref, b2_ref, out_ref):
    f32, bf16 = jnp.float32, jnp.bfloat16
    h = jnp.dot(x_ref[...].astype(bf16), w1_ref[...], preferred_element_type=f32)
    h = jnp.maximum(h + b1_ref[...], 0.0)
    o = jnp.dot(h.astype(bf16), w2_ref[...], preferred_element_type=f32)
    out_ref[...] = o + b2_ref[...]


# ----------------------------------------------------------------------------
# Forward pass
# ----------------------------------------------------------------------------
def net_forward(params, x_nchw):
    """x_nchw: (N, 4, 84, 84) f32 -> (N, 4) f32."""
    n = x_nchw.shape[0]
    # NCHW -> NHWC -> space-to-depth(4) -> flat (441, 64) rows per image.
    x = jnp.transpose(x_nchw, (0, 2, 3, 1))
    x = x.reshape(n, 21, 4, 21, 4, 4).transpose(0, 1, 3, 2, 4, 5)
    x = x.reshape(n, 441, 64)

    conv_out = pl.pallas_call(
        _convnet_kernel,
        out_shape=jax.ShapeDtypeStruct((n, 49, 64), jnp.float32),
        grid=(n,),
        in_specs=[
            pl.BlockSpec((None, 441, 64), lambda i: (i, 0, 0)),
            pl.BlockSpec((4, 64, 128), lambda i: (0, 0, 0)),
            pl.BlockSpec((1, 128), lambda i: (0, 0)),
            pl.BlockSpec((16, 128, 128), lambda i: (0, 0, 0)),
            pl.BlockSpec((1, 128), lambda i: (0, 0)),
            pl.BlockSpec((9, 128, 128), lambda i: (0, 0, 0)),
            pl.BlockSpec((1, 128), lambda i: (0, 0)),
        ],
        out_specs=pl.BlockSpec((None, 49, 64), lambda i: (i, 0, 0)),
        scratch_shapes=[pltpu.VMEM((424, 128), jnp.float32),
                        pltpu.VMEM((_R2, 128), jnp.float32)],
        compiler_params=pltpu.CompilerParams(
            dimension_semantics=("parallel",)),
    )(x, params["w1"], params["b1"], params["w2"], params["b2"],
      params["w3"], params["b3"])

    # (h, w, c) flatten; fc1 weight rows were pre-permuted to match this order.
    xf = conv_out.reshape(n, 3136)

    out = pl.pallas_call(
        _fc_kernel,
        out_shape=jax.ShapeDtypeStruct((n, 4), jnp.float32),
        grid=(1,),
        in_specs=[
            pl.BlockSpec((n, 3136), lambda i: (0, 0)),
            pl.BlockSpec((3136, 512), lambda i: (0, 0)),
            pl.BlockSpec((1, 512), lambda i: (0, 0)),
            pl.BlockSpec((512, 4), lambda i: (0, 0)),
            pl.BlockSpec((1, 4), lambda i: (0, 0)),
        ],
        out_specs=pl.BlockSpec((n, 4), lambda i: (0, 0)),
        compiler_params=pltpu.CompilerParams(
            dimension_semantics=("arbitrary",)),
    )(xf, params["fc1_w"], params["fc1_b"], params["fc2_w"], params["fc2_b"])
    return out


# ----------------------------------------------------------------------------
# Parameters: deterministic synthetic init (PyTorch layout), then one-time
# re-layout to the kernel formats (bf16, channel padding to 128, tap-major).
# ----------------------------------------------------------------------------
def init_raw_params(key):
    ks = jax.random.split(key, 10)
    s = 0.05
    return {
        "conv1_w": s * jax.random.normal(ks[0], (32, 4, 8, 8), jnp.float32),
        "conv1_b": s * jax.random.normal(ks[1], (32,), jnp.float32),
        "conv2_w": s * jax.random.normal(ks[2], (64, 32, 4, 4), jnp.float32),
        "conv2_b": s * jax.random.normal(ks[3], (64,), jnp.float32),
        "conv3_w": s * jax.random.normal(ks[4], (64, 64, 3, 3), jnp.float32),
        "conv3_b": s * jax.random.normal(ks[5], (64,), jnp.float32),
        "fc1_w": s * jax.random.normal(ks[6], (512, 3136), jnp.float32),
        "fc1_b": s * jax.random.normal(ks[7], (512,), jnp.float32),
        "fc2_w": s * jax.random.normal(ks[8], (4, 512), jnp.float32),
        "fc2_b": s * jax.random.normal(ks[9], (4,), jnp.float32),
    }


def prepare_params(raw):
    bf16, f32 = jnp.bfloat16, jnp.float32
    # conv1 (oc,ic,8,8): kh=4*di+qh, kw=4*dj+qw -> (t=2di+dj, qh*16+qw*4+ic, oc_pad128)
    w1 = raw["conv1_w"].reshape(32, 4, 2, 4, 2, 4)
    w1 = w1.transpose(2, 4, 3, 5, 1, 0).reshape(4, 64, 32)
    w1 = jnp.pad(w1, ((0, 0), (0, 0), (0, 96))).astype(bf16)
    b1 = jnp.pad(raw["conv1_b"], (0, 96)).reshape(1, 128).astype(f32)
    # conv2 (oc,ic,4,4): kh=2*di+ri, kw=2*dj+rj -> (t=8di+4dj+2ri+rj, ic_pad, oc_pad)
    w2 = raw["conv2_w"].reshape(64, 32, 2, 2, 2, 2)
    w2 = w2.transpose(2, 4, 3, 5, 1, 0).reshape(16, 32, 64)
    w2 = jnp.pad(w2, ((0, 0), (0, 96), (0, 64))).astype(bf16)
    b2 = jnp.pad(raw["conv2_b"], (0, 64)).reshape(1, 128).astype(f32)
    # conv3 (oc,ic,3,3) -> (t=3i+j, ic_pad, oc_pad)
    w3 = raw["conv3_w"].transpose(2, 3, 1, 0).reshape(9, 64, 64)
    w3 = jnp.pad(w3, ((0, 0), (0, 64), (0, 64))).astype(bf16)
    b3 = jnp.pad(raw["conv3_b"], (0, 64)).reshape(1, 128).astype(f32)
    # fc1: reorder rows from torch's (c,h,w) flatten to the kernel's (h,w,c).
    fw1 = raw["fc1_w"].reshape(512, 64, 7, 7).transpose(2, 3, 1, 0)
    fw1 = fw1.reshape(3136, 512).astype(bf16)
    fb1 = raw["fc1_b"].reshape(1, 512).astype(f32)
    fw2 = raw["fc2_w"].T.astype(bf16)                 # (512, 4)
    fb2 = raw["fc2_b"].reshape(1, 4).astype(f32)
    return {"w1": w1, "b1": b1, "w2": w2, "b2": b2, "w3": w3, "b3": b3,
            "fc1_w": fw1, "fc1_b": fb1, "fc2_w": fw2, "fc2_b": fb2}


# ----------------------------------------------------------------------------
# Plain-JAX reference (same bf16 cast points, f32 accumulation) for validation
# ----------------------------------------------------------------------------
def reference_forward(raw, x_nchw):
    bf16, f32 = jnp.bfloat16, jnp.float32

    def conv(x, w, b, stride):
        y = lax.conv_general_dilated(
            x.astype(bf16), w.astype(bf16), (stride, stride), "VALID",
            dimension_numbers=("NCHW", "OIHW", "NCHW"),
            preferred_element_type=f32)
        return jnp.maximum(y + b.reshape(1, -1, 1, 1), 0.0)

    a = conv(x_nchw, raw["conv1_w"], raw["conv1_b"], 4)
    a = conv(a, raw["conv2_w"], raw["conv2_b"], 2)
    a = conv(a, raw["conv3_w"], raw["conv3_b"], 1)
    a = a.reshape(a.shape[0], -1)                     # torch .view(N, -1)
    h = jnp.dot(a.astype(bf16), raw["fc1_w"].T.astype(bf16),
                preferred_element_type=f32) + raw["fc1_b"]
    h = jnp.maximum(h, 0.0)
    return jnp.dot(h.astype(bf16), raw["fc2_w"].T.astype(bf16),
                   preferred_element_type=f32) + raw["fc2_b"]


if __name__ == "__main__":
    key = jax.random.PRNGKey(0)
    pkey, xkey = jax.random.split(key)
    raw = init_raw_params(pkey)
    params = prepare_params(raw)

    # fc1 expects 64*7*7 = 3136 features, which pins the input to 4 x 84 x 84.
    batch = 2
    x = jax.random.uniform(xkey, (batch, 4, 84, 84), dtype=jnp.float32)

    fwd = jax.jit(net_forward)
    out = jax.block_until_ready(fwd(params, x))
    assert out.shape == (batch, 4), out.shape

    # Validate against the plain-JAX reference (matching bf16/f32 cast points).
    ref = jax.block_until_ready(reference_forward(raw, x))
    assert bool(jnp.allclose(out, ref, rtol=2e-2, atol=2e-2))

    print("KERNEL_OK")
</pallas_src>

<mosaic_0001>
module attributes {stable_mosaic.version = 11 : i64} {
  func.func @_convnet_kernel(%arg0: i32, %arg1: memref<1x441x64xf32, #tpu.memory_space<vmem>>, %arg2: memref<4x64x128xbf16, #tpu.memory_space<vmem>>, %arg3: memref<1x128xf32, #tpu.memory_space<vmem>>, %arg4: memref<16x128x128xbf16, #tpu.memory_space<vmem>>, %arg5: memref<1x128xf32, #tpu.memory_space<vmem>>, %arg6: memref<9x128x128xbf16, #tpu.memory_space<vmem>>, %arg7: memref<1x128xf32, #tpu.memory_space<vmem>>, %arg8: memref<1x49x64xf32, #tpu.memory_space<vmem>>, %arg9: memref<424x128xf32, #tpu.memory_space<vmem>>, %arg10: memref<177x128xf32, #tpu.memory_space<vmem>>) attributes {dimension_semantics = [#tpu.dimension_semantics<parallel>], iteration_bounds = array<i64: 2>, scalar_prefetch = 0 : i64, scratch_operands = 2 : i64, tpu.core_type = #tpu.core_type<tc>, window_params = [{transform_indices = @transform_0, window_bounds = array<i64: 1, 441, 64>}, {pipeline_mode = #tpu.pipeline_mode<synchronous>, transform_indices = @transform_1, window_bounds = array<i64: 4, 64, 128>}, {pipeline_mode = #tpu.pipeline_mode<synchronous>, transform_indices = @transform_2, window_bounds = array<i64: 1, 128>}, {pipeline_mode = #tpu.pipeline_mode<synchronous>, transform_indices = @transform_3, window_bounds = array<i64: 16, 128, 128>}, {pipeline_mode = #tpu.pipeline_mode<synchronous>, transform_indices = @transform_4, window_bounds = array<i64: 1, 128>}, {pipeline_mode = #tpu.pipeline_mode<synchronous>, transform_indices = @transform_5, window_bounds = array<i64: 9, 128, 128>}, {pipeline_mode = #tpu.pipeline_mode<synchronous>, transform_indices = @transform_6, window_bounds = array<i64: 1, 128>}, {transform_indices = @transform_7, window_bounds = array<i64: 1, 49, 64>}]} {
    %cst = arith.constant 0.000000e+00 : f32
    %0 = vector.broadcast %cst : f32 to vector<419x128xf32>
    %c0 = arith.constant 0 : index
    %c0_0 = arith.constant 0 : index
    %c0_1 = arith.constant 0 : index
    %1 = vector.load %arg1[%c0, %c0_0, %c0_1] : memref<1x441x64xf32, #tpu.memory_space<vmem>>, vector<1x419x64xf32>
    %2 = vector.shape_cast %1 : vector<1x419x64xf32> to vector<419x64xf32>
    %3 = arith.truncf %2 : vector<419x64xf32> to vector<419x64xbf16>
    %c0_2 = arith.constant 0 : index
    %c0_3 = arith.constant 0 : index
    %c0_4 = arith.constant 0 : index
    %4 = vector.load %arg2[%c0_2, %c0_3, %c0_4] : memref<4x64x128xbf16, #tpu.memory_space<vmem>>, vector<1x64x128xbf16>
    %5 = vector.shape_cast %4 : vector<1x64x128xbf16> to vector<64x128xbf16>
    %cst_5 = arith.constant dense<0.000000e+00> : vector<419x128xf32>
    %6 = tpu.matmul %3, %5, %cst_5 {dimension_numbers = #tpu.dot_dimension_numbers<[1], [0], [0], [1], [0, 0, 1, 1], [], []>} : vector<419x64xbf16>, vector<64x128xbf16>, vector<419x128xf32> -> vector<419x128xf32>
    %7 = arith.addf %0, %6 : vector<419x128xf32>
    %c0_6 = arith.constant 0 : index
    %c1 = arith.constant 1 : index
    %c0_7 = arith.constant 0 : index
    %8 = vector.load %arg1[%c0_6, %c1, %c0_7] : memref<1x441x64xf32, #tpu.memory_space<vmem>>, vector<1x419x64xf32>
    %9 = vector.shape_cast %8 : vector<1x419x64xf32> to vector<419x64xf32>
    %10 = arith.truncf %9 : vector<419x64xf32> to vector<419x64xbf16>
    %c1_8 = arith.constant 1 : index
    %c0_9 = arith.constant 0 : index
    %c0_10 = arith.constant 0 : index
    %11 = vector.load %arg2[%c1_8, %c0_9, %c0_10] : memref<4x64x128xbf16, #tpu.memory_space<vmem>>, vector<1x64x128xbf16>
    %12 = vector.shape_cast %11 : vector<1x64x128xbf16> to vector<64x128xbf16>
    %cst_11 = arith.constant dense<0.000000e+00> : vector<419x128xf32>
    %13 = tpu.matmul %10, %12, %cst_11 {dimension_numbers = #tpu.dot_dimension_numbers<[1], [0], [0], [1], [0, 0, 1, 1], [], []>} : vector<419x64xbf16>, vector<64x128xbf16>, vector<419x128xf32> -> vector<419x128xf32>
    %14 = arith.addf %7, %13 : vector<419x128xf32>
    %c0_12 = arith.constant 0 : index
    %c21 = arith.constant 21 : index
    %c0_13 = arith.constant 0 : index
    %15 = vector.load %arg1[%c0_12, %c21, %c0_13] : memref<1x441x64xf32, #tpu.memory_space<vmem>>, vector<1x419x64xf32>
    %16 = vector.shape_cast %15 : vector<1x419x64xf32> to vector<419x64xf32>
    %17 = arith.truncf %16 : vector<419x64xf32> to vector<419x64xbf16>
    %c2 = arith.constant 2 : index
    %c0_14 = arith.constant 0 : index
    %c0_15 = arith.constant 0 : index
    %18 = vector.load %arg2[%c2, %c0_14, %c0_15] : memref<4x64x128xbf16, #tpu.memory_space<vmem>>, vector<1x64x128xbf16>
    %19 = vector.shape_cast %18 : vector<1x64x128xbf16> to vector<64x128xbf16>
    %cst_16 = arith.constant dense<0.000000e+00> : vector<419x128xf32>
    %20 = tpu.matmul %17, %19, %cst_16 {dimension_numbers = #tpu.dot_dimension_numbers<[1], [0], [0], [1], [0, 0, 1, 1], [], []>} : vector<419x64xbf16>, vector<64x128xbf16>, vector<419x128xf32> -> vector<419x128xf32>
    %21 = arith.addf %14, %20 : vector<419x128xf32>
    %c0_17 = arith.constant 0 : index
    %c22 = arith.constant 22 : index
    %c0_18 = arith.constant 0 : index
    %22 = vector.load %arg1[%c0_17, %c22, %c0_18] : memref<1x441x64xf32, #tpu.memory_space<vmem>>, vector<1x419x64xf32>
    %23 = vector.shape_cast %22 : vector<1x419x64xf32> to vector<419x64xf32>
    %24 = arith.truncf %23 : vector<419x64xf32> to vector<419x64xbf16>
    %c3 = arith.constant 3 : index
    %c0_19 = arith.constant 0 : index
    %c0_20 = arith.constant 0 : index
    %25 = vector.load %arg2[%c3, %c0_19, %c0_20] : memref<4x64x128xbf16, #tpu.memory_space<vmem>>, vector<1x64x128xbf16>
    %26 = vector.shape_cast %25 : vector<1x64x128xbf16> to vector<64x128xbf16>
    %cst_21 = arith.constant dense<0.000000e+00> : vector<419x128xf32>
    %27 = tpu.matmul %24, %26, %cst_21 {dimension_numbers = #tpu.dot_dimension_numbers<[1], [0], [0], [1], [0, 0, 1, 1], [], []>} : vector<419x64xbf16>, vector<64x128xbf16>, vector<419x128xf32> -> vector<419x128xf32>
    %28 = arith.addf %21, %27 : vector<419x128xf32>
    %c0_22 = arith.constant 0 : index
    %c0_23 = arith.constant 0 : index
    %29 = vector.load %arg3[%c0_22, %c0_23] : memref<1x128xf32, #tpu.memory_space<vmem>>, vector<1x128xf32>
    %30 = vector.broadcast %29 : vector<1x128xf32> to vector<419x128xf32>
    %31 = arith.addf %28, %30 : vector<419x128xf32>
    %cst_24 = arith.constant 0.000000e+00 : f32
    %32 = vector.broadcast %cst_24 : f32 to vector<419x128xf32>
    %33 = arith.maximumf %31, %32 : vector<419x128xf32>
    %c0_25 = arith.constant 0 : index
    %c0_26 = arith.constant 0 : index
    %34 = vector.load %arg9[%c0_25, %c0_26] : memref<424x128xf32, #tpu.memory_space<vmem>>, vector<419x128xf32>
    tpu.vector_store %arg9[%c0_25, %c0_26], %33 {strides = array<i32>} : memref<424x128xf32, #tpu.memory_space<vmem>>, vector<419x128xf32>,
    %cst_27 = arith.constant 0.000000e+00 : f32
    %35 = vector.broadcast %cst_27 : f32 to vector<177x128xf32>
    %c0_28 = arith.constant 0 : index
    %c0_29 = arith.constant 0 : index
    %36 = tpu.strided_load %arg9[%c0_28, %c0_29] {strides = array<i32: 2, 1>} : memref<424x128xf32, #tpu.memory_space<vmem>>, vector<177x128xf32>
    %37 = arith.truncf %36 : vector<177x128xf32> to vector<177x128xbf16>
    %c0_30 = arith.constant 0 : index
    %c0_31 = arith.constant 0 : index
    %c0_32 = arith.constant 0 : index
    %38 = vector.load %arg4[%c0_30, %c0_31, %c0_32] : memref<16x128x128xbf16, #tpu.memory_space<vmem>>, vector<1x128x128xbf16>
    %39 = vector.shape_cast %38 : vector<1x128x128xbf16> to vector<128x128xbf16>
    %cst_33 = arith.constant dense<0.000000e+00> : vector<177x128xf32>
    %40 = tpu.matmul %37, %39, %cst_33 {dimension_numbers = #tpu.dot_dimension_numbers<[1], [0], [0], [1], [0, 0, 1, 1], [], []>} : vector<177x128xbf16>, vector<128x128xbf16>, vector<177x128xf32> -> vector<177x128xf32>
    %41 = arith.addf %35, %40 : vector<177x128xf32>
    %c1_34 = arith.constant 1 : index
    %c0_35 = arith.constant 0 : index
    %42 = tpu.strided_load %arg9[%c1_34, %c0_35] {strides = array<i32: 2, 1>} : memref<424x128xf32, #tpu.memory_space<vmem>>, vector<177x128xf32>
    %43 = arith.truncf %42 : vector<177x128xf32> to vector<177x128xbf16>
    %c1_36 = arith.constant 1 : index
    %c0_37 = arith.constant 0 : index
    %c0_38 = arith.constant 0 : index
    %44 = vector.load %arg4[%c1_36, %c0_37, %c0_38] : memref<16x128x128xbf16, #tpu.memory_space<vmem>>, vector<1x128x128xbf16>
    %45 = vector.shape_cast %44 : vector<1x128x128xbf16> to vector<128x128xbf16>
    %cst_39 = arith.constant dense<0.000000e+00> : vector<177x128xf32>
    %46 = tpu.matmul %43, %45, %cst_39 {dimension_numbers = #tpu.dot_dimension_numbers<[1], [0], [0], [1], [0, 0, 1, 1], [], []>} : vector<177x128xbf16>, vector<128x128xbf16>, vector<177x128xf32> -> vector<177x128xf32>
    %47 = arith.addf %41, %46 : vector<177x128xf32>
    %c21_40 = arith.constant 21 : index
    %c0_41 = arith.constant 0 : index
    %48 = tpu.strided_load %arg9[%c21_40, %c0_41] {strides = array<i32: 2, 1>} : memref<424x128xf32, #tpu.memory_space<vmem>>, vector<177x128xf32>
    %49 = arith.truncf %48 : vector<177x128xf32> to vector<177x128xbf16>
    %c2_42 = arith.constant 2 : index
    %c0_43 = arith.constant 0 : index
    %c0_44 = arith.constant 0 : index
    %50 = vector.load %arg4[%c2_42, %c0_43, %c0_44] : memref<16x128x128xbf16, #tpu.memory_space<vmem>>, vector<1x128x128xbf16>
    %51 = vector.shape_cast %50 : vector<1x128x128xbf16> to vector<128x128xbf16>
    %cst_45 = arith.constant dense<0.000000e+00> : vector<177x128xf32>
    %52 = tpu.matmul %49, %51, %cst_45 {dimension_numbers = #tpu.dot_dimension_numbers<[1], [0], [0], [1], [0, 0, 1, 1], [], []>} : vector<177x128xbf16>, vector<128x128xbf16>, vector<177x128xf32> -> vector<177x128xf32>
    %53 = arith.addf %47, %52 : vector<177x128xf32>
    %c22_46 = arith.constant 22 : index
    %c0_47 = arith.constant 0 : index
    %54 = tpu.strided_load %arg9[%c22_46, %c0_47] {strides = array<i32: 2, 1>} : memref<424x128xf32, #tpu.memory_space<vmem>>, vector<177x128xf32>
    %55 = arith.truncf %54 : vector<177x128xf32> to vector<177x128xbf16>
    %c3_48 = arith.constant 3 : index
    %c0_49 = arith.constant 0 : index
    %c0_50 = arith.constant 0 : index
    %56 = vector.load %arg4[%c3_48, %c0_49, %c0_50] : memref<16x128x128xbf16, #tpu.memory_space<vmem>>, vector<1x128x128xbf16>
    %57 = vector.shape_cast %56 : vector<1x128x128xbf16> to vector<128x128xbf16>
    %cst_51 = arith.constant dense<0.000000e+00> : vector<177x128xf32>
    %58 = tpu.matmul %55, %57, %cst_51 {dimension_numbers = #tpu.dot_dimension_numbers<[1], [0], [0], [1], [0, 0, 1, 1], [], []>} : vector<177x128xbf16>, vector<128x128xbf16>, vector<177x128xf32> -> vector<177x128xf32>
    %59 = arith.addf %53, %58 : vector<177x128xf32>
    %c2_52 = arith.constant 2 : index
    %c0_53 = arith.constant 0 : index
    %60 = tpu.strided_load %arg9[%c2_52, %c0_53] {strides = array<i32: 2, 1>} : memref<424x128xf32, #tpu.memory_space<vmem>>, vector<177x128xf32>
    %61 = arith.truncf %60 : vector<177x128xf32> to vector<177x128xbf16>
    %c4 = arith.constant 4 : index
    %c0_54 = arith.constant 0 : index
    %c0_55 = arith.constant 0 : index
    %62 = vector.load %arg4[%c4, %c0_54, %c0_55] : memref<16x128x128xbf16, #tpu.memory_space<vmem>>, vector<1x128x128xbf16>
    %63 = vector.shape_cast %62 : vector<1x128x128xbf16> to vector<128x128xbf16>
    %cst_56 = arith.constant dense<0.000000e+00> : vector<177x128xf32>
    %64 = tpu.matmul %61, %63, %cst_56 {dimension_numbers = #tpu.dot_dimension_numbers<[1], [0], [0], [1], [0, 0, 1, 1], [], []>} : vector<177x128xbf16>, vector<128x128xbf16>, vector<177x128xf32> -> vector<177x128xf32>
    %65 = arith.addf %59, %64 : vector<177x128xf32>
    %c3_57 = arith.constant 3 : index
    %c0_58 = arith.constant 0 : index
    %66 = tpu.strided_load %arg9[%c3_57, %c0_58] {strides = array<i32: 2, 1>} : memref<424x128xf32, #tpu.memory_space<vmem>>, vector<177x128xf32>
    %67 = arith.truncf %66 : vector<177x128xf32> to vector<177x128xbf16>
    %c5 = arith.constant 5 : index
    %c0_59 = arith.constant 0 : index
    %c0_60 = arith.constant 0 : index
    %68 = vector.load %arg4[%c5, %c0_59, %c0_60] : memref<16x128x128xbf16, #tpu.memory_space<vmem>>, vector<1x128x128xbf16>
    %69 = vector.shape_cast %68 : vector<1x128x128xbf16> to vector<128x128xbf16>
    %cst_61 = arith.constant dense<0.000000e+00> : vector<177x128xf32>
    %70 = tpu.matmul %67, %69, %cst_61 {dimension_numbers = #tpu.dot_dimension_numbers<[1], [0], [0], [1], [0, 0, 1, 1], [], []>} : vector<177x128xbf16>, vector<128x128xbf16>, vector<177x128xf32> -> vector<177x128xf32>
    %71 = arith.addf %65, %70 : vector<177x128xf32>
    %c23 = arith.constant 23 : index
    %c0_62 = arith.constant 0 : index
    %72 = tpu.strided_load %arg9[%c23, %c0_62] {strides = array<i32: 2, 1>} : memref<424x128xf32, #tpu.memory_space<vmem>>, vector<177x128xf32>
    %73 = arith.truncf %72 : vector<177x128xf32> to vector<177x128xbf16>
    %c6 = arith.constant 6 : index
    %c0_63 = arith.constant 0 : index
    %c0_64 = arith.constant 0 : index
    %74 = vector.load %arg4[%c6, %c0_63, %c0_64] : memref<16x128x128xbf16, #tpu.memory_space<vmem>>, vector<1x128x128xbf16>
    %75 = vector.shape_cast %74 : vector<1x128x128xbf16> to vector<128x128xbf16>
    %cst_65 = arith.constant dense<0.000000e+00> : vector<177x128xf32>
    %76 = tpu.matmul %73, %75, %cst_65 {dimension_numbers = #tpu.dot_dimension_numbers<[1], [0], [0], [1], [0, 0, 1, 1], [], []>} : vector<177x128xbf16>, vector<128x128xbf16>, vector<177x128xf32> -> vector<177x128xf32>
    %77 = arith.addf %71, %76 : vector<177x128xf32>
    %c24 = arith.constant 24 : index
    %c0_66 = arith.constant 0 : index
    %78 = tpu.strided_load %arg9[%c24, %c0_66] {strides = array<i32: 2, 1>} : memref<424x128xf32, #tpu.memory_space<vmem>>, vector<177x128xf32>
    %79 = arith.truncf %78 : vector<177x128xf32> to vector<177x128xbf16>
    %c7 = arith.constant 7 : index
    %c0_67 = arith.constant 0 : index
    %c0_68 = arith.constant 0 : index
    %80 = vector.load %arg4[%c7, %c0_67, %c0_68] : memref<16x128x128xbf16, #tpu.memory_space<vmem>>, vector<1x128x128xbf16>
    %81 = vector.shape_cast %80 : vector<1x128x128xbf16> to vector<128x128xbf16>
    %cst_69 = arith.constant dense<0.000000e+00> : vector<177x128xf32>
    %82 = tpu.matmul %79, %81, %cst_69 {dimension_numbers = #tpu.dot_dimension_numbers<[1], [0], [0], [1], [0, 0, 1, 1], [], []>} : vector<177x128xbf16>, vector<128x128xbf16>, vector<177x128xf32> -> vector<177x128xf32>
    %83 = arith.addf %77, %82 : vector<177x128xf32>
    %c42 = arith.constant 42 : index
    %c0_70 = arith.constant 0 : index
    %84 = tpu.strided_load %arg9[%c42, %c0_70] {strides = array<i32: 2, 1>} : memref<424x128xf32, #tpu.memory_space<vmem>>, vector<177x128xf32>
    %85 = arith.truncf %84 : vector<177x128xf32> to vector<177x128xbf16>
    %c8 = arith.constant 8 : index
    %c0_71 = arith.constant 0 : index
    %c0_72 = arith.constant 0 : index
    %86 = vector.load %arg4[%c8, %c0_71, %c0_72] : memref<16x128x128xbf16, #tpu.memory_space<vmem>>, vector<1x128x128xbf16>
    %87 = vector.shape_cast %86 : vector<1x128x128xbf16> to vector<128x128xbf16>
    %cst_73 = arith.constant dense<0.000000e+00> : vector<177x128xf32>
    %88 = tpu.matmul %85, %87, %cst_73 {dimension_numbers = #tpu.dot_dimension_numbers<[1], [0], [0], [1], [0, 0, 1, 1], [], []>} : vector<177x128xbf16>, vector<128x128xbf16>, vector<177x128xf32> -> vector<177x128xf32>
    %89 = arith.addf %83, %88 : vector<177x128xf32>
    %c43 = arith.constant 43 : index
    %c0_74 = arith.constant 0 : index
    %90 = tpu.strided_load %arg9[%c43, %c0_74] {strides = array<i32: 2, 1>} : memref<424x128xf32, #tpu.memory_space<vmem>>, vector<177x128xf32>
    %91 = arith.truncf %90 : vector<177x128xf32> to vector<177x128xbf16>
    %c9 = arith.constant 9 : index
    %c0_75 = arith.constant 0 : index
    %c0_76 = arith.constant 0 : index
    %92 = vector.load %arg4[%c9, %c0_75, %c0_76] : memref<16x128x128xbf16, #tpu.memory_space<vmem>>, vector<1x128x128xbf16>
    %93 = vector.shape_cast %92 : vector<1x128x128xbf16> to vector<128x128xbf16>
    %cst_77 = arith.constant dense<0.000000e+00> : vector<177x128xf32>
    %94 = tpu.matmul %91, %93, %cst_77 {dimension_numbers = #tpu.dot_dimension_numbers<[1], [0], [0], [1], [0, 0, 1, 1], [], []>} : vector<177x128xbf16>, vector<128x128xbf16>, vector<177x128xf32> -> vector<177x128xf32>
    %95 = arith.addf %89, %94 : vector<177x128xf32>
    %c63 = arith.constant 63 : index
    %c0_78 = arith.constant 0 : index
    %96 = tpu.strided_load %arg9[%c63, %c0_78] {strides = array<i32: 2, 1>} : memref<424x128xf32, #tpu.memory_space<vmem>>, vector<177x128xf32>
    %97 = arith.truncf %96 : vector<177x128xf32> to vector<177x128xbf16>
    %c10 = arith.constant 10 : index
    %c0_79 = arith.constant 0 : index
    %c0_80 = arith.constant 0 : index
    %98 = vector.load %arg4[%c10, %c0_79, %c0_80] : memref<16x128x128xbf16, #tpu.memory_space<vmem>>, vector<1x128x128xbf16>
    %99 = vector.shape_cast %98 : vector<1x128x128xbf16> to vector<128x128xbf16>
    %cst_81 = arith.constant dense<0.000000e+00> : vector<177x128xf32>
    %100 = tpu.matmul %97, %99, %cst_81 {dimension_numbers = #tpu.dot_dimension_numbers<[1], [0], [0], [1], [0, 0, 1, 1], [], []>} : vector<177x128xbf16>, vector<128x128xbf16>, vector<177x128xf32> -> vector<177x128xf32>
    %101 = arith.addf %95, %100 : vector<177x128xf32>
    %c64 = arith.constant 64 : index
    %c0_82 = arith.constant 0 : index
    %102 = tpu.strided_load %arg9[%c64, %c0_82] {strides = array<i32: 2, 1>} : memref<424x128xf32, #tpu.memory_space<vmem>>, vector<177x128xf32>
    %103 = arith.truncf %102 : vector<177x128xf32> to vector<177x128xbf16>
    %c11 = arith.constant 11 : index
    %c0_83 = arith.constant 0 : index
    %c0_84 = arith.constant 0 : index
    %104 = vector.load %arg4[%c11, %c0_83, %c0_84] : memref<16x128x128xbf16, #tpu.memory_space<vmem>>, vector<1x128x128xbf16>
    %105 = vector.shape_cast %104 : vector<1x128x128xbf16> to vector<128x128xbf16>
    %cst_85 = arith.constant dense<0.000000e+00> : vector<177x128xf32>
    %106 = tpu.matmul %103, %105, %cst_85 {dimension_numbers = #tpu.dot_dimension_numbers<[1], [0], [0], [1], [0, 0, 1, 1], [], []>} : vector<177x128xbf16>, vector<128x128xbf16>, vector<177x128xf32> -> vector<177x128xf32>
    %107 = arith.addf %101, %106 : vector<177x128xf32>
    %c44 = arith.constant 44 : index
    %c0_86 = arith.constant 0 : index
    %108 = tpu.strided_load %arg9[%c44, %c0_86] {strides = array<i32: 2, 1>} : memref<424x128xf32, #tpu.memory_space<vmem>>, vector<177x128xf32>
    %109 = arith.truncf %108 : vector<177x128xf32> to vector<177x128xbf16>
    %c12 = arith.constant 12 : index
    %c0_87 = arith.constant 0 : index
    %c0_88 = arith.constant 0 : index
    %110 = vector.load %arg4[%c12, %c0_87, %c0_88] : memref<16x128x128xbf16, #tpu.memory_space<vmem>>, vector<1x128x128xbf16>
    %111 = vector.shape_cast %110 : vector<1x128x128xbf16> to vector<128x128xbf16>
    %cst_89 = arith.constant dense<0.000000e+00> : vector<177x128xf32>
    %112 = tpu.matmul %109, %111, %cst_89 {dimension_numbers = #tpu.dot_dimension_numbers<[1], [0], [0], [1], [0, 0, 1, 1], [], []>} : vector<177x128xbf16>, vector<128x128xbf16>, vector<177x128xf32> -> vector<177x128xf32>
    %113 = arith.addf %107, %112 : vector<177x128xf32>
    %c45 = arith.constant 45 : index
    %c0_90 = arith.constant 0 : index
    %114 = tpu.strided_load %arg9[%c45, %c0_90] {strides = array<i32: 2, 1>} : memref<424x128xf32, #tpu.memory_space<vmem>>, vector<177x128xf32>
    %115 = arith.truncf %114 : vector<177x128xf32> to vector<177x128xbf16>
    %c13 = arith.constant 13 : index
    %c0_91 = arith.constant 0 : index
    %c0_92 = arith.constant 0 : index
    %116 = vector.load %arg4[%c13, %c0_91, %c0_92] : memref<16x128x128xbf16, #tpu.memory_space<vmem>>, vector<1x128x128xbf16>
    %117 = vector.shape_cast %116 : vector<1x128x128xbf16> to vector<128x128xbf16>
    %cst_93 = arith.constant dense<0.000000e+00> : vector<177x128xf32>
    %118 = tpu.matmul %115, %117, %cst_93 {dimension_numbers = #tpu.dot_dimension_numbers<[1], [0], [0], [1], [0, 0, 1, 1], [], []>} : vector<177x128xbf16>, vector<128x128xbf16>, vector<177x128xf32> -> vector<177x128xf32>
    %119 = arith.addf %113, %118 : vector<177x128xf32>
    %c65 = arith.constant 65 : index
    %c0_94 = arith.constant 0 : index
    %120 = tpu.strided_load %arg9[%c65, %c0_94] {strides = array<i32: 2, 1>} : memref<424x128xf32, #tpu.memory_space<vmem>>, vector<177x128xf32>
    %121 = arith.truncf %120 : vector<177x128xf32> to vector<177x128xbf16>
    %c14 = arith.constant 14 : index
    %c0_95 = arith.constant 0 : index
    %c0_96 = arith.constant 0 : index
    %122 = vector.load %arg4[%c14, %c0_95, %c0_96] : memref<16x128x128xbf16, #tpu.memory_space<vmem>>, vector<1x128x128xbf16>
    %123 = vector.shape_cast %122 : vector<1x128x128xbf16> to vector<128x128xbf16>
    %cst_97 = arith.constant dense<0.000000e+00> : vector<177x128xf32>
    %124 = tpu.matmul %121, %123, %cst_97 {dimension_numbers = #tpu.dot_dimension_numbers<[1], [0], [0], [1], [0, 0, 1, 1], [], []>} : vector<177x128xbf16>, vector<128x128xbf16>, vector<177x128xf32> -> vector<177x128xf32>
    %125 = arith.addf %119, %124 : vector<177x128xf32>
    %c66 = arith.constant 66 : index
    %c0_98 = arith.constant 0 : index
    %126 = tpu.strided_load %arg9[%c66, %c0_98] {strides = array<i32: 2, 1>} : memref<424x128xf32, #tpu.memory_space<vmem>>, vector<177x128xf32>
    %127 = arith.truncf %126 : vector<177x128xf32> to vector<177x128xbf16>
    %c15 = arith.constant 15 : index
    %c0_99 = arith.constant 0 : index
    %c0_100 = arith.constant 0 : index
    %128 = vector.load %arg4[%c15, %c0_99, %c0_100] : memref<16x128x128xbf16, #tpu.memory_space<vmem>>, vector<1x128x128xbf16>
    %129 = vector.shape_cast %128 : vector<1x128x128xbf16> to vector<128x128xbf16>
    %cst_101 = arith.constant dense<0.000000e+00> : vector<177x128xf32>
    %130 = tpu.matmul %127, %129, %cst_101 {dimension_numbers = #tpu.dot_dimension_numbers<[1], [0], [0], [1], [0, 0, 1, 1], [], []>} : vector<177x128xbf16>, vector<128x128xbf16>, vector<177x128xf32> -> vector<177x128xf32>
    %131 = arith.addf %125, %130 : vector<177x128xf32>
    %c0_102 = arith.constant 0 : index
    %c0_103 = arith.constant 0 : index
    %132 = vector.load %arg5[%c0_102, %c0_103] : memref<1x128xf32, #tpu.memory_space<vmem>>, vector<1x128xf32>
    %133 = vector.broadcast %132 : vector<1x128xf32> to vector<177x128xf32>
    %134 = arith.addf %131, %133 : vector<177x128xf32>
    %cst_104 = arith.constant 0.000000e+00 : f32
    %135 = vector.broadcast %cst_104 : f32 to vector<177x128xf32>
    %136 = arith.maximumf %134, %135 : vector<177x128xf32>
    %c0_105 = arith.constant 0 : index
    %c0_106 = arith.constant 0 : index
    %137 = vector.load %arg10[%c0_105, %c0_106] : memref<177x128xf32, #tpu.memory_space<vmem>>, vector<177x128xf32>
    tpu.vector_store %arg10[%c0_105, %c0_106], %136 {strides = array<i32>} : memref<177x128xf32, #tpu.memory_space<vmem>>, vector<177x128xf32>,
    %cst_107 = arith.constant 0.000000e+00 : f32
    %138 = vector.broadcast %cst_107 : f32 to vector<133x128xf32>
    %c0_108 = arith.constant 0 : index
    %c0_109 = arith.constant 0 : index
    %139 = vector.load %arg10[%c0_108, %c0_109] : memref<177x128xf32, #tpu.memory_space<vmem>>, vector<133x128xf32>
    %140 = arith.truncf %139 : vector<133x128xf32> to vector<133x128xbf16>
    %c0_110 = arith.constant 0 : index
    %c0_111 = arith.constant 0 : index
    %c0_112 = arith.constant 0 : index
    %141 = vector.load %arg6[%c0_110, %c0_111, %c0_112] : memref<9x128x128xbf16, #tpu.memory_space<vmem>>, vector<1x128x128xbf16>
    %142 = vector.shape_cast %141 : vector<1x128x128xbf16> to vector<128x128xbf16>
    %cst_113 = arith.constant dense<0.000000e+00> : vector<133x128xf32>
    %143 = tpu.matmul %140, %142, %cst_113 {dimension_numbers = #tpu.dot_dimension_numbers<[1], [0], [0], [1], [0, 0, 1, 1], [], []>} : vector<133x128xbf16>, vector<128x128xbf16>, vector<133x128xf32> -> vector<133x128xf32>
    %144 = arith.addf %138, %143 : vector<133x128xf32>
    %c1_114 = arith.constant 1 : index
    %c0_115 = arith.constant 0 : index
    %145 = vector.load %arg10[%c1_114, %c0_115] : memref<177x128xf32, #tpu.memory_space<vmem>>, vector<133x128xf32>
    %146 = arith.truncf %145 : vector<133x128xf32> to vector<133x128xbf16>
    %c1_116 = arith.constant 1 : index
    %c0_117 = arith.constant 0 : index
    %c0_118 = arith.constant 0 : index
    %147 = vector.load %arg6[%c1_116, %c0_117, %c0_118] : memref<9x128x128xbf16, #tpu.memory_space<vmem>>, vector<1x128x128xbf16>
    %148 = vector.shape_cast %147 : vector<1x128x128xbf16> to vector<128x128xbf16>
    %cst_119 = arith.constant dense<0.000000e+00> : vector<133x128xf32>
    %149 = tpu.matmul %146, %148, %cst_119 {dimension_numbers = #tpu.dot_dimension_numbers<[1], [0], [0], [1], [0, 0, 1, 1], [], []>} : vector<133x128xbf16>, vector<128x128xbf16>, vector<133x128xf32> -> vector<133x128xf32>
    %150 = arith.addf %144, %149 : vector<133x128xf32>
    %c2_120 = arith.constant 2 : index
    %c0_121 = arith.constant 0 : index
    %151 = vector.load %arg10[%c2_120, %c0_121] : memref<177x128xf32, #tpu.memory_space<vmem>>, vector<133x128xf32>
    %152 = arith.truncf %151 : vector<133x128xf32> to vector<133x128xbf16>
    %c2_122 = arith.constant 2 : index
    %c0_123 = arith.constant 0 : index
    %c0_124 = arith.constant 0 : index
    %153 = vector.load %arg6[%c2_122, %c0_123, %c0_124] : memref<9x128x128xbf16, #tpu.memory_space<vmem>>, vector<1x128x128xbf16>
    %154 = vector.shape_cast %153 : vector<1x128x128xbf16> to vector<128x128xbf16>
    %cst_125 = arith.constant dense<0.000000e+00> : vector<133x128xf32>
    %155 = tpu.matmul %152, %154, %cst_125 {dimension_numbers = #tpu.dot_dimension_numbers<[1], [0], [0], [1], [0, 0, 1, 1], [], []>} : vector<133x128xbf16>, vector<128x128xbf16>, vector<133x128xf32> -> vector<133x128xf32>
    %156 = arith.addf %150, %155 : vector<133x128xf32>
    %c21_126 = arith.constant 21 : index
    %c0_127 = arith.constant 0 : index
    %157 = vector.load %arg10[%c21_126, %c0_127] : memref<177x128xf32, #tpu.memory_space<vmem>>, vector<133x128xf32>
    %158 = arith.truncf %157 : vector<133x128xf32> to vector<133x128xbf16>
    %c3_128 = arith.constant 3 : index
    %c0_129 = arith.constant 0 : index
    %c0_130 = arith.constant 0 : index
    %159 = vector.load %arg6[%c3_128, %c0_129, %c0_130] : memref<9x128x128xbf16, #tpu.memory_space<vmem>>, vector<1x128x128xbf16>
    %160 = vector.shape_cast %159 : vector<1x128x128xbf16> to vector<128x128xbf16>
    %cst_131 = arith.constant dense<0.000000e+00> : vector<133x128xf32>
    %161 = tpu.matmul %158, %160, %cst_131 {dimension_numbers = #tpu.dot_dimension_numbers<[1], [0], [0], [1], [0, 0, 1, 1], [], []>} : vector<133x128xbf16>, vector<128x128xbf16>, vector<133x128xf32> -> vector<133x128xf32>
    %162 = arith.addf %156, %161 : vector<133x128xf32>
    %c22_132 = arith.constant 22 : index
    %c0_133 = arith.constant 0 : index
    %163 = vector.load %arg10[%c22_132, %c0_133] : memref<177x128xf32, #tpu.memory_space<vmem>>, vector<133x128xf32>
    %164 = arith.truncf %163 : vector<133x128xf32> to vector<133x128xbf16>
    %c4_134 = arith.constant 4 : index
    %c0_135 = arith.constant 0 : index
    %c0_136 = arith.constant 0 : index
    %165 = vector.load %arg6[%c4_134, %c0_135, %c0_136] : memref<9x128x128xbf16, #tpu.memory_space<vmem>>, vector<1x128x128xbf16>
    %166 = vector.shape_cast %165 : vector<1x128x128xbf16> to vector<128x128xbf16>
    %cst_137 = arith.constant dense<0.000000e+00> : vector<133x128xf32>
    %167 = tpu.matmul %164, %166, %cst_137 {dimension_numbers = #tpu.dot_dimension_numbers<[1], [0], [0], [1], [0, 0, 1, 1], [], []>} : vector<133x128xbf16>, vector<128x128xbf16>, vector<133x128xf32> -> vector<133x128xf32>
    %168 = arith.addf %162, %167 : vector<133x128xf32>
    %c23_138 = arith.constant 23 : index
    %c0_139 = arith.constant 0 : index
    %169 = vector.load %arg10[%c23_138, %c0_139] : memref<177x128xf32, #tpu.memory_space<vmem>>, vector<133x128xf32>
    %170 = arith.truncf %169 : vector<133x128xf32> to vector<133x128xbf16>
    %c5_140 = arith.constant 5 : index
    %c0_141 = arith.constant 0 : index
    %c0_142 = arith.constant 0 : index
    %171 = vector.load %arg6[%c5_140, %c0_141, %c0_142] : memref<9x128x128xbf16, #tpu.memory_space<vmem>>, vector<1x128x128xbf16>
    %172 = vector.shape_cast %171 : vector<1x128x128xbf16> to vector<128x128xbf16>
    %cst_143 = arith.constant dense<0.000000e+00> : vector<133x128xf32>
    %173 = tpu.matmul %170, %172, %cst_143 {dimension_numbers = #tpu.dot_dimension_numbers<[1], [0], [0], [1], [0, 0, 1, 1], [], []>} : vector<133x128xbf16>, vector<128x128xbf16>, vector<133x128xf32> -> vector<133x128xf32>
    %174 = arith.addf %168, %173 : vector<133x128xf32>
    %c42_144 = arith.constant 42 : index
    %c0_145 = arith.constant 0 : index
    %175 = vector.load %arg10[%c42_144, %c0_145] : memref<177x128xf32, #tpu.memory_space<vmem>>, vector<133x128xf32>
    %176 = arith.truncf %175 : vector<133x128xf32> to vector<133x128xbf16>
    %c6_146 = arith.constant 6 : index
    %c0_147 = arith.constant 0 : index
    %c0_148 = arith.constant 0 : index
    %177 = vector.load %arg6[%c6_146, %c0_147, %c0_148] : memref<9x128x128xbf16, #tpu.memory_space<vmem>>, vector<1x128x128xbf16>
    %178 = vector.shape_cast %177 : vector<1x128x128xbf16> to vector<128x128xbf16>
    %cst_149 = arith.constant dense<0.000000e+00> : vector<133x128xf32>
    %179 = tpu.matmul %176, %178, %cst_149 {dimension_numbers = #tpu.dot_dimension_numbers<[1], [0], [0], [1], [0, 0, 1, 1], [], []>} : vector<133x128xbf16>, vector<128x128xbf16>, vector<133x128xf32> -> vector<133x128xf32>
    %180 = arith.addf %174, %179 : vector<133x128xf32>
    %c43_150 = arith.constant 43 : index
    %c0_151 = arith.constant 0 : index
    %181 = vector.load %arg10[%c43_150, %c0_151] : memref<177x128xf32, #tpu.memory_space<vmem>>, vector<133x128xf32>
    %182 = arith.truncf %181 : vector<133x128xf32> to vector<133x128xbf16>
    %c7_152 = arith.constant 7 : index
    %c0_153 = arith.constant 0 : index
    %c0_154 = arith.constant 0 : index
    %183 = vector.load %arg6[%c7_152, %c0_153, %c0_154] : memref<9x128x128xbf16, #tpu.memory_space<vmem>>, vector<1x128x128xbf16>
    %184 = vector.shape_cast %183 : vector<1x128x128xbf16> to vector<128x128xbf16>
    %cst_155 = arith.constant dense<0.000000e+00> : vector<133x128xf32>
    %185 = tpu.matmul %182, %184, %cst_155 {dimension_numbers = #tpu.dot_dimension_numbers<[1], [0], [0], [1], [0, 0, 1, 1], [], []>} : vector<133x128xbf16>, vector<128x128xbf16>, vector<133x128xf32> -> vector<133x128xf32>
    %186 = arith.addf %180, %185 : vector<133x128xf32>
    %c44_156 = arith.constant 44 : index
    %c0_157 = arith.constant 0 : index
    %187 = vector.load %arg10[%c44_156, %c0_157] : memref<177x128xf32, #tpu.memory_space<vmem>>, vector<133x128xf32>
    %188 = arith.truncf %187 : vector<133x128xf32> to vector<133x128xbf16>
    %c8_158 = arith.constant 8 : index
    %c0_159 = arith.constant 0 : index
    %c0_160 = arith.constant 0 : index
    %189 = vector.load %arg6[%c8_158, %c0_159, %c0_160] : memref<9x128x128xbf16, #tpu.memory_space<vmem>>, vector<1x128x128xbf16>
    %190 = vector.shape_cast %189 : vector<1x128x128xbf16> to vector<128x128xbf16>
    %cst_161 = arith.constant dense<0.000000e+00> : vector<133x128xf32>
    %191 = tpu.matmul %188, %190, %cst_161 {dimension_numbers = #tpu.dot_dimension_numbers<[1], [0], [0], [1], [0, 0, 1, 1], [], []>} : vector<133x128xbf16>, vector<128x128xbf16>, vector<133x128xf32> -> vector<133x128xf32>
    %192 = arith.addf %186, %191 : vector<133x128xf32>
    %c0_162 = arith.constant 0 : index
    %c0_163 = arith.constant 0 : index
    %193 = vector.load %arg7[%c0_162, %c0_163] : memref<1x128xf32, #tpu.memory_space<vmem>>, vector<1x128xf32>
    %194 = vector.broadcast %193 : vector<1x128xf32> to vector<133x128xf32>
    %195 = arith.addf %192, %194 : vector<133x128xf32>
    %cst_164 = arith.constant 0.000000e+00 : f32
    %196 = vector.broadcast %cst_164 : f32 to vector<133x128xf32>
    %197 = arith.maximumf %195, %196 : vector<133x128xf32>
    %198 = vector.extract_strided_slice %197 {offsets = [0, 0], sizes = [7, 64], strides = [1, 1]} : vector<133x128xf32> to vector<7x64xf32>
    %c0_165 = arith.constant 0 : index
    %c0_166 = arith.constant 0 : index
    %c0_167 = arith.constant 0 : index
    %199 = vector.load %arg8[%c0_165, %c0_166, %c0_167] : memref<1x49x64xf32, #tpu.memory_space<vmem>>, vector<1x7x64xf32>
    %200 = vector.shape_cast %199 : vector<1x7x64xf32> to vector<7x64xf32>
    %201 = vector.shape_cast %198 : vector<7x64xf32> to vector<1x7x64xf32>
    tpu.vector_store %arg8[%c0_165, %c0_166, %c0_167], %201 {strides = array<i32>} : memref<1x49x64xf32, #tpu.memory_space<vmem>>, vector<1x7x64xf32>,
    %202 = vector.extract_strided_slice %197 {offsets = [21, 0], sizes = [7, 64], strides = [1, 1]} : vector<133x128xf32> to vector<7x64xf32>
    %c0_168 = arith.constant 0 : index
    %c7_169 = arith.constant 7 : index
    %c0_170 = arith.constant 0 : index
    %203 = vector.load %arg8[%c0_168, %c7_169, %c0_170] : memref<1x49x64xf32, #tpu.memory_space<vmem>>, vector<1x7x64xf32>
    %204 = vector.shape_cast %203 : vector<1x7x64xf32> to vector<7x64xf32>
    %205 = vector.shape_cast %202 : vector<7x64xf32> to vector<1x7x64xf32>
    tpu.vector_store %arg8[%c0_168, %c7_169, %c0_170], %205 {strides = array<i32>} : memref<1x49x64xf32, #tpu.memory_space<vmem>>, vector<1x7x64xf32>,
    %206 = vector.extract_strided_slice %197 {offsets = [42, 0], sizes = [7, 64], strides = [1, 1]} : vector<133x128xf32> to vector<7x64xf32>
    %c0_171 = arith.constant 0 : index
    %c14_172 = arith.constant 14 : index
    %c0_173 = arith.constant 0 : index
    %207 = vector.load %arg8[%c0_171, %c14_172, %c0_173] : memref<1x49x64xf32, #tpu.memory_space<vmem>>, vector<1x7x64xf32>
    %208 = vector.shape_cast %207 : vector<1x7x64xf32> to vector<7x64xf32>
    %209 = vector.shape_cast %206 : vector<7x64xf32> to vector<1x7x64xf32>
    tpu.vector_store %arg8[%c0_171, %c14_172, %c0_173], %209 {strides = array<i32>} : memref<1x49x64xf32, #tpu.memory_space<vmem>>, vector<1x7x64xf32>,
    %210 = vector.extract_strided_slice %197 {offsets = [63, 0], sizes = [7, 64], strides = [1, 1]} : vector<133x128xf32> to vector<7x64xf32>
    %c0_174 = arith.constant 0 : index
    %c21_175 = arith.constant 21 : index
    %c0_176 = arith.constant 0 : index
    %211 = vector.load %arg8[%c0_174, %c21_175, %c0_176] : memref<1x49x64xf32, #tpu.memory_space<vmem>>, vector<1x7x64xf32>
    %212 = vector.shape_cast %211 : vector<1x7x64xf32> to vector<7x64xf32>
    %213 = vector.shape_cast %210 : vector<7x64xf32> to vector<1x7x64xf32>
    tpu.vector_store %arg8[%c0_174, %c21_175, %c0_176], %213 {strides = array<i32>} : memref<1x49x64xf32, #tpu.memory_space<vmem>>, vector<1x7x64xf32>,
    %214 = vector.extract_strided_slice %197 {offsets = [84, 0], sizes = [7, 64], strides = [1, 1]} : vector<133x128xf32> to vector<7x64xf32>
    %c0_177 = arith.constant 0 : index
    %c28 = arith.constant 28 : index
    %c0_178 = arith.constant 0 : index
    %215 = vector.load %arg8[%c0_177, %c28, %c0_178] : memref<1x49x64xf32, #tpu.memory_space<vmem>>, vector<1x7x64xf32>
    %216 = vector.shape_cast %215 : vector<1x7x64xf32> to vector<7x64xf32>
    %217 = vector.shape_cast %214 : vector<7x64xf32> to vector<1x7x64xf32>
    tpu.vector_store %arg8[%c0_177, %c28, %c0_178], %217 {strides = array<i32>} : memref<1x49x64xf32, #tpu.memory_space<vmem>>, vector<1x7x64xf32>,
    %218 = vector.extract_strided_slice %197 {offsets = [105, 0], sizes = [7, 64], strides = [1, 1]} : vector<133x128xf32> to vector<7x64xf32>
    %c0_179 = arith.constant 0 : index
    %c35 = arith.constant 35 : index
    %c0_180 = arith.constant 0 : index
    %219 = vector.load %arg8[%c0_179, %c35, %c0_180] : memref<1x49x64xf32, #tpu.memory_space<vmem>>, vector<1x7x64xf32>
    %220 = vector.shape_cast %219 : vector<1x7x64xf32> to vector<7x64xf32>
    %221 = vector.shape_cast %218 : vector<7x64xf32> to vector<1x7x64xf32>
    tpu.vector_store %arg8[%c0_179, %c35, %c0_180], %221 {strides = array<i32>} : memref<1x49x64xf32, #tpu.memory_space<vmem>>, vector<1x7x64xf32>,
    %222 = vector.extract_strided_slice %197 {offsets = [126, 0], sizes = [7, 64], strides = [1, 1]} : vector<133x128xf32> to vector<7x64xf32>
    %c0_181 = arith.constant 0 : index
    %c42_182 = arith.constant 42 : index
    %c0_183 = arith.constant 0 : index
    %223 = vector.load %arg8[%c0_181, %c42_182, %c0_183] : memref<1x49x64xf32, #tpu.memory_space<vmem>>, vector<1x7x64xf32>
    %224 = vector.shape_cast %223 : vector<1x7x64xf32> to vector<7x64xf32>
    %225 = vector.shape_cast %222 : vector<7x64xf32> to vector<1x7x64xf32>
    tpu.vector_store %arg8[%c0_181, %c42_182, %c0_183], %225 {strides = array<i32>} : memref<1x49x64xf32, #tpu.memory_space<vmem>>, vector<1x7x64xf32>,
    return
  }
  func.func @transform_0(%arg0: i32) -> (i32, i32, i32) {
    %c0_i32 = arith.constant 0 : i32
    %c0_i32_0 = arith.constant 0 : i32
    %c0_i32_1 = arith.constant 0 : i32
    return %arg0, %c0_i32, %c0_i32_0 : i32, i32, i32
  }
  func.func @transform_1(%arg0: i32) -> (i32, i32, i32) {
    %c0_i32 = arith.constant 0 : i32
    %c0_i32_0 = arith.constant 0 : i32
    %c0_i32_1 = arith.constant 0 : i32
    %c0_i32_2 = arith.constant 0 : i32
    return %c0_i32, %c0_i32_0, %c0_i32_1 : i32, i32, i32
  }
  func.func @transform_2(%arg0: i32) -> (i32, i32) {
    %c0_i32 = arith.constant 0 : i32
    %c0_i32_0 = arith.constant 0 : i32
    %c0_i32_1 = arith.constant 0 : i32
    return %c0_i32, %c0_i32_0 : i32, i32
  }
  func.func @transform_3(%arg0: i32) -> (i32, i32, i32) {
    %c0_i32 = arith.constant 0 : i32
    %c0_i32_0 = arith.constant 0 : i32
    %c0_i32_1 = arith.constant 0 : i32
    %c0_i32_2 = arith.constant 0 : i32
    return %c0_i32, %c0_i32_0, %c0_i32_1 : i32, i32, i32
  }
  func.func @transform_4(%arg0: i32) -> (i32, i32) {
    %c0_i32 = arith.constant 0 : i32
    %c0_i32_0 = arith.constant 0 : i32
    %c0_i32_1 = arith.constant 0 : i32
    return %c0_i32, %c0_i32_0 : i32, i32
  }
  func.func @transform_5(%arg0: i32) -> (i32, i32, i32) {
    %c0_i32 = arith.constant 0 : i32
    %c0_i32_0 = arith.constant 0 : i32
    %c0_i32_1 = arith.constant 0 : i32
    %c0_i32_2 = arith.constant 0 : i32
    return %c0_i32, %c0_i32_0, %c0_i32_1 : i32, i32, i32
  }
  func.func @transform_6(%arg0: i32) -> (i32, i32) {
    %c0_i32 = arith.constant 0 : i32
    %c0_i32_0 = arith.constant 0 : i32
    %c0_i32_1 = arith.constant 0 : i32
    return %c0_i32, %c0_i32_0 : i32, i32
  }
  func.func @transform_7(%arg0: i32) -> (i32, i32, i32) {
    %c0_i32 = arith.constant 0 : i32
    %c0_i32_0 = arith.constant 0 : i32
    %c0_i32_1 = arith.constant 0 : i32
    return %arg0, %c0_i32, %c0_i32_0 : i32, i32, i32
  }
}

module attributes {stable_mosaic.version = 11 : i64} {
  func.func @_fc_kernel(%arg0: i32, %arg1: memref<2x3136xf32, #tpu.memory_space<vmem>>, %arg2: memref<3136x512xbf16, #tpu.memory_space<vmem>>, %arg3: memref<1x512xf32, #tpu.memory_space<vmem>>, %arg4: memref<512x4xbf16, #tpu.memory_space<vmem>>, %arg5: memref<1x4xf32, #tpu.memory_space<vmem>>, %arg6: memref<2x4xf32, #tpu.memory_space<vmem>>) attributes {dimension_semantics = [#tpu.dimension_semantics<arbitrary>], iteration_bounds = array<i64: 1>, scalar_prefetch = 0 : i64, scratch_operands = 0 : i64, tpu.core_type = #tpu.core_type<tc>, window_params = [{pipeline_mode = #tpu.pipeline_mode<synchronous>, transform_indices = @transform_0, window_bounds = array<i64: 2, 3136>}, {pipeline_mode = #tpu.pipeline_mode<synchronous>, transform_indices = @transform_1, window_bounds = array<i64: 3136, 512>}, {pipeline_mode = #tpu.pipeline_mode<synchronous>, transform_indices = @transform_2, window_bounds = array<i64: 1, 512>}, {pipeline_mode = #tpu.pipeline_mode<synchronous>, transform_indices = @transform_3, window_bounds = array<i64: 512, 4>}, {pipeline_mode = #tpu.pipeline_mode<synchronous>, transform_indices = @transform_4, window_bounds = array<i64: 1, 4>}, {pipeline_mode = #tpu.pipeline_mode<synchronous>, transform_indices = @transform_5, window_bounds = array<i64: 2, 4>}]} {
    %c0 = arith.constant 0 : index
    %c0_0 = arith.constant 0 : index
    %0 = vector.load %arg1[%c0, %c0_0] : memref<2x3136xf32, #tpu.memory_space<vmem>>, vector<2x3136xf32>
    %1 = arith.truncf %0 : vector<2x3136xf32> to vector<2x3136xbf16>
    %c0_1 = arith.constant 0 : index
    %c0_2 = arith.constant 0 : index
    %2 = vector.load %arg2[%c0_1, %c0_2] : memref<3136x512xbf16, #tpu.memory_space<vmem>>, vector<3136x512xbf16>
    %cst = arith.constant dense<0.000000e+00> : vector<2x512xf32>
    %3 = tpu.matmul %1, %2, %cst {dimension_numbers = #tpu.dot_dimension_numbers<[1], [0], [0], [1], [0, 0, 1, 1], [], []>} : vector<2x3136xbf16>, vector<3136x512xbf16>, vector<2x512xf32> -> vector<2x512xf32>
    %c0_3 = arith.constant 0 : index
    %c0_4 = arith.constant 0 : index
    %4 = vector.load %arg3[%c0_3, %c0_4] : memref<1x512xf32, #tpu.memory_space<vmem>>, vector<1x512xf32>
    %5 = vector.broadcast %4 : vector<1x512xf32> to vector<2x512xf32>
    %6 = arith.addf %3, %5 : vector<2x512xf32>
    %cst_5 = arith.constant 0.000000e+00 : f32
    %7 = vector.broadcast %cst_5 : f32 to vector<2x512xf32>
    %8 = arith.maximumf %6, %7 : vector<2x512xf32>
    %9 = arith.truncf %8 : vector<2x512xf32> to vector<2x512xbf16>
    %c0_6 = arith.constant 0 : index
    %c0_7 = arith.constant 0 : index
    %10 = vector.load %arg4[%c0_6, %c0_7] : memref<512x4xbf16, #tpu.memory_space<vmem>>, vector<512x4xbf16>
    %cst_8 = arith.constant dense<0.000000e+00> : vector<2x4xf32>
    %11 = tpu.matmul %9, %10, %cst_8 {dimension_numbers = #tpu.dot_dimension_numbers<[1], [0], [0], [1], [0, 0, 1, 1], [], []>} : vector<2x512xbf16>, vector<512x4xbf16>, vector<2x4xf32> -> vector<2x4xf32>
    %c0_9 = arith.constant 0 : index
    %c0_10 = arith.constant 0 : index
    %12 = vector.load %arg5[%c0_9, %c0_10] : memref<1x4xf32, #tpu.memory_space<vmem>>, vector<1x4xf32>
    %13 = vector.broadcast %12 : vector<1x4xf32> to vector<2x4xf32>
    %14 = arith.addf %11, %13 : vector<2x4xf32>
    %c0_11 = arith.constant 0 : index
    %c0_12 = arith.constant 0 : index
    %15 = vector.load %arg6[%c0_11, %c0_12] : memref<2x4xf32, #tpu.memory_space<vmem>>, vector<2x4xf32>
    tpu.vector_store %arg6[%c0_11, %c0_12], %14 {strides = array<i32>} : memref<2x4xf32, #tpu.memory_space<vmem>>, vector<2x4xf32>,
    return
  }
  func.func @transform_0(%arg0: i32) -> (i32, i32) {
    %c0_i32 = arith.constant 0 : i32
    %c0_i32_0 = arith.constant 0 : i32
    %c0_i32_1 = arith.constant 0 : i32
    return %c0_i32, %c0_i32_0 : i32, i32
  }
  func.func @transform_1(%arg0: i32) -> (i32, i32) {
    %c0_i32 = arith.constant 0 : i32
    %c0_i32_0 = arith.constant 0 : i32
    %c0_i32_1 = arith.constant 0 : i32
    return %c0_i32, %c0_i32_0 : i32, i32
  }
  func.func @transform_2(%arg0: i32) -> (i32, i32) {
    %c0_i32 = arith.constant 0 : i32
    %c0_i32_0 = arith.constant 0 : i32
    %c0_i32_1 = arith.constant 0 : i32
    return %c0_i32, %c0_i32_0 : i32, i32
  }
  func.func @transform_3(%arg0: i32) -> (i32, i32) {
    %c0_i32 = arith.constant 0 : i32
    %c0_i32_0 = arith.constant 0 : i32
    %c0_i32_1 = arith.constant 0 : i32
    return %c0_i32, %c0_i32_0 : i32, i32
  }
  func.func @transform_4(%arg0: i32) -> (i32, i32) {
    %c0_i32 = arith.constant 0 : i32
    %c0_i32_0 = arith.constant 0 : i32
    %c0_i32_1 = arith.constant 0 : i32
    return %c0_i32, %c0_i32_0 : i32, i32
  }
  func.func @transform_5(%arg0: i32) -> (i32, i32) {
    %c0_i32 = arith.constant 0 : i32
    %c0_i32_0 = arith.constant 0 : i32
    %c0_i32_1 = arith.constant 0 : i32
    return %c0_i32, %c0_i32_0 : i32, i32
  }
}

</mosaic_0001>

<bundles_post_ra>
// kernel: net_forward.2
= control target key start
LH: loop header
LB: loop body
LE: loop exit
PB: predicated region body
PF: predicated region fallthrough
CT: control target
= control target key end

     0   :  { %s12061_s24 = smov 0   ;;  %s14536_s0 = inlined_call_operand.vmem [shape: f32[2,441,64], index: 0, kind: input, shape index: {}]   ;;  %s14537_s1 = inlined_call_operand.vmem [shape: bf16[4,64,128], index: 1, kind: input, shape index: {}]   ;;  %s14538_s2 = inlined_call_operand.vmem [shape: f32[1,128], index: 2, kind: input, shape index: {}]   ;;  %s14539_s3 = inlined_call_operand.vmem [shape: bf16[16,128,128], index: 3, kind: input, shape index: {}]   ;;  %s14540_s4 = inlined_call_operand.vmem [shape: f32[1,128], index: 4, kind: input, shape index: {}]   ;;  %s14541_s5 = inlined_call_operand.vmem [shape: bf16[9,128,128], index: 5, kind: input, shape index: {}]   ;;  %s14542_s6 = inlined_call_operand.vmem [shape: f32[1,128], index: 6, kind: input, shape index: {}]   ;;  %s14543_s7 = inlined_call_operand.vmem [shape: f32[2,49,64], index: 7, kind: output, shape index: {}]  }
   0x1 LB: > { %s8578_s25 = sadd.s32 4294967295, %s12017_s24   ;;  %p8582_p0 = scmp.ge.s32.totalorder %s12017_s24, 1  ;;  %s12017_s24 = sphi %s12061_s24, %s17_s24  }
   0x2   : > { %p237_p1 = scmp.lt.s32.totalorder %s12017_s24, 3 }
   0x4   : > { %p238_p2 = pnand %p8582_p0, %p237_p1 }
   0x6   : > { %241 = sbr.rel (%p238_p2) target bundleno = 2474 (0x9aa), region = 48 }
   0xd   : > { %v11795_v0 = vld [vmem:[%s14537_s1 + $0x20] sm:$0xff]   ;;  %v14544_v1 = vmov 0.0   ;;  %v11796_v2 = vld [vmem:[%s14537_s1 + $0x28] sm:$0xff]   ;;  %p269_p3 = scmp.lt.s32.totalorder %s8578_s25, 1  ;;  %vm12020_vm0 = vmmov 0   ;;  %v11797_v3 = vld [vmem:[%s14537_s1 + $0x30] sm:$0xff]  }
   0xe   : > { %9903 = vmatprep.subr.bf16.mxu0 %v14544_v1  ;;  %11475 = vmatprep.subr.bf16.mxu1 %v14544_v1  ;;  %v11798_v4 = vld [vmem:[%s14537_s1 + $0x38] sm:$0xff]   ;;  %vm481_vm1 = vcmask 523264   ;;  %v11799_v11 = vld [vmem:[%s14537_s1] sm:$0xff]   ;;  %v11800_v13 = vld [vmem:[%s14537_s1 + $0x8] sm:$0xff]   ;;  %vm8499_vm2 = vcmask 522240   ;;  %vm8501_vm3 = vcmask 523269  }
   0xf   : > { %9904 = vmatpush3.bf16.msra.mxu0 %v11795_v0  ;;  %11479 = vmatpush3.bf16.msra.mxu1 %v11795_v0  ;;  %s14570_s25 = smov (!%p269_p3, %s8578_s25), 1  ;;  %v11801_v19 = vld [vmem:[%s14537_s1 + $0x10] sm:$0xff]   ;;  %v11802_v24 = vld [vmem:[%s14537_s1 + $0x18] sm:$0xff]   ;;  %v11804_v25 = vld [vmem:[%s14537_s1 + $0x40] sm:$0xff]   ;;  %vm8503_vm4 = vcmask 519168   ;;  %vm8505_vm5 = vcmask 523266  }
  0x10   : > { %9905 = vmatprep.subr.bf16.mxu0 %v14544_v1  ;;  %11476 = vmatprep.subr.bf16.mxu1 %v14544_v1  ;;  %s11783_s9 = smul.u32 448, %s14570_s25  ;;  %v11806_v32 = vld [vmem:[%s14537_s1 + $0x48] sm:$0xff]   ;;  %v11807_v37 = vld [vmem:[%s14537_s1 + $0x50] sm:$0xff]   ;;  %v11808_v40 = vld [vmem:[%s14537_s1 + $0x58] sm:$0xff]   ;;  %vm8507_vm6 = vcmask 516096   ;;  %vm8509_vm7 = vcmask 523271  }
  0x11   : > { %9911 = vmatprep.mubr.msk.bf16.mxu0 %vm12020_vm0, %v14544_v1  ;;  %9991 = vmatprep.mubr.msk.bf16.mxu1 %vm12020_vm0, %v14544_v1  ;;  %v11803_v60 = vld [vmem:[%s14537_s1 + $0x60] sm:$0xff]   ;;  %s11784_s26 = smul.u32 56, %s14570_s25  ;;  %vm8511_vm8 = vcmask 521216   ;;  %vm8513_vm9 = vcmask 523268   ;;  %vm8515_vm10 = vcmask 518144   ;;  %vm8517_vm11 = vcmask 523265  }
  0x12   : > { %s12094_s12 = scalar_lea.vmem %s14536_s0, %s11783_s9  ;;  %vm8519_vm12 = vcmask 523270   ;;  %vm8521_vm13 = vcmask 520192  }
  0x13   : > { %9906 = vmatpush3.bf16.msra.mxu0 %v11796_v2  ;;  %11480 = vmatpush3.bf16.msra.mxu1 %v11796_v2  ;;  %v368_v5 = vld [vmem:[%s12094_s12 + $0x1] sm:$0xff]  ;;  %v369_v6 = vld [vmem:[%s12094_s12 + $0x9] sm:$0xff]  ;;  %v370_v12 = vld [vmem:[%s12094_s12 + $0x11] sm:$0xff]  ;;  %s14499_s8 = scalar_lea.vmem %s14543_s7, %s11784_s26 }
  0x14   : > { %9907 = vmatprep.subr.bf16.mxu0 %v14544_v1  ;;  %11477 = vmatprep.subr.bf16.mxu1 %v14544_v1  ;;  %v408_v7 = vld [vmem:[%s12094_s12 + $0x141] sm:$0xff]  ;;  %v409_v8 = vld [vmem:[%s12094_s12 + $0x149] sm:$0xff]  ;;  %v421_v9 = vpack.c.bf16 %v369_v6, %v368_v5  ;;  %v371_v14 = vld [vmem:[%s12094_s12 + $0x19] sm:$0xff] }
  0x15   : > { %v441_v10 = vpack.c.bf16 %v409_v8, %v408_v7  ;;  %v410_v15 = vld [vmem:[%s12094_s12 + $0x151] sm:$0xff]  ;;  %v411_v16 = vld [vmem:[%s12094_s12 + $0x159] sm:$0xff]  ;;  %v422_v17 = vpack.c.bf16 %v371_v14, %v370_v12  ;;  %v372_v20 = vld [vmem:[%s12094_s12 + $0x21] sm:$0xff] }
  0x16   : > { %v442_v18 = vpack.c.bf16 %v411_v16, %v410_v15  ;;  %v373_v21 = vld [vmem:[%s12094_s12 + $0x29] sm:$0xff]  ;;  %v412_v22 = vld [vmem:[%s12094_s12 + $0x161] sm:$0xff]  ;;  %v374_v28 = vld [vmem:[%s12094_s12 + $0x31] sm:$0xff] }
  0x17   : > { %9908 = vmatpush3.bf16.msra.mxu0 %v11797_v3  ;;  %11481 = vmatpush3.bf16.msra.mxu1 %v11797_v3  ;;  %v413_v23 = vld [vmem:[%s12094_s12 + $0x169] sm:$0xff]  ;;  %v423_v26 = vpack.c.bf16 %v373_v21, %v372_v20  ;;  %v375_v29 = vld [vmem:[%s12094_s12 + $0x39] sm:$0xff]  ;;  %v414_v30 = vld [vmem:[%s12094_s12 + $0x171] sm:$0xff] }
  0x18   : > { %9909 = vmatprep.subr.bf16.mxu0 %v14544_v1  ;;  %11478 = vmatprep.subr.bf16.mxu1 %v14544_v1  ;;  %v443_v27 = vpack.c.bf16 %v413_v23, %v412_v22  ;;  %v415_v31 = vld [vmem:[%s12094_s12 + $0x179] sm:$0xff]  ;;  %v424_v33 = vpack.c.bf16 %v375_v29, %v374_v28  ;;  %v376_v35 = vld [vmem:[%s12094_s12 + $0x41] sm:$0xff]  ;;  %v377_v36 = vld [vmem:[%s12094_s12 + $0x49] sm:$0xff] }
  0x19   : > { %v444_v34 = vpack.c.bf16 %v415_v31, %v414_v30  ;;  %v416_v38 = vld [vmem:[%s12094_s12 + $0x181] sm:$0xff]  ;;  %v417_v39 = vld [vmem:[%s12094_s12 + $0x189] sm:$0xff]  ;;  %v425_v41 = vpack.c.bf16 %v377_v36, %v376_v35  ;;  %v378_v43 = vld [vmem:[%s12094_s12 + $0x51] sm:$0xff] }
  0x1a   : > { %v445_v42 = vpack.c.bf16 %v417_v39, %v416_v38  ;;  %v379_v44 = vld [vmem:[%s12094_s12 + $0x59] sm:$0xff]  ;;  %v418_v45 = vld [vmem:[%s12094_s12 + $0x191] sm:$0xff]  ;;  %v380_v49 = vld [vmem:[%s12094_s12 + $0x61] sm:$0xff] }
  0x1b   : > { %9910 = vmatpush3.bf16.msra.mxu0 %v11798_v4  ;;  %11482 = vmatpush3.bf16.msra.mxu1 %v11798_v4  ;;  %v419_v46 = vld [vmem:[%s12094_s12 + $0x199] sm:$0xff]  ;;  %v426_v47 = vpack.c.bf16 %v379_v44, %v378_v43  ;;  %v381_v50 = vld [vmem:[%s12094_s12 + $0x69] sm:$0xff]  ;;  %v420_v51 = vld [vmem:[%s12094_s12 + $0x1a1] sm:$0x7] }
  0x1c   : > { %10019 = vmatprep.subr.bf16.mxu1 %v14544_v1  ;;  %10135 = vmatprep.subr.bf16.mxu0 %v14544_v1  ;;  %v446_v48 = vpack.c.bf16 %v419_v46, %v418_v45  ;;  %v427_v52 = vpack.c.bf16 %v381_v50, %v380_v49  ;;  %v447_v53 = vpack.c.bf16 %v420_v51, %v420_v51  ;;  %v382_v54 = vld [vmem:[%s12094_s12 + $0x71] sm:$0xff]  ;;  %v383_v55 = vld [vmem:[%s12094_s12 + $0x79] sm:$0xff]  ;;  %v281_v57 = vld [vmem:[%s12094_s12 + $0x8] sm:$0xff] }
  0x1d   : > { %v280_v56 = vld [vmem:[%s12094_s12] sm:$0xff]  ;;  %v428_v58 = vpack.c.bf16 %v383_v55, %v382_v54  ;;  %v385_v62 = vld [vmem:[%s12094_s12 + $0x89] sm:$0xff]  ;;  %v283_v0 = vld [vmem:[%s12094_s12 + $0x18] sm:$0xff] }
  0x1e   : > { %9912 = vmatmul.mubr.msk.bf16.vlgmr.msra.gmra.mrb[0].mxu0 %vm481_vm1, %v421_v9  ;;  %9992 = vmatmul.mubr.msk.bf16.vlgmr.msra.gmra.mrb[0].mxu1 %vm481_vm1, %v441_v10  ;;  %v333_v59 = vpack.c.bf16 %v281_v57, %v280_v56  ;;  %v384_v61 = vld [vmem:[%s12094_s12 + $0x81] sm:$0xff]  ;;  %v282_v63 = vld [vmem:[%s12094_s12 + $0x10] sm:$0xff]  ;;  %v387_v7 = vld [vmem:[%s12094_s12 + $0x99] sm:$0xff] }
  0x1f   : > { %10020 = vmatpush3.bf16.msra.mxu1 %v11799_v11  ;;  %9915 = vmatprep.mubr.msk.bf16.mxu0 %vm12020_vm0, %v14544_v1  ;;  %v11805_v2 = vld [vmem:[%s14537_s1 + $0x68] sm:$0xff]   ;;  %v429_v3 = vpack.c.bf16 %v385_v62, %v384_v61  ;;  %v334_v4 = vpack.c.bf16 %v283_v0, %v282_v63  ;;  %v11809_v5 = vld [vmem:[%s14537_s1 + $0x70] sm:$0xff]   ;;  %v284_v8 = vld [vmem:[%s12094_s12 + $0x20] sm:$0xff] }
  0x20   : > { %9995 = vmatprep.mubr.msk.bf16.mxu1 %vm12020_vm0, %v14544_v1  ;;  %10021 = vmatprep.subr.bf16.mxu1 %v14544_v1  ;;  %v386_v6 = vld [vmem:[%s12094_s12 + $0x91] sm:$0xff]  ;;  %v285_v9 = vld [vmem:[%s12094_s12 + $0x28] sm:$0xff]  ;;  %v288_v20 = vld [vmem:[%s12094_s12 + $0x40] sm:$0xff] }
  0x21   : > { %10136 = vmatpush3.bf16.msra.mxu0 %v11804_v25  ;;  %v430_v10 = vpack.c.bf16 %v387_v7, %v386_v6  ;;  %v335_v11 = vpack.c.bf16 %v285_v9, %v284_v8  ;;  %v388_v12 = vld [vmem:[%s12094_s12 + $0xa1] sm:$0xff]  ;;  %v286_v14 = vld [vmem:[%s12094_s12 + $0x30] sm:$0xff]  ;;  %v287_v15 = vld [vmem:[%s12094_s12 + $0x38] sm:$0xff] }
  0x22   : > { %10137 = vmatprep.subr.bf16.mxu0 %v14544_v1  ;;  %v289_v21 = vld [vmem:[%s12094_s12 + $0x48] sm:$0xff]  ;;  %v11810_v28 = vld [vmem:[%s14537_s1 + $0x78] sm:$0xff]   ;;  %v294_v39 = vld [vmem:[%s12094_s12 + $0x70] sm:$0xff] }
  0x23   : > { %10022 = vmatpush3.bf16.msra.mxu1 %v11800_v13  ;;  %v389_v13 = vld [vmem:[%s12094_s12 + $0xa9] sm:$0xff]  ;;  %v337_v23 = vpack.c.bf16 %v289_v21, %v288_v20  ;;  %v394_v31 = vld [vmem:[%s12094_s12 + $0xd1] sm:$0xff]  ;;  %v399_v44 = vld [vmem:[%s12094_s12 + $0xf9] sm:$0xff] }
  0x24   : > { %10023 = vmatprep.subr.bf16.mxu1 %v14544_v1  ;;  %v431_v16 = vpack.c.bf16 %v389_v13, %v388_v12  ;;  %v393_v25 = vld [vmem:[%s12094_s12 + $0xc9] sm:$0xff]  ;;  %v398_v43 = vld [vmem:[%s12094_s12 + $0xf1] sm:$0xff]  ;;  %v296_v45 = vld [vmem:[%s12094_s12 + $0x80] sm:$0xff] }
  0x25   : > { %10138 = vmatpush3.bf16.msra.mxu0 %v11806_v32  ;;  %v395_v32 = vld [vmem:[%s12094_s12 + $0xd9] sm:$0xff]  ;;  %v397_v38 = vld [vmem:[%s12094_s12 + $0xe9] sm:$0xff]  ;;  %v400_v49 = vld [vmem:[%s12094_s12 + $0x101] sm:$0xff] }
  0x26   : > { %9916 = vmatmul.mubr.msk.bf16.gmra.mrb[4].mxu0 %vm481_vm1, %v422_v17  ;;  %9996 = vmatmul.mubr.msk.bf16.gmra.mrb[4].mxu1 %vm481_vm1, %v442_v18  ;;  %v336_v17 = vpack.c.bf16 %v287_v15, %v286_v14  ;;  %v390_v18 = vld [vmem:[%s12094_s12 + $0xb1] sm:$0xff]  ;;  %v434_v35 = vpack.c.bf16 %v395_v32, %v394_v31  ;;  %v297_v46 = vld [vmem:[%s12094_s12 + $0x88] sm:$0xff]  ;;  %v403_v56 = vld [vmem:[%s12094_s12 + $0x119] sm:$0xff] }
  0x27   : > { %9919 = vmatprep.mubr.msk.bf16.mxu0 %vm12020_vm0, %v14544_v1  ;;  %9999 = vmatprep.mubr.msk.bf16.mxu1 %vm12020_vm0, %v14544_v1  ;;  %v401_v50 = vld [vmem:[%s12094_s12 + $0x109] sm:$0xff]  ;;  %v402_v55 = vld [vmem:[%s12094_s12 + $0x111] sm:$0xff]  ;;  %v300_v57 = vld [vmem:[%s12094_s12 + $0xa0] sm:$0xff] }
  0x28   : > { %10024 = vmatpush3.bf16.msra.mxu1 %v11801_v19  ;;  %10139 = vmatprep.subr.bf16.mxu0 %v14544_v1  ;;  %v391_v19 = vld [vmem:[%s12094_s12 + $0xb9] sm:$0xff]  ;;  %v298_v51 = vld [vmem:[%s12094_s12 + $0x90] sm:$0xff]  ;;  %v404_v61 = vld [vmem:[%s12094_s12 + $0x121] sm:$0xff] }
  0x29   : > { %10025 = vmatprep.subr.bf16.mxu1 %v14544_v1  ;;  %10140 = vmatpush3.bf16.msra.mxu0 %v11807_v37  ;;  %v432_v22 = vpack.c.bf16 %v391_v19, %v390_v18  ;;  %v396_v37 = vld [vmem:[%s12094_s12 + $0xe1] sm:$0xff]  ;;  %v405_v62 = vld [vmem:[%s12094_s12 + $0x129] sm:$0xff]  ;;  %v303_v0 = vld [vmem:[%s12094_s12 + $0xb8] sm:$0xff] }
  0x2a   : > { %10141 = vmatprep.subr.bf16.mxu0 %v14544_v1  ;;  %v302_v63 = vld [vmem:[%s12094_s12 + $0xb0] sm:$0xff]  ;;  %v304_v6 = vld [vmem:[%s12094_s12 + $0xc0] sm:$0xff]  ;;  %v305_v7 = vld [vmem:[%s12094_s12 + $0xc8] sm:$0xff] }
  0x2b   : > { %v345_v9 = vpack.c.bf16 %v305_v7, %v304_v6  ;;  %v1164_v12 = vld [vmem:[%s12094_s12 + $0x15] sm:$0xff]  ;;  %v1165_v13 = vld [vmem:[%s12094_s12 + $0x1d] sm:$0xff]  ;;  %v1166_v18 = vld [vmem:[%s12094_s12 + $0x25] sm:$0xff] }
  0x2c   : > { %10026 = vmatpush3.bf16.msra.mxu1 %v11802_v24  ;;  %v392_v24 = vld [vmem:[%s12094_s12 + $0xc1] sm:$0xff]  ;;  %v1217_v15 = vpack.c.bf16 %v1165_v13, %v1164_v12  ;;  %v1167_v19 = vld [vmem:[%s12094_s12 + $0x2d] sm:$0xff] }
  0x2d   : > { %10251 = vmatprep.subr.bf16.mxu1 %v14544_v1  ;;  %10142 = vmatpush3.bf16.msra.mxu0 %v11808_v40  ;;  %v433_v29 = vpack.c.bf16 %v393_v25, %v392_v24  ;;  %v295_v40 = vld [vmem:[%s12094_s12 + $0x78] sm:$0xff]  ;;  %v1218_v21 = vpack.c.bf16 %v1167_v19, %v1166_v18  ;;  %v1171_v31 = vld [vmem:[%s12094_s12 + $0x4d] sm:$0xff]  ;;  %v1182_v19 = vld [vmem:[%s12094_s12 + $0xa5] sm:$0xff] }
  0x2e   : > { %9920 = vmatmul.mubr.msk.bf16.gmra.mrb[8].mxu0 %vm481_vm1, %v423_v26  ;;  %10000 = vmatmul.mubr.msk.bf16.gmra.mrb[8].mxu1 %vm481_vm1, %v443_v27  ;;  %v290_v26 = vld [vmem:[%s12094_s12 + $0x50] sm:$0xff]  ;;  %v291_v27 = vld [vmem:[%s12094_s12 + $0x58] sm:$0xff]  ;;  %v325_v18 = vld [vmem:[%s12094_s12 + $0x168] sm:$0xff] }
  0x2f   : > { %9923 = vmatprep.mubr.msk.bf16.mxu0 %vm12020_vm0, %v14544_v1  ;;  %10003 = vmatprep.mubr.msk.bf16.mxu1 %vm12020_vm0, %v14544_v1  ;;  %v338_v30 = vpack.c.bf16 %v291_v27, %v290_v26  ;;  %v1168_v24 = vld [vmem:[%s12094_s12 + $0x35] sm:$0xff]  ;;  %v1169_v25 = vld [vmem:[%s12094_s12 + $0x3d] sm:$0xff] }
  0x30   : > { %v1219_v27 = vpack.c.bf16 %v1169_v25, %v1168_v24  ;;  %v1181_v6 = vld [vmem:[%s12094_s12 + $0x9d] sm:$0xff] }
  0x36   : > { %9924 = vmatmul.mubr.msk.bf16.gmra.mrb[12].mxu0 %vm481_vm1, %v424_v33  ;;  %10004 = vmatmul.mubr.msk.bf16.gmra.mrb[12].mxu1 %vm481_vm1, %v444_v34  ;;  %v292_v33 = vld [vmem:[%s12094_s12 + $0x60] sm:$0xff]  ;;  %v293_v34 = vld [vmem:[%s12094_s12 + $0x68] sm:$0xff] }
  0x37   : > { %9927 = vmatprep.mubr.msk.bf16.mxu0 %vm12020_vm0, %v14544_v1  ;;  %10007 = vmatprep.mubr.msk.bf16.mxu1 %vm12020_vm0, %v14544_v1  ;;  %v339_v36 = vpack.c.bf16 %v293_v34, %v292_v33  ;;  %v314_v34 = vld [vmem:[%s12094_s12 + $0x110] sm:$0xff] }
  0x3e   : > { %9928 = vmatmul.mubr.msk.bf16.gmra.mrb[16].mxu0 %vm481_vm1, %v425_v41  ;;  %10008 = vmatmul.mubr.msk.bf16.gmra.mrb[16].mxu1 %vm481_vm1, %v445_v42  ;;  %v435_v41 = vpack.c.bf16 %v397_v38, %v396_v37  ;;  %v340_v42 = vpack.c.bf16 %v295_v40, %v294_v39  ;;  %v1173_v37 = vld [vmem:[%s12094_s12 + $0x5d] sm:$0xff] }
  0x3f   : > { %9931 = vmatprep.mubr.msk.bf16.mxu0 %vm12020_vm0, %v14544_v1  ;;  %10011 = vmatprep.mubr.msk.bf16.mxu1 %vm12020_vm0, %v14544_v1  ;;  %v316_v40 = vld [vmem:[%s12094_s12 + $0x120] sm:$0xff] }
  0x46   : > { %9932 = vmatmul.mubr.msk.bf16.gmra.mrb[20].mxu0 %vm481_vm1, %v426_v47  ;;  %10012 = vmatmul.mubr.msk.bf16.gmra.mrb[20].mxu1 %vm481_vm1, %v446_v48  ;;  %v436_v47 = vpack.c.bf16 %v399_v44, %v398_v43  ;;  %v341_v48 = vpack.c.bf16 %v297_v46, %v296_v45  ;;  %v1175_v43 = vld [vmem:[%s12094_s12 + $0x6d] sm:$0xff] }
  0x47   : > { %9935 = vmatprep.mubr.msk.bf16.mxu0 %vm12020_vm0, %v14544_v1  ;;  %10015 = vmatprep.mubr.msk.bf16.mxu1 %vm12020_vm0, %v14544_v1  ;;  %v318_v46 = vld [vmem:[%s12094_s12 + $0x130] sm:$0xff] }
  0x4e   : > { %9936 = vmatmul.mubr.msk.bf16.gmra.mrb[24].mxu0 %vm481_vm1, %v427_v52  ;;  %10016 = vmatmul.mubr.msk.bf16.gmra.mrb[24].mxu1 %vm481_vm1, %v447_v53  ;;  %v299_v52 = vld [vmem:[%s12094_s12 + $0x98] sm:$0xff]  ;;  %v437_v53 = vpack.c.bf16 %v401_v50, %v400_v49 }
  0x4f   : > { %9939 = vmatprep.mubr.msk.bf16.mxu0 %vm12020_vm0, %v14544_v1  ;;  %10027 = vmatprep.mubr.msk.bf16.mxu1 %vm12020_vm0, %v14544_v1  ;;  %v342_v54 = vpack.c.bf16 %v299_v52, %v298_v51  ;;  %v1177_v49 = vld [vmem:[%s12094_s12 + $0x7d] sm:$0xff] }
  0x50   : > { %v320_v52 = vld [vmem:[%s12094_s12 + $0x140] sm:$0xff] }
  0x56   : > { %9940 = vmatmul.mubr.msk.bf16.gmra.mrb[28].mxu0 %vm481_vm1, %v428_v58  ;;  %10028 = vmatmul.mubr.msk.bf16.vlgmr.msra.gmra.mrb[28].mxu1 %vm481_vm1, %v333_v59  ;;  %v301_v58 = vld [vmem:[%s12094_s12 + $0xa8] sm:$0xff]  ;;  %v438_v59 = vpack.c.bf16 %v403_v56, %v402_v55 }
  0x57   : > { %10252 = vmatpush3.bf16.msra.mxu1 %v11803_v60  ;;  %9943 = vmatprep.mubr.msk.bf16.mxu0 %vm12020_vm0, %v14544_v1  ;;  %v343_v60 = vpack.c.bf16 %v301_v58, %v300_v57  ;;  %v1179_v55 = vld [vmem:[%s12094_s12 + $0x8d] sm:$0xff] }
  0x58   : > { %10031 = vmatprep.mubr.msk.bf16.mxu1 %vm12020_vm0, %v14544_v1  ;;  %10253 = vmatprep.subr.bf16.mxu1 %v14544_v1 }
  0x5b   : > { %10254 = vmatpush3.bf16.msra.mxu1 %v11805_v2  ;;  %v439_v2 = vpack.c.bf16 %v405_v62, %v404_v61 }
  0x5c   : > { %10255 = vmatprep.subr.bf16.mxu1 %v14544_v1 }
  0x5e   : > { %9944 = vmatmul.mubr.msk.bf16.gmra.mrb[32].mxu0 %vm481_vm1, %v429_v3  ;;  %10032 = vmatmul.mubr.msk.bf16.gmra.mrb[32].mxu1 %vm481_vm1, %v334_v4  ;;  %v344_v3 = vpack.c.bf16 %v303_v0, %v302_v63  ;;  %v406_v4 = vld [vmem:[%s12094_s12 + $0x131] sm:$0xff] }
  0x5f   : > { %9947 = vmatprep.mubr.msk.bf16.mxu0 %vm12020_vm0, %v14544_v1  ;;  %10035 = vmatprep.mubr.msk.bf16.mxu1 %vm12020_vm0, %v14544_v1 }
  0x60   : > { %10256 = vmatpush3.bf16.msra.mxu1 %v11809_v5  ;;  %v407_v5 = vld [vmem:[%s12094_s12 + $0x139] sm:$0xff] }
  0x61   : > { %10257 = vmatprep.subr.bf16.mxu1 %v14544_v1  ;;  %v440_v8 = vpack.c.bf16 %v407_v5, %v406_v4  ;;  %v323_v4 = vld [vmem:[%s12094_s12 + $0x158] sm:$0xff] }
  0x62   : > { %v1180_v5 = vld [vmem:[%s12094_s12 + $0x95] sm:$0xff] }
  0x64   : > { %10258 = vmatpush3.bf16.msra.mxu1 %v11810_v28  ;;  %v312_v28 = vld [vmem:[%s12094_s12 + $0x100] sm:$0xff] }
  0x65   : > { %11007 = vmatprep.subr.bf16.mxu1 %v14544_v1 }
  0x66   : > { %9948 = vmatmul.mubr.msk.bf16.gmra.mrb[36].mxu0 %vm481_vm1, %v430_v10  ;;  %10036 = vmatmul.mubr.msk.bf16.gmra.mrb[36].mxu1 %vm481_vm1, %v335_v11  ;;  %v306_v10 = vld [vmem:[%s12094_s12 + $0xd0] sm:$0xff]  ;;  %v307_v11 = vld [vmem:[%s12094_s12 + $0xd8] sm:$0xff] }
  0x67   : > { %9951 = vmatprep.mubr.msk.bf16.mxu0 %vm12020_vm0, %v14544_v1  ;;  %10039 = vmatprep.mubr.msk.bf16.mxu1 %vm12020_vm0, %v14544_v1  ;;  %v346_v14 = vpack.c.bf16 %v307_v11, %v306_v10  ;;  %v1225_v11 = vpack.c.bf16 %v1181_v6, %v1180_v5 }
  0x6e   : > { %9952 = vmatmul.mubr.msk.bf16.gmra.mrb[40].mxu0 %vm481_vm1, %v431_v16  ;;  %10040 = vmatmul.mubr.msk.bf16.gmra.mrb[40].mxu1 %vm481_vm1, %v336_v17  ;;  %v308_v16 = vld [vmem:[%s12094_s12 + $0xe0] sm:$0xff]  ;;  %v309_v17 = vld [vmem:[%s12094_s12 + $0xe8] sm:$0xff] }
  0x6f   : > { %9955 = vmatprep.mubr.msk.bf16.mxu0 %vm12020_vm0, %v14544_v1  ;;  %10043 = vmatprep.mubr.msk.bf16.mxu1 %vm12020_vm0, %v14544_v1  ;;  %v347_v20 = vpack.c.bf16 %v309_v17, %v308_v16  ;;  %v324_v17 = vld [vmem:[%s12094_s12 + $0x160] sm:$0xff] }
  0x70   : > { %v355_v24 = vpack.c.bf16 %v325_v18, %v324_v17  ;;  %v332_v18 = vld [vmem:[%s12094_s12 + $0x1a0] sm:$0x7] }
  0x76   : > { %9956 = vmatmul.mubr.msk.bf16.gmra.mrb[44].mxu0 %vm481_vm1, %v432_v22  ;;  %10044 = vmatmul.mubr.msk.bf16.gmra.mrb[44].mxu1 %vm481_vm1, %v337_v23  ;;  %v310_v22 = vld [vmem:[%s12094_s12 + $0xf0] sm:$0xff]  ;;  %v311_v23 = vld [vmem:[%s12094_s12 + $0xf8] sm:$0xff] }
  0x77   : > { %9959 = vmatprep.mubr.msk.bf16.mxu0 %vm12020_vm0, %v14544_v1  ;;  %10047 = vmatprep.mubr.msk.bf16.mxu1 %vm12020_vm0, %v14544_v1  ;;  %v348_v26 = vpack.c.bf16 %v311_v23, %v310_v22 }
  0x7e   : > { %9960 = vmatmul.mubr.msk.bf16.gmra.mrb[48].mxu0 %vm481_vm1, %v433_v29  ;;  %10048 = vmatmul.mubr.msk.bf16.gmra.mrb[48].mxu1 %vm481_vm1, %v338_v30  ;;  %v313_v29 = vld [vmem:[%s12094_s12 + $0x108] sm:$0xff] }
  0x7f   : > { %9963 = vmatprep.mubr.msk.bf16.mxu0 %vm12020_vm0, %v14544_v1  ;;  %10051 = vmatprep.mubr.msk.bf16.mxu1 %vm12020_vm0, %v14544_v1  ;;  %v1170_v30 = vld [vmem:[%s12094_s12 + $0x45] sm:$0xff]  ;;  %v349_v32 = vpack.c.bf16 %v313_v29, %v312_v28 }
  0x80   : > { %v1220_v33 = vpack.c.bf16 %v1171_v31, %v1170_v30  ;;  %v326_v31 = vld [vmem:[%s12094_s12 + $0x170] sm:$0xff] }
  0x86   : > { %9964 = vmatmul.mubr.msk.bf16.gmra.mrb[52].mxu0 %vm481_vm1, %v434_v35  ;;  %10052 = vmatmul.mubr.msk.bf16.gmra.mrb[52].mxu1 %vm481_vm1, %v339_v36  ;;  %v315_v35 = vld [vmem:[%s12094_s12 + $0x118] sm:$0xff] }
  0x87   : > { %9967 = vmatprep.mubr.msk.bf16.mxu0 %vm12020_vm0, %v14544_v1  ;;  %10055 = vmatprep.mubr.msk.bf16.mxu1 %vm12020_vm0, %v14544_v1  ;;  %v1172_v36 = vld [vmem:[%s12094_s12 + $0x55] sm:$0xff]  ;;  %v350_v38 = vpack.c.bf16 %v315_v35, %v314_v34  ;;  %v1185_v34 = vld [vmem:[%s12094_s12 + $0xbd] sm:$0xff] }
  0x88   : > { %v1221_v39 = vpack.c.bf16 %v1173_v37, %v1172_v36 }
  0x8e   : > { %9968 = vmatmul.mubr.msk.bf16.gmra.mrb[56].mxu0 %vm481_vm1, %v435_v41  ;;  %10056 = vmatmul.mubr.msk.bf16.gmra.mrb[56].mxu1 %vm481_vm1, %v340_v42  ;;  %v317_v41 = vld [vmem:[%s12094_s12 + $0x128] sm:$0xff] }
  0x8f   : > { %9971 = vmatprep.mubr.msk.bf16.mxu0 %vm12020_vm0, %v14544_v1  ;;  %10059 = vmatprep.mubr.msk.bf16.mxu1 %vm12020_vm0, %v14544_v1  ;;  %v1174_v42 = vld [vmem:[%s12094_s12 + $0x65] sm:$0xff]  ;;  %v351_v44 = vpack.c.bf16 %v317_v41, %v316_v40 }
  0x90   : > { %v1222_v45 = vpack.c.bf16 %v1175_v43, %v1174_v42 }
  0x96   : > { %9972 = vmatmul.mubr.msk.bf16.gmra.mrb[60].mxu0 %vm481_vm1, %v436_v47  ;;  %10060 = vmatmul.mubr.msk.bf16.gmra.mrb[60].mxu1 %vm481_vm1, %v341_v48  ;;  %v319_v47 = vld [vmem:[%s12094_s12 + $0x138] sm:$0xff] }
  0x97   : > { %9975 = vmatprep.mubr.msk.bf16.mxu0 %vm12020_vm0, %v14544_v1  ;;  %10063 = vmatprep.mubr.msk.bf16.mxu1 %vm12020_vm0, %v14544_v1  ;;  %v1176_v48 = vld [vmem:[%s12094_s12 + $0x75] sm:$0xff]  ;;  %v352_v50 = vpack.c.bf16 %v319_v47, %v318_v46  ;;  %v329_v46 = vld [vmem:[%s12094_s12 + $0x188] sm:$0xff] }
  0x98   : > { %v1223_v51 = vpack.c.bf16 %v1177_v49, %v1176_v48  ;;  %v1186_v47 = vld [vmem:[%s12094_s12 + $0xc5] sm:$0xff]  ;;  %v1187_v48 = vld [vmem:[%s12094_s12 + $0xcd] sm:$0xff] }
  0x9e   : > { %9976 = vmatmul.mubr.msk.bf16.gmra.mrb[64].mxu0 %vm481_vm1, %v437_v53  ;;  %10064 = vmatmul.mubr.msk.bf16.gmra.mrb[64].mxu1 %vm481_vm1, %v342_v54  ;;  %v321_v53 = vld [vmem:[%s12094_s12 + $0x148] sm:$0xff] }
  0x9f   : > { %9979 = vmatprep.mubr.msk.bf16.mxu0 %vm12020_vm0, %v14544_v1  ;;  %10067 = vmatprep.mubr.msk.bf16.mxu1 %vm12020_vm0, %v14544_v1  ;;  %v1178_v54 = vld [vmem:[%s12094_s12 + $0x85] sm:$0xff] }
  0xa6   : > { %9980 = vmatmul.mubr.msk.bf16.gmra.mrb[68].mxu0 %vm481_vm1, %v438_v59  ;;  %10068 = vmatmul.mubr.msk.bf16.gmra.mrb[68].mxu1 %vm481_vm1, %v343_v60  ;;  %v353_v59 = vpack.c.bf16 %v321_v53, %v320_v52  ;;  %v1224_v60 = vpack.c.bf16 %v1179_v55, %v1178_v54  ;;  %v1228_v53 = vpack.c.bf16 %v1187_v48, %v1186_v47 }
  0xa7   : > { %9983 = vmatprep.mubr.msk.bf16.mxu0 %vm12020_vm0, %v14544_v1  ;;  %10071 = vmatprep.mubr.msk.bf16.mxu1 %vm12020_vm0, %v14544_v1 }
  0xae   : > { %9984 = vmatmul.mubr.msk.bf16.gmra.mrb[72].mxu0 %vm481_vm1, %v439_v2  ;;  %10072 = vmatmul.mubr.msk.bf16.gmra.mrb[72].mxu1 %vm481_vm1, %v344_v3  ;;  %v322_v3 = vld [vmem:[%s12094_s12 + $0x150] sm:$0xff] }
  0xaf   : > { %9987 = vmatprep.mubr.msk.bf16.mxu0 %vm12020_vm0, %v14544_v1  ;;  %10075 = vmatprep.mubr.msk.bf16.mxu1 %vm12020_vm0, %v14544_v1  ;;  %v354_v10 = vpack.c.bf16 %v323_v4, %v322_v3  ;;  %v1189_v3 = vld [vmem:[%s12094_s12 + $0xdd] sm:$0xff] }
  0xb6   : > { %9988 = vmatmul.mubr.msk.bf16.gmra.mrb[76].mxu0 %vm481_vm1, %v440_v8  ;;  %10076 = vmatmul.mubr.msk.bf16.gmra.mrb[76].mxu1 %vm481_vm1, %v345_v9 }
  0xb7   : > { %10079 = vmatprep.mubr.msk.bf16.mxu1 %vm12020_vm0, %v14544_v1  ;;  %10143 = vmatprep.mubr.msk.bf16.mxu0 %vm12020_vm0, %v14544_v1 }
  0xbe   : > { %10080 = vmatmul.mubr.msk.bf16.gmra.mrb[80].mxu1 %vm481_vm1, %v346_v14  ;;  %10144 = vmatmul.mubr.msk.bf16.vlgmr.msra.gmra.mrb[80].mxu0 %vm481_vm1, %v1217_v15 }
  0xbf   : > { %10083 = vmatprep.mubr.msk.bf16.mxu1 %vm12020_vm0, %v14544_v1  ;;  %10147 = vmatprep.mubr.msk.bf16.mxu0 %vm12020_vm0, %v14544_v1 }
  0xc6   : > { %10084 = vmatmul.mubr.msk.bf16.gmra.mrb[84].mxu1 %vm481_vm1, %v347_v20  ;;  %10148 = vmatmul.mubr.msk.bf16.gmra.mrb[84].mxu0 %vm481_vm1, %v1218_v21  ;;  %v1183_v20 = vld [vmem:[%s12094_s12 + $0xad] sm:$0xff] }
  0xc7   : > { %10087 = vmatprep.mubr.msk.bf16.mxu1 %vm12020_vm0, %v14544_v1  ;;  %10151 = vmatprep.mubr.msk.bf16.mxu0 %vm12020_vm0, %v14544_v1  ;;  %v1226_v25 = vpack.c.bf16 %v1183_v20, %v1182_v19  ;;  %v1190_v19 = vld [vmem:[%s12094_s12 + $0xe5] sm:$0xff]  ;;  %v1191_v20 = vld [vmem:[%s12094_s12 + $0xed] sm:$0xff] }
  0xce   : > { %10088 = vmatmul.mubr.msk.bf16.gmra.mrb[88].mxu1 %vm481_vm1, %v348_v26  ;;  %10152 = vmatmul.mubr.msk.bf16.gmra.mrb[88].mxu0 %vm481_vm1, %v1219_v27 }
  0xcf   : > { %10091 = vmatprep.mubr.msk.bf16.mxu1 %vm12020_vm0, %v14544_v1  ;;  %10155 = vmatprep.mubr.msk.bf16.mxu0 %vm12020_vm0, %v14544_v1 }
  0xd6   : > { %10092 = vmatmul.mubr.msk.bf16.gmra.mrb[92].mxu1 %vm481_vm1, %v349_v32  ;;  %10156 = vmatmul.mubr.msk.bf16.gmra.mrb[92].mxu0 %vm481_vm1, %v1220_v33  ;;  %v327_v32 = vld [vmem:[%s12094_s12 + $0x178] sm:$0xff] }
  0xd7   : > { %10095 = vmatprep.mubr.msk.bf16.mxu1 %vm12020_vm0, %v14544_v1  ;;  %10159 = vmatprep.mubr.msk.bf16.mxu0 %vm12020_vm0, %v14544_v1  ;;  %v1184_v33 = vld [vmem:[%s12094_s12 + $0xb5] sm:$0xff] }
  0xde   : > { %10096 = vmatmul.mubr.msk.bf16.gmra.mrb[96].mxu1 %vm481_vm1, %v350_v38  ;;  %10160 = vmatmul.mubr.msk.bf16.gmra.mrb[96].mxu0 %vm481_vm1, %v1221_v39  ;;  %v356_v38 = vpack.c.bf16 %v327_v32, %v326_v31  ;;  %v1227_v39 = vpack.c.bf16 %v1185_v34, %v1184_v33 }
  0xdf   : > { %10099 = vmatprep.mubr.msk.bf16.mxu1 %vm12020_vm0, %v14544_v1  ;;  %10163 = vmatprep.mubr.msk.bf16.mxu0 %vm12020_vm0, %v14544_v1 }
  0xe6   : > { %10100 = vmatmul.mubr.msk.bf16.gmra.mrb[100].mxu1 %vm481_vm1, %v351_v44  ;;  %10164 = vmatmul.mubr.msk.bf16.gmra.mrb[100].mxu0 %vm481_vm1, %v1222_v45  ;;  %v328_v45 = vld [vmem:[%s12094_s12 + $0x180] sm:$0xff] }
  0xe7   : > { %10103 = vmatprep.mubr.msk.bf16.mxu1 %vm12020_vm0, %v14544_v1  ;;  %10167 = vmatprep.mubr.msk.bf16.mxu0 %vm12020_vm0, %v14544_v1  ;;  %v357_v52 = vpack.c.bf16 %v329_v46, %v328_v45 }
  0xee   : > { %10104 = vmatmul.mubr.msk.bf16.gmra.mrb[104].mxu1 %vm481_vm1, %v352_v50  ;;  %10168 = vmatmul.mubr.msk.bf16.gmra.mrb[104].mxu0 %vm481_vm1, %v1223_v51 }
  0xef   : > { %10107 = vmatprep.mubr.msk.bf16.mxu1 %vm12020_vm0, %v14544_v1  ;;  %10171 = vmatprep.mubr.msk.bf16.mxu0 %vm12020_vm0, %v14544_v1 }
  0xf1   : > { %v12423_v56 = vpop.f32.mrb[0].mxu1  ;;  %v12425_v57 = vpop.f32.mrb[0].mxu0 }
  0xf2   : > { %v9993_v58 = vpop.f32.mrb[1].mxu1  ;;  %v9913_v61 = vpop.f32.mrb[1].mxu0 }
  0xf3   : > { %v12427_v62 = vpop.f32.mrb[2].mxu1  ;;  %v12429_v63 = vpop.f32.mrb[2].mxu0  ;;  %v330_v61 = vld [vmem:[%s12094_s12 + $0x190] sm:$0xff] }
  0xf4   : > { %v9994_v0 = vpop.f32.mrb[3].mxu1  ;;  %v9914_v2 = vpop.f32.mrb[3].mxu0 }
  0xf5   : > { %v331_v0 = vld [vmem:[%s12094_s12 + $0x198] sm:$0xff] }
  0xf6   : > { %10108 = vmatmul.mubr.msk.bf16.gmra.mrb[108].mxu1 %vm481_vm1, %v353_v59  ;;  %10172 = vmatmul.mubr.msk.bf16.gmra.mrb[108].mxu0 %vm481_vm1, %v1224_v60  ;;  %v1188_v2 = vld [vmem:[%s12094_s12 + $0xd5] sm:$0xff] }
  0xf7   : > { %10111 = vmatprep.mubr.msk.bf16.mxu1 %vm12020_vm0, %v14544_v1  ;;  %10175 = vmatprep.mubr.msk.bf16.mxu0 %vm12020_vm0, %v14544_v1 }
  0xf9   : > { %v12441_v7 = vpop.f32.mrb[4].mxu1  ;;  %v12443_v8 = vpop.f32.mrb[4].mxu0 }
  0xfa   : > { %v9997_v9 = vpop.f32.mrb[5].mxu1  ;;  %v9917_v12 = vpop.f32.mrb[5].mxu0 }
  0xfb   : > { %v12445_v13 = vpop.f32.mrb[6].mxu1  ;;  %v12447_v14 = vpop.f32.mrb[6].mxu0  ;;  %v358_v9 = vpack.c.bf16 %v331_v0, %v330_v61  ;;  %v1194_v61 = vld [vmem:[%s12094_s12 + $0x105] sm:$0xff] }
  0xfc   : > { %v9998_v15 = vpop.f32.mrb[7].mxu1  ;;  %v9918_v16 = vpop.f32.mrb[7].mxu0  ;;  %v1661_v0 = vld [vmem:[%s12094_s12 + $0x26] sm:$0xff] }
  0xfe   : > { %10112 = vmatmul.mubr.msk.bf16.gmra.mrb[112].mxu1 %vm481_vm1, %v354_v10  ;;  %10176 = vmatmul.mubr.msk.bf16.gmra.mrb[112].mxu0 %vm481_vm1, %v1225_v11  ;;  %v1229_v10 = vpack.c.bf16 %v1189_v3, %v1188_v2  ;;  %v1662_v2 = vld [vmem:[%s12094_s12 + $0x2e] sm:$0xff] }
  0xff   : > { %10115 = vmatprep.mubr.msk.bf16.mxu1 %vm12020_vm0, %v14544_v1  ;;  %10179 = vmatprep.mubr.msk.bf16.mxu0 %vm12020_vm0, %v14544_v1 }
 0x101   : > { %v12459_v21 = vpop.f32.mrb[8].mxu1  ;;  %v12461_v22 = vpop.f32.mrb[8].mxu0 }
 0x102   : > { %v10001_v23 = vpop.f32.mrb[9].mxu1  ;;  %v9921_v26 = vpop.f32.mrb[9].mxu0 }
 0x103   : > { %v12463_v27 = vpop.f32.mrb[10].mxu1  ;;  %v12465_v28 = vpop.f32.mrb[10].mxu0  ;;  %v359_v26 = vpack.c.bf16 %v332_v18, %v332_v18 }
 0x104   : > { %v10002_v29 = vpop.f32.mrb[11].mxu1  ;;  %v9922_v30 = vpop.f32.mrb[11].mxu0 }
 0x105   : > { %v1230_v29 = vpack.c.bf16 %v1191_v20, %v1190_v19 }
 0x106   : > { %10116 = vmatmul.mubr.msk.bf16.gmra.mrb[116].mxu1 %vm481_vm1, %v355_v24  ;;  %10180 = vmatmul.mubr.msk.bf16.gmra.mrb[116].mxu0 %vm481_vm1, %v1226_v25 }
 0x107   : > { %10119 = vmatprep.mubr.msk.bf16.mxu1 %vm12020_vm0, %v14544_v1  ;;  %10183 = vmatprep.mubr.msk.bf16.mxu0 %vm12020_vm0, %v14544_v1 }
 0x109   : > { %v12477_v35 = vpop.f32.mrb[12].mxu1  ;;  %v12479_v36 = vpop.f32.mrb[12].mxu0 }
 0x10a   : > { %v10005_v37 = vpop.f32.mrb[13].mxu1  ;;  %v9925_v40 = vpop.f32.mrb[13].mxu0 }
 0x10b   : > { %v12481_v41 = vpop.f32.mrb[14].mxu1  ;;  %v12483_v42 = vpop.f32.mrb[14].mxu0  ;;  %v1192_v37 = vld [vmem:[%s12094_s12 + $0xf5] sm:$0xff]  ;;  %v1660_v40 = vld [vmem:[%s12094_s12 + $0x1e] sm:$0xff] }
 0x10c   : > { %v10006_v43 = vpop.f32.mrb[15].mxu1  ;;  %v9926_v44 = vpop.f32.mrb[15].mxu0 }
 0x10e   : > { %10120 = vmatmul.mubr.msk.bf16.gmra.mrb[120].mxu1 %vm481_vm1, %v356_v38  ;;  %10184 = vmatmul.mubr.msk.bf16.gmra.mrb[120].mxu0 %vm481_vm1, %v1227_v39  ;;  %v1193_v38 = vld [vmem:[%s12094_s12 + $0xfd] sm:$0xff] }
 0x10f   : > { %10123 = vmatprep.mubr.msk.bf16.mxu1 %vm12020_vm0, %v14544_v1  ;;  %10187 = vmatprep.mubr.msk.bf16.mxu0 %vm12020_vm0, %v14544_v1  ;;  %v1659_v39 = vld [vmem:[%s12094_s12 + $0x16] sm:$0xff]  ;;  %v1231_v46 = vpack.c.bf16 %v1193_v38, %v1192_v37 }
 0x110   : > { %v1712_v47 = vpack.c.bf16 %v1660_v40, %v1659_v39 }
 0x111   : > { %v12495_v49 = vpop.f32.mrb[16].mxu1  ;;  %v12497_v50 = vpop.f32.mrb[16].mxu0 }
 0x112   : > { %v10009_v51 = vpop.f32.mrb[17].mxu1  ;;  %v9929_v54 = vpop.f32.mrb[17].mxu0 }
 0x113   : > { %v12499_v55 = vpop.f32.mrb[18].mxu1  ;;  %v12501_v58 = vpop.f32.mrb[18].mxu0 }
 0x114   : > { %v10010_v59 = vpop.f32.mrb[19].mxu1  ;;  %v9930_v60 = vpop.f32.mrb[19].mxu0 }
 0x116   : > { %10124 = vmatmul.mubr.msk.bf16.gmra.mrb[124].mxu1 %vm481_vm1, %v357_v52  ;;  %10188 = vmatmul.mubr.msk.bf16.gmra.mrb[124].mxu0 %vm481_vm1, %v1228_v53 }
 0x117   : > { %10127 = vmatprep.mubr.msk.bf16.mxu1 %vm12020_vm0, %v14544_v1  ;;  %10191 = vmatprep.mubr.msk.bf16.mxu0 %vm12020_vm0, %v14544_v1 }
 0x119   : > { %v12513_v4 = vpop.f32.mrb[20].mxu1  ;;  %v12515_v5 = vpop.f32.mrb[20].mxu0 }
 0x11a   : > { %14547 = vst [vmem:[#allocation4_spill] sm:$0xff] %v12513_v4  ;;  %v10013_v6 = vpop.f32.mrb[21].mxu1  ;;  %v9933_v11 = vpop.f32.mrb[21].mxu0 }
 0x11b   : > { %v12517_v12 = vpop.f32.mrb[22].mxu1  ;;  %v12519_v15 = vpop.f32.mrb[22].mxu0 }
 0x11c   : > { %14548 = vst [vmem:[#allocation5_spill] sm:$0xff] %v12517_v12  ;;  %v10014_v16 = vpop.f32.mrb[23].mxu1  ;;  %v9934_v17 = vpop.f32.mrb[23].mxu0 }
 0x11e   : > { %10128 = vmatmul.mubr.msk.bf16.gmra.mrb[128].mxu1 %vm481_vm1, %v358_v9  ;;  %10192 = vmatmul.mubr.msk.bf16.gmra.mrb[128].mxu0 %vm481_vm1, %v1229_v10  ;;  %v1713_v10 = vpack.c.bf16 %v1662_v2, %v1661_v0 }
 0x11f   : > { %10131 = vmatprep.mubr.msk.bf16.mxu1 %vm12020_vm0, %v14544_v1  ;;  %10195 = vmatprep.mubr.msk.bf16.mxu0 %vm12020_vm0, %v14544_v1 }
 0x121   : > { %v12530_v23 = vpop.f32.mrb[24].mxu1  ;;  %v12532_v24 = vpop.f32.mrb[24].mxu0 }
 0x122   : > { %14549 = vst [vmem:[#allocation6_spill] sm:$0xff] %v12530_v23  ;;  %v10017_v25 = vpop.f32.mrb[25].mxu1  ;;  %v9937_v30 = vpop.f32.mrb[25].mxu0 }
 0x123   : > { %v808_v31 = vpop.f32.mrb[26].mxu1  ;;  %v12534_v32 = vpop.f32.mrb[26].mxu0  ;;  %v1664_v30 = vld [vmem:[%s12094_s12 + $0x3e] sm:$0xff] }
 0x124   : > { %v10018_v33 = vpop.f32.mrb[27].mxu1  ;;  %v9938_v34 = vpop.f32.mrb[27].mxu0 }
 0x126   : > { %10132 = vmatmul.mubr.msk.bf16.gmra.mrb[132].mxu1 %vm481_vm1, %v359_v26  ;;  %10196 = vmatmul.mubr.msk.bf16.gmra.mrb[132].mxu0 %vm481_vm1, %v1230_v29  ;;  %v1196_v26 = vld [vmem:[%s12094_s12 + $0x115] sm:$0xff] }
 0x127   : > { %10199 = vmatprep.mubr.msk.bf16.mxu0 %vm12020_vm0, %v14544_v1  ;;  %10259 = vmatprep.mubr.msk.bf16.mxu1 %vm12020_vm0, %v14544_v1  ;;  %v1663_v29 = vld [vmem:[%s12094_s12 + $0x36] sm:$0xff] }
 0x128   : > { %v1714_v37 = vpack.c.bf16 %v1664_v30, %v1663_v29 }
 0x129   : > { %v950_v43 = vpop.f32.mrb[28].mxu1  ;;  %v12546_v44 = vpop.f32.mrb[28].mxu0 }
 0x12a   : > { %v10029_v45 = vpop.f32.mrb[29].mxu1  ;;  %v9941_v48 = vpop.f32.mrb[29].mxu0  ;;  %v12549_v51 = vadd.f32 %v950_v43, %v12425_v57  ;;  %v1195_v57 = vld [vmem:[%s12094_s12 + $0x10d] sm:$0xff] }
 0x12b   : > { %v953_v52 = vpop.f32.mrb[30].mxu1  ;;  %v12551_v53 = vpop.f32.mrb[30].mxu0  ;;  %v1232_v9 = vpack.c.bf16 %v1195_v57, %v1194_v61  ;;  %v1198_v48 = vld [vmem:[%s12094_s12 + $0x125] sm:$0xff] }
 0x12c   : > { %v10030_v54 = vpop.f32.mrb[31].mxu1  ;;  %v9942_v59 = vpop.f32.mrb[31].mxu0  ;;  %v12554_v60 = vadd.f32 %v953_v52, %v12429_v63  ;;  %v1665_v52 = vld [vmem:[%s12094_s12 + $0x46] sm:$0xff] }
 0x12d   : > { %v1666_v54 = vld [vmem:[%s12094_s12 + $0x4e] sm:$0xff] }
 0x12e   : > { %10200 = vmatmul.mubr.msk.bf16.gmra.mrb[136].mxu0 %vm481_vm1, %v1231_v46  ;;  %10260 = vmatmul.mubr.msk.bf16.vlgmr.msra.gmra.mrb[136].mxu1 %vm481_vm1, %v1712_v47  ;;  %v1715_v0 = vpack.c.bf16 %v1666_v54, %v1665_v52  ;;  %v1669_v52 = vld [vmem:[%s12094_s12 + $0x66] sm:$0xff]  ;;  %v1670_v54 = vld [vmem:[%s12094_s12 + $0x6e] sm:$0xff] }
 0x12f   : > { %10203 = vmatprep.mubr.msk.bf16.mxu0 %vm12020_vm0, %v14544_v1  ;;  %10263 = vmatprep.mubr.msk.bf16.mxu1 %vm12020_vm0, %v14544_v1 }
 0x131   : > { %v958_v3 = vpop.f32.mrb[32].mxu1  ;;  %v12566_v6 = vpop.f32.mrb[32].mxu0 }
 0x132   : > { %v10033_v63 = vpop.f32.mrb[33].mxu1  ;;  %v9945_v11 = vpop.f32.mrb[33].mxu0  ;;  %v12569_v16 = vadd.f32 %v958_v3, %v12443_v8  ;;  %v1197_v8 = vld [vmem:[%s12094_s12 + $0x11d] sm:$0xff] }
 0x133   : > { %v961_v17 = vpop.f32.mrb[34].mxu1  ;;  %v12571_v18 = vpop.f32.mrb[34].mxu0  ;;  %v1233_v34 = vpack.c.bf16 %v1197_v8, %v1196_v26  ;;  %v11811_v63 = vld [vmem:[%s14539_s3 + $0x40] sm:$0xff]   ;;  %v1667_v26 = vld [vmem:[%s12094_s12 + $0x56] sm:$0xff] }
 0x134   : > { %v10034_v19 = vpop.f32.mrb[35].mxu1  ;;  %v9946_v20 = vpop.f32.mrb[35].mxu0  ;;  %v12574_v25 = vadd.f32 %v961_v17, %v12447_v14  ;;  %10367 = vmatprep.subr.bf16.mxu0 %v11811_v63  ;;  %v1668_v8 = vld [vmem:[%s12094_s12 + $0x5e] sm:$0xff] }
 0x135   : > { %10368 = vmatpush3.bf16.msra.mxu0 %v11811_v63  ;;  %v1201_v20 = vld [vmem:[%s12094_s12 + $0x13d] sm:$0xff] }
 0x136   : > { %10204 = vmatmul.mubr.msk.bf16.gmra.mrb[140].mxu0 %vm481_vm1, %v1232_v9  ;;  %10264 = vmatmul.mubr.msk.bf16.gmra.mrb[140].mxu1 %vm481_vm1, %v1713_v10 }
 0x137   : > { %10207 = vmatprep.mubr.msk.bf16.mxu0 %vm12020_vm0, %v14544_v1  ;;  %10267 = vmatprep.mubr.msk.bf16.mxu1 %vm12020_vm0, %v14544_v1 }
 0x139   : > { %v966_v31 = vpop.f32.mrb[36].mxu1  ;;  %v12586_v33 = vpop.f32.mrb[36].mxu0 }
 0x13a   : > { %v10037_v14 = vpop.f32.mrb[37].mxu1  ;;  %v9949_v38 = vpop.f32.mrb[37].mxu0  ;;  %v12589_v39 = vadd.f32 %v966_v31, %v12461_v22  ;;  %v1199_v22 = vld [vmem:[%s12094_s12 + $0x12d] sm:$0xff] }
 0x13b   : > { %v969_v40 = vpop.f32.mrb[38].mxu1  ;;  %v12591_v43 = vpop.f32.mrb[38].mxu0  ;;  %v1234_v57 = vpack.c.bf16 %v1199_v22, %v1198_v48  ;;  %v1716_v14 = vpack.c.bf16 %v1668_v8, %v1667_v26  ;;  %v1202_v22 = vld [vmem:[%s12094_s12 + $0x145] sm:$0xff]  ;;  %v1204_v26 = vld [vmem:[%s12094_s12 + $0x155] sm:$0xff] }
 0x13c   : > { %v10038_v45 = vpop.f32.mrb[39].mxu1  ;;  %v9950_v46 = vpop.f32.mrb[39].mxu0  ;;  %v12594_v47 = vadd.f32 %v969_v40, %v12465_v28  ;;  %v1671_v8 = vld [vmem:[%s12094_s12 + $0x76] sm:$0xff] }
 0x13e   : > { %10208 = vmatmul.mubr.msk.bf16.gmra.mrb[144].mxu0 %vm481_vm1, %v1233_v34  ;;  %10268 = vmatmul.mubr.msk.bf16.gmra.mrb[144].mxu1 %vm481_vm1, %v1714_v37 }
 0x13f   : > { %10211 = vmatprep.mubr.msk.bf16.mxu0 %vm12020_vm0, %v14544_v1  ;;  %10271 = vmatprep.mubr.msk.bf16.mxu1 %vm12020_vm0, %v14544_v1 }
 0x141   : > { %v974_v59 = vpop.f32.mrb[40].mxu1  ;;  %v12606_v61 = vpop.f32.mrb[40].mxu0 }
 0x142   : > { %v10041_v28 = vpop.f32.mrb[41].mxu1  ;;  %v9953_v2 = vpop.f32.mrb[41].mxu0  ;;  %v12609_v3 = vadd.f32 %v974_v59, %v12479_v36  ;;  %v1200_v36 = vld [vmem:[%s12094_s12 + $0x135] sm:$0xff] }
 0x143   : > { %v977_v9 = vpop.f32.mrb[42].mxu1  ;;  %v12614_v10 = vpop.f32.mrb[42].mxu0  ;;  %v1235_v31 = vpack.c.bf16 %v1201_v20, %v1200_v36 }
 0x144   : > { %v10042_v11 = vpop.f32.mrb[43].mxu1  ;;  %v9954_v17 = vpop.f32.mrb[43].mxu0  ;;  %v12617_v19 = vadd.f32 %v977_v9, %v12483_v42 }
 0x146   : > { %10212 = vmatmul.mubr.msk.bf16.gmra.mrb[148].mxu0 %vm481_vm1, %v1234_v57  ;;  %10272 = vmatmul.mubr.msk.bf16.gmra.mrb[148].mxu1 %vm481_vm1, %v1715_v0  ;;  %v1717_v0 = vpack.c.bf16 %v1670_v54, %v1669_v52 }
 0x147   : > { %10215 = vmatprep.mubr.msk.bf16.mxu0 %vm12020_vm0, %v14544_v1  ;;  %10275 = vmatprep.mubr.msk.bf16.mxu1 %vm12020_vm0, %v14544_v1 }
 0x149   : > { %v982_v29 = vpop.f32.mrb[44].mxu1  ;;  %v12629_v42 = vpop.f32.mrb[44].mxu0 }
 0x14a   : > { %v10045_v30 = vpop.f32.mrb[45].mxu1  ;;  %v9957_v34 = vpop.f32.mrb[45].mxu0  ;;  %v12632_v37 = vadd.f32 %v982_v29, %v12497_v50  ;;  %v1203_v50 = vld [vmem:[%s12094_s12 + $0x14d] sm:$0xff]  ;;  %v1672_v29 = vld [vmem:[%s12094_s12 + $0x7e] sm:$0xff] }
 0x14b   : > { %v985_v38 = vpop.f32.mrb[46].mxu1  ;;  %v12634_v40 = vpop.f32.mrb[46].mxu0  ;;  %v1236_v57 = vpack.c.bf16 %v1203_v50, %v1202_v22  ;;  %v1718_v34 = vpack.c.bf16 %v1672_v29, %v1671_v8 }
 0x14c   : > { %v10046_v45 = vpop.f32.mrb[47].mxu1  ;;  %v9958_v46 = vpop.f32.mrb[47].mxu0  ;;  %v12637_v48 = vadd.f32 %v985_v38, %v12501_v58 }
 0x14e   : > { %10216 = vmatmul.mubr.msk.bf16.gmra.mrb[152].mxu0 %vm481_vm1, %v1235_v31  ;;  %10276 = vmatmul.mubr.msk.bf16.gmra.mrb[152].mxu1 %vm481_vm1, %v1716_v14 }
 0x14f   : > { %10219 = vmatprep.mubr.msk.bf16.mxu0 %vm12020_vm0, %v14544_v1  ;;  %10279 = vmatprep.mubr.msk.bf16.mxu1 %vm12020_vm0, %v14544_v1 }
 0x151   : > { %v990_v59 = vpop.f32.mrb[48].mxu1  ;;  %v12649_v28 = vpop.f32.mrb[48].mxu0 }
 0x152   : > { %v10049_v58 = vpop.f32.mrb[49].mxu1  ;;  %v9961_v2 = vpop.f32.mrb[49].mxu0  ;;  %v12652_v63 = vadd.f32 %v990_v59, %v12515_v5  ;;  %v1205_v5 = vld [vmem:[%s12094_s12 + $0x15d] sm:$0xff]  ;;  %v11812_v59 = vld [vmem:[%s14539_s3 + $0x48] sm:$0xff]  }
 0x153   : > { %v993_v9 = vpop.f32.mrb[50].mxu1  ;;  %v12654_v11 = vpop.f32.mrb[50].mxu0  ;;  %v1237_v14 = vpack.c.bf16 %v1205_v5, %v1204_v26  ;;  %v1206_v58 = vld [vmem:[%s12094_s12 + $0x165] sm:$0xff]  ;;  %10369 = vmatprep.subr.bf16.mxu0 %v11812_v59 }
 0x154   : > { %v10050_v17 = vpop.f32.mrb[51].mxu1  ;;  %v9962_v36 = vpop.f32.mrb[51].mxu0  ;;  %v12657_v20 = vadd.f32 %v993_v9, %v12519_v15  ;;  %10370 = vmatpush3.bf16.msra.mxu0 %v11812_v59 }
 0x156   : > { %10220 = vmatmul.mubr.msk.bf16.gmra.mrb[156].mxu0 %vm481_vm1, %v1236_v57  ;;  %10280 = vmatmul.mubr.msk.bf16.gmra.mrb[156].mxu1 %vm481_vm1, %v1717_v0  ;;  %v1673_v57 = vld [vmem:[%s12094_s12 + $0x86] sm:$0xff]  ;;  %v1674_v0 = vld [vmem:[%s12094_s12 + $0x8e] sm:$0xff] }
 0x157   : > { %10223 = vmatprep.mubr.msk.bf16.mxu0 %vm12020_vm0, %v14544_v1  ;;  %10283 = vmatprep.mubr.msk.bf16.mxu1 %vm12020_vm0, %v14544_v1  ;;  %v1719_v36 = vpack.c.bf16 %v1674_v0, %v1673_v57 }
 0x159   : > { %v998_v30 = vpop.f32.mrb[52].mxu1  ;;  %v12669_v31 = vpop.f32.mrb[52].mxu0 }
 0x15a   : > { %v10053_v15 = vpop.f32.mrb[53].mxu1  ;;  %v9965_v38 = vpop.f32.mrb[53].mxu0  ;;  %v12672_v45 = vadd.f32 %v998_v30, %v12532_v24  ;;  %v1207_v24 = vld [vmem:[%s12094_s12 + $0x16d] sm:$0xff] }
 0x15b   : > { %v1001_v46 = vpop.f32.mrb[54].mxu1  ;;  %v12674_v22 = vpop.f32.mrb[54].mxu0  ;;  %v1238_v17 = vpack.c.bf16 %v1207_v24, %v1206_v58  ;;  %v1675_v38 = vld [vmem:[%s12094_s12 + $0x96] sm:$0xff] }
 0x15c   : > { %v10054_v50 = vpop.f32.mrb[55].mxu1  ;;  %v9966_v52 = vpop.f32.mrb[55].mxu0  ;;  %v12677_v54 = vadd.f32 %v1001_v46, %v12534_v32  ;;  %v1676_v46 = vld [vmem:[%s12094_s12 + $0x9e] sm:$0xff] }
 0x15d   : > { %v1720_v58 = vpack.c.bf16 %v1676_v46, %v1675_v38 }
 0x15e   : > { %10224 = vmatmul.mubr.msk.bf16.gmra.mrb[160].mxu0 %vm481_vm1, %v1237_v14  ;;  %10284 = vmatmul.mubr.msk.bf16.gmra.mrb[160].mxu1 %vm481_vm1, %v1718_v34  ;;  %v1208_v34 = vld [vmem:[%s12094_s12 + $0x175] sm:$0xff] }
 0x15f   : > { %10227 = vmatprep.mubr.msk.bf16.mxu0 %vm12020_vm0, %v14544_v1  ;;  %10287 = vmatprep.mubr.msk.bf16.mxu1 %vm12020_vm0, %v14544_v1 }
 0x161   : > { %v1006_v32 = vpop.f32.mrb[56].mxu1  ;;  %v12692_v2 = vpop.f32.mrb[56].mxu0 }
 0x162   : > { %v10057_v9 = vpop.f32.mrb[57].mxu1  ;;  %v9969_v26 = vpop.f32.mrb[57].mxu0  ;;  %v12695_v5 = vadd.f32 %v1006_v32, %v12546_v44  ;;  %v1209_v44 = vld [vmem:[%s12094_s12 + $0x17d] sm:$0xff] }
 0x163   : > { %v1009_v8 = vpop.f32.mrb[58].mxu1  ;;  %v12697_v29 = vpop.f32.mrb[58].mxu0  ;;  %v1239_v59 = vpack.c.bf16 %v1209_v44, %v1208_v34  ;;  %v1210_v26 = vld [vmem:[%s12094_s12 + $0x185] sm:$0xff] }
 0x164   : > { %v10058_v30 = vpop.f32.mrb[59].mxu1  ;;  %v9970_v15 = vpop.f32.mrb[59].mxu0  ;;  %v12700_v14 = vadd.f32 %v1009_v8, %v12551_v53  ;;  %v1677_v8 = vld [vmem:[%s12094_s12 + $0xa6] sm:$0xff] }
 0x165   : > { %v1678_v30 = vld [vmem:[%s12094_s12 + $0xae] sm:$0xff] }
 0x166   : > { %10228 = vmatmul.mubr.msk.bf16.gmra.mrb[164].mxu0 %vm481_vm1, %v1238_v17  ;;  %10288 = vmatmul.mubr.msk.bf16.gmra.mrb[164].mxu1 %vm481_vm1, %v1719_v36  ;;  %v1721_v38 = vpack.c.bf16 %v1678_v30, %v1677_v8 }
 0x167   : > { %10231 = vmatprep.mubr.msk.bf16.mxu0 %vm12020_vm0, %v14544_v1  ;;  %10291 = vmatprep.mubr.msk.bf16.mxu1 %vm12020_vm0, %v14544_v1 }
 0x169   : > { %v1014_v50 = vpop.f32.mrb[60].mxu1  ;;  %v12712_v52 = vpop.f32.mrb[60].mxu0 }
 0x16a   : > { %v10061_v53 = vpop.f32.mrb[61].mxu1  ;;  %v9973_v24 = vpop.f32.mrb[61].mxu0  ;;  %v12715_v57 = vadd.f32 %v1014_v50, %v12566_v6  ;;  %v1211_v6 = vld [vmem:[%s12094_s12 + $0x18d] sm:$0xff] }
 0x16b   : > { %v1017_v0 = vpop.f32.mrb[62].mxu1  ;;  %v12717_v32 = vpop.f32.mrb[62].mxu0  ;;  %v1240_v44 = vpack.c.bf16 %v1211_v6, %v1210_v26  ;;  %v1679_v26 = vld [vmem:[%s12094_s12 + $0xb6] sm:$0xff]  ;;  %v1680_v6 = vld [vmem:[%s12094_s12 + $0xbe] sm:$0xff] }
 0x16c   : > { %v10062_v9 = vpop.f32.mrb[63].mxu1  ;;  %v9974_v17 = vpop.f32.mrb[63].mxu0  ;;  %v12720_v36 = vadd.f32 %v1017_v0, %v12571_v18 }
 0x16d   : > { %v1212_v9 = vld [vmem:[%s12094_s12 + $0x195] sm:$0xff] }
 0x16e   : > { %10232 = vmatmul.mubr.msk.bf16.gmra.mrb[168].mxu0 %vm481_vm1, %v1239_v59  ;;  %10292 = vmatmul.mubr.msk.bf16.gmra.mrb[168].mxu1 %vm481_vm1, %v1720_v58  ;;  %v11813_v17 = vld [vmem:[%s14539_s3 + $0x50] sm:$0xff]  }
 0x16f   : > { %10235 = vmatprep.mubr.msk.bf16.mxu0 %vm12020_vm0, %v14544_v1  ;;  %10295 = vmatprep.mubr.msk.bf16.mxu1 %vm12020_vm0, %v14544_v1 }
 0x170   : > { %10371 = vmatprep.subr.bf16.mxu0 %v11813_v17 }
 0x171   : > { %v1022_v15 = vpop.f32.mrb[64].mxu1  ;;  %v12732_v34 = vpop.f32.mrb[64].mxu0  ;;  %10372 = vmatpush3.bf16.msra.mxu0 %v11813_v17  ;;  %v1214_v17 = vld [vmem:[%s12094_s12 + $0x1a5] sm:$0xff] }
 0x172   : > { %v10065_v18 = vpop.f32.mrb[65].mxu1  ;;  %v9977_v46 = vpop.f32.mrb[65].mxu0  ;;  %v12735_v50 = vadd.f32 %v1022_v15, %v12586_v33  ;;  %v1213_v33 = vld [vmem:[%s12094_s12 + $0x19d] sm:$0xff] }
 0x173   : > { %v1025_v53 = vpop.f32.mrb[66].mxu1  ;;  %v12737_v59 = vpop.f32.mrb[66].mxu0  ;;  %v1241_v15 = vpack.c.bf16 %v1213_v33, %v1212_v9  ;;  %v1722_v18 = vpack.c.bf16 %v1680_v6, %v1679_v26  ;;  %v14550_v9 = vmov 0.0   ;;  %v1681_v33 = vld [vmem:[%s12094_s12 + $0xc6] sm:$0xff]  ;;  %v1682_v26 = vld [vmem:[%s12094_s12 + $0xce] sm:$0xff] }
 0x174   : > { %v10066_v58 = vpop.f32.mrb[67].mxu1  ;;  %v9978_v24 = vpop.f32.mrb[67].mxu0  ;;  %v12740_v0 = vadd.f32 %v1025_v53, %v12591_v43 }
 0x176   : > { %10236 = vmatmul.mubr.msk.bf16.gmra.mrb[172].mxu0 %vm481_vm1, %v1240_v44  ;;  %10296 = vmatmul.mubr.msk.bf16.gmra.mrb[172].mxu1 %vm481_vm1, %v1721_v38 }
 0x177   : > { %10239 = vmatprep.mubr.msk.bf16.mxu0 %vm12020_vm0, %v14544_v1  ;;  %10299 = vmatprep.mubr.msk.bf16.mxu1 %vm12020_vm0, %v14544_v1 }
 0x179   : > { %v1030_v43 = vpop.f32.mrb[68].mxu1  ;;  %v12755_v8 = vpop.f32.mrb[68].mxu0 }
 0x17a   : > { %v10069_v30 = vpop.f32.mrb[69].mxu1  ;;  %v9981_v44 = vpop.f32.mrb[69].mxu0  ;;  %v12758_v38 = vadd.f32 %v1030_v43, %v12606_v61  ;;  %v1215_v61 = vld [vmem:[%s12094_s12 + $0x1ad] sm:$0xff] }
 0x17b   : > { %v1033_v46 = vpop.f32.mrb[70].mxu1  ;;  %v12760_v53 = vpop.f32.mrb[70].mxu0  ;;  %v1242_v30 = vpack.c.bf16 %v1215_v61, %v1214_v17  ;;  %v1683_v17 = vld [vmem:[%s12094_s12 + $0xd6] sm:$0xff]  ;;  %v1684_v61 = vld [vmem:[%s12094_s12 + $0xde] sm:$0xff] }
 0x17c   : > { %v10070_v58 = vpop.f32.mrb[71].mxu1  ;;  %v9982_v24 = vpop.f32.mrb[71].mxu0  ;;  %v12763_v1 = vadd.f32 %v1033_v46, %v12614_v10 }
 0x17e   : > { %10240 = vmatmul.mubr.msk.bf16.gmra.mrb[176].mxu0 %vm481_vm1, %v1241_v15  ;;  %10300 = vmatmul.mubr.msk.bf16.gmra.mrb[176].mxu1 %vm481_vm1, %v1722_v18  ;;  %v1723_v15 = vpack.c.bf16 %v1682_v26, %v1681_v33 }
 0x17f   : > { %10243 = vmatprep.mubr.msk.bf16.mxu0 %vm12020_vm0, %v14550_v9  ;;  %10303 = vmatprep.mubr.msk.bf16.mxu1 %vm12020_vm0, %v14550_v9 }
 0x181   : > { %v1038_v6 = vpop.f32.mrb[72].mxu1  ;;  %v12775_v43 = vpop.f32.mrb[72].mxu0 }
 0x182   : > { %v10073_v10 = vpop.f32.mrb[73].mxu1  ;;  %v9985_v18 = vpop.f32.mrb[73].mxu0  ;;  %v12778_v44 = vadd.f32 %v1038_v6, %v12629_v42  ;;  %v1216_v42 = vld [vmem:[%s12094_s12 + $0x1b5] sm:$0x7] }
 0x183   : > { %v1041_v46 = vpop.f32.mrb[74].mxu1  ;;  %v12780_v58 = vpop.f32.mrb[74].mxu0  ;;  %v1243_v6 = vpack.c.bf16 %v1216_v42, %v1216_v42  ;;  %v1724_v10 = vpack.c.bf16 %v1684_v61, %v1683_v17  ;;  %v1685_v42 = vld [vmem:[%s12094_s12 + $0xe6] sm:$0xff]  ;;  %v1686_v17 = vld [vmem:[%s12094_s12 + $0xee] sm:$0xff] }
 0x184   : > { %v10074_v24 = vpop.f32.mrb[75].mxu1  ;;  %v9986_v23 = vpop.f32.mrb[75].mxu0  ;;  %v12783_v12 = vadd.f32 %v1041_v46, %v12634_v40 }
 0x186   : > { %10244 = vmatmul.mubr.msk.bf16.gmra.mrb[180].mxu0 %vm481_vm1, %v1242_v30  ;;  %10304 = vmatmul.mubr.msk.bf16.gmra.mrb[180].mxu1 %vm481_vm1, %v1723_v15 }
 0x187   : > { %10247 = vmatprep.mubr.msk.bf16.mxu0 %vm12020_vm0, %v14550_v9  ;;  %10307 = vmatprep.mubr.msk.bf16.mxu1 %vm12020_vm0, %v14550_v9 }
 0x189   : > { %v1046_v33 = vpop.f32.mrb[76].mxu1  ;;  %v12794_v23 = vpop.f32.mrb[76].mxu0 }
 0x18a   : > { %v10077_v40 = vpop.f32.mrb[77].mxu1  ;;  %v9989_v26 = vpop.f32.mrb[77].mxu0  ;;  %v12797_v30 = vadd.f32 %v1046_v33, %v12649_v28 }
 0x18b   : > { %v1049_v15 = vpop.f32.mrb[78].mxu1  ;;  %v12799_v18 = vpop.f32.mrb[78].mxu0 }
 0x18c   : > { %14551 = vst [vmem:[#allocation7_spill] sm:$0xff] %v12797_v30  ;;  %v10078_v46 = vpop.f32.mrb[79].mxu1  ;;  %v9990_v24 = vpop.f32.mrb[79].mxu0  ;;  %v12802_v4 = vadd.f32 %v1049_v15, %v12654_v11  ;;  %v1725_v11 = vpack.c.bf16 %v1686_v17, %v1685_v42  ;;  %v1688_v42 = vld [vmem:[%s12094_s12 + $0xfe] sm:$0xff] }
 0x18e   : > { %14552 = vst [vmem:[#allocation8_spill] sm:$0xff] %v12802_v4  ;;  %10248 = vmatmul.mubr.msk.bf16.gmra.mrb[184].mxu0 %vm481_vm1, %v1243_v6  ;;  %10308 = vmatmul.mubr.msk.bf16.gmra.mrb[184].mxu1 %vm481_vm1, %v1724_v10 }
 0x18f   : > { %10311 = vmatprep.mubr.msk.bf16.mxu1 %vm12020_vm0, %v14550_v9 }
 0x191   : > { %v1054_v61 = vpop.f32.mrb[80].mxu1  ;;  %v1392_v28 = vpop.f32.mrb[80].mxu0 }
 0x192   : > { %v12811_v33 = vadd.f32 %v1392_v28, %v12549_v51  ;;  %v10081_v40 = vpop.f32.mrb[81].mxu1  ;;  %v10145_v26 = vpop.f32.mrb[81].mxu0  ;;  %v12814_v15 = vadd.f32 %v1054_v61, %v12669_v31  ;;  %v11814_v51 = vld [vmem:[%s14539_s3 + $0x58] sm:$0xff]  }
 0x193   : > { %v1057_v6 = vpop.f32.mrb[82].mxu1  ;;  %v1395_v10 = vpop.f32.mrb[82].mxu0  ;;  %v1687_v31 = vld [vmem:[%s12094_s12 + $0xf6] sm:$0xff]  ;;  %10373 = vmatprep.subr.bf16.mxu0 %v11814_v51  ;;  %v11815_v26 = vld [vmem:[%s14539_s3 + $0x60] sm:$0xff]  }
 0x194   : > { %v12817_v46 = vadd.f32 %v1395_v10, %v12554_v60  ;;  %v10082_v24 = vpop.f32.mrb[83].mxu1  ;;  %v10146_v4 = vpop.f32.mrb[83].mxu0  ;;  %v12820_v30 = vadd.f32 %v1057_v6, %v12674_v22  ;;  %10374 = vmatpush3.bf16.msra.mxu0 %v11814_v51  ;;  %v1726_v28 = vpack.c.bf16 %v1688_v42, %v1687_v31  ;;  %v1689_v31 = vld [vmem:[%s12094_s12 + $0x106] sm:$0xff]  ;;  %v1690_v42 = vld [vmem:[%s12094_s12 + $0x10e] sm:$0xff] }
 0x195   : > { %10375 = vmatprep.subr.bf16.mxu0 %v11815_v26 }
 0x196   : > { %10312 = vmatmul.mubr.msk.bf16.gmra.mrb[188].mxu1 %vm481_vm1, %v1725_v11 }
 0x197   : > { %10315 = vmatprep.mubr.msk.bf16.mxu1 %vm12020_vm0, %v14550_v9 }
 0x198   : > { %10376 = vmatpush3.bf16.msra.mxu0 %v11815_v26  ;;  %v11817_v26 = vld [vmem:[%s14539_s3 + $0x70] sm:$0xff]  }
 0x199   : > { %v1062_v17 = vpop.f32.mrb[84].mxu1  ;;  %v1400_v60 = vpop.f32.mrb[84].mxu0 }
 0x19a   : > { %v12831_v4 = vadd.f32 %v1400_v60, %v12569_v16  ;;  %v10085_v22 = vpop.f32.mrb[85].mxu1  ;;  %v10149_v61 = vpop.f32.mrb[85].mxu0  ;;  %v12834_v40 = vadd.f32 %v1062_v17, %v12692_v2  ;;  %v11816_v2 = vld [vmem:[%s14539_s3 + $0x68] sm:$0xff]  }
 0x19b   : > { %v1065_v11 = vpop.f32.mrb[86].mxu1  ;;  %v1403_v6 = vpop.f32.mrb[86].mxu0  ;;  %10377 = vmatprep.subr.bf16.mxu0 %v11816_v2  ;;  %v1727_v61 = vpack.c.bf16 %v1690_v42, %v1689_v31  ;;  %v1691_v31 = vld [vmem:[%s12094_s12 + $0x116] sm:$0xff]  ;;  %v1692_v42 = vld [vmem:[%s12094_s12 + $0x11e] sm:$0xff] }
 0x19c   : > { %v12840_v10 = vadd.f32 %v1403_v6, %v12574_v25  ;;  %v10086_v24 = vpop.f32.mrb[87].mxu1  ;;  %v10150_v16 = vpop.f32.mrb[87].mxu0  ;;  %v12843_v51 = vadd.f32 %v1065_v11, %v12697_v29  ;;  %10378 = vmatpush3.bf16.msra.mxu0 %v11816_v2 }
 0x19d   : > { %10379 = vmatprep.subr.bf16.mxu0 %v11817_v26 }
 0x19e   : > { %10316 = vmatmul.mubr.msk.bf16.gmra.mrb[192].mxu1 %vm481_vm1, %v1726_v28 }
 0x19f   : > { %10319 = vmatprep.mubr.msk.bf16.mxu1 %vm12020_vm0, %v14550_v9 }
 0x1a0   : > { %10380 = vmatpush3.bf16.msra.mxu0 %v11817_v26 }
 0x1a1   : > { %v1070_v25 = vpop.f32.mrb[88].mxu1  ;;  %v1408_v17 = vpop.f32.mrb[88].mxu0 }
 0x1a2   : > { %v12854_v29 = vadd.f32 %v1408_v17, %v12589_v39  ;;  %v10089_v60 = vpop.f32.mrb[89].mxu1  ;;  %v10153_v22 = vpop.f32.mrb[89].mxu0  ;;  %v12857_v28 = vadd.f32 %v1070_v25, %v12712_v52  ;;  %v11818_v52 = vld [vmem:[%s14539_s3 + $0x78] sm:$0xff]  }
 0x1a3   : > { %v1073_v11 = vpop.f32.mrb[90].mxu1  ;;  %v1411_v6 = vpop.f32.mrb[90].mxu0  ;;  %10381 = vmatprep.subr.bf16.mxu0 %v11818_v52  ;;  %v1728_v22 = vpack.c.bf16 %v1692_v42, %v1691_v31 }
 0x1a4   : > { %v12863_v24 = vadd.f32 %v1411_v6, %v12594_v47  ;;  %v10090_v16 = vpop.f32.mrb[91].mxu1  ;;  %v10154_v39 = vpop.f32.mrb[91].mxu0  ;;  %v12866_v2 = vadd.f32 %v1073_v11, %v12717_v32  ;;  %10382 = vmatpush3.bf16.msra.mxu0 %v11818_v52  ;;  %v1694_v52 = vld [vmem:[%s12094_s12 + $0x12e] sm:$0xff] }
 0x1a6   : > { %14553 = vst [vmem:[#allocation9_spill] sm:$0xff] %v12863_v24  ;;  %10320 = vmatmul.mubr.msk.bf16.gmra.mrb[196].mxu1 %vm481_vm1, %v1727_v61 }
 0x1a7   : > { %10323 = vmatprep.mubr.msk.bf16.mxu1 %vm12020_vm0, %v14550_v9 }
 0x1a9   : > { %v1078_v47 = vpop.f32.mrb[92].mxu1  ;;  %v1416_v25 = vpop.f32.mrb[92].mxu0 }
 0x1aa   : > { %v12877_v32 = vadd.f32 %v1416_v25, %v12609_v3  ;;  %v10093_v17 = vpop.f32.mrb[93].mxu1  ;;  %v10157_v60 = vpop.f32.mrb[93].mxu0  ;;  %v12880_v61 = vadd.f32 %v1078_v47, %v12732_v34  ;;  %v1693_v3 = vld [vmem:[%s12094_s12 + $0x126] sm:$0xff] }
 0x1ab   : > { %v1081_v26 = vpop.f32.mrb[94].mxu1  ;;  %v1419_v11 = vpop.f32.mrb[94].mxu0  ;;  %v1729_v25 = vpack.c.bf16 %v1694_v52, %v1693_v3 }
 0x1ac   : > { %v12883_v6 = vadd.f32 %v1419_v11, %v12617_v19  ;;  %v10094_v16 = vpop.f32.mrb[95].mxu1  ;;  %v10158_v39 = vpop.f32.mrb[95].mxu0  ;;  %v12886_v24 = vadd.f32 %v1081_v26, %v12737_v59 }
 0x1ad   : > { %v1696_v39 = vld [vmem:[%s12094_s12 + $0x13e] sm:$0xff] }
 0x1ae   : > { %10324 = vmatmul.mubr.msk.bf16.gmra.mrb[200].mxu1 %vm481_vm1, %v1728_v22 }
 0x1af   : > { %10327 = vmatprep.mubr.msk.bf16.mxu1 %vm12020_vm0, %v14550_v9 }
 0x1b1   : > { %v1086_v34 = vpop.f32.mrb[96].mxu1  ;;  %v1424_v31 = vpop.f32.mrb[96].mxu0 }
 0x1b2   : > { %v12894_v42 = vadd.f32 %v1424_v31, %v12632_v37  ;;  %v10097_v19 = vpop.f32.mrb[97].mxu1  ;;  %v10161_v47 = vpop.f32.mrb[97].mxu0  ;;  %v12897_v59 = vadd.f32 %v1086_v34, %v12755_v8  ;;  %v1695_v37 = vld [vmem:[%s12094_s12 + $0x136] sm:$0xff] }
 0x1b3   : > { %v1089_v17 = vpop.f32.mrb[98].mxu1  ;;  %v1427_v60 = vpop.f32.mrb[98].mxu0  ;;  %v1730_v31 = vpack.c.bf16 %v1696_v39, %v1695_v37 }
 0x1b4   : > { %v12900_v22 = vadd.f32 %v1427_v60, %v12637_v48  ;;  %v10098_v26 = vpop.f32.mrb[99].mxu1  ;;  %v10162_v11 = vpop.f32.mrb[99].mxu0  ;;  %v12903_v16 = vadd.f32 %v1089_v17, %v12760_v53 }
 0x1b5   : > { %v1698_v11 = vld [vmem:[%s12094_s12 + $0x14e] sm:$0xff] }
 0x1b6   : > { %10328 = vmatmul.mubr.msk.bf16.gmra.mrb[204].mxu1 %vm481_vm1, %v1729_v25 }
 0x1b7   : > { %10331 = vmatprep.mubr.msk.bf16.mxu1 %vm12020_vm0, %v14550_v9 }
 0x1b9   : > { %v1094_v8 = vpop.f32.mrb[100].mxu1  ;;  %v1432_v3 = vpop.f32.mrb[100].mxu0 }
 0x1ba   : > { %v12911_v52 = vadd.f32 %v1432_v3, %v12652_v63  ;;  %v10101_v48 = vpop.f32.mrb[101].mxu1  ;;  %v10165_v34 = vpop.f32.mrb[101].mxu0  ;;  %v12914_v53 = vadd.f32 %v1094_v8, %v12775_v43  ;;  %v1697_v63 = vld [vmem:[%s12094_s12 + $0x146] sm:$0xff] }
 0x1bb   : > { %v1097_v19 = vpop.f32.mrb[102].mxu1  ;;  %v1435_v47 = vpop.f32.mrb[102].mxu0  ;;  %v1731_v3 = vpack.c.bf16 %v1698_v11, %v1697_v63 }
 0x1bc   : > { %v12917_v25 = vadd.f32 %v1435_v47, %v12657_v20  ;;  %v10102_v17 = vpop.f32.mrb[103].mxu1  ;;  %v10166_v60 = vpop.f32.mrb[103].mxu0  ;;  %v12920_v26 = vadd.f32 %v1097_v19, %v12780_v58 }
 0x1bd   : > { %v1700_v60 = vld [vmem:[%s12094_s12 + $0x15e] sm:$0xff] }
 0x1be   : > { %10332 = vmatmul.mubr.msk.bf16.gmra.mrb[208].mxu1 %vm481_vm1, %v1730_v31 }
 0x1bf   : > { %10335 = vmatprep.mubr.msk.bf16.mxu1 %vm12020_vm0, %v14550_v9 }
 0x1c1   : > { %v1102_v43 = vpop.f32.mrb[104].mxu1  ;;  %v1440_v37 = vpop.f32.mrb[104].mxu0 }
 0x1c2   : > { %v12928_v39 = vadd.f32 %v1440_v37, %v12672_v45  ;;  %v10105_v20 = vpop.f32.mrb[105].mxu1  ;;  %v10169_v8 = vpop.f32.mrb[105].mxu0  ;;  %v12931_v58 = vadd.f32 %v1102_v43, %v12794_v23  ;;  %v1699_v45 = vld [vmem:[%s12094_s12 + $0x156] sm:$0xff] }
 0x1c3   : > { %v1105_v48 = vpop.f32.mrb[106].mxu1  ;;  %v1443_v34 = vpop.f32.mrb[106].mxu0  ;;  %v1732_v37 = vpack.c.bf16 %v1700_v60, %v1699_v45 }
 0x1c4   : > { %v12934_v31 = vadd.f32 %v1443_v34, %v12677_v54  ;;  %v10106_v19 = vpop.f32.mrb[107].mxu1  ;;  %v10170_v47 = vpop.f32.mrb[107].mxu0  ;;  %v12937_v17 = vadd.f32 %v1105_v48, %v12799_v18 }
 0x1c5   : > { %v1702_v47 = vld [vmem:[%s12094_s12 + $0x16e] sm:$0xff] }
 0x1c6   : > { %10336 = vmatmul.mubr.msk.bf16.gmra.mrb[212].mxu1 %vm481_vm1, %v1731_v3 }
 0x1c7   : > { %10339 = vmatprep.mubr.msk.bf16.mxu1 %vm12020_vm0, %v14550_v9 }
 0x1c9   : > { %v1110_v23 = vpop.f32.mrb[108].mxu1  ;;  %v1448_v63 = vpop.f32.mrb[108].mxu0 }
 0x1ca   : > { %v12945_v11 = vadd.f32 %v1448_v63, %v12695_v5  ;;  %v10109_v54 = vpop.f32.mrb[109].mxu1  ;;  %v10173_v43 = vpop.f32.mrb[109].mxu0  ;;  %v12948_v18 = vadd.f32 %v1110_v23, %v12423_v56  ;;  %v1701_v5 = vld [vmem:[%s12094_s12 + $0x166] sm:$0xff] }
 0x1cb   : > { %v1113_v20 = vpop.f32.mrb[110].mxu1  ;;  %v1451_v8 = vpop.f32.mrb[110].mxu0  ;;  %v1733_v63 = vpack.c.bf16 %v1702_v47, %v1701_v5 }
 0x1cc   : > { %v12951_v3 = vadd.f32 %v1451_v8, %v12700_v14  ;;  %v10110_v48 = vpop.f32.mrb[111].mxu1  ;;  %v10174_v34 = vpop.f32.mrb[111].mxu0  ;;  %v12954_v19 = vadd.f32 %v1113_v20, %v12427_v62 }
 0x1cd   : > { %v1704_v34 = vld [vmem:[%s12094_s12 + $0x17e] sm:$0xff] }
 0x1ce   : > { %10340 = vmatmul.mubr.msk.bf16.gmra.mrb[216].mxu1 %vm481_vm1, %v1732_v37 }
 0x1cf   : > { %10343 = vmatprep.mubr.msk.bf16.mxu1 %vm12020_vm0, %v14550_v9 }
 0x1d1   : > { %v1118_v56 = vpop.f32.mrb[112].mxu1  ;;  %v1456_v45 = vpop.f32.mrb[112].mxu0 }
 0x1d2   : > { %v12962_v60 = vadd.f32 %v1456_v45, %v12715_v57  ;;  %v10113_v14 = vpop.f32.mrb[113].mxu1  ;;  %v10177_v23 = vpop.f32.mrb[113].mxu0  ;;  %v12965_v62 = vadd.f32 %v1118_v56, %v12441_v7  ;;  %v1703_v57 = vld [vmem:[%s12094_s12 + $0x176] sm:$0xff] }
 0x1d3   : > { %v1121_v54 = vpop.f32.mrb[114].mxu1  ;;  %v1459_v43 = vpop.f32.mrb[114].mxu0  ;;  %v1734_v45 = vpack.c.bf16 %v1704_v34, %v1703_v57 }
 0x1d4   : > { %v12968_v37 = vadd.f32 %v1459_v43, %v12720_v36  ;;  %v10114_v20 = vpop.f32.mrb[115].mxu1  ;;  %v10178_v8 = vpop.f32.mrb[115].mxu0  ;;  %v12971_v48 = vadd.f32 %v1121_v54, %v12445_v13 }
 0x1d5   : > { %v1706_v8 = vld [vmem:[%s12094_s12 + $0x18e] sm:$0xff] }
 0x1d6   : > { %10344 = vmatmul.mubr.msk.bf16.gmra.mrb[220].mxu1 %vm481_vm1, %v1733_v63 }
 0x1d7   : > { %10347 = vmatprep.mubr.msk.bf16.mxu1 %vm12020_vm0, %v14550_v9 }
 0x1d9   : > { %v1126_v7 = vpop.f32.mrb[116].mxu1  ;;  %v1464_v5 = vpop.f32.mrb[116].mxu0 }
 0x1da   : > { %v12979_v47 = vadd.f32 %v1464_v5, %v12735_v50  ;;  %v10117_v36 = vpop.f32.mrb[117].mxu1  ;;  %v10181_v56 = vpop.f32.mrb[117].mxu0  ;;  %v12982_v13 = vadd.f32 %v1126_v7, %v12459_v21  ;;  %v1705_v50 = vld [vmem:[%s12094_s12 + $0x186] sm:$0xff] }
 0x1db   : > { %v1129_v14 = vpop.f32.mrb[118].mxu1  ;;  %v1467_v23 = vpop.f32.mrb[118].mxu0  ;;  %v1735_v5 = vpack.c.bf16 %v1706_v8, %v1705_v50 }
 0x1dc   : > { %v12985_v63 = vadd.f32 %v1467_v23, %v12740_v0  ;;  %v10118_v54 = vpop.f32.mrb[119].mxu1  ;;  %v10182_v43 = vpop.f32.mrb[119].mxu0  ;;  %v12988_v20 = vadd.f32 %v1129_v14, %v12463_v27 }
 0x1dd   : > { %v1708_v43 = vld [vmem:[%s12094_s12 + $0x19e] sm:$0xff] }
 0x1de   : > { %10348 = vmatmul.mubr.msk.bf16.gmra.mrb[224].mxu1 %vm481_vm1, %v1734_v45 }
 0x1df   : > { %10351 = vmatprep.mubr.msk.bf16.mxu1 %vm12020_vm0, %v14550_v9 }
 0x1e1   : > { %v1134_v21 = vpop.f32.mrb[120].mxu1  ;;  %v1472_v57 = vpop.f32.mrb[120].mxu0 }
 0x1e2   : > { %v12996_v34 = vadd.f32 %v1472_v57, %v12758_v38  ;;  %v10121_v0 = vpop.f32.mrb[121].mxu1  ;;  %v10185_v7 = vpop.f32.mrb[121].mxu0  ;;  %v12999_v27 = vadd.f32 %v1134_v21, %v12477_v35  ;;  %v1707_v38 = vld [vmem:[%s12094_s12 + $0x196] sm:$0xff] }
 0x1e3   : > { %v1137_v36 = vpop.f32.mrb[122].mxu1  ;;  %v1475_v56 = vpop.f32.mrb[122].mxu0  ;;  %v1736_v57 = vpack.c.bf16 %v1708_v43, %v1707_v38  ;;  %v14557_v43 = vld [vmem:[#allocation7_spill] sm:$0xff] }
 0x1e4   : > { %v13002_v45 = vadd.f32 %v1475_v56, %v12763_v1  ;;  %v10122_v14 = vpop.f32.mrb[123].mxu1  ;;  %v10186_v23 = vpop.f32.mrb[123].mxu0  ;;  %v13005_v54 = vadd.f32 %v1137_v36, %v12481_v41 }
 0x1e5   : > { %v1710_v23 = vld [vmem:[%s12094_s12 + $0x1ae] sm:$0xff] }
 0x1e6   : > { %14554 = vst [vmem:[#allocation10_spill] sm:$0xff] %v13002_v45  ;;  %10352 = vmatmul.mubr.msk.bf16.gmra.mrb[228].mxu1 %vm481_vm1, %v1735_v5 }
 0x1e7   : > { %10355 = vmatprep.mubr.msk.bf16.mxu1 %vm12020_vm0, %v14550_v9 }
 0x1e9   : > { %v1142_v35 = vpop.f32.mrb[124].mxu1  ;;  %v1480_v50 = vpop.f32.mrb[124].mxu0 }
 0x1ea   : > { %v13013_v8 = vadd.f32 %v1480_v50, %v12778_v44  ;;  %v10125_v1 = vpop.f32.mrb[125].mxu1  ;;  %v10189_v21 = vpop.f32.mrb[125].mxu0  ;;  %v13016_v41 = vadd.f32 %v1142_v35, %v12495_v49  ;;  %v1709_v44 = vld [vmem:[%s12094_s12 + $0x1a6] sm:$0xff] }
 0x1eb   : > { %v1145_v0 = vpop.f32.mrb[126].mxu1  ;;  %v1483_v7 = vpop.f32.mrb[126].mxu0  ;;  %v1737_v1 = vpack.c.bf16 %v1710_v23, %v1709_v44  ;;  %v14558_v21 = vld [vmem:[#allocation4_spill] sm:$0xff] }
 0x1ec   : > { %14555 = vst [vmem:[#allocation11_spill] sm:$0xff] %v13013_v8  ;;  %v13019_v5 = vadd.f32 %v1483_v7, %v12783_v12  ;;  %v10126_v36 = vpop.f32.mrb[127].mxu1  ;;  %v10190_v56 = vpop.f32.mrb[127].mxu0  ;;  %v13022_v14 = vadd.f32 %v1145_v0, %v12499_v55  ;;  %v14560_v8 = vld [vmem:[#allocation5_spill] sm:$0xff] }
 0x1ee   : > { %14556 = vst [vmem:[#allocation12_spill] sm:$0xff] %v13019_v5  ;;  %10356 = vmatmul.mubr.msk.bf16.gmra.mrb[232].mxu1 %vm481_vm1, %v1736_v57  ;;  %v14559_v57 = vld [vmem:[#allocation8_spill] sm:$0xff] }
 0x1ef   : > { %10359 = vmatprep.mubr.msk.bf16.mxu1 %vm12020_vm0, %v14550_v9 }
 0x1f1   : > { %v1150_v49 = vpop.f32.mrb[128].mxu1  ;;  %v1488_v38 = vpop.f32.mrb[128].mxu0 }
 0x1f2   : > { %v13030_v35 = vadd.f32 %v1488_v38, %v14557_v43  ;;  %v10129_v12 = vpop.f32.mrb[129].mxu1  ;;  %v10193_v50 = vpop.f32.mrb[129].mxu0  ;;  %v13033_v7 = vadd.f32 %v1150_v49, %v14558_v21  ;;  %v1711_v38 = vld [vmem:[%s12094_s12 + $0x1b6] sm:$0x7] }
 0x1f3   : > { %v1153_v55 = vpop.f32.mrb[130].mxu1  ;;  %v1491_v0 = vpop.f32.mrb[130].mxu0  ;;  %v1738_v50 = vpack.c.bf16 %v1711_v38, %v1711_v38  ;;  %v14561_v21 = vld [vmem:[#allocation6_spill] sm:$0xff]  ;;  %v13060_v38 = vld [vmem:[%s14538_s2] ss:$0 sm:$0xff] }
 0x1f4   : > { %v13036_v36 = vadd.f32 %v1491_v0, %v14559_v57  ;;  %v10130_v56 = vpop.f32.mrb[131].mxu1  ;;  %v10194_v5 = vpop.f32.mrb[131].mxu0  ;;  %v13039_v45 = vadd.f32 %v1153_v55, %v14560_v8 }
 0x1f6   : > { %10360 = vmatmul.mubr.msk.bf16.gmra.mrb[236].mxu1 %vm481_vm1, %v1737_v1 }
 0x1f7   : > { %10363 = vmatprep.mubr.msk.bf16.mxu1 %vm12020_vm0, %v14550_v9 }
 0x1f9   : > { %v1158_v44 = vpop.f32.mrb[132].mxu1  ;;  %v1496_v23 = vpop.f32.mrb[132].mxu0 }
 0x1fa   : > { %v13046_v49 = vadd.f32 %v1496_v23, %v12814_v15  ;;  %v10133_v43 = vpop.f32.mrb[133].mxu1  ;;  %v10197_v12 = vpop.f32.mrb[133].mxu0  ;;  %v13049_v0 = vadd.f32 %v1158_v44, %v14561_v21 }
 0x1fb   : > { %v1161_v5 = vpop.f32.mrb[134].mxu1  ;;  %v1499_v8 = vpop.f32.mrb[134].mxu0 }
 0x1fc   : > { %v13052_v55 = vadd.f32 %v1499_v8, %v12820_v30  ;;  %v10134_v1 = vpop.f32.mrb[135].mxu1  ;;  %v10198_v57 = vpop.f32.mrb[135].mxu0 }
 0x1fe   : > { %14562 = vst [vmem:[#allocation7_spill] sm:$0xff] %v13052_v55  ;;  %10364 = vmatmul.mubr.msk.bf16.gmra.mrb[240].mxu1 %vm481_vm1, %v1738_v50 }
 0x1ff   : > { %11023 = vmatprep.mubr.msk.bf16.mxu1 %vm12020_vm0, %v14550_v9 }
 0x201   : > { %v1504_v15 = vpop.f32.mrb[136].mxu0  ;;  %v1887_v56 = vpop.f32.mrb[136].mxu1 }
 0x202   : > { %v13063_v44 = vadd.f32 %v1504_v15, %v12834_v40  ;;  %v2101_v30 = vadd.f32 %v1887_v56, %v12811_v33  ;;  %v10201_v23 = vpop.f32.mrb[137].mxu0  ;;  %v10261_v43 = vpop.f32.mrb[137].mxu1 }
 0x203   : > { %v1507_v12 = vpop.f32.mrb[138].mxu0  ;;  %v1890_v21 = vpop.f32.mrb[138].mxu1 }
 0x204   : > { %v2161_v50 = vadd.f32 %v13060_v38, %v2101_v30  ;;  %v13068_v5 = vadd.f32 %v1507_v12, %v12843_v51  ;;  %v2102_v8 = vadd.f32 %v1890_v21, %v12817_v46  ;;  %v10262_v1 = vpop.f32.mrb[139].mxu1  ;;  %v10202_v57 = vpop.f32.mrb[139].mxu0 }
 0x206   : > { %v2214_v9 = vmax.f32 %v2161_v50, 0.0  ;;  %v2162_v55 = vadd.f32 %v13060_v38, %v2102_v8 }
 0x208   : > { %2267 = vst [vmem:[#allocation2] sm:$0xff] %v2214_v9  ;;  %v2215_v40 = vmax.f32 %v2162_v55, 0.0 }
 0x209   : > { %v1512_v15 = vpop.f32.mrb[140].mxu0  ;;  %v1895_v33 = vpop.f32.mrb[140].mxu1 }
 0x20a   : > { %2268 = vst [vmem:[#allocation2 + $0x8] sm:$0xff] %v2215_v40  ;;  %v13073_v56 = vadd.f32 %v1512_v15, %v12857_v28  ;;  %v2103_v30 = vadd.f32 %v1895_v33, %v12831_v4  ;;  %v10205_v23 = vpop.f32.mrb[141].mxu0  ;;  %v10265_v51 = vpop.f32.mrb[141].mxu1 }
 0x20b   : > { %v1515_v43 = vpop.f32.mrb[142].mxu0  ;;  %v1898_v12 = vpop.f32.mrb[142].mxu1 }
 0x20c   : > { %v2163_v46 = vadd.f32 %v13060_v38, %v2103_v30  ;;  %v13078_v21 = vadd.f32 %v1515_v43, %v12866_v2  ;;  %v2104_v9 = vadd.f32 %v1898_v12, %v12840_v10  ;;  %v10266_v55 = vpop.f32.mrb[143].mxu1  ;;  %v10206_v50 = vpop.f32.mrb[143].mxu0  ;;  %v14563_v43 = vld [vmem:[#allocation9_spill] sm:$0xff] }
 0x20e   : > { %v2216_v8 = vmax.f32 %v2163_v46, 0.0  ;;  %v2164_v1 = vadd.f32 %v13060_v38, %v2104_v9 }
 0x210   : > { %2269 = vst [vmem:[#allocation2 + $0x10] sm:$0xff] %v2216_v8  ;;  %v2217_v28 = vmax.f32 %v2164_v1, 0.0 }
 0x211   : > { %v1520_v57 = vpop.f32.mrb[144].mxu0  ;;  %v1903_v4 = vpop.f32.mrb[144].mxu1  ;;  %v2394_v1 = vld [vmem:[#allocation2 + $0x1] ss:$2 sm:$0xff] }
 0x212   : > { %2270 = vst [vmem:[#allocation2 + $0x18] sm:$0xff] %v2217_v28  ;;  %v13083_v40 = vadd.f32 %v1520_v57, %v12880_v61  ;;  %v2105_v15 = vadd.f32 %v1903_v4, %v12854_v29  ;;  %v10209_v33 = vpop.f32.mrb[145].mxu0  ;;  %v10269_v2 = vpop.f32.mrb[145].mxu1 }
 0x213   : > { %v1523_v30 = vpop.f32.mrb[146].mxu0  ;;  %v1906_v23 = vpop.f32.mrb[146].mxu1 }
 0x214   : > { %v2165_v10 = vadd.f32 %v13060_v38, %v2105_v15  ;;  %v13088_v51 = vadd.f32 %v1523_v30, %v12886_v24  ;;  %v2106_v12 = vadd.f32 %v1906_v23, %v14563_v43  ;;  %v10270_v46 = vpop.f32.mrb[147].mxu1  ;;  %v10210_v9 = vpop.f32.mrb[147].mxu0 }
 0x216   : > { %v2218_v55 = vmax.f32 %v2165_v10, 0.0  ;;  %v2166_v50 = vadd.f32 %v13060_v38, %v2106_v12 }
 0x218   : > { %2271 = vst [vmem:[#allocation2 + $0x20] sm:$0xff] %v2218_v55  ;;  %v2219_v61 = vmax.f32 %v2166_v50, 0.0  ;;  %v11819_v55 = vld [vmem:[%s14539_s3] sm:$0xff]  }
 0x219   : > { %v1528_v8 = vpop.f32.mrb[148].mxu0  ;;  %v1911_v29 = vpop.f32.mrb[148].mxu1  ;;  %v2396_v28 = vld [vmem:[#allocation2 + $0x11] ss:$2 sm:$0xff]  ;;  %10407 = vmatprep.subr.bf16.mxu0 %v11819_v55 }
 0x21a   : > { %2272 = vst [vmem:[#allocation2 + $0x28] sm:$0xff] %v2219_v61  ;;  %v13093_v57 = vadd.f32 %v1528_v8, %v12897_v59  ;;  %v2107_v24 = vadd.f32 %v1911_v29, %v12877_v32  ;;  %v10213_v4 = vpop.f32.mrb[149].mxu0  ;;  %v10273_v15 = vpop.f32.mrb[149].mxu1  ;;  %v2439_v33 = vpack.c.bf16 %v2396_v28, %v2394_v1 }
 0x21b   : > { %v1531_v2 = vpop.f32.mrb[150].mxu0  ;;  %v1914_v30 = vpop.f32.mrb[150].mxu1 }
 0x21c   : > { %v2167_v23 = vadd.f32 %v13060_v38, %v2107_v24  ;;  %v13098_v10 = vadd.f32 %v1531_v2, %v12903_v16  ;;  %v2108_v43 = vadd.f32 %v1914_v30, %v12883_v6  ;;  %v10274_v12 = vpop.f32.mrb[151].mxu1  ;;  %10383 = vmatprep.mubr.bf16.mxu0 %v2439_v33  ;;  %v10214_v46 = vpop.f32.mrb[151].mxu0 }
 0x21e   : > { %v2220_v9 = vmax.f32 %v2167_v23, 0.0  ;;  %v2168_v59 = vadd.f32 %v13060_v38, %v2108_v43 }
 0x220   : > { %2273 = vst [vmem:[#allocation2 + $0x30] sm:$0xff] %v2220_v9  ;;  %v2221_v32 = vmax.f32 %v2168_v59, 0.0 }
 0x221   : > { %v1536_v50 = vpop.f32.mrb[152].mxu0  ;;  %v1919_v61 = vpop.f32.mrb[152].mxu1  ;;  %v2398_v12 = vld [vmem:[#allocation2 + $0x21] ss:$2 sm:$0xff] }
 0x222   : > { %2274 = vst [vmem:[#allocation2 + $0x38] sm:$0xff] %v2221_v32  ;;  %v13106_v16 = vadd.f32 %v1536_v50, %v12914_v53  ;;  %v2109_v6 = vadd.f32 %v1919_v61, %v12894_v42  ;;  %v10217_v8 = vpop.f32.mrb[153].mxu0  ;;  %v10277_v29 = vpop.f32.mrb[153].mxu1  ;;  %v11820_v50 = vld [vmem:[%s14539_s3 + $0x8] sm:$0xff]  }
 0x223   : > { %v1539_v1 = vpop.f32.mrb[154].mxu0  ;;  %v1922_v28 = vpop.f32.mrb[154].mxu1 }
 0x224   : > { %v2169_v24 = vadd.f32 %v13060_v38, %v2109_v6  ;;  %v13111_v4 = vadd.f32 %v1539_v1, %v12920_v26  ;;  %v2110_v15 = vadd.f32 %v1922_v28, %v12900_v22  ;;  %v10278_v33 = vpop.f32.mrb[155].mxu1  ;;  %v10218_v2 = vpop.f32.mrb[155].mxu0 }
 0x226   : > { %v2222_v30 = vmax.f32 %v2169_v24, 0.0  ;;  %v2170_v53 = vadd.f32 %v13060_v38, %v2110_v15  ;;  %v11821_v15 = vld [vmem:[%s14539_s3 + $0x10] sm:$0xff]  }
 0x228   : > { %2275 = vst [vmem:[#allocation2 + $0x40] sm:$0xff] %v2222_v30  ;;  %v2223_v23 = vmax.f32 %v2170_v53, 0.0 }
 0x229   : > { %v1544_v42 = vpop.f32.mrb[156].mxu0  ;;  %v1927_v43 = vpop.f32.mrb[156].mxu1  ;;  %v2400_v46 = vld [vmem:[#allocation2 + $0x31] ss:$2 sm:$0xff] }
 0x22a   : > { %2276 = vst [vmem:[#allocation2 + $0x48] sm:$0xff] %v2223_v23  ;;  %v13116_v9 = vadd.f32 %v1544_v42, %v12931_v58  ;;  %v2111_v26 = vadd.f32 %v1927_v43, %v12911_v52  ;;  %v10221_v59 = vpop.f32.mrb[157].mxu0  ;;  %v10281_v32 = vpop.f32.mrb[157].mxu1  ;;  %v2440_v22 = vpack.c.bf16 %v2400_v46, %v2398_v12  ;;  %v11822_v23 = vld [vmem:[%s14539_s3 + $0x18] sm:$0xff]  }
 0x22b   : > { %v1547_v61 = vpop.f32.mrb[158].mxu0  ;;  %v1930_v6 = vpop.f32.mrb[158].mxu1 }
 0x22c   : > { %v2171_v8 = vadd.f32 %v13060_v38, %v2111_v26  ;;  %v13124_v29 = vadd.f32 %v1547_v61, %v12937_v17  ;;  %v2112_v1 = vadd.f32 %v1930_v6, %v12917_v25  ;;  %v10282_v58 = vpop.f32.mrb[159].mxu1  ;;  %10384 = vmatmul.mubr.bf16.vlgmr.msra.gmra.mrb[188].mxu0 %v2440_v22  ;;  %v10222_v28 = vpop.f32.mrb[159].mxu0 }
 0x22d   : > { %10408 = vmatpush3.bf16.msra.mxu0 %v11819_v55 }
 0x22e   : > { %v2224_v52 = vmax.f32 %v2171_v8, 0.0  ;;  %v2172_v24 = vadd.f32 %v13060_v38, %v2112_v1  ;;  %10409 = vmatprep.subr.bf16.mxu0 %v11820_v50 }
 0x230   : > { %2277 = vst [vmem:[#allocation2 + $0x50] sm:$0xff] %v2224_v52  ;;  %v2225_v33 = vmax.f32 %v2172_v24, 0.0  ;;  %v11824_v24 = vld [vmem:[%s14539_s3 + $0x28] sm:$0xff]  }
 0x231   : > { %v1552_v2 = vpop.f32.mrb[160].mxu0  ;;  %v1935_v30 = vpop.f32.mrb[160].mxu1  ;;  %10410 = vmatpush3.bf16.msra.mxu0 %v11820_v50  ;;  %v11823_v50 = vld [vmem:[%s14539_s3 + $0x20] sm:$0xff]  }
 0x232   : > { %2278 = vst [vmem:[#allocation2 + $0x58] sm:$0xff] %v2225_v33  ;;  %v13132_v25 = vadd.f32 %v1552_v2, %v12948_v18  ;;  %v2113_v17 = vadd.f32 %v1935_v30, %v12928_v39  ;;  %v10225_v55 = vpop.f32.mrb[161].mxu0  ;;  %v10285_v53 = vpop.f32.mrb[161].mxu1  ;;  %10411 = vmatprep.subr.bf16.mxu0 %v11821_v15  ;;  %v2402_v8 = vld [vmem:[#allocation2 + $0x41] ss:$2 sm:$0xff] }
 0x233   : > { %v1555_v42 = vpop.f32.mrb[162].mxu0  ;;  %v1938_v43 = vpop.f32.mrb[162].mxu1 }
 0x234   : > { %v2173_v12 = vadd.f32 %v13060_v38, %v2113_v17  ;;  %v13140_v46 = vadd.f32 %v1555_v42, %v12954_v19  ;;  %v2114_v26 = vadd.f32 %v1938_v43, %v12934_v31  ;;  %v10286_v18 = vpop.f32.mrb[163].mxu1  ;;  %v10226_v59 = vpop.f32.mrb[163].mxu0  ;;  %v11825_v42 = vld [vmem:[%s14539_s3 + $0x30] sm:$0xff]  }
 0x235   : > { %10412 = vmatpush3.bf16.msra.mxu0 %v11821_v15 }
 0x236   : > { %v2226_v39 = vmax.f32 %v2173_v12, 0.0  ;;  %v2174_v32 = vadd.f32 %v13060_v38, %v2114_v26  ;;  %10413 = vmatprep.subr.bf16.mxu0 %v11822_v23 }
 0x238   : > { %2279 = vst [vmem:[#allocation2 + $0x60] sm:$0xff] %v2226_v39  ;;  %v2227_v22 = vmax.f32 %v2174_v32, 0.0 }
 0x239   : > { %v1560_v61 = vpop.f32.mrb[164].mxu0  ;;  %v1943_v6 = vpop.f32.mrb[164].mxu1  ;;  %v2404_v19 = vld [vmem:[#allocation2 + $0x51] ss:$2 sm:$0xff]  ;;  %10414 = vmatpush3.bf16.msra.mxu0 %v11822_v23 }
 0x23a   : > { %2280 = vst [vmem:[#allocation2 + $0x68] sm:$0xff] %v2227_v22  ;;  %v13148_v31 = vadd.f32 %v1560_v61, %v12965_v62  ;;  %v2115_v1 = vadd.f32 %v1943_v6, %v12945_v11  ;;  %v10229_v58 = vpop.f32.mrb[165].mxu0  ;;  %v10289_v28 = vpop.f32.mrb[165].mxu1  ;;  %v2441_v52 = vpack.c.bf16 %v2404_v19, %v2402_v8  ;;  %10415 = vmatprep.subr.bf16.mxu0 %v11823_v50 }
 0x23b   : > { %v1563_v15 = vpop.f32.mrb[166].mxu0  ;;  %v1946_v33 = vpop.f32.mrb[166].mxu1 }
 0x23c   : > { %v2175_v2 = vadd.f32 %v13060_v38, %v2115_v1  ;;  %v13156_v30 = vadd.f32 %v1563_v15, %v12971_v48  ;;  %v2116_v62 = vadd.f32 %v1946_v33, %v12951_v3  ;;  %v10290_v17 = vpop.f32.mrb[167].mxu1  ;;  %10387 = vmatprep.mubr.bf16.mxu0 %v2441_v52  ;;  %v10230_v11 = vpop.f32.mrb[167].mxu0 }
 0x23d   : > { %10416 = vmatpush3.bf16.msra.mxu0 %v11823_v50 }
 0x23e   : > { %v2228_v55 = vmax.f32 %v2175_v2, 0.0  ;;  %v2176_v53 = vadd.f32 %v13060_v38, %v2116_v62  ;;  %10417 = vmatprep.subr.bf16.mxu0 %v11824_v24 }
 0x240   : > { %2281 = vst [vmem:[#allocation2 + $0x70] sm:$0xff] %v2228_v55  ;;  %v2229_v23 = vmax.f32 %v2176_v53, 0.0 }
 0x241   : > { %v1568_v43 = vpop.f32.mrb[168].mxu0  ;;  %v1951_v12 = vpop.f32.mrb[168].mxu1  ;;  %10418 = vmatpush3.bf16.msra.mxu0 %v11824_v24  ;;  %v2406_v28 = vld [vmem:[#allocation2 + $0x61] ss:$2 sm:$0xff] }
 0x242   : > { %2282 = vst [vmem:[#allocation2 + $0x78] sm:$0xff] %v2229_v23  ;;  %v13164_v3 = vadd.f32 %v1568_v43, %v12982_v13  ;;  %v2117_v48 = vadd.f32 %v1951_v12, %v12962_v60  ;;  %v10233_v26 = vpop.f32.mrb[169].mxu0  ;;  %v10293_v18 = vpop.f32.mrb[169].mxu1  ;;  %10419 = vmatprep.subr.bf16.mxu0 %v11825_v42  ;;  %v11826_v13 = vld [vmem:[%s14539_s3 + $0x38] sm:$0xff]   ;;  %v13189_v43 = vld [vmem:[%s14539_s3 + $0x80] sm:$0xff]  }
 0x243   : > { %v1571_v59 = vpop.f32.mrb[170].mxu0  ;;  %v1954_v39 = vpop.f32.mrb[170].mxu1 }
 0x244   : > { %v2177_v32 = vadd.f32 %v13060_v38, %v2117_v48  ;;  %v13169_v22 = vadd.f32 %v1571_v59, %v12988_v20  ;;  %v2118_v50 = vadd.f32 %v1954_v39, %v12968_v37  ;;  %v10294_v61 = vpop.f32.mrb[171].mxu1  ;;  %v10234_v6 = vpop.f32.mrb[171].mxu0 }
 0x245   : > { %10420 = vmatpush3.bf16.msra.mxu0 %v11825_v42  ;;  %v14564_v61 = vld [vmem:[#allocation10_spill] sm:$0xff] }
 0x246   : > { %v2230_v60 = vmax.f32 %v2177_v32, 0.0  ;;  %v2178_v8 = vadd.f32 %v13060_v38, %v2118_v50  ;;  %10421 = vmatprep.subr.bf16.mxu0 %v11826_v13 }
 0x248   : > { %2283 = vst [vmem:[#allocation2 + $0x80] sm:$0xff] %v2230_v60  ;;  %v2231_v19 = vmax.f32 %v2178_v8, 0.0 }
 0x249   : > { %v1576_v1 = vpop.f32.mrb[172].mxu0  ;;  %v1959_v58 = vpop.f32.mrb[172].mxu1  ;;  %v2408_v20 = vld [vmem:[#allocation2 + $0x71] ss:$2 sm:$0xff]  ;;  %10422 = vmatpush3.bf16.msra.mxu0 %v11826_v13 }
 0x24a   : > { %2284 = vst [vmem:[#allocation2 + $0x88] sm:$0xff] %v2231_v19  ;;  %v13177_v37 = vadd.f32 %v1576_v1, %v12999_v27  ;;  %v2119_v52 = vadd.f32 %v1959_v58, %v12979_v47  ;;  %v10237_v24 = vpop.f32.mrb[173].mxu0  ;;  %v10297_v15 = vpop.f32.mrb[173].mxu1  ;;  %v2442_v33 = vpack.c.bf16 %v2408_v20, %v2406_v28  ;;  %10447 = vmatprep.subr.bf16.mxu0 %v13189_v43 }
 0x24b   : > { %v1579_v2 = vpop.f32.mrb[174].mxu0  ;;  %v1962_v62 = vpop.f32.mrb[174].mxu1 }
 0x24c   : > { %v2179_v17 = vadd.f32 %v13060_v38, %v2119_v52  ;;  %v13182_v11 = vadd.f32 %v1579_v2, %v13005_v54  ;;  %v2120_v55 = vadd.f32 %v1962_v62, %v12985_v63  ;;  %v10298_v53 = vpop.f32.mrb[175].mxu1  ;;  %10388 = vmatmul.mubr.bf16.gmra.mrb[192].mxu0 %v2442_v33  ;;  %v10238_v23 = vpop.f32.mrb[175].mxu0  ;;  %v14565_v52 = vld [vmem:[#allocation11_spill] sm:$0xff] }
 0x24d   : > { %v14566_v53 = vld [vmem:[#allocation12_spill] sm:$0xff] }
 0x24e   : > { %v2232_v42 = vmax.f32 %v2179_v17, 0.0  ;;  %v2180_v27 = vadd.f32 %v13060_v38, %v2120_v55 }
 0x250   : > { %2285 = vst [vmem:[#allocation2 + $0x90] sm:$0xff] %v2232_v42  ;;  %v2233_v47 = vmax.f32 %v2180_v27, 0.0 }
 0x251   : > { %v1584_v12 = vpop.f32.mrb[176].mxu0  ;;  %v1967_v48 = vpop.f32.mrb[176].mxu1  ;;  %v2410_v58 = vld [vmem:[#allocation2 + $0x81] ss:$2 sm:$0xff] }
 0x252   : > { %2286 = vst [vmem:[#allocation2 + $0x98] sm:$0xff] %v2233_v47  ;;  %v13192_v54 = vadd.f32 %v1584_v12, %v13016_v41  ;;  %v2121_v63 = vadd.f32 %v1967_v48, %v12996_v34  ;;  %v10241_v26 = vpop.f32.mrb[177].mxu0  ;;  %v10301_v18 = vpop.f32.mrb[177].mxu1 }
 0x253   : > { %v1587_v59 = vpop.f32.mrb[178].mxu0  ;;  %v1970_v39 = vpop.f32.mrb[178].mxu1 }
 0x254   : > { %v2181_v32 = vadd.f32 %v13060_v38, %v2121_v63  ;;  %v13198_v50 = vadd.f32 %v1587_v59, %v13022_v14  ;;  %v2122_v6 = vadd.f32 %v1970_v39, %v14564_v61  ;;  %v10302_v13 = vpop.f32.mrb[179].mxu1  ;;  %v10242_v60 = vpop.f32.mrb[179].mxu0 }
 0x256   : > { %v2234_v8 = vmax.f32 %v2181_v32, 0.0  ;;  %v2182_v41 = vadd.f32 %v13060_v38, %v2122_v6 }
 0x258   : > { %2287 = vst [vmem:[#allocation2 + $0xa0] sm:$0xff] %v2234_v8  ;;  %v2235_v34 = vmax.f32 %v2182_v41, 0.0 }
 0x259   : > { %v1592_v19 = vpop.f32.mrb[180].mxu0  ;;  %v1975_v1 = vpop.f32.mrb[180].mxu1  ;;  %v2412_v28 = vld [vmem:[#allocation2 + $0x91] ss:$2 sm:$0xff] }
 0x25a   : > { %2288 = vst [vmem:[#allocation2 + $0xa8] sm:$0xff] %v2235_v34  ;;  %v13203_v20 = vadd.f32 %v1592_v19, %v13033_v7  ;;  %v2123_v14 = vadd.f32 %v1975_v1, %v14565_v52  ;;  %v10245_v24 = vpop.f32.mrb[181].mxu0  ;;  %v10305_v15 = vpop.f32.mrb[181].mxu1  ;;  %v2443_v33 = vpack.c.bf16 %v2412_v28, %v2410_v58 }
 0x25b   : > { %v1595_v2 = vpop.f32.mrb[182].mxu0  ;;  %v1978_v62 = vpop.f32.mrb[182].mxu1  ;;  %v14567_v24 = vld [vmem:[#allocation7_spill] sm:$0xff] }
 0x25c   : > { %v2183_v17 = vadd.f32 %v13060_v38, %v2123_v14  ;;  %v13208_v55 = vadd.f32 %v1595_v2, %v13039_v45  ;;  %v2124_v23 = vadd.f32 %v1978_v62, %v14566_v53  ;;  %v10306_v42 = vpop.f32.mrb[183].mxu1  ;;  %10391 = vmatprep.mubr.bf16.mxu0 %v2443_v33  ;;  %v10246_v27 = vpop.f32.mrb[183].mxu0 }
 0x25e   : > { %v2236_v47 = vmax.f32 %v2183_v17, 0.0  ;;  %v2184_v7 = vadd.f32 %v13060_v38, %v2124_v23 }
 0x260   : > { %2289 = vst [vmem:[#allocation2 + $0xb0] sm:$0xff] %v2236_v47  ;;  %v2237_v12 = vmax.f32 %v2184_v7, 0.0 }
 0x261   : > { %v1600_v48 = vpop.f32.mrb[184].mxu0  ;;  %v1983_v63 = vpop.f32.mrb[184].mxu1 }
 0x262   : > { %2290 = vst [vmem:[#allocation2 + $0xb8] sm:$0xff] %v2237_v12  ;;  %v13213_v26 = vadd.f32 %v1600_v48, %v13049_v0  ;;  %v2125_v18 = vadd.f32 %v1983_v63, %v13030_v35  ;;  %v10309_v45 = vpop.f32.mrb[185].mxu1  ;;  %v10249_v59 = vpop.f32.mrb[185].mxu0  ;;  %v2414_v0 = vld [vmem:[#allocation2 + $0xa1] ss:$2 sm:$0xff] }
 0x263   : > { %v1986_v39 = vpop.f32.mrb[186].mxu1  ;;  %v1603_v32 = vpop.f32.mrb[186].mxu0 }
 0x264   : > { %v2185_v61 = vadd.f32 %v13060_v38, %v2125_v18  ;;  %v2126_v6 = vadd.f32 %v1986_v39, %v13036_v36  ;;  %v10310_v13 = vpop.f32.mrb[187].mxu1  ;;  %v10250_v60 = vpop.f32.mrb[187].mxu0 }
 0x266   : > { %v2238_v8 = vmax.f32 %v2185_v61, 0.0  ;;  %v2186_v41 = vadd.f32 %v13060_v38, %v2126_v6 }
 0x268   : > { %2291 = vst [vmem:[#allocation2 + $0xc0] sm:$0xff] %v2238_v8  ;;  %v2239_v34 = vmax.f32 %v2186_v41, 0.0 }
 0x269   : > { %v1991_v19 = vpop.f32.mrb[188].mxu1  ;;  %v2416_v1 = vld [vmem:[#allocation2 + $0xb1] ss:$2 sm:$0xff] }
 0x26a   : > { %2292 = vst [vmem:[#allocation2 + $0xc8] sm:$0xff] %v2239_v34  ;;  %v2127_v35 = vadd.f32 %v1991_v19, %v13046_v49  ;;  %v10313_v58 = vpop.f32.mrb[189].mxu1  ;;  %v2444_v28 = vpack.c.bf16 %v2416_v1, %v2414_v0 }
 0x26b   : > { %v1994_v52 = vpop.f32.mrb[190].mxu1 }
 0x26c   : > { %v2187_v14 = vadd.f32 %v13060_v38, %v2127_v35  ;;  %v2128_v36 = vadd.f32 %v1994_v52, %v14567_v24  ;;  %v10314_v15 = vpop.f32.mrb[191].mxu1  ;;  %10392 = vmatmul.mubr.bf16.gmra.mrb[196].mxu0 %v2444_v28 }
 0x26e   : > { %v2240_v33 = vmax.f32 %v2187_v14, 0.0  ;;  %v2188_v2 = vadd.f32 %v13060_v38, %v2128_v36 }
 0x270   : > { %2293 = vst [vmem:[#allocation2 + $0xd0] sm:$0xff] %v2240_v33  ;;  %v2241_v62 = vmax.f32 %v2188_v2, 0.0 }
 0x271   : > { %v1999_v17 = vpop.f32.mrb[192].mxu1  ;;  %v2418_v18 = vld [vmem:[#allocation2 + $0xc1] ss:$2 sm:$0xff] }
 0x272   : > { %2294 = vst [vmem:[#allocation2 + $0xd8] sm:$0xff] %v2241_v62  ;;  %v2129_v53 = vadd.f32 %v1999_v17, %v13063_v44  ;;  %v10317_v23 = vpop.f32.mrb[193].mxu1 }
 0x273   : > { %v2002_v49 = vpop.f32.mrb[194].mxu1 }
 0x274   : > { %v2189_v42 = vadd.f32 %v13060_v38, %v2129_v53  ;;  %v2130_v27 = vadd.f32 %v2002_v49, %v13068_v5  ;;  %v10318_v47 = vpop.f32.mrb[195].mxu1 }
 0x276   : > { %v2242_v7 = vmax.f32 %v2189_v42, 0.0  ;;  %v2190_v12 = vadd.f32 %v13060_v38, %v2130_v27 }
 0x278   : > { %2295 = vst [vmem:[#allocation2 + $0xe0] sm:$0xff] %v2242_v7  ;;  %v2243_v48 = vmax.f32 %v2190_v12, 0.0 }
 0x279   : > { %v2007_v63 = vpop.f32.mrb[196].mxu1  ;;  %v2420_v45 = vld [vmem:[#allocation2 + $0xd1] ss:$2 sm:$0xff] }
 0x27a   : > { %2296 = vst [vmem:[#allocation2 + $0xe8] sm:$0xff] %v2243_v48  ;;  %v2131_v59 = vadd.f32 %v2007_v63, %v13073_v56  ;;  %v10321_v39 = vpop.f32.mrb[197].mxu1  ;;  %v2445_v44 = vpack.c.bf16 %v2420_v45, %v2418_v18 }
 0x27b   : > { %v2010_v32 = vpop.f32.mrb[198].mxu1 }
 0x27c   : > { %v2191_v61 = vadd.f32 %v13060_v38, %v2131_v59  ;;  %v2132_v6 = vadd.f32 %v2010_v32, %v13078_v21  ;;  %v10322_v5 = vpop.f32.mrb[199].mxu1  ;;  %10395 = vmatprep.mubr.bf16.mxu0 %v2445_v44 }
 0x27e   : > { %v2244_v13 = vmax.f32 %v2191_v61, 0.0  ;;  %v2192_v60 = vadd.f32 %v13060_v38, %v2132_v6 }
 0x280   : > { %2297 = vst [vmem:[#allocation2 + $0xf0] sm:$0xff] %v2244_v13  ;;  %v2245_v8 = vmax.f32 %v2192_v60, 0.0 }
 0x281   : > { %v2015_v41 = vpop.f32.mrb[200].mxu1  ;;  %v2422_v14 = vld [vmem:[#allocation2 + $0xe1] ss:$2 sm:$0xff] }
 0x282   : > { %2298 = vst [vmem:[#allocation2 + $0xf8] sm:$0xff] %v2245_v8  ;;  %v2133_v34 = vadd.f32 %v2015_v41, %v13083_v40  ;;  %v10325_v19 = vpop.f32.mrb[201].mxu1 }
 0x283   : > { %v2018_v56 = vpop.f32.mrb[202].mxu1 }
 0x284   : > { %v2193_v0 = vadd.f32 %v13060_v38, %v2133_v34  ;;  %v2134_v1 = vadd.f32 %v2018_v56, %v13088_v51  ;;  %v10326_v35 = vpop.f32.mrb[203].mxu1 }
 0x286   : > { %v2246_v58 = vmax.f32 %v2193_v0, 0.0  ;;  %v2194_v21 = vadd.f32 %v13060_v38, %v2134_v1 }
 0x288   : > { %2299 = vst [vmem:[#allocation2 + $0x100] sm:$0xff] %v2246_v58  ;;  %v2247_v28 = vmax.f32 %v2194_v21, 0.0 }
 0x289   : > { %v2023_v52 = vpop.f32.mrb[204].mxu1  ;;  %v2424_v24 = vld [vmem:[#allocation2 + $0xf1] ss:$2 sm:$0xff] }
 0x28a   : > { %2300 = vst [vmem:[#allocation2 + $0x108] sm:$0xff] %v2247_v28  ;;  %v2135_v36 = vadd.f32 %v2023_v52, %v13093_v57  ;;  %v10329_v15 = vpop.f32.mrb[205].mxu1  ;;  %v2446_v40 = vpack.c.bf16 %v2424_v24, %v2422_v14 }
 0x28b   : > { %v2026_v33 = vpop.f32.mrb[206].mxu1 }
 0x28c   : > { %v2195_v2 = vadd.f32 %v13060_v38, %v2135_v36  ;;  %v2136_v62 = vadd.f32 %v2026_v33, %v13098_v10  ;;  %v10330_v51 = vpop.f32.mrb[207].mxu1  ;;  %10396 = vmatmul.mubr.bf16.gmra.mrb[200].mxu0 %v2446_v40 }
 0x28e   : > { %v2248_v17 = vmax.f32 %v2195_v2, 0.0  ;;  %v2196_v53 = vadd.f32 %v13060_v38, %v2136_v62 }
 0x290   : > { %2301 = vst [vmem:[#allocation2 + $0x110] sm:$0xff] %v2248_v17  ;;  %v2249_v23 = vmax.f32 %v2196_v53, 0.0 }
 0x291   : > { %v2031_v49 = vpop.f32.mrb[208].mxu1  ;;  %v2426_v45 = vld [vmem:[#allocation2 + $0x101] ss:$2 sm:$0xff] }
 0x292   : > { %2302 = vst [vmem:[#allocation2 + $0x118] sm:$0xff] %v2249_v23  ;;  %v2137_v42 = vadd.f32 %v2031_v49, %v13106_v16  ;;  %v10333_v27 = vpop.f32.mrb[209].mxu1 }
 0x293   : > { %v2034_v57 = vpop.f32.mrb[210].mxu1 }
 0x294   : > { %v2197_v47 = vadd.f32 %v13060_v38, %v2137_v42  ;;  %v2138_v7 = vadd.f32 %v2034_v57, %v13111_v4  ;;  %v10334_v12 = vpop.f32.mrb[211].mxu1 }
 0x296   : > { %v2250_v48 = vmax.f32 %v2197_v47, 0.0  ;;  %v2198_v10 = vadd.f32 %v13060_v38, %v2138_v7 }
 0x298   : > { %2303 = vst [vmem:[#allocation2 + $0x120] sm:$0xff] %v2250_v48  ;;  %v2251_v63 = vmax.f32 %v2198_v10, 0.0 }
 0x299   : > { %v2039_v18 = vpop.f32.mrb[212].mxu1  ;;  %v2428_v59 = vld [vmem:[#allocation2 + $0x111] ss:$2 sm:$0xff] }
 0x29a   : > { %2304 = vst [vmem:[#allocation2 + $0x128] sm:$0xff] %v2251_v63  ;;  %v2139_v39 = vadd.f32 %v2039_v18, %v13116_v9  ;;  %v10337_v44 = vpop.f32.mrb[213].mxu1  ;;  %v2447_v16 = vpack.c.bf16 %v2428_v59, %v2426_v45 }
 0x29b   : > { %v2042_v32 = vpop.f32.mrb[214].mxu1 }
 0x29c   : > { %v2199_v61 = vadd.f32 %v13060_v38, %v2139_v39  ;;  %v2140_v6 = vadd.f32 %v2042_v32, %v13124_v29  ;;  %v10338_v4 = vpop.f32.mrb[215].mxu1  ;;  %10399 = vmatprep.mubr.bf16.mxu0 %v2447_v16  ;;  %v2322_v39 = vld [vmem:[#allocation2 + $0x10] ss:$2 sm:$0xff] }
 0x29e   : > { %v2252_v5 = vmax.f32 %v2199_v61, 0.0  ;;  %v2200_v13 = vadd.f32 %v13060_v38, %v2140_v6  ;;  %v2320_v61 = vld [vmem:[#allocation2] ss:$2 sm:$0xff] }
 0x2a0   : > { %2305 = vst [vmem:[#allocation2 + $0x130] sm:$0xff] %v2252_v5  ;;  %v2253_v60 = vmax.f32 %v2200_v13, 0.0 }
 0x2a1   : > { %v2047_v8 = vpop.f32.mrb[216].mxu1  ;;  %v2430_v21 = vld [vmem:[#allocation2 + $0x121] ss:$2 sm:$0xff] }
 0x2a2   : > { %2306 = vst [vmem:[#allocation2 + $0x138] sm:$0xff] %v2253_v60  ;;  %v2141_v41 = vadd.f32 %v2047_v8, %v13132_v25  ;;  %v10341_v34 = vpop.f32.mrb[217].mxu1 }
 0x2a3   : > { %v2050_v9 = vpop.f32.mrb[218].mxu1 }
 0x2a4   : > { %v2201_v19 = vadd.f32 %v13060_v38, %v2141_v41  ;;  %v2142_v56 = vadd.f32 %v2050_v9, %v13140_v46  ;;  %v10342_v0 = vpop.f32.mrb[219].mxu1  ;;  %v2326_v41 = vld [vmem:[#allocation2 + $0x30] ss:$2 sm:$0xff] }
 0x2a6   : > { %v2254_v1 = vmax.f32 %v2201_v19, 0.0  ;;  %v2202_v29 = vadd.f32 %v13060_v38, %v2142_v56  ;;  %v2330_v19 = vld [vmem:[#allocation2 + $0x50] ss:$2 sm:$0xff]  ;;  %v2324_v56 = vld [vmem:[#allocation2 + $0x20] ss:$2 sm:$0xff] }
 0x2a8   : > { %2307 = vst [vmem:[#allocation2 + $0x140] sm:$0xff] %v2254_v1  ;;  %v2255_v35 = vmax.f32 %v2202_v29, 0.0  ;;  %v2366_v1 = vpack.c.bf16 %v2326_v41, %v2324_v56  ;;  %v2328_v29 = vld [vmem:[#allocation2 + $0x40] ss:$2 sm:$0xff]  ;;  %v2831_v41 = vld [vmem:[#allocation2 + $0x65] ss:$2 sm:$0xff] }
 0x2a9   : > { %v2055_v58 = vpop.f32.mrb[220].mxu1  ;;  %v2432_v28 = vld [vmem:[#allocation2 + $0x131] ss:$2 sm:$0xff]  ;;  %v11836_v56 = vld [vmem:[%s14539_s3 + $0xc8] sm:$0xff]  }
 0x2aa   : > { %2308 = vst [vmem:[#allocation2 + $0x148] sm:$0xff] %v2255_v35  ;;  %v2143_v52 = vadd.f32 %v2055_v58, %v13148_v31  ;;  %v10345_v14 = vpop.f32.mrb[221].mxu1  ;;  %v2448_v25 = vpack.c.bf16 %v2432_v28, %v2430_v21  ;;  %v2367_v58 = vpack.c.bf16 %v2330_v19, %v2328_v29  ;;  %v2829_v19 = vld [vmem:[#allocation2 + $0x55] ss:$2 sm:$0xff]  ;;  %v2835_v29 = vld [vmem:[#allocation2 + $0x85] ss:$2 sm:$0xff] }
 0x2ab   : > { %v2058_v24 = vpop.f32.mrb[222].mxu1 }
 0x2ac   : > { %v2203_v36 = vadd.f32 %v13060_v38, %v2143_v52  ;;  %v2144_v15 = vadd.f32 %v2058_v24, %v13156_v30  ;;  %v10346_v46 = vpop.f32.mrb[223].mxu1  ;;  %10400 = vmatmul.mubr.bf16.gmra.mrb[204].mxu0 %v2448_v25  ;;  %v11829_v24 = vld [vmem:[%s14539_s3 + $0x90] sm:$0xff]  }
 0x2ad   : > { %v2338_v46 = vld [vmem:[#allocation2 + $0x90] ss:$2 sm:$0xff] }
 0x2ae   : > { %v2256_v40 = vmax.f32 %v2203_v36, 0.0  ;;  %v2204_v33 = vadd.f32 %v13060_v38, %v2144_v15  ;;  %v2334_v36 = vld [vmem:[#allocation2 + $0x70] ss:$2 sm:$0xff] }
 0x2b0   : > { %2309 = vst [vmem:[#allocation2 + $0x150] sm:$0xff] %v2256_v40  ;;  %v2257_v2 = vmax.f32 %v2204_v33, 0.0  ;;  %v2332_v40 = vld [vmem:[#allocation2 + $0x60] ss:$2 sm:$0xff] }
 0x2b1   : > { %v2063_v62 = vpop.f32.mrb[224].mxu1  ;;  %v2434_v47 = vld [vmem:[#allocation2 + $0x141] ss:$2 sm:$0xff] }
 0x2b2   : > { %2310 = vst [vmem:[#allocation2 + $0x158] sm:$0xff] %v2257_v2  ;;  %v2145_v51 = vadd.f32 %v2063_v62, %v13164_v3  ;;  %v10349_v17 = vpop.f32.mrb[225].mxu1  ;;  %v2336_v2 = vld [vmem:[#allocation2 + $0x80] ss:$2 sm:$0xff] }
 0x2b3   : > { %v2066_v31 = vpop.f32.mrb[226].mxu1 }
 0x2b4   : > { %v2205_v53 = vadd.f32 %v13060_v38, %v2145_v51  ;;  %v2146_v23 = vadd.f32 %v2066_v31, %v13169_v22  ;;  %v10350_v49 = vpop.f32.mrb[227].mxu1  ;;  %v2369_v51 = vpack.c.bf16 %v2338_v46, %v2336_v2  ;;  %v2849_v2 = vld [vmem:[#allocation2 + $0xf5] ss:$2 sm:$0xff] }
 0x2b5   : > { %v11831_v49 = vld [vmem:[%s14539_s3 + $0xa0] sm:$0xff]  }
 0x2b6   : > { %v2258_v42 = vmax.f32 %v2205_v53, 0.0  ;;  %v2206_v30 = vadd.f32 %v13060_v38, %v2146_v23 }
 0x2b8   : > { %2311 = vst [vmem:[#allocation2 + $0x160] sm:$0xff] %v2258_v42  ;;  %v2259_v27 = vmax.f32 %v2206_v30, 0.0  ;;  %v2342_v30 = vld [vmem:[#allocation2 + $0xb0] ss:$2 sm:$0xff] }
 0x2b9   : > { %v2071_v57 = vpop.f32.mrb[228].mxu1  ;;  %v2436_v7 = vld [vmem:[#allocation2 + $0x151] ss:$2 sm:$0xff] }
 0x2ba   : > { %2312 = vst [vmem:[#allocation2 + $0x168] sm:$0xff] %v2259_v27  ;;  %v2147_v12 = vadd.f32 %v2071_v57, %v13177_v37  ;;  %v10353_v48 = vpop.f32.mrb[229].mxu1  ;;  %v2449_v3 = vpack.c.bf16 %v2436_v7, %v2434_v47  ;;  %v2365_v37 = vpack.c.bf16 %v2322_v39, %v2320_v61  ;;  %v2346_v57 = vld [vmem:[#allocation2 + $0xd0] ss:$2 sm:$0xff]  ;;  %v2340_v47 = vld [vmem:[#allocation2 + $0xa0] ss:$2 sm:$0xff] }
 0x2bb   : > { %v2074_v10 = vpop.f32.mrb[230].mxu1  ;;  %v2344_v7 = vld [vmem:[#allocation2 + $0xc0] ss:$2 sm:$0xff]  ;;  %v11833_v48 = vld [vmem:[%s14539_s3 + $0xb0] sm:$0xff]  }
 0x2bc   : > { %v2207_v63 = vadd.f32 %v13060_v38, %v2147_v12  ;;  %v2148_v18 = vadd.f32 %v2074_v10, %v13182_v11  ;;  %10403 = vmatprep.mubr.bf16.mxu0 %v2449_v3  ;;  %v10354_v22 = vpop.f32.mrb[231].mxu1  ;;  %v11832_v12 = vld [vmem:[%s14539_s3 + $0xa8] sm:$0xff]   ;;  %v2350_v3 = vld [vmem:[#allocation2 + $0xf0] ss:$2 sm:$0xff]  ;;  %v11835_v39 = vld [vmem:[%s14539_s3 + $0xc0] sm:$0xff]  }
 0x2bd   : > { %v2354_v10 = vld [vmem:[#allocation2 + $0x110] ss:$2 sm:$0xff]  ;;  %v2352_v22 = vld [vmem:[#allocation2 + $0x100] ss:$2 sm:$0xff] }
 0x2be   : > { %v2260_v45 = vmax.f32 %v2207_v63, 0.0  ;;  %v2208_v59 = vadd.f32 %v13060_v38, %v2148_v18  ;;  %v2348_v63 = vld [vmem:[#allocation2 + $0xe0] ss:$2 sm:$0xff] }
 0x2bf   : > { %v2438_v44 = vld [vmem:[#allocation2 + $0x161] ss:$2 sm:$0x1]  ;;  %v2372_v18 = vpack.c.bf16 %v2350_v3, %v2348_v63  ;;  %v3099_v3 = vld [vmem:[#allocation2 + $0x36] ss:$2 sm:$0xff] }
 0x2c0   : > { %2313 = vst [vmem:[#allocation2 + $0x170] sm:$0xff] %v2260_v45  ;;  %v2261_v16 = vmax.f32 %v2208_v59, 0.0  ;;  %v2450_v32 = vpack.c.bf16 %v2438_v44, %v2438_v44  ;;  %v11834_v45 = vld [vmem:[%s14539_s3 + $0xb8] sm:$0xff]   ;;  %v2373_v59 = vpack.c.bf16 %v2354_v10, %v2352_v22 }
 0x2c1   : > { %v2079_v6 = vpop.f32.mrb[232].mxu1  ;;  %v2358_v44 = vld [vmem:[#allocation2 + $0x130] ss:$2 sm:$0xff] }
 0x2c2   : > { %2314 = vst [vmem:[#allocation2 + $0x178] sm:$0xff] %v2261_v16  ;;  %v2149_v4 = vadd.f32 %v2079_v6, %v13192_v54  ;;  %v10357_v5 = vpop.f32.mrb[233].mxu1  ;;  %10404 = vmatmul.mubr.bf16.gmra.mrb[208].mxu0 %v2450_v32  ;;  %v11828_v54 = vld [vmem:[%s14539_s3 + $0x88] sm:$0xff]   ;;  %v2362_v16 = vld [vmem:[#allocation2 + $0x150] ss:$2 sm:$0xff] }
 0x2c3   : > { %v2082_v13 = vpop.f32.mrb[234].mxu1  ;;  %10423 = vmatprep.mubr.bf16.mxu0 %v2365_v37  ;;  %v2356_v32 = vld [vmem:[#allocation2 + $0x120] ss:$2 sm:$0xff]  ;;  %v2823_v5 = vld [vmem:[#allocation2 + $0x25] ss:$2 sm:$0xff] }
 0x2c4   : > { %v2209_v11 = vadd.f32 %v13060_v38, %v2149_v4  ;;  %v2150_v60 = vadd.f32 %v2082_v13, %v13198_v50  ;;  %v10358_v8 = vpop.f32.mrb[235].mxu1  ;;  %v2374_v61 = vpack.c.bf16 %v2358_v44, %v2356_v32  ;;  %v2360_v6 = vld [vmem:[#allocation2 + $0x140] ss:$2 sm:$0xff] }
 0x2c5   : > { %v2375_v37 = vpack.c.bf16 %v2362_v16, %v2360_v6  ;;  %v2364_v4 = vld [vmem:[#allocation2 + $0x160] ss:$2 sm:$0x1]  ;;  %v2827_v8 = vld [vmem:[#allocation2 + $0x45] ss:$2 sm:$0xff] }
 0x2c6   : > { %v2262_v34 = vmax.f32 %v2209_v11, 0.0  ;;  %v2210_v9 = vadd.f32 %v13060_v38, %v2150_v60  ;;  %v2376_v13 = vpack.c.bf16 %v2364_v4, %v2364_v4  ;;  %v2821_v11 = vld [vmem:[#allocation2 + $0x15] ss:$2 sm:$0xff]  ;;  %v3103_v63 = vld [vmem:[#allocation2 + $0x56] ss:$2 sm:$0xff] }
 0x2c7   : > { %v2866_v60 = vpack.c.bf16 %v2823_v5, %v2821_v11  ;;  %v3107_v44 = vld [vmem:[#allocation2 + $0x76] ss:$2 sm:$0xff]  ;;  %v3117_v4 = vld [vmem:[#allocation2 + $0xc6] ss:$2 sm:$0xff] }
 0x2c8   : > { %2315 = vst [vmem:[#allocation2 + $0x180] sm:$0xff] %v2262_v34  ;;  %v2263_v0 = vmax.f32 %v2210_v9, 0.0  ;;  %v2825_v34 = vld [vmem:[#allocation2 + $0x35] ss:$2 sm:$0xff]  ;;  %v3111_v32 = vld [vmem:[#allocation2 + $0x96] ss:$2 sm:$0xff] }
 0x2c9   : > { %v2087_v35 = vpop.f32.mrb[236].mxu1  ;;  %v2867_v9 = vpack.c.bf16 %v2827_v8, %v2825_v34  ;;  %v3121_v5 = vld [vmem:[#allocation2 + $0xe6] ss:$2 sm:$0xff] }
 0x2ca   : > { %2316 = vst [vmem:[#allocation2 + $0x188] sm:$0xff] %v2263_v0  ;;  %v2151_v50 = vadd.f32 %v2087_v35, %v13203_v20  ;;  %v10361_v21 = vpop.f32.mrb[237].mxu1  ;;  %10424 = vmatmul.mubr.bf16.vlgmr.msra.gmra.mrb[188].mxu0 %v2366_v1  ;;  %v2868_v0 = vpack.c.bf16 %v2831_v41, %v2829_v19  ;;  %v11837_v1 = vld [vmem:[%s14539_s3 + $0xd0] sm:$0xff]   ;;  %v11848_v8 = vld [vmem:[%s14539_s3 + $0x128] sm:$0xff]  }
 0x2cb   : > { %v2090_v28 = vpop.f32.mrb[238].mxu1  ;;  %10427 = vmatprep.mubr.bf16.mxu0 %v2367_v58  ;;  %10448 = vmatpush3.bf16.msra.mxu0 %v13189_v43  ;;  %v2368_v43 = vpack.c.bf16 %v2334_v36, %v2332_v40  ;;  %v2833_v35 = vld [vmem:[#allocation2 + $0x75] ss:$2 sm:$0xff]  ;;  %v3129_v19 = vld [vmem:[#allocation2 + $0x126] ss:$2 sm:$0xff] }
 0x2cc   : > { %v2211_v52 = vadd.f32 %v13060_v38, %v2151_v50  ;;  %v2152_v14 = vadd.f32 %v2090_v28, %v13208_v55  ;;  %v10362_v25 = vpop.f32.mrb[239].mxu1  ;;  %10449 = vmatprep.subr.bf16.mxu0 %v11828_v54  ;;  %v11830_v55 = vld [vmem:[%s14539_s3 + $0x98] sm:$0xff]   ;;  %v2869_v58 = vpack.c.bf16 %v2835_v29, %v2833_v35  ;;  %v11841_v40 = vld [vmem:[%s14539_s3 + $0xf0] sm:$0xff]   ;;  %v11851_v35 = vld [vmem:[%s14539_s3 + $0x140] sm:$0xff]  }
 0x2cd   : > { %v2837_v50 = vld [vmem:[#allocation2 + $0x95] ss:$2 sm:$0xff]  ;;  %v2847_v25 = vld [vmem:[#allocation2 + $0xe5] ss:$2 sm:$0xff] }
 0x2ce   : > { %v2264_v15 = vmax.f32 %v2211_v52, 0.0  ;;  %v2212_v20 = vadd.f32 %v13060_v38, %v2152_v14  ;;  %v11838_v21 = vld [vmem:[%s14539_s3 + $0xd8] sm:$0xff]   ;;  %v11839_v52 = vld [vmem:[%s14539_s3 + $0xe0] sm:$0xff]   ;;  %v11849_v34 = vld [vmem:[%s14539_s3 + $0x130] sm:$0xff]  }
 0x2cf   : > { %10450 = vmatpush3.bf16.msra.mxu0 %v11828_v54  ;;  %v2839_v54 = vld [vmem:[#allocation2 + $0xa5] ss:$2 sm:$0xff]  ;;  %v11850_v29 = vld [vmem:[%s14539_s3 + $0x138] sm:$0xff]  }
 0x2d0   : > { %2317 = vst [vmem:[#allocation2 + $0x190] sm:$0xff] %v2264_v15  ;;  %v2265_v33 = vmax.f32 %v2212_v20, 0.0  ;;  %10451 = vmatprep.subr.bf16.mxu0 %v11829_v24  ;;  %v2870_v28 = vpack.c.bf16 %v2839_v54, %v2837_v50  ;;  %v2843_v14 = vld [vmem:[#allocation2 + $0xc5] ss:$2 sm:$0xff]  ;;  %v2845_v15 = vld [vmem:[#allocation2 + $0xd5] ss:$2 sm:$0xff] }
 0x2d1   : > { %v2095_v62 = vpop.f32.mrb[240].mxu1  ;;  %v11840_v20 = vld [vmem:[%s14539_s3 + $0xe8] sm:$0xff]   ;;  %v2872_v46 = vpack.c.bf16 %v2847_v25, %v2845_v15  ;;  %v3139_v25 = vld [vmem:[#allocation2 + $0x176] ss:$2 sm:$0x1] }
 0x2d2   : > { %2318 = vst [vmem:[#allocation2 + $0x198] sm:$0xff] %v2265_v33  ;;  %v2153_v17 = vadd.f32 %v2095_v62, %v13213_v26  ;;  %10428 = vmatmul.mubr.bf16.gmra.mrb[192].mxu0 %v2368_v43  ;;  %v10365_v31 = vpop.f32.mrb[241].mxu1  ;;  %v2370_v26 = vpack.c.bf16 %v2342_v30, %v2340_v47  ;;  %v2851_v33 = vld [vmem:[#allocation2 + $0x105] ss:$2 sm:$0xff]  ;;  %v2853_v62 = vld [vmem:[#allocation2 + $0x115] ss:$2 sm:$0xff] }
 0x2d3   : > { %10431 = vmatprep.mubr.bf16.mxu0 %v2369_v51  ;;  %10452 = vmatpush3.bf16.msra.mxu0 %v11829_v24  ;;  %v2098_v53 = vpop.f32.mrb[242].mxu1  ;;  %v2841_v24 = vld [vmem:[#allocation2 + $0xb5] ss:$2 sm:$0xff]  ;;  %v2855_v43 = vld [vmem:[#allocation2 + $0x125] ss:$2 sm:$0xff] }
 0x2d4   : > { %v2213_v23 = vadd.f32 %v13060_v38, %v2153_v17  ;;  %10453 = vmatprep.subr.bf16.mxu0 %v11830_v55  ;;  %v10366_v42 = vpop.f32.mrb[243].mxu1  ;;  %v2371_v38 = vpack.c.bf16 %v2346_v57, %v2344_v7  ;;  %v2871_v36 = vpack.c.bf16 %v2843_v14, %v2841_v24  ;;  %v11842_v51 = vld [vmem:[%s14539_s3 + $0xf8] sm:$0xff]   ;;  %v2874_v17 = vpack.c.bf16 %v2855_v43, %v2853_v62  ;;  %v11843_v31 = vld [vmem:[%s14539_s3 + $0x100] sm:$0xff]   ;;  %v2865_v57 = vld [vmem:[#allocation2 + $0x175] ss:$2 sm:$0x1] }
 0x2d5   : > { %v2859_v53 = vld [vmem:[#allocation2 + $0x145] ss:$2 sm:$0xff]  ;;  %v2861_v30 = vld [vmem:[#allocation2 + $0x155] ss:$2 sm:$0xff]  ;;  %v3097_v47 = vld [vmem:[#allocation2 + $0x26] ss:$2 sm:$0xff] }
 0x2d6   : > { %v2266_v27 = vmax.f32 %v2213_v23, 0.0  ;;  %v2863_v23 = vld [vmem:[#allocation2 + $0x165] ss:$2 sm:$0xff]  ;;  %v3095_v7 = vld [vmem:[#allocation2 + $0x16] ss:$2 sm:$0xff] }
 0x2d7   : > { %10454 = vmatpush3.bf16.msra.mxu0 %v11830_v55  ;;  %v2873_v55 = vpack.c.bf16 %v2851_v33, %v2849_v2  ;;  %v3137_v50 = vld [vmem:[#allocation2 + $0x166] ss:$2 sm:$0xff] }
 0x2d8   : > { %2319 = vst [vmem:[#allocation2 + $0x1a0] sm:$0x7] %v2266_v27  ;;  %10455 = vmatprep.subr.bf16.mxu0 %v11831_v49  ;;  %v2876_v27 = vpack.c.bf16 %v2863_v23, %v2861_v30  ;;  %v3371_v24 = vld [vmem:[#allocation2 + $0x12] ss:$2 sm:$0xff]  ;;  %v3369_v15 = vld [vmem:[#allocation2 + $0x2] ss:$2 sm:$0xff] }
 0x2d9   : > { %v3373_v33 = vld [vmem:[#allocation2 + $0x22] ss:$2 sm:$0xff] }
 0x2da   : > { %10432 = vmatmul.mubr.bf16.gmra.mrb[196].mxu0 %v2370_v26  ;;  %v2877_v26 = vpack.c.bf16 %v2865_v57, %v2865_v57  ;;  %v3377_v2 = vld [vmem:[#allocation2 + $0x42] ss:$2 sm:$0xff]  ;;  %v3391_v57 = vld [vmem:[#allocation2 + $0xb2] ss:$2 sm:$0xff] }
 0x2db   : > { %10435 = vmatprep.mubr.bf16.mxu0 %v2371_v38  ;;  %10456 = vmatpush3.bf16.msra.mxu0 %v11831_v49  ;;  %v2857_v49 = vld [vmem:[#allocation2 + $0x135] ss:$2 sm:$0xff]  ;;  %v3101_v38 = vld [vmem:[#allocation2 + $0x46] ss:$2 sm:$0xff] }
 0x2dc   : > { %10457 = vmatprep.subr.bf16.mxu0 %v11832_v12  ;;  %v2875_v42 = vpack.c.bf16 %v2859_v53, %v2857_v49  ;;  %v3141_v10 = vpack.c.bf16 %v3101_v38, %v3099_v3  ;;  %v3381_v53 = vld [vmem:[#allocation2 + $0x62] ss:$2 sm:$0xff] }
 0x2dd   : > { %v3385_v49 = vld [vmem:[#allocation2 + $0x82] ss:$2 sm:$0xff] }
 0x2de   : > { %v11856_v38 = vld [vmem:[%s14539_s3 + $0x168] sm:$0xff]   ;;  %v11857_v3 = vld [vmem:[%s14539_s3 + $0x170] sm:$0xff]  }
 0x2df   : > { %10458 = vmatpush3.bf16.msra.mxu0 %v11832_v12  ;;  %v3140_v12 = vpack.c.bf16 %v3097_v47, %v3095_v7  ;;  %v3395_v47 = vld [vmem:[#allocation2 + $0xd2] ss:$2 sm:$0xff] }
 0x2e0   : > { %10459 = vmatprep.subr.bf16.mxu0 %v11833_v48 }
 0x2e2   : > { %10436 = vmatmul.mubr.bf16.gmra.mrb[200].mxu0 %v2372_v18  ;;  %v11844_v18 = vld [vmem:[%s14539_s3 + $0x108] sm:$0xff]  }
 0x2e3   : > { %10439 = vmatprep.mubr.bf16.mxu0 %v2373_v59  ;;  %10460 = vmatpush3.bf16.msra.mxu0 %v11833_v48  ;;  %v3105_v48 = vld [vmem:[#allocation2 + $0x66] ss:$2 sm:$0xff] }
 0x2e4   : > { %10461 = vmatprep.subr.bf16.mxu0 %v11834_v45  ;;  %v3142_v22 = vpack.c.bf16 %v3105_v48, %v3103_v63  ;;  %v3109_v59 = vld [vmem:[#allocation2 + $0x86] ss:$2 sm:$0xff] }
 0x2e5   : > { %v3143_v16 = vpack.c.bf16 %v3109_v59, %v3107_v44  ;;  %v3403_v63 = vld [vmem:[#allocation2 + $0x112] ss:$2 sm:$0xff] }
 0x2e6   : > { %v11858_v59 = vld [vmem:[%s14539_s3 + $0x178] sm:$0xff]   ;;  %v11859_v44 = vld [vmem:[%s14539_s3 + $0x180] sm:$0xff]  }
 0x2e7   : > { %10462 = vmatpush3.bf16.msra.mxu0 %v11834_v45  ;;  %v11845_v45 = vld [vmem:[%s14539_s3 + $0x110] sm:$0xff]  }
 0x2e8   : > { %10487 = vmatprep.subr.bf16.mxu0 %v11835_v39 }
 0x2ea   : > { %10440 = vmatmul.mubr.bf16.gmra.mrb[204].mxu0 %v2374_v61  ;;  %v11846_v61 = vld [vmem:[%s14539_s3 + $0x118] sm:$0xff]  }
 0x2eb   : > { %10443 = vmatprep.mubr.bf16.mxu0 %v2375_v37  ;;  %v11847_v37 = vld [vmem:[%s14539_s3 + $0x120] sm:$0xff]  }
 0x2f2   : > { %10444 = vmatmul.mubr.bf16.gmra.mrb[212].mxu0 %v2376_v13  ;;  %v3115_v13 = vld [vmem:[#allocation2 + $0xb6] ss:$2 sm:$0xff] }
 0x2f3   : > { %10463 = vmatprep.mubr.bf16.mxu0 %v2866_v60  ;;  %v3145_v11 = vpack.c.bf16 %v3117_v4, %v3115_v13  ;;  %v3119_v60 = vld [vmem:[#allocation2 + $0xd6] ss:$2 sm:$0xff]  ;;  %v3645_v13 = vld [vmem:[#allocation2 + $0x13] ss:$2 sm:$0xff] }
 0x2f4   : > { %v3146_v41 = vpack.c.bf16 %v3121_v5, %v3119_v60  ;;  %v3413_v5 = vld [vmem:[#allocation2 + $0x162] ss:$2 sm:$0x1]  ;;  %v3643_v60 = vld [vmem:[#allocation2 + $0x3] ss:$2 sm:$0xff] }
 0x2fa   : > { %10464 = vmatmul.mubr.bf16.vlgmr.msra.gmra.mrb[188].mxu0 %v2867_v9  ;;  %v3125_v9 = vld [vmem:[#allocation2 + $0x106] ss:$2 sm:$0xff] }
 0x2fb   : > { %10467 = vmatprep.mubr.bf16.mxu0 %v2868_v0  ;;  %10488 = vmatpush3.bf16.msra.mxu0 %v11835_v39  ;;  %v3113_v39 = vld [vmem:[#allocation2 + $0xa6] ss:$2 sm:$0xff] }
 0x2fc   : > { %10489 = vmatprep.subr.bf16.mxu0 %v11836_v56  ;;  %v3144_v6 = vpack.c.bf16 %v3113_v39, %v3111_v32  ;;  %v3411_v32 = vld [vmem:[#allocation2 + $0x152] ss:$2 sm:$0xff] }
 0x2ff   : > { %10490 = vmatpush3.bf16.msra.mxu0 %v11836_v56  ;;  %v3123_v56 = vld [vmem:[#allocation2 + $0xf6] ss:$2 sm:$0xff] }
 0x300   : > { %10491 = vmatprep.subr.bf16.mxu0 %v11837_v1  ;;  %v3147_v0 = vpack.c.bf16 %v3125_v9, %v3123_v56  ;;  %v3647_v9 = vld [vmem:[#allocation2 + $0x23] ss:$2 sm:$0xff] }
 0x301   : > { %v3651_v56 = vld [vmem:[#allocation2 + $0x43] ss:$2 sm:$0xff] }
 0x302   : > { %10468 = vmatmul.mubr.bf16.gmra.mrb[192].mxu0 %v2869_v58  ;;  %v3133_v58 = vld [vmem:[#allocation2 + $0x146] ss:$2 sm:$0xff] }
 0x303   : > { %10471 = vmatprep.mubr.bf16.mxu0 %v2870_v28  ;;  %10492 = vmatpush3.bf16.msra.mxu0 %v11837_v1  ;;  %v3127_v1 = vld [vmem:[#allocation2 + $0x116] ss:$2 sm:$0xff] }
 0x304   : > { %10493 = vmatprep.subr.bf16.mxu0 %v11838_v21  ;;  %v3148_v54 = vpack.c.bf16 %v3129_v19, %v3127_v1 }
 0x307   : > { %10494 = vmatpush3.bf16.msra.mxu0 %v11838_v21  ;;  %v3131_v21 = vld [vmem:[#allocation2 + $0x136] ss:$2 sm:$0xff] }
 0x308   : > { %10495 = vmatprep.subr.bf16.mxu0 %v11839_v52  ;;  %v3149_v28 = vpack.c.bf16 %v3133_v58, %v3131_v21  ;;  %v3655_v58 = vld [vmem:[#allocation2 + $0x63] ss:$2 sm:$0xff] }
 0x309   : > { %v3659_v21 = vld [vmem:[#allocation2 + $0x83] ss:$2 sm:$0xff] }
 0x30a   : > { %10472 = vmatmul.mubr.bf16.gmra.mrb[196].mxu0 %v2871_v36  ;;  %v3151_v36 = vpack.c.bf16 %v3139_v25, %v3139_v25 }
 0x30b   : > { %10475 = vmatprep.mubr.bf16.mxu0 %v2872_v46  ;;  %10496 = vmatpush3.bf16.msra.mxu0 %v11839_v52  ;;  %v3135_v52 = vld [vmem:[#allocation2 + $0x156] ss:$2 sm:$0xff] }
 0x30c   : > { %10497 = vmatprep.subr.bf16.mxu0 %v11840_v20  ;;  %v3150_v14 = vpack.c.bf16 %v3137_v50, %v3135_v52  ;;  %v3375_v46 = vld [vmem:[#allocation2 + $0x32] ss:$2 sm:$0xff] }
 0x30d   : > { %v3415_v43 = vpack.c.bf16 %v3375_v46, %v3373_v33  ;;  %v3663_v46 = vld [vmem:[#allocation2 + $0xa3] ss:$2 sm:$0xff] }
 0x30f   : > { %10498 = vmatpush3.bf16.msra.mxu0 %v11840_v20  ;;  %v3414_v20 = vpack.c.bf16 %v3371_v24, %v3369_v15  ;;  %v3665_v24 = vld [vmem:[#allocation2 + $0xb3] ss:$2 sm:$0xff] }
 0x310   : > { %10499 = vmatprep.subr.bf16.mxu0 %v11841_v40  ;;  %v3669_v15 = vld [vmem:[#allocation2 + $0xd3] ss:$2 sm:$0xff]  ;;  %v3693_v33 = vpack.c.bf16 %v3665_v24, %v3663_v46 }
 0x311   : > { %v11875_v46 = vld [vmem:[%s14539_s3 + $0x200] sm:$0xff]  }
 0x312   : > { %10476 = vmatmul.mubr.bf16.gmra.mrb[200].mxu0 %v2873_v55  ;;  %v11852_v55 = vld [vmem:[%s14539_s3 + $0x148] sm:$0xff]  }
 0x313   : > { %10479 = vmatprep.mubr.bf16.mxu0 %v2874_v17  ;;  %10500 = vmatpush3.bf16.msra.mxu0 %v11841_v40  ;;  %v3379_v40 = vld [vmem:[#allocation2 + $0x52] ss:$2 sm:$0xff] }
 0x314   : > { %10501 = vmatprep.subr.bf16.mxu0 %v11842_v51  ;;  %v3416_v62 = vpack.c.bf16 %v3379_v40, %v3377_v2  ;;  %v3383_v17 = vld [vmem:[#allocation2 + $0x72] ss:$2 sm:$0xff]  ;;  %v11864_v2 = vld [vmem:[%s14539_s3 + $0x1a8] sm:$0xff]  }
 0x315   : > { %v3417_v23 = vpack.c.bf16 %v3383_v17, %v3381_v53  ;;  %v3677_v17 = vld [vmem:[#allocation2 + $0x113] ss:$2 sm:$0xff] }
 0x317   : > { %10502 = vmatpush3.bf16.msra.mxu0 %v11842_v51  ;;  %v11853_v51 = vld [vmem:[%s14539_s3 + $0x150] sm:$0xff]  }
 0x318   : > { %10527 = vmatprep.subr.bf16.mxu0 %v11843_v31 }
 0x31a   : > { %10480 = vmatmul.mubr.bf16.gmra.mrb[204].mxu0 %v2875_v42  ;;  %v11854_v42 = vld [vmem:[%s14539_s3 + $0x158] sm:$0xff]  }
 0x31b   : > { %10483 = vmatprep.mubr.bf16.mxu0 %v2876_v27  ;;  %v11855_v27 = vld [vmem:[%s14539_s3 + $0x160] sm:$0xff]  }
 0x322   : > { %10484 = vmatmul.mubr.bf16.gmra.mrb[216].mxu0 %v2877_v26  ;;  %v3389_v26 = vld [vmem:[#allocation2 + $0xa2] ss:$2 sm:$0xff] }
 0x323   : > { %10503 = vmatprep.mubr.bf16.mxu0 %v3140_v12  ;;  %v3419_v7 = vpack.c.bf16 %v3391_v57, %v3389_v26  ;;  %v3393_v12 = vld [vmem:[#allocation2 + $0xc2] ss:$2 sm:$0xff]  ;;  %v3685_v57 = vld [vmem:[#allocation2 + $0x153] ss:$2 sm:$0xff] }
 0x324   : > { %v3420_v48 = vpack.c.bf16 %v3395_v47, %v3393_v12  ;;  %v3679_v47 = vld [vmem:[#allocation2 + $0x123] ss:$2 sm:$0xff] }
 0x32a   : > { %10504 = vmatmul.mubr.bf16.vlgmr.msra.gmra.mrb[188].mxu0 %v3141_v10  ;;  %v3399_v10 = vld [vmem:[#allocation2 + $0xf2] ss:$2 sm:$0xff] }
 0x32b   : > { %10507 = vmatprep.mubr.bf16.mxu0 %v3142_v22  ;;  %10528 = vmatpush3.bf16.msra.mxu0 %v11843_v31  ;;  %v3387_v31 = vld [vmem:[#allocation2 + $0x92] ss:$2 sm:$0xff] }
 0x32c   : > { %10529 = vmatprep.subr.bf16.mxu0 %v11844_v18  ;;  %v3418_v30 = vpack.c.bf16 %v3387_v31, %v3385_v49  ;;  %v3671_v31 = vld [vmem:[#allocation2 + $0xe3] ss:$2 sm:$0xff]  ;;  %v11866_v49 = vld [vmem:[%s14539_s3 + $0x1b8] sm:$0xff]  }
 0x32f   : > { %10530 = vmatpush3.bf16.msra.mxu0 %v11844_v18  ;;  %v3397_v18 = vld [vmem:[#allocation2 + $0xe2] ss:$2 sm:$0xff] }
 0x330   : > { %10531 = vmatprep.subr.bf16.mxu0 %v11845_v45  ;;  %v3421_v22 = vpack.c.bf16 %v3399_v10, %v3397_v18  ;;  %v3917_v10 = vld [vmem:[#allocation2 + $0x17] ss:$2 sm:$0xff]  ;;  %v3923_v18 = vld [vmem:[#allocation2 + $0x47] ss:$2 sm:$0xff] }
 0x332   : > { %10508 = vmatmul.mubr.bf16.gmra.mrb[192].mxu0 %v3143_v16  ;;  %v3407_v16 = vld [vmem:[#allocation2 + $0x132] ss:$2 sm:$0xff] }
 0x333   : > { %10511 = vmatprep.mubr.bf16.mxu0 %v3144_v6  ;;  %10532 = vmatpush3.bf16.msra.mxu0 %v11845_v45  ;;  %v3401_v45 = vld [vmem:[#allocation2 + $0x102] ss:$2 sm:$0xff] }
 0x334   : > { %10533 = vmatprep.subr.bf16.mxu0 %v11846_v61  ;;  %v3422_v39 = vpack.c.bf16 %v3403_v63, %v3401_v45  ;;  %v3921_v45 = vld [vmem:[#allocation2 + $0x37] ss:$2 sm:$0xff] }
 0x337   : > { %10534 = vmatpush3.bf16.msra.mxu0 %v11846_v61  ;;  %v3405_v61 = vld [vmem:[#allocation2 + $0x122] ss:$2 sm:$0xff] }
 0x338   : > { %10535 = vmatprep.subr.bf16.mxu0 %v11847_v37  ;;  %v3423_v6 = vpack.c.bf16 %v3407_v16, %v3405_v61  ;;  %v3931_v61 = vld [vmem:[#allocation2 + $0x87] ss:$2 sm:$0xff] }
 0x33a   : > { %10512 = vmatmul.mubr.bf16.gmra.mrb[196].mxu0 %v3145_v11  ;;  %v3425_v11 = vpack.c.bf16 %v3413_v5, %v3413_v5  ;;  %v3933_v5 = vld [vmem:[#allocation2 + $0x97] ss:$2 sm:$0xff] }
 0x33b   : > { %10515 = vmatprep.mubr.bf16.mxu0 %v3146_v41  ;;  %10536 = vmatpush3.bf16.msra.mxu0 %v11847_v37  ;;  %v3409_v37 = vld [vmem:[#allocation2 + $0x142] ss:$2 sm:$0xff]  ;;  %v3649_v41 = vld [vmem:[#allocation2 + $0x33] ss:$2 sm:$0xff] }
 0x33c   : > { %10537 = vmatprep.subr.bf16.mxu0 %v11848_v8  ;;  %v3424_v4 = vpack.c.bf16 %v3411_v32, %v3409_v37  ;;  %v3689_v19 = vpack.c.bf16 %v3649_v41, %v3647_v9  ;;  %v11869_v32 = vld [vmem:[%s14539_s3 + $0x1d0] sm:$0xff]  }
 0x33d   : > { %v3929_v37 = vld [vmem:[#allocation2 + $0x77] ss:$2 sm:$0xff]  ;;  %v3939_v41 = vld [vmem:[#allocation2 + $0xc7] ss:$2 sm:$0xff] }
 0x33f   : > { %10538 = vmatpush3.bf16.msra.mxu0 %v11848_v8  ;;  %v3688_v8 = vpack.c.bf16 %v3645_v13, %v3643_v60  ;;  %v11870_v13 = vld [vmem:[%s14539_s3 + $0x1d8] sm:$0xff]   ;;  %v11871_v60 = vld [vmem:[%s14539_s3 + $0x1e0] sm:$0xff]  }
 0x340   : > { %10539 = vmatprep.subr.bf16.mxu0 %v11849_v34 }
 0x342   : > { %10516 = vmatmul.mubr.bf16.gmra.mrb[200].mxu0 %v3147_v0  ;;  %v11860_v0 = vld [vmem:[%s14539_s3 + $0x188] sm:$0xff]  }
 0x343   : > { %10519 = vmatprep.mubr.bf16.mxu0 %v3148_v54  ;;  %10540 = vmatpush3.bf16.msra.mxu0 %v11849_v34  ;;  %v3653_v34 = vld [vmem:[#allocation2 + $0x53] ss:$2 sm:$0xff] }
 0x344   : > { %10541 = vmatprep.subr.bf16.mxu0 %v11850_v29  ;;  %v3690_v1 = vpack.c.bf16 %v3653_v34, %v3651_v56  ;;  %v3657_v54 = vld [vmem:[#allocation2 + $0x73] ss:$2 sm:$0xff] }
 0x345   : > { %v3691_v50 = vpack.c.bf16 %v3657_v54, %v3655_v58  ;;  %v11872_v58 = vld [vmem:[%s14539_s3 + $0x1e8] sm:$0xff]  }
 0x347   : > { %10542 = vmatpush3.bf16.msra.mxu0 %v11850_v29  ;;  %v11861_v29 = vld [vmem:[%s14539_s3 + $0x190] sm:$0xff]  }
 0x348   : > { %10567 = vmatprep.subr.bf16.mxu0 %v11851_v35 }
 0x34a   : > { %10520 = vmatmul.mubr.bf16.gmra.mrb[204].mxu0 %v3149_v28  ;;  %v11862_v28 = vld [vmem:[%s14539_s3 + $0x198] sm:$0xff]  }
 0x34b   : > { %10523 = vmatprep.mubr.bf16.mxu0 %v3150_v14  ;;  %v11863_v14 = vld [vmem:[%s14539_s3 + $0x1a0] sm:$0xff]  }
 0x352   : > { %10524 = vmatmul.mubr.bf16.gmra.mrb[220].mxu0 %v3151_v36 }
 0x353   : > { %10543 = vmatprep.mubr.bf16.mxu0 %v3414_v20 }
 0x35a   : > { %10544 = vmatmul.mubr.bf16.vlgmr.msra.gmra.mrb[188].mxu0 %v3415_v43  ;;  %v3667_v43 = vld [vmem:[#allocation2 + $0xc3] ss:$2 sm:$0xff] }
 0x35b   : > { %10547 = vmatprep.mubr.bf16.mxu0 %v3416_v62  ;;  %10568 = vmatpush3.bf16.msra.mxu0 %v11851_v35  ;;  %v3661_v35 = vld [vmem:[#allocation2 + $0x93] ss:$2 sm:$0xff] }
 0x35c   : > { %10569 = vmatprep.subr.bf16.mxu0 %v11852_v55  ;;  %v3692_v52 = vpack.c.bf16 %v3661_v35, %v3659_v21  ;;  %v11865_v62 = vld [vmem:[%s14539_s3 + $0x1b0] sm:$0xff]  }
 0x35d   : > { %v3941_v35 = vld [vmem:[#allocation2 + $0xd7] ss:$2 sm:$0xff] }
 0x35f   : > { %10570 = vmatpush3.bf16.msra.mxu0 %v11852_v55  ;;  %v3694_v55 = vpack.c.bf16 %v3669_v15, %v3667_v43  ;;  %v11874_v15 = vld [vmem:[%s14539_s3 + $0x1f8] sm:$0xff]  }
 0x360   : > { %10571 = vmatprep.subr.bf16.mxu0 %v11853_v51  ;;  %v3953_v43 = vld [vmem:[#allocation2 + $0x137] ss:$2 sm:$0xff] }
 0x362   : > { %10548 = vmatmul.mubr.bf16.gmra.mrb[192].mxu0 %v3417_v23  ;;  %v3675_v23 = vld [vmem:[#allocation2 + $0x103] ss:$2 sm:$0xff] }
 0x363   : > { %10551 = vmatprep.mubr.bf16.mxu0 %v3418_v30  ;;  %10572 = vmatpush3.bf16.msra.mxu0 %v11853_v51  ;;  %v3673_v51 = vld [vmem:[#allocation2 + $0xf3] ss:$2 sm:$0xff] }
 0x364   : > { %10573 = vmatprep.subr.bf16.mxu0 %v11854_v42  ;;  %v3695_v53 = vpack.c.bf16 %v3673_v51, %v3671_v31  ;;  %v11867_v30 = vld [vmem:[%s14539_s3 + $0x1c0] sm:$0xff]   ;;  %v3961_v51 = vld [vmem:[#allocation2 + $0x177] ss:$2 sm:$0x1] }
 0x365   : > { %v3973_v31 = vpack.c.bf16 %v3961_v51, %v3961_v51  ;;  %v4483_v51 = vld [vmem:[#allocation2 + $0xba] ss:$2 sm:$0xff] }
 0x367   : > { %10574 = vmatpush3.bf16.msra.mxu0 %v11854_v42  ;;  %v3696_v42 = vpack.c.bf16 %v3677_v17, %v3675_v23  ;;  %v4193_v17 = vld [vmem:[#allocation2 + $0x28] ss:$2 sm:$0xff] }
 0x368   : > { %10575 = vmatprep.subr.bf16.mxu0 %v11855_v27 }
 0x36a   : > { %10552 = vmatmul.mubr.bf16.gmra.mrb[196].mxu0 %v3419_v7  ;;  %v3683_v7 = vld [vmem:[#allocation2 + $0x143] ss:$2 sm:$0xff] }
 0x36b   : > { %10555 = vmatprep.mubr.bf16.mxu0 %v3420_v48  ;;  %10576 = vmatpush3.bf16.msra.mxu0 %v11855_v27  ;;  %v3681_v27 = vld [vmem:[#allocation2 + $0x133] ss:$2 sm:$0xff]  ;;  %v3698_v12 = vpack.c.bf16 %v3685_v57, %v3683_v7  ;;  %v4199_v57 = vld [vmem:[#allocation2 + $0x58] ss:$2 sm:$0xff] }
 0x36c   : > { %10577 = vmatprep.subr.bf16.mxu0 %v11856_v38  ;;  %v3697_v26 = vpack.c.bf16 %v3681_v27, %v3679_v47  ;;  %v3919_v48 = vld [vmem:[#allocation2 + $0x27] ss:$2 sm:$0xff] }
 0x36d   : > { %v3962_v63 = vpack.c.bf16 %v3919_v48, %v3917_v10  ;;  %v11876_v47 = vld [vmem:[%s14539_s3 + $0x208] sm:$0xff]   ;;  %v11877_v7 = vld [vmem:[%s14539_s3 + $0x210] sm:$0xff]   ;;  %v4203_v48 = vld [vmem:[#allocation2 + $0x78] ss:$2 sm:$0xff] }
 0x36e   : > { %v4207_v10 = vld [vmem:[#allocation2 + $0x98] ss:$2 sm:$0xff] }
 0x36f   : > { %10578 = vmatpush3.bf16.msra.mxu0 %v11856_v38  ;;  %v3687_v38 = vld [vmem:[#allocation2 + $0x163] ss:$2 sm:$0x1] }
 0x370   : > { %10579 = vmatprep.subr.bf16.mxu0 %v11857_v3 }
 0x372   : > { %10556 = vmatmul.mubr.bf16.gmra.mrb[200].mxu0 %v3421_v22  ;;  %v3927_v22 = vld [vmem:[#allocation2 + $0x67] ss:$2 sm:$0xff] }
 0x373   : > { %10559 = vmatprep.mubr.bf16.mxu0 %v3422_v39  ;;  %10580 = vmatpush3.bf16.msra.mxu0 %v11857_v3  ;;  %v3699_v3 = vpack.c.bf16 %v3687_v38, %v3687_v38  ;;  %v3925_v39 = vld [vmem:[#allocation2 + $0x57] ss:$2 sm:$0xff]  ;;  %v4209_v38 = vld [vmem:[#allocation2 + $0xa8] ss:$2 sm:$0xff] }
 0x374   : > { %10581 = vmatprep.subr.bf16.mxu0 %v11858_v59  ;;  %v3964_v16 = vpack.c.bf16 %v3927_v22, %v3925_v39  ;;  %v11879_v22 = vld [vmem:[%s14539_s3 + $0x220] sm:$0xff]  }
 0x377   : > { %10582 = vmatpush3.bf16.msra.mxu0 %v11858_v59  ;;  %v3963_v59 = vpack.c.bf16 %v3923_v18, %v3921_v45  ;;  %v4240_v18 = vpack.c.bf16 %v4209_v38, %v4207_v10  ;;  %v4485_v38 = vld [vmem:[#allocation2 + $0xca] ss:$2 sm:$0xff] }
 0x378   : > { %10607 = vmatprep.subr.bf16.mxu0 %v11859_v44  ;;  %v4489_v10 = vld [vmem:[#allocation2 + $0xea] ss:$2 sm:$0xff] }
 0x37a   : > { %10560 = vmatmul.mubr.bf16.gmra.mrb[204].mxu0 %v3423_v6  ;;  %v3935_v6 = vld [vmem:[#allocation2 + $0xa7] ss:$2 sm:$0xff] }
 0x37b   : > { %10563 = vmatprep.mubr.bf16.mxu0 %v3424_v4  ;;  %v3965_v4 = vpack.c.bf16 %v3931_v61, %v3929_v37 }
 0x382   : > { %10564 = vmatmul.mubr.bf16.gmra.mrb[224].mxu0 %v3425_v11  ;;  %v3966_v11 = vpack.c.bf16 %v3935_v6, %v3933_v5  ;;  %v4211_v6 = vld [vmem:[#allocation2 + $0xb8] ss:$2 sm:$0xff] }
 0x383   : > { %10583 = vmatprep.mubr.bf16.mxu0 %v3688_v8  ;;  %v4215_v5 = vld [vmem:[#allocation2 + $0xd8] ss:$2 sm:$0xff] }
 0x38a   : > { %10584 = vmatmul.mubr.bf16.vlgmr.msra.gmra.mrb[188].mxu0 %v3689_v19  ;;  %v3943_v19 = vld [vmem:[#allocation2 + $0xe7] ss:$2 sm:$0xff] }
 0x38b   : > { %10587 = vmatprep.mubr.bf16.mxu0 %v3690_v1  ;;  %10608 = vmatpush3.bf16.msra.mxu0 %v11859_v44  ;;  %v11868_v44 = vld [vmem:[%s14539_s3 + $0x1c8] sm:$0xff]   ;;  %v3937_v1 = vld [vmem:[#allocation2 + $0xb7] ss:$2 sm:$0xff]  ;;  %v3968_v21 = vpack.c.bf16 %v3943_v19, %v3941_v35 }
 0x38c   : > { %10609 = vmatprep.subr.bf16.mxu0 %v11860_v0  ;;  %v3967_v54 = vpack.c.bf16 %v3939_v41, %v3937_v1  ;;  %v4221_v41 = vld [vmem:[#allocation2 + $0x108] ss:$2 sm:$0xff] }
 0x38d   : > { %v4233_v35 = vld [vmem:[#allocation2 + $0x168] ss:$2 sm:$0xff] }
 0x38f   : > { %10610 = vmatpush3.bf16.msra.mxu0 %v11860_v0 }
 0x390   : > { %10611 = vmatprep.subr.bf16.mxu0 %v11861_v29 }
 0x392   : > { %10588 = vmatmul.mubr.bf16.gmra.mrb[192].mxu0 %v3691_v50 }
 0x393   : > { %10591 = vmatprep.mubr.bf16.mxu0 %v3692_v52  ;;  %10612 = vmatpush3.bf16.msra.mxu0 %v11861_v29  ;;  %v3947_v52 = vld [vmem:[#allocation2 + $0x107] ss:$2 sm:$0xff] }
 0x394   : > { %10613 = vmatprep.subr.bf16.mxu0 %v11862_v28 }
 0x395   : > { %v13382_v25 = vpop.f32.mrb[208].mxu0 }
 0x396   : > { %v13384_v36 = vpop.f32.mrb[209].mxu0 }
 0x397   : > { %v10406_v20 = vpop.f32.mrb[210].mxu0  ;;  %10614 = vmatpush3.bf16.msra.mxu0 %v11862_v28  ;;  %v11873_v28 = vld [vmem:[%s14539_s3 + $0x1f0] sm:$0xff]  }
 0x398   : > { %v13386_v40 = vpop.f32.mrb[211].mxu0  ;;  %10615 = vmatprep.subr.bf16.mxu0 %v11863_v14 }
 0x39a   : > { %10592 = vmatmul.mubr.bf16.gmra.mrb[196].mxu0 %v3693_v33  ;;  %v3959_v33 = vld [vmem:[#allocation2 + $0x167] ss:$2 sm:$0xff] }
 0x39b   : > { %10595 = vmatprep.mubr.bf16.mxu0 %v3694_v55  ;;  %10616 = vmatpush3.bf16.msra.mxu0 %v11863_v14  ;;  %v3951_v14 = vld [vmem:[#allocation2 + $0x127] ss:$2 sm:$0xff]  ;;  %v3957_v55 = vld [vmem:[#allocation2 + $0x157] ss:$2 sm:$0xff] }
 0x39c   : > { %10617 = vmatprep.subr.bf16.mxu0 %v11864_v2 }
 0x39f   : > { %10618 = vmatpush3.bf16.msra.mxu0 %v11864_v2 }
 0x3a0   : > { %10619 = vmatprep.subr.bf16.mxu0 %v11865_v62 }
 0x3a2   : > { %10596 = vmatmul.mubr.bf16.gmra.mrb[200].mxu0 %v3695_v53  ;;  %v4191_v53 = vld [vmem:[#allocation2 + $0x18] ss:$2 sm:$0xff] }
 0x3a3   : > { %10599 = vmatprep.mubr.bf16.mxu0 %v3696_v42  ;;  %10620 = vmatpush3.bf16.msra.mxu0 %v11865_v62  ;;  %v3972_v62 = vpack.c.bf16 %v3959_v33, %v3957_v55  ;;  %v4236_v23 = vpack.c.bf16 %v4193_v17, %v4191_v53  ;;  %v4201_v42 = vld [vmem:[#allocation2 + $0x68] ss:$2 sm:$0xff] }
 0x3a4   : > { %10621 = vmatprep.subr.bf16.mxu0 %v11866_v49  ;;  %v4473_v33 = vld [vmem:[#allocation2 + $0x6a] ss:$2 sm:$0xff] }
 0x3a5   : > { %v11885_v55 = vld [vmem:[%s14539_s3 + $0x250] sm:$0xff]  }
 0x3a6   : > { %v4477_v17 = vld [vmem:[#allocation2 + $0x8a] ss:$2 sm:$0xff] }
 0x3a7   : > { %10622 = vmatpush3.bf16.msra.mxu0 %v11866_v49  ;;  %v4197_v49 = vld [vmem:[#allocation2 + $0x48] ss:$2 sm:$0xff] }
 0x3a8   : > { %10647 = vmatprep.subr.bf16.mxu0 %v11867_v30  ;;  %v4481_v53 = vld [vmem:[#allocation2 + $0xaa] ss:$2 sm:$0xff] }
 0x3aa   : > { %10600 = vmatmul.mubr.bf16.gmra.mrb[204].mxu0 %v3697_v26  ;;  %v4238_v26 = vpack.c.bf16 %v4201_v42, %v4199_v57  ;;  %v11887_v42 = vld [vmem:[%s14539_s3 + $0x260] sm:$0xff]  }
 0x3ab   : > { %10603 = vmatprep.mubr.bf16.mxu0 %v3698_v12  ;;  %v4205_v12 = vld [vmem:[#allocation2 + $0x88] ss:$2 sm:$0xff] }
 0x3b2   : > { %10604 = vmatmul.mubr.bf16.gmra.mrb[228].mxu0 %v3699_v3  ;;  %v4239_v3 = vpack.c.bf16 %v4205_v12, %v4203_v48 }
 0x3b3   : > { %10623 = vmatprep.mubr.bf16.mxu0 %v3962_v63  ;;  %v11878_v63 = vld [vmem:[%s14539_s3 + $0x218] sm:$0xff]  }
 0x3ba   : > { %10624 = vmatmul.mubr.bf16.vlgmr.msra.gmra.mrb[188].mxu0 %v3963_v59  ;;  %v4213_v59 = vld [vmem:[#allocation2 + $0xc8] ss:$2 sm:$0xff] }
 0x3bb   : > { %10627 = vmatprep.mubr.bf16.mxu0 %v3964_v16  ;;  %10648 = vmatpush3.bf16.msra.mxu0 %v11867_v30  ;;  %v4195_v30 = vld [vmem:[#allocation2 + $0x38] ss:$2 sm:$0xff]  ;;  %v4217_v16 = vld [vmem:[#allocation2 + $0xe8] ss:$2 sm:$0xff] }
 0x3bc   : > { %10649 = vmatprep.subr.bf16.mxu0 %v11868_v44  ;;  %v4237_v27 = vpack.c.bf16 %v4197_v49, %v4195_v30  ;;  %v4514_v49 = vpack.c.bf16 %v4483_v51, %v4481_v53  ;;  %v4759_v51 = vld [vmem:[#allocation2 + $0xcb] ss:$2 sm:$0xff] }
 0x3bd   : > { %v4763_v53 = vld [vmem:[#allocation2 + $0xeb] ss:$2 sm:$0xff] }
 0x3bf   : > { %10650 = vmatpush3.bf16.msra.mxu0 %v11868_v44 }
 0x3c0   : > { %10651 = vmatprep.subr.bf16.mxu0 %v11869_v32 }
 0x3c2   : > { %10628 = vmatmul.mubr.bf16.gmra.mrb[192].mxu0 %v3965_v4  ;;  %v4241_v4 = vpack.c.bf16 %v4213_v59, %v4211_v6  ;;  %v4495_v59 = vld [vmem:[#allocation2 + $0x11a] ss:$2 sm:$0xff] }
 0x3c3   : > { %10631 = vmatprep.mubr.bf16.mxu0 %v3966_v11  ;;  %10652 = vmatpush3.bf16.msra.mxu0 %v11869_v32 }
 0x3c4   : > { %10653 = vmatprep.subr.bf16.mxu0 %v11870_v13 }
 0x3c5   : > { %v10445_v8 = vpop.f32.mrb[212].mxu0 }
 0x3c6   : > { %v13413_v34 = vadd.f32 %v10445_v8, %v13382_v25  ;;  %v2806_v9 = vpop.f32.mrb[213].mxu0  ;;  %v3945_v25 = vld [vmem:[#allocation2 + $0xf7] ss:$2 sm:$0xff] }
 0x3c7   : > { %v13416_v56 = vadd.f32 %v2806_v9, %v13384_v36  ;;  %v10446_v0 = vpop.f32.mrb[214].mxu0  ;;  %10654 = vmatpush3.bf16.msra.mxu0 %v11870_v13  ;;  %v3969_v24 = vpack.c.bf16 %v3947_v52, %v3945_v25  ;;  %v3949_v36 = vld [vmem:[#allocation2 + $0x117] ss:$2 sm:$0xff]  ;;  %v11880_v13 = vld [vmem:[%s14539_s3 + $0x228] sm:$0xff]   ;;  %v4219_v9 = vld [vmem:[#allocation2 + $0xf8] ss:$2 sm:$0xff] }
 0x3c8   : > { %v2809_v29 = vpop.f32.mrb[215].mxu0  ;;  %10655 = vmatprep.subr.bf16.mxu0 %v11871_v60  ;;  %v3970_v20 = vpack.c.bf16 %v3951_v14, %v3949_v36  ;;  %v11881_v8 = vld [vmem:[%s14539_s3 + $0x230] sm:$0xff]   ;;  %v4243_v19 = vpack.c.bf16 %v4221_v41, %v4219_v9  ;;  %v11882_v0 = vld [vmem:[%s14539_s3 + $0x238] sm:$0xff]   ;;  %v4509_v41 = vld [vmem:[#allocation2 + $0x18a] ss:$2 sm:$0x1] }
 0x3c9   : > { %v13422_v50 = vadd.f32 %v2809_v29, %v13386_v40  ;;  %v3955_v40 = vld [vmem:[#allocation2 + $0x147] ss:$2 sm:$0xff]  ;;  %v4235_v52 = vld [vmem:[#allocation2 + $0x178] ss:$2 sm:$0x1]  ;;  %v4521_v9 = vpack.c.bf16 %v4509_v41, %v4509_v41 }
 0x3ca   : > { %10632 = vmatmul.mubr.bf16.gmra.mrb[196].mxu0 %v3967_v54  ;;  %v3971_v2 = vpack.c.bf16 %v3955_v40, %v3953_v43  ;;  %v11883_v29 = vld [vmem:[%s14539_s3 + $0x240] sm:$0xff]   ;;  %v4229_v54 = vld [vmem:[#allocation2 + $0x148] ss:$2 sm:$0xff]  ;;  %v4247_v25 = vpack.c.bf16 %v4235_v52, %v4235_v52  ;;  %v5031_v41 = vld [vmem:[#allocation2 + $0xcf] ss:$2 sm:$0xff] }
 0x3cb   : > { %10635 = vmatprep.mubr.bf16.mxu0 %v3968_v21  ;;  %10656 = vmatpush3.bf16.msra.mxu0 %v11871_v60  ;;  %v4242_v60 = vpack.c.bf16 %v4217_v16, %v4215_v5  ;;  %v4231_v21 = vld [vmem:[#allocation2 + $0x158] ss:$2 sm:$0xff]  ;;  %v11884_v43 = vld [vmem:[%s14539_s3 + $0x248] sm:$0xff]  }
 0x3cc   : > { %10657 = vmatprep.subr.bf16.mxu0 %v11872_v58  ;;  %v4467_v14 = vld [vmem:[#allocation2 + $0x3a] ss:$2 sm:$0xff]  ;;  %v4757_v52 = vld [vmem:[#allocation2 + $0xbb] ss:$2 sm:$0xff] }
 0x3cd   : > { %v4507_v5 = vld [vmem:[#allocation2 + $0x17a] ss:$2 sm:$0xff] }
 0x3cf   : > { %10658 = vmatpush3.bf16.msra.mxu0 %v11872_v58  ;;  %v4227_v58 = vld [vmem:[#allocation2 + $0x138] ss:$2 sm:$0xff] }
 0x3d0   : > { %10659 = vmatprep.subr.bf16.mxu0 %v11873_v28 }
 0x3d2   : > { %10636 = vmatmul.mubr.bf16.gmra.mrb[200].mxu0 %v3969_v24  ;;  %v4465_v24 = vld [vmem:[#allocation2 + $0x2a] ss:$2 sm:$0xff] }
 0x3d3   : > { %10639 = vmatprep.mubr.bf16.mxu0 %v3970_v20  ;;  %10660 = vmatpush3.bf16.msra.mxu0 %v11873_v28  ;;  %v4246_v28 = vpack.c.bf16 %v4233_v35, %v4231_v21  ;;  %v4510_v36 = vpack.c.bf16 %v4467_v14, %v4465_v24  ;;  %v4475_v20 = vld [vmem:[#allocation2 + $0x7a] ss:$2 sm:$0xff]  ;;  %v4747_v35 = vld [vmem:[#allocation2 + $0x6b] ss:$2 sm:$0xff] }
 0x3d4   : > { %10661 = vmatprep.subr.bf16.mxu0 %v11874_v15  ;;  %v11893_v21 = vld [vmem:[%s14539_s3 + $0x290] sm:$0xff]  }
 0x3d5   : > { %v4751_v14 = vld [vmem:[#allocation2 + $0x8b] ss:$2 sm:$0xff] }
 0x3d6   : > { %v4755_v24 = vld [vmem:[#allocation2 + $0xab] ss:$2 sm:$0xff] }
 0x3d7   : > { %10662 = vmatpush3.bf16.msra.mxu0 %v11874_v15  ;;  %v4471_v15 = vld [vmem:[#allocation2 + $0x5a] ss:$2 sm:$0xff] }
 0x3d8   : > { %10687 = vmatprep.subr.bf16.mxu0 %v11875_v46 }
 0x3da   : > { %10640 = vmatmul.mubr.bf16.gmra.mrb[204].mxu0 %v3971_v2  ;;  %v4512_v2 = vpack.c.bf16 %v4475_v20, %v4473_v33  ;;  %v11895_v20 = vld [vmem:[%s14539_s3 + $0x2a0] sm:$0xff]  }
 0x3db   : > { %10643 = vmatprep.mubr.bf16.mxu0 %v3972_v62  ;;  %v4479_v62 = vld [vmem:[#allocation2 + $0x9a] ss:$2 sm:$0xff] }
 0x3e2   : > { %10644 = vmatmul.mubr.bf16.gmra.mrb[232].mxu0 %v3973_v31  ;;  %v4513_v31 = vpack.c.bf16 %v4479_v62, %v4477_v17 }
 0x3e3   : > { %10663 = vmatprep.mubr.bf16.mxu0 %v4236_v23  ;;  %v11886_v23 = vld [vmem:[%s14539_s3 + $0x258] sm:$0xff]  }
 0x3ea   : > { %10664 = vmatmul.mubr.bf16.vlgmr.msra.gmra.mrb[188].mxu0 %v4237_v27  ;;  %v4487_v27 = vld [vmem:[#allocation2 + $0xda] ss:$2 sm:$0xff] }
 0x3eb   : > { %10667 = vmatprep.mubr.bf16.mxu0 %v4238_v26  ;;  %10688 = vmatpush3.bf16.msra.mxu0 %v11875_v46  ;;  %v4469_v46 = vld [vmem:[#allocation2 + $0x4a] ss:$2 sm:$0xff]  ;;  %v4491_v26 = vld [vmem:[#allocation2 + $0xfa] ss:$2 sm:$0xff] }
 0x3ec   : > { %10689 = vmatprep.subr.bf16.mxu0 %v11876_v47  ;;  %v4511_v40 = vpack.c.bf16 %v4471_v15, %v4469_v46  ;;  %v4788_v15 = vpack.c.bf16 %v4757_v52, %v4755_v24  ;;  %v5033_v52 = vld [vmem:[#allocation2 + $0xdf] ss:$2 sm:$0xff] }
 0x3ed   : > { %v5037_v24 = vld [vmem:[#allocation2 + $0xff] ss:$2 sm:$0xff] }
 0x3ef   : > { %10690 = vmatpush3.bf16.msra.mxu0 %v11876_v47 }
 0x3f0   : > { %10691 = vmatprep.subr.bf16.mxu0 %v11877_v7 }
 0x3f2   : > { %10668 = vmatmul.mubr.bf16.gmra.mrb[192].mxu0 %v4239_v3  ;;  %v4515_v3 = vpack.c.bf16 %v4487_v27, %v4485_v38  ;;  %v4769_v27 = vld [vmem:[#allocation2 + $0x11b] ss:$2 sm:$0xff] }
 0x3f3   : > { %10671 = vmatprep.mubr.bf16.mxu0 %v4240_v18  ;;  %10692 = vmatpush3.bf16.msra.mxu0 %v11877_v7 }
 0x3f4   : > { %10693 = vmatprep.subr.bf16.mxu0 %v11878_v63 }
 0x3f5   : > { %v10485_v45 = vpop.f32.mrb[216].mxu0 }
 0x3f6   : > { %v13446_v39 = vadd.f32 %v10485_v45, %v13413_v34  ;;  %v3057_v44 = vpop.f32.mrb[217].mxu0  ;;  %v4225_v34 = vld [vmem:[#allocation2 + $0x128] ss:$2 sm:$0xff] }
 0x3f7   : > { %v13449_v32 = vadd.f32 %v3057_v44, %v13416_v56  ;;  %v10486_v61 = vpop.f32.mrb[218].mxu0  ;;  %10694 = vmatpush3.bf16.msra.mxu0 %v11878_v63  ;;  %v4223_v56 = vld [vmem:[#allocation2 + $0x118] ss:$2 sm:$0xff]  ;;  %v11888_v63 = vld [vmem:[%s14539_s3 + $0x268] sm:$0xff]   ;;  %v11889_v45 = vld [vmem:[%s14539_s3 + $0x270] sm:$0xff]  }
 0x3f8   : > { %v3060_v37 = vpop.f32.mrb[219].mxu0  ;;  %10695 = vmatprep.subr.bf16.mxu0 %v11879_v22  ;;  %v4244_v1 = vpack.c.bf16 %v4225_v34, %v4223_v56  ;;  %v4493_v44 = vld [vmem:[#allocation2 + $0x10a] ss:$2 sm:$0xff]  ;;  %v4741_v34 = vld [vmem:[#allocation2 + $0x3b] ss:$2 sm:$0xff] }
 0x3f9   : > { %v13455_v11 = vadd.f32 %v3060_v37, %v13422_v50  ;;  %v4245_v50 = vpack.c.bf16 %v4229_v54, %v4227_v58  ;;  %v4517_v16 = vpack.c.bf16 %v4495_v59, %v4493_v44  ;;  %v11890_v61 = vld [vmem:[%s14539_s3 + $0x278] sm:$0xff]   ;;  %v11891_v37 = vld [vmem:[%s14539_s3 + $0x280] sm:$0xff]   ;;  %v11892_v58 = vld [vmem:[%s14539_s3 + $0x288] sm:$0xff]  }
 0x3fa   : > { %10672 = vmatmul.mubr.bf16.gmra.mrb[196].mxu0 %v4241_v4  ;;  %v4503_v4 = vld [vmem:[#allocation2 + $0x15a] ss:$2 sm:$0xff]  ;;  %v4783_v59 = vld [vmem:[#allocation2 + $0x18b] ss:$2 sm:$0x1] }
 0x3fb   : > { %10675 = vmatprep.mubr.bf16.mxu0 %v4242_v60  ;;  %10696 = vmatpush3.bf16.msra.mxu0 %v11879_v22  ;;  %v4516_v22 = vpack.c.bf16 %v4491_v26, %v4489_v10  ;;  %v4505_v60 = vld [vmem:[#allocation2 + $0x16a] ss:$2 sm:$0xff]  ;;  %v4781_v10 = vld [vmem:[#allocation2 + $0x17b] ss:$2 sm:$0xff]  ;;  %v4795_v44 = vpack.c.bf16 %v4783_v59, %v4783_v59 }
 0x3fc   : > { %10697 = vmatprep.subr.bf16.mxu0 %v11880_v13  ;;  %v5295_v59 = vld [vmem:[#allocation2 + $0xd0] ss:$2 sm:$0xff] }
 0x3ff   : > { %10698 = vmatpush3.bf16.msra.mxu0 %v11880_v13  ;;  %v4501_v13 = vld [vmem:[#allocation2 + $0x14a] ss:$2 sm:$0xff] }
 0x400   : > { %10699 = vmatprep.subr.bf16.mxu0 %v11881_v8 }
 0x402   : > { %10676 = vmatmul.mubr.bf16.gmra.mrb[200].mxu0 %v4243_v19  ;;  %v4739_v19 = vld [vmem:[#allocation2 + $0x2b] ss:$2 sm:$0xff] }
 0x403   : > { %10679 = vmatprep.mubr.bf16.mxu0 %v4244_v1  ;;  %10700 = vmatpush3.bf16.msra.mxu0 %v11881_v8  ;;  %v4520_v8 = vpack.c.bf16 %v4507_v5, %v4505_v60  ;;  %v4784_v56 = vpack.c.bf16 %v4741_v34, %v4739_v19  ;;  %v4749_v1 = vld [vmem:[#allocation2 + $0x7b] ss:$2 sm:$0xff]  ;;  %v11901_v60 = vld [vmem:[%s14539_s3 + $0x2d0] sm:$0xff]  }
 0x404   : > { %10701 = vmatprep.subr.bf16.mxu0 %v11882_v0  ;;  %v5021_v5 = vld [vmem:[#allocation2 + $0x7f] ss:$2 sm:$0xff] }
 0x405   : > { %v5025_v34 = vld [vmem:[#allocation2 + $0x9f] ss:$2 sm:$0xff] }
 0x406   : > { %v5029_v19 = vld [vmem:[#allocation2 + $0xbf] ss:$2 sm:$0xff] }
 0x407   : > { %10702 = vmatpush3.bf16.msra.mxu0 %v11882_v0  ;;  %v4745_v0 = vld [vmem:[#allocation2 + $0x5b] ss:$2 sm:$0xff] }
 0x408   : > { %10727 = vmatprep.subr.bf16.mxu0 %v11883_v29 }
 0x40a   : > { %10680 = vmatmul.mubr.bf16.gmra.mrb[204].mxu0 %v4245_v50  ;;  %v4786_v50 = vpack.c.bf16 %v4749_v1, %v4747_v35  ;;  %v11903_v1 = vld [vmem:[%s14539_s3 + $0x2e0] sm:$0xff]  }
 0x40b   : > { %10683 = vmatprep.mubr.bf16.mxu0 %v4246_v28  ;;  %v4753_v28 = vld [vmem:[#allocation2 + $0x9b] ss:$2 sm:$0xff] }
 0x412   : > { %10684 = vmatmul.mubr.bf16.gmra.mrb[236].mxu0 %v4247_v25  ;;  %v4787_v25 = vpack.c.bf16 %v4753_v28, %v4751_v14 }
 0x413   : > { %10703 = vmatprep.mubr.bf16.mxu0 %v4510_v36  ;;  %v11894_v36 = vld [vmem:[%s14539_s3 + $0x298] sm:$0xff]  }
 0x41a   : > { %10704 = vmatmul.mubr.bf16.vlgmr.msra.gmra.mrb[188].mxu0 %v4511_v40  ;;  %v4761_v40 = vld [vmem:[#allocation2 + $0xdb] ss:$2 sm:$0xff] }
 0x41b   : > { %10707 = vmatprep.mubr.bf16.mxu0 %v4512_v2  ;;  %10728 = vmatpush3.bf16.msra.mxu0 %v11883_v29  ;;  %v4743_v29 = vld [vmem:[#allocation2 + $0x4b] ss:$2 sm:$0xff]  ;;  %v4765_v2 = vld [vmem:[#allocation2 + $0xfb] ss:$2 sm:$0xff] }
 0x41c   : > { %10729 = vmatprep.subr.bf16.mxu0 %v11884_v43  ;;  %v4785_v54 = vpack.c.bf16 %v4745_v0, %v4743_v29  ;;  %v5062_v0 = vpack.c.bf16 %v5031_v41, %v5029_v19  ;;  %v5296_v41 = vld [vmem:[#allocation2 + $0xe0] ss:$2 sm:$0xff] }
 0x41d   : > { %v5298_v19 = vld [vmem:[#allocation2 + $0x100] ss:$2 sm:$0xff] }
 0x41f   : > { %10730 = vmatpush3.bf16.msra.mxu0 %v11884_v43 }
 0x420   : > { %10731 = vmatprep.subr.bf16.mxu0 %v11885_v55 }
 0x422   : > { %10708 = vmatmul.mubr.bf16.gmra.mrb[192].mxu0 %v4513_v31  ;;  %v4789_v31 = vpack.c.bf16 %v4761_v40, %v4759_v51  ;;  %v5043_v40 = vld [vmem:[#allocation2 + $0x12f] ss:$2 sm:$0xff] }
 0x423   : > { %10711 = vmatprep.mubr.bf16.mxu0 %v4514_v49  ;;  %10732 = vmatpush3.bf16.msra.mxu0 %v11885_v55 }
 0x424   : > { %10733 = vmatprep.subr.bf16.mxu0 %v11886_v23 }
 0x425   : > { %v10525_v30 = vpop.f32.mrb[220].mxu0 }
 0x426   : > { %v13479_v57 = vadd.f32 %v10525_v30, %v13446_v39  ;;  %v3331_v47 = vpop.f32.mrb[221].mxu0  ;;  %v4499_v39 = vld [vmem:[#allocation2 + $0x13a] ss:$2 sm:$0xff]  ;;  %v11897_v30 = vld [vmem:[%s14539_s3 + $0x2b0] sm:$0xff]  }
 0x427   : > { %v13482_v7 = vadd.f32 %v3331_v47, %v13449_v32  ;;  %v10526_v12 = vpop.f32.mrb[222].mxu0  ;;  %10734 = vmatpush3.bf16.msra.mxu0 %v11886_v23  ;;  %v4497_v32 = vld [vmem:[#allocation2 + $0x12a] ss:$2 sm:$0xff]  ;;  %v4767_v47 = vld [vmem:[#allocation2 + $0x10b] ss:$2 sm:$0xff] }
 0x428   : > { %v3334_v48 = vpop.f32.mrb[223].mxu0  ;;  %10735 = vmatprep.subr.bf16.mxu0 %v11887_v42  ;;  %v4518_v6 = vpack.c.bf16 %v4499_v39, %v4497_v32  ;;  %v11896_v23 = vld [vmem:[%s14539_s3 + $0x2a8] sm:$0xff]   ;;  %v4791_v26 = vpack.c.bf16 %v4769_v27, %v4767_v47  ;;  %v11898_v12 = vld [vmem:[%s14539_s3 + $0x2b8] sm:$0xff]  }
 0x429   : > { %v13488_v18 = vadd.f32 %v3334_v48, %v13455_v11  ;;  %v4519_v11 = vpack.c.bf16 %v4503_v4, %v4501_v13  ;;  %v11899_v48 = vld [vmem:[%s14539_s3 + $0x2c0] sm:$0xff]   ;;  %v5015_v39 = vld [vmem:[#allocation2 + $0x4f] ss:$2 sm:$0xff]  ;;  %v5057_v27 = vld [vmem:[#allocation2 + $0x19f] ss:$2 sm:$0x1] }
 0x42a   : > { %10712 = vmatmul.mubr.bf16.gmra.mrb[196].mxu0 %v4515_v3  ;;  %v4777_v3 = vld [vmem:[#allocation2 + $0x15b] ss:$2 sm:$0xff]  ;;  %v5069_v47 = vpack.c.bf16 %v5057_v27, %v5057_v27  ;;  %v5560_v27 = vld [vmem:[#allocation2 + $0xbc] ss:$2 sm:$0xff] }
 0x42b   : > { %10715 = vmatprep.mubr.bf16.mxu0 %v4516_v22  ;;  %10736 = vmatpush3.bf16.msra.mxu0 %v11887_v42  ;;  %v4790_v42 = vpack.c.bf16 %v4765_v2, %v4763_v53  ;;  %v4779_v22 = vld [vmem:[#allocation2 + $0x16b] ss:$2 sm:$0xff] }
 0x42c   : > { %10737 = vmatprep.subr.bf16.mxu0 %v11888_v63  ;;  %v11900_v13 = vld [vmem:[%s14539_s3 + $0x2c8] sm:$0xff]  }
 0x42d   : > { %v5055_v53 = vld [vmem:[#allocation2 + $0x18f] ss:$2 sm:$0xff] }
 0x42f   : > { %10738 = vmatpush3.bf16.msra.mxu0 %v11888_v63  ;;  %v4775_v63 = vld [vmem:[#allocation2 + $0x14b] ss:$2 sm:$0xff] }
 0x430   : > { %10739 = vmatprep.subr.bf16.mxu0 %v11889_v45 }
 0x432   : > { %10716 = vmatmul.mubr.bf16.gmra.mrb[200].mxu0 %v4517_v16  ;;  %v5013_v16 = vld [vmem:[#allocation2 + $0x3f] ss:$2 sm:$0xff] }
 0x433   : > { %10719 = vmatprep.mubr.bf16.mxu0 %v4518_v6  ;;  %10740 = vmatpush3.bf16.msra.mxu0 %v11889_v45  ;;  %v4794_v45 = vpack.c.bf16 %v4781_v10, %v4779_v22  ;;  %v5058_v32 = vpack.c.bf16 %v5015_v39, %v5013_v16  ;;  %v5023_v6 = vld [vmem:[#allocation2 + $0x8f] ss:$2 sm:$0xff]  ;;  %v5290_v10 = vld [vmem:[#allocation2 + $0x80] ss:$2 sm:$0xff] }
 0x434   : > { %10741 = vmatprep.subr.bf16.mxu0 %v11890_v61  ;;  %v11909_v22 = vld [vmem:[%s14539_s3 + $0x310] sm:$0xff]   ;;  %v5292_v39 = vld [vmem:[#allocation2 + $0xa0] ss:$2 sm:$0xff] }
 0x435   : > { %v5294_v16 = vld [vmem:[#allocation2 + $0xc0] ss:$2 sm:$0xff] }
 0x437   : > { %10742 = vmatpush3.bf16.msra.mxu0 %v11890_v61  ;;  %v5019_v61 = vld [vmem:[#allocation2 + $0x6f] ss:$2 sm:$0xff] }
 0x438   : > { %10767 = vmatprep.subr.bf16.mxu0 %v11891_v37 }
 0x43a   : > { %10720 = vmatmul.mubr.bf16.gmra.mrb[204].mxu0 %v4519_v11  ;;  %v5060_v11 = vpack.c.bf16 %v5023_v6, %v5021_v5  ;;  %v11911_v6 = vld [vmem:[%s14539_s3 + $0x320] sm:$0xff]  }
 0x43b   : > { %10723 = vmatprep.mubr.bf16.mxu0 %v4520_v8  ;;  %v5027_v8 = vld [vmem:[#allocation2 + $0xaf] ss:$2 sm:$0xff] }
 0x442   : > { %10724 = vmatmul.mubr.bf16.gmra.mrb[240].mxu0 %v4521_v9  ;;  %v5061_v9 = vpack.c.bf16 %v5027_v8, %v5025_v34 }
 0x443   : > { %10743 = vmatprep.mubr.bf16.mxu0 %v4784_v56  ;;  %v11902_v56 = vld [vmem:[%s14539_s3 + $0x2d8] sm:$0xff]  }
 0x44a   : > { %10744 = vmatmul.mubr.bf16.vlgmr.msra.gmra.mrb[188].mxu0 %v4785_v54  ;;  %v5035_v54 = vld [vmem:[#allocation2 + $0xef] ss:$2 sm:$0xff] }
 0x44b   : > { %10747 = vmatprep.mubr.bf16.mxu0 %v4786_v50  ;;  %10768 = vmatpush3.bf16.msra.mxu0 %v11891_v37  ;;  %v5017_v37 = vld [vmem:[#allocation2 + $0x5f] ss:$2 sm:$0xff]  ;;  %v5039_v50 = vld [vmem:[#allocation2 + $0x10f] ss:$2 sm:$0xff] }
 0x44c   : > { %10769 = vmatprep.subr.bf16.mxu0 %v11892_v58  ;;  %v5059_v4 = vpack.c.bf16 %v5019_v61, %v5017_v37  ;;  %v5317_v61 = vpack.c.bf16 %v5295_v59, %v5294_v16  ;;  %v5562_v59 = vld [vmem:[#allocation2 + $0xcc] ss:$2 sm:$0xff] }
 0x44d   : > { %v5566_v16 = vld [vmem:[#allocation2 + $0xec] ss:$2 sm:$0xff] }
 0x44f   : > { %10770 = vmatpush3.bf16.msra.mxu0 %v11892_v58 }
 0x450   : > { %10771 = vmatprep.subr.bf16.mxu0 %v11893_v21 }
 0x452   : > { %10748 = vmatmul.mubr.bf16.gmra.mrb[192].mxu0 %v4787_v25  ;;  %v5063_v25 = vpack.c.bf16 %v5035_v54, %v5033_v52  ;;  %v5301_v54 = vld [vmem:[#allocation2 + $0x130] ss:$2 sm:$0xff] }
 0x453   : > { %10751 = vmatprep.mubr.bf16.mxu0 %v4788_v15  ;;  %10772 = vmatpush3.bf16.msra.mxu0 %v11893_v21 }
 0x454   : > { %10773 = vmatprep.subr.bf16.mxu0 %v11894_v36 }
 0x455   : > { %v10565_v46 = vpop.f32.mrb[224].mxu0 }
 0x456   : > { %v13512_v33 = vadd.f32 %v10565_v46, %v13479_v57  ;;  %v3605_v43 = vpop.f32.mrb[225].mxu0  ;;  %v4773_v57 = vld [vmem:[#allocation2 + $0x13b] ss:$2 sm:$0xff]  ;;  %v11905_v46 = vld [vmem:[%s14539_s3 + $0x2f0] sm:$0xff]  }
 0x457   : > { %v13515_v55 = vadd.f32 %v3605_v43, %v13482_v7  ;;  %v10566_v62 = vpop.f32.mrb[226].mxu0  ;;  %10774 = vmatpush3.bf16.msra.mxu0 %v11894_v36  ;;  %v4771_v7 = vld [vmem:[#allocation2 + $0x12b] ss:$2 sm:$0xff] }
 0x458   : > { %v3608_v17 = vpop.f32.mrb[227].mxu0  ;;  %10775 = vmatprep.subr.bf16.mxu0 %v11895_v20  ;;  %v4792_v38 = vpack.c.bf16 %v4773_v57, %v4771_v7  ;;  %v11904_v36 = vld [vmem:[%s14539_s3 + $0x2e8] sm:$0xff]   ;;  %v11906_v62 = vld [vmem:[%s14539_s3 + $0x2f8] sm:$0xff]  }
 0x459   : > { %v13521_v49 = vadd.f32 %v3608_v17, %v13488_v18  ;;  %v4793_v18 = vpack.c.bf16 %v4777_v3, %v4775_v63  ;;  %v5041_v43 = vld [vmem:[#allocation2 + $0x11f] ss:$2 sm:$0xff]  ;;  %v5287_v57 = vld [vmem:[#allocation2 + $0x50] ss:$2 sm:$0xff] }
 0x45a   : > { %10752 = vmatmul.mubr.bf16.gmra.mrb[196].mxu0 %v4789_v31  ;;  %v5065_v2 = vpack.c.bf16 %v5043_v40, %v5041_v43  ;;  %v11907_v17 = vld [vmem:[%s14539_s3 + $0x300] sm:$0xff]   ;;  %v5051_v31 = vld [vmem:[#allocation2 + $0x16f] ss:$2 sm:$0xff] }
 0x45b   : > { %10755 = vmatprep.mubr.bf16.mxu0 %v4790_v42  ;;  %10776 = vmatpush3.bf16.msra.mxu0 %v11895_v20  ;;  %v5064_v20 = vpack.c.bf16 %v5039_v50, %v5037_v24  ;;  %v5053_v42 = vld [vmem:[#allocation2 + $0x17f] ss:$2 sm:$0xff]  ;;  %v5310_v24 = vld [vmem:[#allocation2 + $0x190] ss:$2 sm:$0xff] }
 0x45c   : > { %10777 = vmatprep.subr.bf16.mxu0 %v11896_v23  ;;  %v11908_v63 = vld [vmem:[%s14539_s3 + $0x308] sm:$0xff]   ;;  %v5312_v40 = vld [vmem:[#allocation2 + $0x1a0] ss:$2 sm:$0x1] }
 0x45d   : > { %v5324_v43 = vpack.c.bf16 %v5312_v40, %v5312_v40  ;;  %v11925_v40 = vld [vmem:[%s14539_s3 + $0x390] sm:$0xff]  }
 0x45f   : > { %10778 = vmatpush3.bf16.msra.mxu0 %v11896_v23  ;;  %v5049_v23 = vld [vmem:[#allocation2 + $0x15f] ss:$2 sm:$0xff] }
 0x460   : > { %10779 = vmatprep.subr.bf16.mxu0 %v11897_v30 }
 0x462   : > { %10756 = vmatmul.mubr.bf16.gmra.mrb[200].mxu0 %v4791_v26  ;;  %v5286_v26 = vld [vmem:[#allocation2 + $0x40] ss:$2 sm:$0xff] }
 0x463   : > { %10759 = vmatprep.mubr.bf16.mxu0 %v4792_v38  ;;  %10780 = vmatpush3.bf16.msra.mxu0 %v11897_v30  ;;  %v5068_v30 = vpack.c.bf16 %v5055_v53, %v5053_v42  ;;  %v5313_v7 = vpack.c.bf16 %v5287_v57, %v5286_v26  ;;  %v5291_v38 = vld [vmem:[#allocation2 + $0x90] ss:$2 sm:$0xff] }
 0x464   : > { %10781 = vmatprep.subr.bf16.mxu0 %v11898_v12  ;;  %v5550_v53 = vld [vmem:[#allocation2 + $0x6c] ss:$2 sm:$0xff] }
 0x465   : > { %v11917_v42 = vld [vmem:[%s14539_s3 + $0x350] sm:$0xff]  }
 0x466   : > { %v5554_v57 = vld [vmem:[#allocation2 + $0x8c] ss:$2 sm:$0xff] }
 0x467   : > { %10782 = vmatpush3.bf16.msra.mxu0 %v11898_v12  ;;  %v5289_v12 = vld [vmem:[#allocation2 + $0x70] ss:$2 sm:$0xff] }
 0x468   : > { %10807 = vmatprep.subr.bf16.mxu0 %v11899_v48  ;;  %v5558_v26 = vld [vmem:[#allocation2 + $0xac] ss:$2 sm:$0xff] }
 0x46a   : > { %10760 = vmatmul.mubr.bf16.gmra.mrb[204].mxu0 %v4793_v18  ;;  %v5315_v18 = vpack.c.bf16 %v5291_v38, %v5290_v10  ;;  %v11919_v38 = vld [vmem:[%s14539_s3 + $0x360] sm:$0xff]  }
 0x46b   : > { %10763 = vmatprep.mubr.bf16.mxu0 %v4794_v45  ;;  %v5293_v45 = vld [vmem:[#allocation2 + $0xb0] ss:$2 sm:$0xff] }
 0x472   : > { %10764 = vmatmul.mubr.bf16.gmra.mrb[244].mxu0 %v4795_v44  ;;  %v5316_v44 = vpack.c.bf16 %v5293_v45, %v5292_v39 }
 0x473   : > { %10783 = vmatprep.mubr.bf16.mxu0 %v5058_v32  ;;  %v11910_v32 = vld [vmem:[%s14539_s3 + $0x318] sm:$0xff]  }
 0x47a   : > { %10784 = vmatmul.mubr.bf16.vlgmr.msra.gmra.mrb[188].mxu0 %v5059_v4  ;;  %v5297_v4 = vld [vmem:[#allocation2 + $0xf0] ss:$2 sm:$0xff] }
 0x47b   : > { %10787 = vmatprep.mubr.bf16.mxu0 %v5060_v11  ;;  %10808 = vmatpush3.bf16.msra.mxu0 %v11899_v48  ;;  %v5288_v48 = vld [vmem:[#allocation2 + $0x60] ss:$2 sm:$0xff]  ;;  %v5299_v11 = vld [vmem:[#allocation2 + $0x110] ss:$2 sm:$0xff] }
 0x47c   : > { %10809 = vmatprep.subr.bf16.mxu0 %v11900_v13  ;;  %v5314_v3 = vpack.c.bf16 %v5289_v12, %v5288_v48  ;;  %v5591_v12 = vpack.c.bf16 %v5560_v27, %v5558_v26  ;;  %v5842_v27 = vld [vmem:[#allocation2 + $0xfd] ss:$2 sm:$0xff]  ;;  %v5836_v26 = vld [vmem:[#allocation2 + $0xcd] ss:$2 sm:$0xff] }
 0x47f   : > { %10810 = vmatpush3.bf16.msra.mxu0 %v11900_v13 }
 0x480   : > { %10811 = vmatprep.subr.bf16.mxu0 %v11901_v60 }
 0x482   : > { %10788 = vmatmul.mubr.bf16.gmra.mrb[192].mxu0 %v5061_v9  ;;  %v5318_v9 = vpack.c.bf16 %v5297_v4, %v5296_v41  ;;  %v5572_v4 = vld [vmem:[#allocation2 + $0x11c] ss:$2 sm:$0xff] }
 0x483   : > { %10791 = vmatprep.mubr.bf16.mxu0 %v5062_v0  ;;  %10812 = vmatpush3.bf16.msra.mxu0 %v11901_v60 }
 0x484   : > { %10813 = vmatprep.subr.bf16.mxu0 %v11902_v56 }
 0x485   : > { %v10605_v29 = vpop.f32.mrb[228].mxu0 }
 0x486   : > { %v13545_v35 = vadd.f32 %v10605_v29, %v13512_v33  ;;  %v3879_v58 = vpop.f32.mrb[229].mxu0  ;;  %v5047_v33 = vld [vmem:[#allocation2 + $0x14f] ss:$2 sm:$0xff] }
 0x487   : > { %v13548_v21 = vadd.f32 %v3879_v58, %v13515_v55  ;;  %v10606_v28 = vpop.f32.mrb[230].mxu0  ;;  %10814 = vmatpush3.bf16.msra.mxu0 %v11902_v56  ;;  %v5045_v55 = vld [vmem:[#allocation2 + $0x13f] ss:$2 sm:$0xff]  ;;  %v11913_v29 = vld [vmem:[%s14539_s3 + $0x330] sm:$0xff]   ;;  %v5300_v58 = vld [vmem:[#allocation2 + $0x120] ss:$2 sm:$0xff] }
 0x488   : > { %v3882_v14 = vpop.f32.mrb[231].mxu0  ;;  %10815 = vmatprep.subr.bf16.mxu0 %v11903_v1  ;;  %v5066_v51 = vpack.c.bf16 %v5047_v33, %v5045_v55  ;;  %v11912_v56 = vld [vmem:[%s14539_s3 + $0x328] sm:$0xff]   ;;  %v5320_v50 = vpack.c.bf16 %v5301_v54, %v5300_v58  ;;  %v11914_v28 = vld [vmem:[%s14539_s3 + $0x338] sm:$0xff]   ;;  %v11939_v54 = vld [vmem:[%s14541_s5 + $0x40] sm:$0xff]  }
 0x489   : > { %v13554_v15 = vadd.f32 %v3882_v14, %v13521_v49  ;;  %v5067_v49 = vpack.c.bf16 %v5051_v31, %v5049_v23  ;;  %v11915_v14 = vld [vmem:[%s14539_s3 + $0x340] sm:$0xff]   ;;  %v11916_v23 = vld [vmem:[%s14539_s3 + $0x348] sm:$0xff]   ;;  %11008 = vmatpush3.bf16.msra.mxu1 %v11939_v54 }
 0x48a   : > { %10792 = vmatmul.mubr.bf16.gmra.mrb[196].mxu0 %v5063_v25  ;;  %v5306_v25 = vld [vmem:[#allocation2 + $0x170] ss:$2 sm:$0xff]  ;;  %v5586_v58 = vld [vmem:[#allocation2 + $0x18c] ss:$2 sm:$0x1] }
 0x48b   : > { %10795 = vmatprep.mubr.bf16.mxu0 %v5064_v20  ;;  %10816 = vmatpush3.bf16.msra.mxu0 %v11903_v1  ;;  %v5319_v1 = vpack.c.bf16 %v5299_v11, %v5298_v19  ;;  %v5308_v20 = vld [vmem:[#allocation2 + $0x180] ss:$2 sm:$0xff]  ;;  %v6093_v54 = vld [vmem:[#allocation2 + $0x81] ss:$2 sm:$0xff] }
 0x48c   : > { %10817 = vmatprep.subr.bf16.mxu0 %v11904_v36  ;;  %v5544_v33 = vld [vmem:[#allocation2 + $0x3c] ss:$2 sm:$0xff] }
 0x48d   : > { %v5584_v19 = vld [vmem:[#allocation2 + $0x17c] ss:$2 sm:$0xff] }
 0x48f   : > { %10818 = vmatpush3.bf16.msra.mxu0 %v11904_v36  ;;  %v5304_v36 = vld [vmem:[#allocation2 + $0x160] ss:$2 sm:$0xff] }
 0x490   : > { %10819 = vmatprep.subr.bf16.mxu0 %v11905_v46 }
 0x492   : > { %10796 = vmatmul.mubr.bf16.gmra.mrb[200].mxu0 %v5065_v2  ;;  %v5542_v2 = vld [vmem:[#allocation2 + $0x2c] ss:$2 sm:$0xff] }
 0x493   : > { %10799 = vmatprep.mubr.bf16.mxu0 %v5066_v51  ;;  %10820 = vmatpush3.bf16.msra.mxu0 %v11905_v46  ;;  %v5323_v46 = vpack.c.bf16 %v5310_v24, %v5308_v20  ;;  %v5587_v55 = vpack.c.bf16 %v5544_v33, %v5542_v2  ;;  %v5552_v51 = vld [vmem:[#allocation2 + $0x7c] ss:$2 sm:$0xff]  ;;  %v5820_v24 = vld [vmem:[#allocation2 + $0x4d] ss:$2 sm:$0xff]  ;;  %v5830_v33 = vld [vmem:[#allocation2 + $0x9d] ss:$2 sm:$0xff] }
 0x494   : > { %10821 = vmatprep.subr.bf16.mxu0 %v11906_v62  ;;  %v11924_v20 = vld [vmem:[%s14539_s3 + $0x388] sm:$0xff]  }
 0x495   : > { %v5828_v2 = vld [vmem:[#allocation2 + $0x8d] ss:$2 sm:$0xff] }
 0x497   : > { %10822 = vmatpush3.bf16.msra.mxu0 %v11906_v62  ;;  %v5548_v62 = vld [vmem:[#allocation2 + $0x5c] ss:$2 sm:$0xff] }
 0x498   : > { %10847 = vmatprep.subr.bf16.mxu0 %v11907_v17 }
 0x49a   : > { %10800 = vmatmul.mubr.bf16.gmra.mrb[204].mxu0 %v5067_v49  ;;  %v5589_v49 = vpack.c.bf16 %v5552_v51, %v5550_v53  ;;  %v11926_v51 = vld [vmem:[%s14539_s3 + $0x398] sm:$0xff]   ;;  %v11927_v53 = vld [vmem:[%s14539_s3 + $0x3a0] sm:$0xff]  }
 0x49b   : > { %10803 = vmatprep.mubr.bf16.mxu0 %v5068_v30  ;;  %v5556_v30 = vld [vmem:[#allocation2 + $0x9c] ss:$2 sm:$0xff] }
 0x4a2   : > { %10804 = vmatmul.mubr.bf16.gmra.mrb[248].mxu0 %v5069_v47  ;;  %v5590_v47 = vpack.c.bf16 %v5556_v30, %v5554_v57 }
 0x4a3   : > { %10823 = vmatprep.mubr.bf16.mxu0 %v5313_v7  ;;  %v11918_v7 = vld [vmem:[%s14539_s3 + $0x358] sm:$0xff]  }
 0x4aa   : > { %10824 = vmatmul.mubr.bf16.vlgmr.msra.gmra.mrb[188].mxu0 %v5314_v3  ;;  %v5564_v3 = vld [vmem:[#allocation2 + $0xdc] ss:$2 sm:$0xff] }
 0x4ab   : > { %10827 = vmatprep.mubr.bf16.mxu0 %v5315_v18  ;;  %10848 = vmatpush3.bf16.msra.mxu0 %v11907_v17  ;;  %v5546_v17 = vld [vmem:[#allocation2 + $0x4c] ss:$2 sm:$0xff]  ;;  %v5568_v18 = vld [vmem:[#allocation2 + $0xfc] ss:$2 sm:$0xff] }
 0x4ac   : > { %10849 = vmatprep.subr.bf16.mxu0 %v11908_v63  ;;  %v5588_v31 = vpack.c.bf16 %v5548_v62, %v5546_v17  ;;  %v5832_v62 = vld [vmem:[#allocation2 + $0xad] ss:$2 sm:$0xff] }
 0x4af   : > { %10850 = vmatpush3.bf16.msra.mxu0 %v11908_v63 }
 0x4b0   : > { %10851 = vmatprep.subr.bf16.mxu0 %v11909_v22 }
 0x4b2   : > { %10828 = vmatmul.mubr.bf16.gmra.mrb[192].mxu0 %v5316_v44  ;;  %v5592_v44 = vpack.c.bf16 %v5564_v3, %v5562_v59 }
 0x4b3   : > { %10831 = vmatprep.mubr.bf16.mxu0 %v5317_v61  ;;  %10852 = vmatpush3.bf16.msra.mxu0 %v11909_v22 }
 0x4b4   : > { %10853 = vmatprep.subr.bf16.mxu0 %v11910_v32 }
 0x4b5   : > { %v10645_v37 = vpop.f32.mrb[232].mxu0 }
 0x4b6   : > { %v13578_v5 = vadd.f32 %v10645_v37, %v13545_v35  ;;  %v4153_v13 = vpop.f32.mrb[233].mxu0  ;;  %v5303_v35 = vld [vmem:[#allocation2 + $0x150] ss:$2 sm:$0xff] }
 0x4b7   : > { %v13581_v60 = vadd.f32 %v4153_v13, %v13548_v21  ;;  %v10646_v8 = vpop.f32.mrb[234].mxu0  ;;  %10854 = vmatpush3.bf16.msra.mxu0 %v11910_v32  ;;  %v5302_v21 = vld [vmem:[#allocation2 + $0x140] ss:$2 sm:$0xff]  ;;  %v11921_v37 = vld [vmem:[%s14539_s3 + $0x370] sm:$0xff]  }
 0x4b8   : > { %v4156_v34 = vpop.f32.mrb[235].mxu0  ;;  %10855 = vmatprep.subr.bf16.mxu0 %v11911_v6  ;;  %v5321_v52 = vpack.c.bf16 %v5303_v35, %v5302_v21  ;;  %v11920_v32 = vld [vmem:[%s14539_s3 + $0x368] sm:$0xff]   ;;  %v11922_v8 = vld [vmem:[%s14539_s3 + $0x378] sm:$0xff]   ;;  %v14568_v35 = vmov 0.0   ;;  %v5598_v21 = vpack.c.bf16 %v5586_v58, %v5586_v58 }
 0x4b9   : > { %v13587_v0 = vadd.f32 %v4156_v34, %v13554_v15  ;;  %v5322_v15 = vpack.c.bf16 %v5306_v25, %v5304_v36  ;;  %v5570_v13 = vld [vmem:[#allocation2 + $0x10c] ss:$2 sm:$0xff]  ;;  %v11923_v34 = vld [vmem:[%s14539_s3 + $0x380] sm:$0xff]   ;;  %11009 = vmatprep.subr.bf16.mxu1 %v14568_v35 }
 0x4ba   : > { %10832 = vmatmul.mubr.bf16.gmra.mrb[196].mxu0 %v5318_v9  ;;  %v5594_v11 = vpack.c.bf16 %v5572_v4, %v5570_v13  ;;  %v5580_v9 = vld [vmem:[#allocation2 + $0x15c] ss:$2 sm:$0xff]  ;;  %v5826_v25 = vld [vmem:[#allocation2 + $0x7d] ss:$2 sm:$0xff] }
 0x4bb   : > { %10835 = vmatprep.mubr.bf16.mxu0 %v5319_v1  ;;  %10856 = vmatpush3.bf16.msra.mxu0 %v11911_v6  ;;  %v5593_v6 = vpack.c.bf16 %v5568_v18, %v5566_v16  ;;  %v5582_v1 = vld [vmem:[#allocation2 + $0x16c] ss:$2 sm:$0xff]  ;;  %v5846_v18 = vld [vmem:[#allocation2 + $0x11d] ss:$2 sm:$0xff] }
 0x4bc   : > { %10857 = vmatprep.subr.bf16.mxu0 %v11912_v56  ;;  %v11932_v58 = vld [vmem:[%s14539_s3 + $0x3c8] sm:$0xff]  }
 0x4bf   : > { %10858 = vmatpush3.bf16.msra.mxu0 %v11912_v56  ;;  %v5578_v56 = vld [vmem:[#allocation2 + $0x14c] ss:$2 sm:$0xff] }
 0x4c0   : > { %10859 = vmatprep.subr.bf16.mxu0 %v11913_v29 }
 0x4c2   : > { %10836 = vmatmul.mubr.bf16.gmra.mrb[200].mxu0 %v5320_v50  ;;  %v5818_v50 = vld [vmem:[#allocation2 + $0x3d] ss:$2 sm:$0xff] }
 0x4c3   : > { %10839 = vmatprep.mubr.bf16.mxu0 %v5321_v52  ;;  %10860 = vmatpush3.bf16.msra.mxu0 %v11913_v29  ;;  %v5597_v29 = vpack.c.bf16 %v5584_v19, %v5582_v1  ;;  %v6091_v1 = vld [vmem:[#allocation2 + $0x61] ss:$2 sm:$0xff] }
 0x4c4   : > { %10861 = vmatprep.subr.bf16.mxu0 %v11914_v28 }
 0x4c7   : > { %10862 = vmatpush3.bf16.msra.mxu0 %v11914_v28  ;;  %v5816_v28 = vld [vmem:[#allocation2 + $0x2d] ss:$2 sm:$0xff] }
 0x4c8   : > { %10887 = vmatprep.subr.bf16.mxu0 %v11915_v14  ;;  %v5861_v52 = vpack.c.bf16 %v5818_v50, %v5816_v28  ;;  %v6096_v28 = vld [vmem:[#allocation2 + $0xb1] ss:$2 sm:$0xff] }
 0x4ca   : > { %10840 = vmatmul.mubr.bf16.gmra.mrb[204].mxu0 %v5322_v15  ;;  %v5824_v15 = vld [vmem:[#allocation2 + $0x6d] ss:$2 sm:$0xff] }
 0x4cb   : > { %10843 = vmatprep.mubr.bf16.mxu0 %v5323_v46  ;;  %v5863_v46 = vpack.c.bf16 %v5826_v25, %v5824_v15 }
 0x4d2   : > { %10844 = vmatmul.mubr.bf16.gmra.mrb[252].mxu0 %v5324_v43  ;;  %v5834_v43 = vld [vmem:[#allocation2 + $0xbd] ss:$2 sm:$0xff] }
 0x4d3   : > { %10863 = vmatprep.mubr.bf16.mxu0 %v5587_v55  ;;  %v5864_v55 = vpack.c.bf16 %v5830_v33, %v5828_v2  ;;  %v5865_v17 = vpack.c.bf16 %v5834_v43, %v5832_v62  ;;  %v6102_v2 = vld [vmem:[#allocation2 + $0x111] ss:$2 sm:$0xff] }
 0x4da   : > { %10864 = vmatmul.mubr.bf16.vlgmr.msra.gmra.mrb[188].mxu0 %v5588_v31  ;;  %v11940_v31 = vld [vmem:[%s14541_s5 + $0x48] sm:$0xff]  }
 0x4db   : > { %10867 = vmatprep.mubr.bf16.mxu0 %v5589_v49  ;;  %10888 = vmatpush3.bf16.msra.mxu0 %v11915_v14  ;;  %v5822_v14 = vld [vmem:[#allocation2 + $0x5d] ss:$2 sm:$0xff] }
 0x4dc   : > { %10889 = vmatprep.subr.bf16.mxu0 %v11916_v23  ;;  %v5862_v36 = vpack.c.bf16 %v5822_v14, %v5820_v24  ;;  %11010 = vmatpush3.bf16.msra.mxu1 %v11940_v31  ;;  %v5838_v49 = vld [vmem:[#allocation2 + $0xdd] ss:$2 sm:$0xff] }
 0x4dd   : > { %11011 = vmatprep.subr.bf16.mxu1 %v14568_v35  ;;  %v6095_v14 = vld [vmem:[#allocation2 + $0xa1] ss:$2 sm:$0xff] }
 0x4de   : > { %v6119_v25 = vpack.c.bf16 %v6096_v28, %v6095_v14  ;;  %v6097_v24 = vld [vmem:[#allocation2 + $0xc1] ss:$2 sm:$0xff]  ;;  %v6356_v14 = vld [vmem:[#allocation2 + $0x102] ss:$2 sm:$0xff] }
 0x4df   : > { %10890 = vmatpush3.bf16.msra.mxu0 %v11916_v23 }
 0x4e0   : > { %10891 = vmatprep.subr.bf16.mxu0 %v11917_v42 }
 0x4e2   : > { %10868 = vmatmul.mubr.bf16.gmra.mrb[192].mxu0 %v5590_v47 }
 0x4e3   : > { %10871 = vmatprep.mubr.bf16.mxu0 %v5591_v12  ;;  %10892 = vmatpush3.bf16.msra.mxu0 %v11917_v42  ;;  %v5866_v12 = vpack.c.bf16 %v5838_v49, %v5836_v26 }
 0x4e4   : > { %10893 = vmatprep.subr.bf16.mxu0 %v11918_v7 }
 0x4e5   : > { %v10685_v48 = vpop.f32.mrb[236].mxu0 }
 0x4e6   : > { %v13611_v10 = vadd.f32 %v10685_v48, %v13578_v5  ;;  %v4427_v63 = vpop.f32.mrb[237].mxu0  ;;  %v5576_v5 = vld [vmem:[#allocation2 + $0x13c] ss:$2 sm:$0xff] }
 0x4e7   : > { %v13614_v22 = vadd.f32 %v4427_v63, %v13581_v60  ;;  %v10686_v45 = vpop.f32.mrb[238].mxu0  ;;  %10894 = vmatpush3.bf16.msra.mxu0 %v11918_v7  ;;  %v5574_v60 = vld [vmem:[#allocation2 + $0x12c] ss:$2 sm:$0xff] }
 0x4e8   : > { %v4430_v39 = vpop.f32.mrb[239].mxu0  ;;  %10895 = vmatprep.subr.bf16.mxu0 %v11919_v38  ;;  %v5595_v41 = vpack.c.bf16 %v5576_v5, %v5574_v60  ;;  %v11928_v48 = vld [vmem:[%s14539_s3 + $0x3a8] sm:$0xff]   ;;  %v11929_v63 = vld [vmem:[%s14539_s3 + $0x3b0] sm:$0xff]   ;;  %v11942_v60 = vld [vmem:[%s14541_s5 + $0x58] sm:$0xff]  }
 0x4e9   : > { %v13620_v61 = vadd.f32 %v4430_v39, %v13587_v0  ;;  %v5596_v0 = vpack.c.bf16 %v5580_v9, %v5578_v56  ;;  %v5844_v45 = vld [vmem:[#allocation2 + $0x10d] ss:$2 sm:$0xff] }
 0x4ea   : > { %10872 = vmatmul.mubr.bf16.gmra.mrb[196].mxu0 %v5592_v44  ;;  %v5868_v59 = vpack.c.bf16 %v5846_v18, %v5844_v45  ;;  %v5848_v39 = vld [vmem:[#allocation2 + $0x12d] ss:$2 sm:$0xff]  ;;  %v11943_v45 = vld [vmem:[%s14541_s5 + $0x60] sm:$0xff]  }
 0x4eb   : > { %10875 = vmatprep.mubr.bf16.mxu0 %v5593_v6  ;;  %10896 = vmatpush3.bf16.msra.mxu0 %v11919_v38  ;;  %v5840_v38 = vld [vmem:[#allocation2 + $0xed] ss:$2 sm:$0xff]  ;;  %v5858_v6 = vld [vmem:[#allocation2 + $0x17d] ss:$2 sm:$0xff] }
 0x4ec   : > { %10897 = vmatprep.subr.bf16.mxu0 %v11920_v32  ;;  %v11930_v44 = vld [vmem:[%s14539_s3 + $0x3b8] sm:$0xff]   ;;  %v6089_v9 = vld [vmem:[#allocation2 + $0x41] ss:$2 sm:$0xff] }
 0x4ed   : > { %v5856_v5 = vld [vmem:[#allocation2 + $0x16d] ss:$2 sm:$0xff] }
 0x4ee   : > { %v5871_v13 = vpack.c.bf16 %v5858_v6, %v5856_v5  ;;  %v6092_v56 = vld [vmem:[#allocation2 + $0x71] ss:$2 sm:$0xff]  ;;  %v6111_v18 = vld [vmem:[#allocation2 + $0x181] ss:$2 sm:$0xff]  ;;  %v6347_v6 = vld [vmem:[#allocation2 + $0x72] ss:$2 sm:$0xff] }
 0x4ef   : > { %10898 = vmatpush3.bf16.msra.mxu0 %v11920_v32  ;;  %v11931_v32 = vld [vmem:[%s14539_s3 + $0x3c0] sm:$0xff]  }
 0x4f0   : > { %10899 = vmatprep.subr.bf16.mxu0 %v11921_v37 }
 0x4f2   : > { %10876 = vmatmul.mubr.bf16.gmra.mrb[200].mxu0 %v5594_v11  ;;  %v11941_v11 = vld [vmem:[%s14541_s5 + $0x50] sm:$0xff]  }
 0x4f3   : > { %10879 = vmatprep.mubr.bf16.mxu0 %v5595_v41  ;;  %10900 = vmatpush3.bf16.msra.mxu0 %v11921_v37  ;;  %v5852_v37 = vld [vmem:[#allocation2 + $0x14d] ss:$2 sm:$0xff] }
 0x4f4   : > { %10901 = vmatprep.subr.bf16.mxu0 %v11922_v8  ;;  %11012 = vmatpush3.bf16.msra.mxu1 %v11941_v11  ;;  %v6090_v41 = vld [vmem:[#allocation2 + $0x51] ss:$2 sm:$0xff] }
 0x4f5   : > { %11013 = vmatprep.subr.bf16.mxu1 %v14568_v35  ;;  %v6116_v19 = vpack.c.bf16 %v6090_v41, %v6089_v9  ;;  %v6350_v41 = vld [vmem:[#allocation2 + $0xa2] ss:$2 sm:$0xff] }
 0x4f6   : > { %v6352_v9 = vld [vmem:[#allocation2 + $0xc2] ss:$2 sm:$0xff] }
 0x4f7   : > { %10902 = vmatpush3.bf16.msra.mxu0 %v11922_v8  ;;  %v5860_v8 = vld [vmem:[#allocation2 + $0x18d] ss:$2 sm:$0x1] }
 0x4f8   : > { %10927 = vmatprep.subr.bf16.mxu0 %v11923_v34  ;;  %11014 = vmatpush3.bf16.msra.mxu1 %v11942_v60  ;;  %v6351_v60 = vld [vmem:[#allocation2 + $0xb2] ss:$2 sm:$0xff] }
 0x4f9   : > { %11015 = vmatprep.subr.bf16.mxu1 %v14568_v35 }
 0x4fa   : > { %10880 = vmatmul.mubr.bf16.gmra.mrb[204].mxu0 %v5596_v0  ;;  %v6094_v0 = vld [vmem:[#allocation2 + $0x91] ss:$2 sm:$0xff] }
 0x4fb   : > { %10883 = vmatprep.mubr.bf16.mxu0 %v5597_v29  ;;  %v6117_v29 = vpack.c.bf16 %v6092_v56, %v6091_v1  ;;  %v6118_v50 = vpack.c.bf16 %v6094_v0, %v6093_v54  ;;  %v6355_v0 = vld [vmem:[#allocation2 + $0xf2] ss:$2 sm:$0xff] }
 0x4fc   : > { %11016 = vmatpush3.bf16.msra.mxu1 %v11943_v45  ;;  %v6357_v54 = vld [vmem:[#allocation2 + $0x112] ss:$2 sm:$0xff] }
 0x4fd   : > { %11017 = vmatprep.subr.bf16.mxu1 %v14568_v35 }
 0x502   : > { %10884 = vmatmul.mubr.bf16.gmra.mrb[0].mxu0 %v5598_v21  ;;  %v11933_v21 = vld [vmem:[%s14539_s3 + $0x3d0] sm:$0xff]  }
 0x503   : > { %10903 = vmatprep.mubr.bf16.mxu0 %v5861_v52  ;;  %v6098_v52 = vld [vmem:[#allocation2 + $0xd1] ss:$2 sm:$0xff] }
 0x504   : > { %v6120_v15 = vpack.c.bf16 %v6098_v52, %v6097_v24  ;;  %v6377_v24 = vpack.c.bf16 %v6357_v54, %v6356_v14 }
 0x50a   : > { %10904 = vmatmul.mubr.bf16.vlgmr.msra.gmra.mrb[188].mxu0 %v5862_v36  ;;  %v11934_v36 = vld [vmem:[%s14539_s3 + $0x3d8] sm:$0xff]  }
 0x50b   : > { %10907 = vmatprep.mubr.bf16.mxu0 %v5863_v46  ;;  %10928 = vmatpush3.bf16.msra.mxu0 %v11923_v34  ;;  %v5872_v34 = vpack.c.bf16 %v5860_v8, %v5860_v8  ;;  %v6353_v8 = vld [vmem:[#allocation2 + $0xd2] ss:$2 sm:$0xff] }
 0x50c   : > { %10929 = vmatprep.subr.bf16.mxu0 %v11924_v20 }
 0x50f   : > { %10930 = vmatpush3.bf16.msra.mxu0 %v11924_v20  ;;  %v11935_v20 = vld [vmem:[%s14539_s3 + $0x3e0] sm:$0xff]  }
 0x510   : > { %10931 = vmatprep.subr.bf16.mxu0 %v11925_v40 }
 0x512   : > { %10908 = vmatmul.mubr.bf16.gmra.mrb[192].mxu0 %v5864_v55 }
 0x513   : > { %10911 = vmatprep.mubr.bf16.mxu0 %v5865_v17  ;;  %10932 = vmatpush3.bf16.msra.mxu0 %v11925_v40  ;;  %v6100_v40 = vld [vmem:[#allocation2 + $0xf1] ss:$2 sm:$0xff] }
 0x514   : > { %10933 = vmatprep.subr.bf16.mxu0 %v11926_v51 }
 0x515   : > { %v10725_v23 = vpop.f32.mrb[240].mxu0 }
 0x516   : > { %v13652_v42 = vadd.f32 %v10725_v23, %v13611_v10  ;;  %v4701_v30 = vpop.f32.mrb[241].mxu0  ;;  %v5867_v10 = vpack.c.bf16 %v5842_v27, %v5840_v38  ;;  %v11936_v23 = vld [vmem:[%s14539_s3 + $0x3e8] sm:$0xff]   ;;  %v6104_v27 = vld [vmem:[#allocation2 + $0x131] ss:$2 sm:$0xff] }
 0x517   : > { %v13655_v57 = vadd.f32 %v4701_v30, %v13614_v22  ;;  %v10726_v47 = vpop.f32.mrb[242].mxu0  ;;  %10934 = vmatpush3.bf16.msra.mxu0 %v11926_v51  ;;  %v5850_v22 = vld [vmem:[#allocation2 + $0x13d] ss:$2 sm:$0xff]  ;;  %v11937_v30 = vld [vmem:[%s14539_s3 + $0x3f0] sm:$0xff]  }
 0x518   : > { %v4704_v7 = vpop.f32.mrb[243].mxu0  ;;  %10935 = vmatprep.subr.bf16.mxu0 %v11927_v53  ;;  %v5869_v16 = vpack.c.bf16 %v5850_v22, %v5848_v39  ;;  %v6099_v51 = vld [vmem:[#allocation2 + $0xe1] ss:$2 sm:$0xff] }
 0x519   : > { %v13661_v3 = vadd.f32 %v4704_v7, %v13620_v61  ;;  %v5854_v61 = vld [vmem:[#allocation2 + $0x15d] ss:$2 sm:$0xff]  ;;  %v6121_v31 = vpack.c.bf16 %v6100_v40, %v6099_v51  ;;  %v6360_v40 = vld [vmem:[#allocation2 + $0x142] ss:$2 sm:$0xff] }
 0x51a   : > { %10912 = vmatmul.mubr.bf16.gmra.mrb[196].mxu0 %v5866_v12  ;;  %v5870_v4 = vpack.c.bf16 %v5854_v61, %v5852_v37  ;;  %v6103_v47 = vld [vmem:[#allocation2 + $0x121] ss:$2 sm:$0xff]  ;;  %v11938_v12 = vld [vmem:[%s14539_s3 + $0x3f8] sm:$0xff]   ;;  %v6366_v51 = vld [vmem:[#allocation2 + $0x182] ss:$2 sm:$0xff] }
 0x51b   : > { %10915 = vmatprep.mubr.bf16.mxu0 %v5867_v10  ;;  %10936 = vmatpush3.bf16.msra.mxu0 %v11927_v53  ;;  %v6101_v53 = vld [vmem:[#allocation2 + $0x101] ss:$2 sm:$0xff]  ;;  %v6123_v26 = vpack.c.bf16 %v6104_v27, %v6103_v47  ;;  %v6349_v37 = vld [vmem:[#allocation2 + $0x92] ss:$2 sm:$0xff] }
 0x51c   : > { %10937 = vmatprep.subr.bf16.mxu0 %v11928_v48  ;;  %v6105_v7 = vld [vmem:[#allocation2 + $0x141] ss:$2 sm:$0xff] }
 0x51d   : > { %v6107_v10 = vld [vmem:[#allocation2 + $0x161] ss:$2 sm:$0xff] }
 0x51e   : > { %v6115_v39 = vld [vmem:[#allocation2 + $0x1a1] ss:$2 sm:$0x1] }
 0x51f   : > { %10938 = vmatpush3.bf16.msra.mxu0 %v11928_v48  ;;  %v6109_v48 = vld [vmem:[#allocation2 + $0x171] ss:$2 sm:$0xff] }
 0x520   : > { %10939 = vmatprep.subr.bf16.mxu0 %v11929_v63 }
 0x522   : > { %10916 = vmatmul.mubr.bf16.gmra.mrb[200].mxu0 %v5868_v59  ;;  %v11944_v59 = vld [vmem:[%s14541_s5 + $0x68] sm:$0xff]  }
 0x523   : > { %10919 = vmatprep.mubr.bf16.mxu0 %v5869_v16  ;;  %10940 = vmatpush3.bf16.msra.mxu0 %v11929_v63  ;;  %v6125_v63 = vpack.c.bf16 %v6109_v48, %v6107_v10  ;;  %v6127_v16 = vpack.c.bf16 %v6115_v39, %v6115_v39 }
 0x524   : > { %10941 = vmatprep.subr.bf16.mxu0 %v11930_v44  ;;  %11018 = vmatpush3.bf16.msra.mxu1 %v11944_v59 }
 0x525   : > { %11019 = vmatprep.subr.bf16.mxu1 %v14568_v35 }
 0x527   : > { %10942 = vmatpush3.bf16.msra.mxu0 %v11930_v44  ;;  %v6345_v44 = vld [vmem:[#allocation2 + $0x52] ss:$2 sm:$0xff] }
 0x528   : > { %10967 = vmatprep.subr.bf16.mxu0 %v11931_v32 }
 0x52a   : > { %10920 = vmatmul.mubr.bf16.gmra.mrb[204].mxu0 %v5870_v4  ;;  %v6346_v4 = vld [vmem:[#allocation2 + $0x62] ss:$2 sm:$0xff] }
 0x52b   : > { %10923 = vmatprep.mubr.bf16.mxu0 %v5871_v13  ;;  %v6372_v5 = vpack.c.bf16 %v6347_v6, %v6346_v4  ;;  %v6348_v13 = vld [vmem:[#allocation2 + $0x82] ss:$2 sm:$0xff] }
 0x52c   : > { %v6373_v11 = vpack.c.bf16 %v6349_v37, %v6348_v13 }
 0x532   : > { %10924 = vmatmul.mubr.bf16.gmra.mrb[4].mxu0 %v5872_v34  ;;  %v6374_v34 = vpack.c.bf16 %v6351_v60, %v6350_v41  ;;  %v13738_v60 = vld [vmem:[%s14540_s4] ss:$0 sm:$0xff] }
 0x533   : > { %10943 = vmatprep.mubr.bf16.mxu0 %v6116_v19  ;;  %v6375_v19 = vpack.c.bf16 %v6353_v8, %v6352_v9 }
 0x53a   : > { %10944 = vmatmul.mubr.bf16.vlgmr.msra.gmra.mrb[188].mxu0 %v6117_v29 }
 0x53b   : > { %10947 = vmatprep.mubr.bf16.mxu0 %v6118_v50  ;;  %10968 = vmatpush3.bf16.msra.mxu0 %v11931_v32  ;;  %v6344_v32 = vld [vmem:[#allocation2 + $0x42] ss:$2 sm:$0xff] }
 0x53c   : > { %10969 = vmatprep.subr.bf16.mxu0 %v11932_v58  ;;  %v6371_v61 = vpack.c.bf16 %v6345_v44, %v6344_v32 }
 0x53f   : > { %10970 = vmatpush3.bf16.msra.mxu0 %v11932_v58 }
 0x540   : > { %10971 = vmatprep.subr.bf16.mxu0 %v11933_v21 }
 0x542   : > { %10948 = vmatmul.mubr.bf16.gmra.mrb[192].mxu0 %v6119_v25 }
 0x543   : > { %10951 = vmatprep.mubr.bf16.mxu0 %v6120_v15  ;;  %10972 = vmatpush3.bf16.msra.mxu0 %v11933_v21  ;;  %v6354_v21 = vld [vmem:[#allocation2 + $0xe2] ss:$2 sm:$0xff]  ;;  %v6361_v15 = vld [vmem:[#allocation2 + $0x152] ss:$2 sm:$0xff] }
 0x544   : > { %10973 = vmatprep.subr.bf16.mxu0 %v11934_v36  ;;  %v6376_v52 = vpack.c.bf16 %v6355_v0, %v6354_v21 }
 0x545   : > { %v10765_v46 = vpop.f32.mrb[244].mxu0 }
 0x546   : > { %v13693_v33 = vadd.f32 %v10765_v46, %v13652_v42  ;;  %v4975_v43 = vpop.f32.mrb[245].mxu0  ;;  %v6122_v42 = vpack.c.bf16 %v6102_v2, %v6101_v53  ;;  %v6368_v2 = vld [vmem:[#allocation2 + $0x192] ss:$2 sm:$0xff]  ;;  %v6370_v53 = vld [vmem:[#allocation2 + $0x1a2] ss:$2 sm:$0x1] }
 0x547   : > { %v13696_v55 = vadd.f32 %v4975_v43, %v13655_v57  ;;  %v10766_v62 = vpop.f32.mrb[246].mxu0  ;;  %10974 = vmatpush3.bf16.msra.mxu0 %v11934_v36  ;;  %v6106_v57 = vld [vmem:[#allocation2 + $0x151] ss:$2 sm:$0xff]  ;;  %v6359_v36 = vld [vmem:[#allocation2 + $0x132] ss:$2 sm:$0xff] }
 0x548   : > { %v4978_v17 = vpop.f32.mrb[247].mxu0  ;;  %10975 = vmatprep.subr.bf16.mxu0 %v11935_v20  ;;  %v6124_v38 = vpack.c.bf16 %v6106_v57, %v6105_v7  ;;  %v6364_v43 = vld [vmem:[#allocation2 + $0x172] ss:$2 sm:$0xff] }
 0x549   : > { %v13702_v49 = vadd.f32 %v4978_v17, %v13661_v3  ;;  %v6113_v3 = vld [vmem:[#allocation2 + $0x191] ss:$2 sm:$0xff]  ;;  %v6381_v17 = vpack.c.bf16 %v6368_v2, %v6366_v51 }
 0x54a   : > { %10952 = vmatmul.mubr.bf16.gmra.mrb[196].mxu0 %v6121_v31  ;;  %v6126_v22 = vpack.c.bf16 %v6113_v3, %v6111_v18  ;;  %v11945_v31 = vld [vmem:[%s14541_s5 + $0x70] sm:$0xff]   ;;  %v11946_v7 = vld [vmem:[%s14541_s5 + $0x78] sm:$0xff]  }
 0x54b   : > { %10955 = vmatprep.mubr.bf16.mxu0 %v6122_v42  ;;  %10976 = vmatpush3.bf16.msra.mxu0 %v11935_v20  ;;  %v6358_v20 = vld [vmem:[#allocation2 + $0x122] ss:$2 sm:$0xff] }
 0x54c   : > { %10977 = vmatprep.subr.bf16.mxu0 %v11936_v23  ;;  %v6378_v46 = vpack.c.bf16 %v6359_v36, %v6358_v20  ;;  %11020 = vmatpush3.bf16.msra.mxu1 %v11945_v31  ;;  %v11947_v31 = vld [vmem:[%s14541_s5] sm:$0xff]  }
 0x54d   : > { %11021 = vmatprep.subr.bf16.mxu1 %v14568_v35 }
 0x54f   : > { %10978 = vmatpush3.bf16.msra.mxu0 %v11936_v23  ;;  %v6382_v23 = vpack.c.bf16 %v6370_v53, %v6370_v53 }
 0x550   : > { %10979 = vmatprep.subr.bf16.mxu0 %v11937_v30  ;;  %11022 = vmatpush3.bf16.msra.mxu1 %v11946_v7 }
 0x551   : > { %11059 = vmatprep.subr.bf16.mxu1 %v14568_v35 }
 0x552   : > { %10956 = vmatmul.mubr.bf16.gmra.mrb[200].mxu0 %v6123_v26 }
 0x553   : > { %10959 = vmatprep.mubr.bf16.mxu0 %v6124_v38  ;;  %10980 = vmatpush3.bf16.msra.mxu0 %v11937_v30 }
 0x554   : > { %10981 = vmatprep.subr.bf16.mxu0 %v11938_v12 }
 0x557   : > { %10982 = vmatpush3.bf16.msra.mxu0 %v11938_v12 }
 0x55a   : > { %10960 = vmatmul.mubr.bf16.gmra.mrb[204].mxu0 %v6125_v63 }
 0x55b   : > { %10963 = vmatprep.mubr.bf16.mxu0 %v6126_v22 }
 0x562   : > { %10964 = vmatmul.mubr.bf16.gmra.mrb[8].mxu0 %v6127_v16 }
 0x563   : > { %10983 = vmatprep.mubr.bf16.mxu0 %v6371_v61 }
 0x56a   : > { %10984 = vmatmul.mubr.bf16.vlgmr.msra.gmra.mrb[188].mxu0 %v6372_v5 }
 0x56b   : > { %10987 = vmatprep.mubr.bf16.mxu0 %v6373_v11 }
 0x572   : > { %10988 = vmatmul.mubr.bf16.gmra.mrb[192].mxu0 %v6374_v34 }
 0x573   : > { %10991 = vmatprep.mubr.bf16.mxu0 %v6375_v19 }
 0x575   : > { %v10805_v56 = vpop.f32.mrb[248].mxu0 }
 0x576   : > { %v5285_v1 = vadd.f32 %v10805_v56, %v13693_v33  ;;  %v5249_v29 = vpop.f32.mrb[249].mxu0  ;;  %v6379_v33 = vpack.c.bf16 %v6361_v15, %v6360_v40 }
 0x577   : > { %v5283_v58 = vadd.f32 %v5249_v29, %v13696_v55  ;;  %v10806_v50 = vpop.f32.mrb[250].mxu0  ;;  %v6362_v55 = vld [vmem:[#allocation2 + $0x162] ss:$2 sm:$0xff] }
 0x578   : > { %v5252_v28 = vpop.f32.mrb[251].mxu0  ;;  %v6380_v62 = vpack.c.bf16 %v6364_v43, %v6362_v55 }
 0x579   : > { %v5284_v25 = vadd.f32 %v5252_v28, %v13702_v49 }
 0x57a   : > { %10992 = vmatmul.mubr.bf16.gmra.mrb[196].mxu0 %v6376_v52 }
 0x57b   : > { %10995 = vmatprep.mubr.bf16.mxu0 %v6377_v24 }
 0x582   : > { %10996 = vmatmul.mubr.bf16.gmra.mrb[200].mxu0 %v6378_v46 }
 0x583   : > { %10999 = vmatprep.mubr.bf16.mxu0 %v6379_v33 }
 0x58a   : > { %11000 = vmatmul.mubr.bf16.gmra.mrb[204].mxu0 %v6380_v62 }
 0x58b   : > { %11003 = vmatprep.mubr.bf16.mxu0 %v6381_v17 }
 0x592   : > { %11004 = vmatmul.mubr.bf16.gmra.mrb[12].mxu0 %v6382_v23 }
 0x5a5   : > { %v10845_v49 = vpop.f32.mrb[252].mxu0 }
 0x5a6   : > { %v5540_v42 = vadd.f32 %v10845_v49, %v5285_v1  ;;  %v5504_v30 = vpop.f32.mrb[253].mxu0 }
 0x5a7   : > { %v5538_v27 = vadd.f32 %v5504_v30, %v5283_v58  ;;  %v10846_v57 = vpop.f32.mrb[254].mxu0 }
 0x5a8   : > { %v5507_v47 = vpop.f32.mrb[255].mxu0 }
 0x5a9   : > { %v5539_v26 = vadd.f32 %v5507_v47, %v5284_v25 }
 0x5d5   : > { %v10885_v12 = vpop.f32.mrb[0].mxu0 }
 0x5d6   : > { %v5814_v38 = vadd.f32 %v10885_v12, %v5540_v42  ;;  %v5778_v48 = vpop.f32.mrb[1].mxu0 }
 0x5d7   : > { %v5812_v3 = vadd.f32 %v5778_v48, %v5538_v27  ;;  %v10886_v10 = vpop.f32.mrb[2].mxu0 }
 0x5d8   : > { %v5781_v63 = vpop.f32.mrb[3].mxu0 }
 0x5d9   : > { %v5813_v18 = vadd.f32 %v5781_v63, %v5539_v26 }
 0x605   : > { %v10925_v22 = vpop.f32.mrb[4].mxu0 }
 0x606   : > { %v6088_v45 = vadd.f32 %v10925_v22, %v5814_v38  ;;  %v6052_v59 = vpop.f32.mrb[5].mxu0  ;;  %v11948_v38 = vld [vmem:[%s14541_s5 + $0x8] sm:$0xff]  }
 0x607   : > { %v6086_v39 = vadd.f32 %v6052_v59, %v5812_v3  ;;  %v10926_v44 = vpop.f32.mrb[6].mxu0 }
 0x608   : > { %v6055_v16 = vpop.f32.mrb[7].mxu0  ;;  %v11949_v44 = vld [vmem:[%s14541_s5 + $0x10] sm:$0xff]  }
 0x609   : > { %v6087_v32 = vadd.f32 %v6055_v16, %v5813_v18 }
 0x635   : > { %v10965_v61 = vpop.f32.mrb[8].mxu0 }
 0x636   : > { %v13729_v6 = vadd.f32 %v10965_v61, %v6088_v45  ;;  %v6307_v37 = vpop.f32.mrb[9].mxu0 }
 0x637   : > { %v13731_v4 = vadd.f32 %v6307_v37, %v6086_v39  ;;  %v10966_v5 = vpop.f32.mrb[10].mxu0 }
 0x638   : > { %v6310_v13 = vpop.f32.mrb[11].mxu0 }
 0x639   : > { %v13733_v11 = vadd.f32 %v6310_v13, %v6087_v32 }
 0x63d   : > { %v10985_v8 = vpop.f32.mrb[188].mxu0 }
 0x63e   : > { %v6608_v41 = vadd.f32 %v10985_v8, %v13738_v60  ;;  %v6482_v34 = vpop.f32.mrb[189].mxu0 }
 0x63f   : > { %v6606_v9 = vadd.f32 %v13738_v60, %v6482_v34  ;;  %v10986_v19 = vpop.f32.mrb[190].mxu0 }
 0x640   : > { %v6631_v56 = vmax.f32 %v6608_v41, 0.0  ;;  %v6609_v0 = vadd.f32 %v10986_v19, %v13738_v60  ;;  %v6485_v1 = vpop.f32.mrb[191].mxu0 }
 0x641   : > { %v6629_v29 = vmax.f32 %v6606_v9, 0.0  ;;  %v6607_v54 = vadd.f32 %v13738_v60, %v6485_v1 }
 0x642   : > { %6654 = vst [vmem:[#allocation3 + $0x10] sm:$0xff] %v6631_v56  ;;  %v6632_v58 = vmax.f32 %v6609_v0, 0.0 }
 0x643   : > { %6652 = vst [vmem:[#allocation3] sm:$0xff] %v6629_v29  ;;  %v6630_v50 = vmax.f32 %v6607_v54, 0.0 }
 0x644   : > { %6655 = vst [vmem:[#allocation3 + $0x18] sm:$0xff] %v6632_v58  ;;  %v13744_v21 = vpack.c.bf16 %v6632_v58, %v6631_v56  ;;  %v11950_v56 = vld [vmem:[%s14541_s5 + $0x18] sm:$0xff]  }
 0x645   : > { %6653 = vst [vmem:[#allocation3 + $0x8] sm:$0xff] %v6630_v50  ;;  %v13746_v28 = vpack.c.bf16 %v6630_v50, %v6629_v29  ;;  %v10989_v52 = vpop.f32.mrb[192].mxu0 }
 0x646   : > { %v6612_v14 = vadd.f32 %v10989_v52, %v13738_v60  ;;  %v6498_v25 = vpop.f32.mrb[193].mxu0 }
 0x647   : > { %v6610_v24 = vadd.f32 %v13738_v60, %v6498_v25  ;;  %v10990_v36 = vpop.f32.mrb[194].mxu0 }
 0x648   : > { %v6635_v15 = vmax.f32 %v6612_v14, 0.0  ;;  %v6613_v20 = vadd.f32 %v10990_v36, %v13738_v60  ;;  %v6501_v46 = vpop.f32.mrb[195].mxu0 }
 0x649   : > { %v6633_v40 = vmax.f32 %v6610_v24, 0.0  ;;  %v6611_v33 = vadd.f32 %v13738_v60, %v6501_v46  ;;  %v11951_v24 = vld [vmem:[%s14541_s5 + $0x20] sm:$0xff]  }
 0x64a   : > { %6658 = vst [vmem:[#allocation3 + $0x30] sm:$0xff] %v6635_v15  ;;  %v6636_v43 = vmax.f32 %v6613_v20, 0.0 }
 0x64b   : > { %6656 = vst [vmem:[#allocation3 + $0x20] sm:$0xff] %v6633_v40  ;;  %v6634_v2 = vmax.f32 %v6611_v33, 0.0  ;;  %v6719_v59 = vld [vmem:[#allocation3 + $0x11] sm:$0xff] }
 0x64c   : > { %6659 = vst [vmem:[#allocation3 + $0x38] sm:$0xff] %v6636_v43  ;;  %v6717_v55 = vld [vmem:[#allocation3 + $0x1] sm:$0xff]  ;;  %v13752_v62 = vpack.c.bf16 %v6636_v43, %v6635_v15  ;;  %v6718_v17 = vld [vmem:[#allocation3 + $0x9] sm:$0xff] }
 0x64d   : > { %6657 = vst [vmem:[#allocation3 + $0x28] sm:$0xff] %v6634_v2  ;;  %v10993_v51 = vpop.f32.mrb[196].mxu0  ;;  %v13757_v53 = vpack.c.bf16 %v6634_v2, %v6633_v40  ;;  %v6734_v42 = vpack.c.bf16 %v6718_v17, %v6717_v55 }
 0x64e   : > { %v6616_v23 = vadd.f32 %v10993_v51, %v13738_v60  ;;  %v6514_v49 = vpop.f32.mrb[197].mxu0 }
 0x64f   : > { %v6614_v30 = vadd.f32 %v13738_v60, %v6514_v49  ;;  %v10994_v27 = vpop.f32.mrb[198].mxu0  ;;  %11024 = vmatmul.mubr.bf16.vlgmr.msra.gmra.mrb[244].mxu1 %v6734_v42  ;;  %v11952_v42 = vld [vmem:[%s14541_s5 + $0x28] sm:$0xff]  }
 0x650   : > { %v6639_v57 = vmax.f32 %v6616_v23, 0.0  ;;  %v6617_v47 = vadd.f32 %v10994_v27, %v13738_v60  ;;  %v6517_v26 = vpop.f32.mrb[199].mxu0  ;;  %11060 = vmatpush3.bf16.msra.mxu1 %v11947_v31  ;;  %11027 = vmatprep.mubr.msk.bf16.mxu1 %vm12020_vm0, %v14568_v35 }
 0x651   : > { %v6637_v7 = vmax.f32 %v6614_v30, 0.0  ;;  %v6615_v12 = vadd.f32 %v13738_v60, %v6517_v26  ;;  %11061 = vmatprep.subr.bf16.mxu1 %v14568_v35 }
 0x652   : > { %6662 = vst [vmem:[#allocation3 + $0x50] sm:$0xff] %v6639_v57  ;;  %v6640_v48 = vmax.f32 %v6617_v47, 0.0  ;;  %v6720_v39 = vld [vmem:[#allocation3 + $0x19] sm:$0xff] }
 0x653   : > { %v13769_v3 = vld [vmem:[#allocation3 + $0x32] sm:$0xff]  ;;  %6660 = vst [vmem:[#allocation3 + $0x40] sm:$0xff] %v6637_v7  ;;  %v6638_v10 = vmax.f32 %v6615_v12, 0.0  ;;  %v6735_v37 = vpack.c.bf16 %v6720_v39, %v6719_v59 }
 0x654   : > { %v13771_v63 = vld [vmem:[#allocation3 + $0x2a] sm:$0xff]  ;;  %6663 = vst [vmem:[#allocation3 + $0x58] sm:$0xff] %v6640_v48  ;;  %v13773_v18 = vpack.c.bf16 %v6640_v48, %v6639_v57  ;;  %11062 = vmatpush3.bf16.msra.mxu1 %v11948_v38  ;;  %v6721_v29 = vld [vmem:[#allocation3 + $0x21] sm:$0xff] }
 0x655   : > { %v7879_v22 = vpack.c.bf16 %v13769_v3, %v13771_v63  ;;  %6661 = vst [vmem:[#allocation3 + $0x48] sm:$0xff] %v6638_v10  ;;  %v10997_v45 = vpop.f32.mrb[200].mxu0  ;;  %v13780_v16 = vpack.c.bf16 %v6638_v10, %v6637_v7  ;;  %11063 = vmatprep.subr.bf16.mxu1 %v14568_v35  ;;  %v6722_v54 = vld [vmem:[#allocation3 + $0x29] sm:$0xff]  ;;  %v6723_v38 = vld [vmem:[#allocation3 + $0x31] sm:$0xff] }
 0x656   : > { %v6620_v32 = vadd.f32 %v10997_v45, %v13738_v60  ;;  %v6530_v61 = vpop.f32.mrb[201].mxu0  ;;  %v6736_v33 = vpack.c.bf16 %v6722_v54, %v6721_v29  ;;  %v11953_v48 = vld [vmem:[%s14541_s5 + $0x30] sm:$0xff]  }
 0x657   : > { %v6618_v5 = vadd.f32 %v13738_v60, %v6530_v61  ;;  %v10998_v13 = vpop.f32.mrb[202].mxu0  ;;  %11028 = vmatmul.mubr.bf16.gmra.mrb[248].mxu1 %v6735_v37 }
 0x658   : > { %v6643_v8 = vmax.f32 %v6620_v32, 0.0  ;;  %v6621_v41 = vadd.f32 %v10998_v13, %v13738_v60  ;;  %v6533_v34 = vpop.f32.mrb[203].mxu0  ;;  %11031 = vmatprep.mubr.msk.bf16.mxu1 %vm12020_vm0, %v14568_v35  ;;  %11064 = vmatpush3.bf16.msra.mxu1 %v11949_v44 }
 0x659   : > { %v6641_v9 = vmax.f32 %v6618_v5, 0.0  ;;  %v6619_v19 = vadd.f32 %v13738_v60, %v6533_v34  ;;  %11065 = vmatprep.subr.bf16.mxu1 %v14568_v35 }
 0x65a   : > { %6666 = vst [vmem:[#allocation3 + $0x70] sm:$0xff] %v6643_v8  ;;  %v6644_v0 = vmax.f32 %v6621_v41, 0.0  ;;  %v13797_v52 = vld [vmem:[#allocation3 + $0x3a] sm:$0xff] }
 0x65b   : > { %6664 = vst [vmem:[#allocation3 + $0x60] sm:$0xff] %v6641_v9  ;;  %v6642_v1 = vmax.f32 %v6619_v19, 0.0  ;;  %v13793_v58 = vld [vmem:[#allocation3 + $0x52] sm:$0xff] }
 0x65c   : > { %6667 = vst [vmem:[#allocation3 + $0x78] sm:$0xff] %v6644_v0  ;;  %v13795_v50 = vpack.c.bf16 %v6644_v0, %v6643_v8  ;;  %v13799_v14 = vld [vmem:[#allocation3 + $0x42] sm:$0xff]  ;;  %11066 = vmatpush3.bf16.msra.mxu1 %v11950_v56  ;;  %v13806_v15 = vld [vmem:[#allocation3 + $0x4a] sm:$0xff]  ;;  %v6724_v57 = vld [vmem:[#allocation3 + $0x39] sm:$0xff] }
 0x65d   : > { %6665 = vst [vmem:[#allocation3 + $0x68] sm:$0xff] %v6642_v1  ;;  %v11001_v25 = vpop.f32.mrb[204].mxu0  ;;  %v13804_v36 = vpack.c.bf16 %v6642_v1, %v6641_v9  ;;  %v7880_v20 = vpack.c.bf16 %v13799_v14, %v13797_v52  ;;  %11067 = vmatprep.subr.bf16.mxu1 %v14568_v35  ;;  %v7881_v43 = vpack.c.bf16 %v13793_v58, %v13806_v15  ;;  %v6725_v19 = vld [vmem:[#allocation3 + $0x41] sm:$0xff]  ;;  %v6726_v56 = vld [vmem:[#allocation3 + $0x49] sm:$0xff]  ;;  %v6727_v29 = vld [vmem:[#allocation3 + $0x51] sm:$0xff] }
 0x65e   : > { %v6624_v46 = vadd.f32 %v11001_v25, %v13738_v60  ;;  %v6546_v40 = vpop.f32.mrb[205].mxu0  ;;  %v6737_v44 = vpack.c.bf16 %v6724_v57, %v6723_v38  ;;  %v7056_v57 = vld [vmem:[#allocation3 + $0x12] sm:$0xff] }
 0x65f   : > { %v6622_v2 = vadd.f32 %v13738_v60, %v6546_v40  ;;  %v11002_v55 = vpop.f32.mrb[206].mxu0  ;;  %11032 = vmatmul.mubr.bf16.gmra.mrb[252].mxu1 %v6736_v33 }
 0x660   : > { %v6647_v51 = vmax.f32 %v6624_v46, 0.0  ;;  %v6625_v17 = vadd.f32 %v11002_v55, %v13738_v60  ;;  %v6549_v31 = vpop.f32.mrb[207].mxu0  ;;  %11035 = vmatprep.mubr.msk.bf16.mxu1 %vm12020_vm0, %v14568_v35  ;;  %11068 = vmatpush3.bf16.msra.mxu1 %v11951_v24 }
 0x661   : > { %v6645_v23 = vmax.f32 %v6622_v2, 0.0  ;;  %v6623_v49 = vadd.f32 %v13738_v60, %v6549_v31  ;;  %11069 = vmatprep.subr.bf16.mxu1 %v14568_v35  ;;  %v11957_v31 = vld [vmem:[%s14541_s5 + $0x90] sm:$0xff]  }
 0x662   : > { %6670 = vst [vmem:[#allocation3 + $0x90] sm:$0xff] %v6647_v51  ;;  %v6648_v30 = vmax.f32 %v6625_v17, 0.0  ;;  %v13825_v26 = vld [vmem:[#allocation3 + $0x5a] sm:$0xff] }
 0x663   : > { %6668 = vst [vmem:[#allocation3 + $0x80] sm:$0xff] %v6645_v23  ;;  %v6646_v27 = vmax.f32 %v6623_v49, 0.0  ;;  %v13823_v47 = vld [vmem:[#allocation3 + $0x72] sm:$0xff]  ;;  %v11956_v17 = vld [vmem:[%s14541_s5 + $0x88] sm:$0xff]   ;;  %v11961_v49 = vld [vmem:[%s14541_s5 + $0xb0] sm:$0xff]  }
 0x664   : > { %6671 = vst [vmem:[#allocation3 + $0x98] sm:$0xff] %v6648_v30  ;;  %v13827_v7 = vld [vmem:[#allocation3 + $0x62] sm:$0xff]  ;;  %11070 = vmatpush3.bf16.msra.mxu1 %v11952_v42  ;;  %v13832_v10 = vld [vmem:[#allocation3 + $0x6a] sm:$0xff]  ;;  %v6728_v1 = vld [vmem:[#allocation3 + $0x59] sm:$0xff] }
 0x665   : > { %6669 = vst [vmem:[#allocation3 + $0x88] sm:$0xff] %v6646_v27  ;;  %v11005_v12 = vpop.f32.mrb[12].mxu0  ;;  %v7882_v45 = vpack.c.bf16 %v13827_v7, %v13825_v26  ;;  %11071 = vmatprep.subr.bf16.mxu1 %v14568_v35  ;;  %v7883_v32 = vpack.c.bf16 %v13823_v47, %v13832_v10  ;;  %v6739_v54 = vpack.c.bf16 %v6728_v1, %v6727_v29  ;;  %v6730_v25 = vld [vmem:[#allocation3 + $0x69] sm:$0xff]  ;;  %v6731_v40 = vld [vmem:[#allocation3 + $0x71] sm:$0xff]  ;;  %v7057_v27 = vld [vmem:[#allocation3 + $0x1a] sm:$0xff] }
 0x666   : > { %v6598_v59 = vadd.f32 %v11005_v12, %v13729_v6  ;;  %v6562_v39 = vpop.f32.mrb[13].mxu0  ;;  %v11954_v6 = vld [vmem:[%s14541_s5 + $0x38] sm:$0xff]   ;;  %v11955_v51 = vld [vmem:[%s14541_s5 + $0x80] sm:$0xff]   ;;  %v11965_v12 = vld [vmem:[%s14541_s5 + $0xd0] sm:$0xff]   ;;  %v7072_v38 = vpack.c.bf16 %v7057_v27, %v7056_v57 }
 0x667   : > { %v6596_v61 = vadd.f32 %v6562_v39, %v13731_v4  ;;  %v11006_v37 = vpop.f32.mrb[14].mxu0  ;;  %11036 = vmatmul.mubr.bf16.gmra.mrb[0].mxu1 %v6737_v44  ;;  %v11959_v23 = vld [vmem:[%s14541_s5 + $0xa0] sm:$0xff]   ;;  %v7055_v42 = vld [vmem:[#allocation3 + $0xa] sm:$0xff] }
 0x668   : > { %v6628_v5 = vadd.f32 %v13738_v60, %v6598_v59  ;;  %v6565_v13 = vpop.f32.mrb[15].mxu0  ;;  %11039 = vmatprep.mubr.msk.bf16.mxu1 %vm12020_vm0, %v14568_v35  ;;  %11072 = vmatpush3.bf16.msra.mxu1 %v11953_v48  ;;  %v11966_v48 = vld [vmem:[%s14541_s5 + $0xd8] sm:$0xff]   ;;  %v7058_v59 = vld [vmem:[#allocation3 + $0x22] sm:$0xff]  ;;  %v11967_v39 = vld [vmem:[%s14541_s5 + $0xe0] sm:$0xff]  }
 0x669   : > { %v6626_v8 = vadd.f32 %v13738_v60, %v6596_v61  ;;  %v6597_v41 = vadd.f32 %v6565_v13, %v13733_v11  ;;  %11073 = vmatprep.subr.bf16.mxu1 %v14568_v35  ;;  %v6738_v11 = vpack.c.bf16 %v6726_v56, %v6725_v19  ;;  %v7073_v44 = vpack.c.bf16 %v13771_v63, %v7058_v59  ;;  %v11968_v61 = vld [vmem:[%s14541_s5 + $0xe8] sm:$0xff]   ;;  %v11969_v37 = vld [vmem:[%s14541_s5 + $0xf0] sm:$0xff]   ;;  %v11970_v13 = vld [vmem:[%s14541_s5 + $0xf8] sm:$0xff]  }
 0x66a   : > { %v6651_v34 = vmax.f32 %v6628_v5, 0.0  ;;  %v6732_v46 = vld [vmem:[#allocation3 + $0x79] sm:$0xff]  ;;  %v6733_v2 = vld [vmem:[#allocation3 + $0x81] sm:$0x1f]  ;;  %v7074_v5 = vpack.c.bf16 %v13797_v52, %v13769_v3  ;;  %v7263_v27 = vld [vmem:[#allocation3 + $0x4d] sm:$0xff] }
 0x66b   : > { %v6649_v4 = vmax.f32 %v6626_v8, 0.0  ;;  %v6627_v9 = vadd.f32 %v13738_v60, %v6597_v41  ;;  %v6729_v60 = vld [vmem:[#allocation3 + $0x61] sm:$0xff]  ;;  %v6741_v33 = vpack.c.bf16 %v6732_v46, %v6731_v40  ;;  %v6742_v55 = vpack.c.bf16 %v6733_v2, %v6733_v2  ;;  %v7256_v1 = vld [vmem:[#allocation3 + $0x15] sm:$0xff] }
 0x66c   : > { %6674 = vst [vmem:[#allocation3 + $0xb0] sm:$0x1] %v6651_v34  ;;  %11074 = vmatpush3.bf16.msra.mxu1 %v11954_v6  ;;  %v6740_v24 = vpack.c.bf16 %v6730_v25, %v6729_v60  ;;  %v7075_v8 = vpack.c.bf16 %v13806_v15, %v13799_v14  ;;  %v7076_v41 = vpack.c.bf16 %v13825_v26, %v13793_v58  ;;  %v13975_v34 = vld [vmem:[#allocation3 + $0x7a] sm:$0xff]  ;;  %v7258_v40 = vld [vmem:[#allocation3 + $0x25] sm:$0xff] }
 0x66d   : > { %6672 = vst [vmem:[#allocation3 + $0xa0] sm:$0xff] %v6649_v4  ;;  %v6650_v0 = vmax.f32 %v6627_v9, 0.0  ;;  %11111 = vmatprep.subr.bf16.mxu1 %v14568_v35  ;;  %v7077_v6 = vpack.c.bf16 %v13832_v10, %v13827_v7  ;;  %v7078_v4 = vpack.c.bf16 %v13975_v34, %v13823_v47  ;;  %v7070_v9 = vld [vmem:[#allocation3 + $0x82] sm:$0x1f]  ;;  %v11997_v3 = vld [vmem:[%s14541_s5 + $0x1d0] sm:$0xff]  }
 0x66e   : > { %v7079_v19 = vpack.c.bf16 %v7070_v9, %v7070_v9  ;;  %v7257_v56 = vld [vmem:[#allocation3 + $0x1d] sm:$0xff]  ;;  %v7267_v9 = vld [vmem:[#allocation3 + $0x6d] sm:$0xff] }
 0x66f   : > { %6673 = vst [vmem:[#allocation3 + $0xa8] sm:$0xff] %v6650_v0  ;;  %11040 = vmatmul.mubr.bf16.gmra.mrb[4].mxu1 %v6738_v11  ;;  %v7273_v60 = vpack.c.bf16 %v7257_v56, %v7256_v1  ;;  %v12001_v58 = vld [vmem:[%s14541_s5 + $0x1f0] sm:$0xff]  }
 0x670   : > { %11043 = vmatprep.mubr.msk.bf16.mxu1 %vm12020_vm0, %v14568_v35  ;;  %v7873_v7 = vld [vmem:[#allocation3 + $0x82] sm:$0xff]  ;;  %v7874_v10 = vld [vmem:[#allocation3 + $0x8a] sm:$0xff] }
 0x677   : > { %11044 = vmatmul.mubr.bf16.gmra.mrb[8].mxu1 %v6739_v54  ;;  %v11971_v54 = vld [vmem:[%s14541_s5 + $0x100] sm:$0xff]  }
 0x678   : > { %11047 = vmatprep.mubr.msk.bf16.mxu1 %vm12020_vm0, %v14568_v35 }
 0x67f   : > { %11048 = vmatmul.mubr.bf16.gmra.mrb[12].mxu1 %v6740_v24  ;;  %v11972_v24 = vld [vmem:[%s14541_s5 + $0x108] sm:$0xff]  }
 0x680   : > { %11051 = vmatprep.mubr.msk.bf16.mxu1 %vm12020_vm0, %v14568_v35 }
 0x687   : > { %11052 = vmatmul.mubr.bf16.gmra.mrb[16].mxu1 %v6741_v33  ;;  %v7259_v33 = vld [vmem:[#allocation3 + $0x2d] sm:$0xff] }
 0x688   : > { %11055 = vmatprep.mubr.msk.bf16.mxu1 %vm12020_vm0, %v14568_v35 }
 0x68f   : > { %11056 = vmatmul.mubr.bf16.gmra.mrb[20].mxu1 %v6742_v55 }
 0x690   : > { %11075 = vmatprep.mubr.msk.bf16.mxu1 %vm12020_vm0, %v14568_v35 }
 0x697   : > { %11076 = vmatmul.mubr.bf16.vlgmr.msra.gmra.mrb[24].mxu1 %v13746_v28  ;;  %v11958_v28 = vld [vmem:[%s14541_s5 + $0x98] sm:$0xff]  }
 0x698   : > { %11112 = vmatpush3.bf16.msra.mxu1 %v11955_v51  ;;  %11079 = vmatprep.mubr.msk.bf16.mxu1 %vm12020_vm0, %v14568_v35  ;;  %v11973_v51 = vld [vmem:[%s14541_s5 + $0x110] sm:$0xff]  }
 0x699   : > { %11113 = vmatprep.subr.bf16.mxu1 %v14568_v35 }
 0x69c   : > { %11114 = vmatpush3.bf16.msra.mxu1 %v11956_v17 }
 0x69d   : > { %11115 = vmatprep.subr.bf16.mxu1 %v14568_v35 }
 0x69f   : > { %11080 = vmatmul.mubr.bf16.gmra.mrb[28].mxu1 %v13744_v21  ;;  %v11960_v21 = vld [vmem:[%s14541_s5 + $0xa8] sm:$0xff]  }
 0x6a0   : > { %11083 = vmatprep.mubr.msk.bf16.mxu1 %vm12020_vm0, %v14568_v35  ;;  %11116 = vmatpush3.bf16.msra.mxu1 %v11957_v31  ;;  %v7274_v31 = vpack.c.bf16 %v7259_v33, %v7258_v40 }
 0x6a1   : > { %11117 = vmatprep.subr.bf16.mxu1 %v14568_v35 }
 0x6a4   : > { %11118 = vmatpush3.bf16.msra.mxu1 %v11958_v28  ;;  %v11974_v28 = vld [vmem:[%s14541_s5 + $0x118] sm:$0xff]  }
 0x6a5   : > { %11119 = vmatprep.subr.bf16.mxu1 %v14568_v35 }
 0x6a7   : > { %11084 = vmatmul.mubr.bf16.gmra.mrb[32].mxu1 %v13757_v53  ;;  %v11962_v53 = vld [vmem:[%s14541_s5 + $0xb8] sm:$0xff]  }
 0x6a8   : > { %11087 = vmatprep.mubr.msk.bf16.mxu1 %vm12020_vm0, %v14568_v35  ;;  %11120 = vmatpush3.bf16.msra.mxu1 %v11959_v23 }
 0x6a9   : > { %11121 = vmatprep.subr.bf16.mxu1 %v14568_v35 }
 0x6ac   : > { %11122 = vmatpush3.bf16.msra.mxu1 %v11960_v21  ;;  %v7261_v21 = vld [vmem:[#allocation3 + $0x3d] sm:$0xff] }
 0x6ad   : > { %11123 = vmatprep.subr.bf16.mxu1 %v14568_v35 }
 0x6af   : > { %11088 = vmatmul.mubr.bf16.gmra.mrb[36].mxu1 %v13752_v62  ;;  %v6691_v62 = vld [vmem:[#allocation3 + $0x80] sm:$0x1f] }
 0x6b0   : > { %11091 = vmatprep.mubr.msk.bf16.mxu1 %vm12020_vm0, %v14568_v35  ;;  %11124 = vmatpush3.bf16.msra.mxu1 %v11961_v49 }
 0x6b1   : > { %11125 = vmatprep.subr.bf16.mxu1 %v14568_v35 }
 0x6b4   : > { %11126 = vmatpush3.bf16.msra.mxu1 %v11962_v53 }
 0x6b5   : > { %11163 = vmatprep.subr.bf16.mxu1 %v14568_v35 }
 0x6b7   : > { %11092 = vmatmul.mubr.bf16.gmra.mrb[40].mxu1 %v13780_v16  ;;  %v6700_v16 = vpack.c.bf16 %v6691_v62, %v6691_v62  ;;  %v7260_v62 = vld [vmem:[#allocation3 + $0x35] sm:$0xff] }
 0x6b8   : > { %11095 = vmatprep.mubr.msk.bf16.mxu1 %vm12020_vm0, %v14568_v35 }
 0x6bf   : > { %11096 = vmatmul.mubr.bf16.gmra.mrb[44].mxu1 %v13773_v18  ;;  %v7054_v18 = vld [vmem:[#allocation3 + $0x2] sm:$0xff] }
 0x6c0   : > { %11099 = vmatprep.mubr.msk.bf16.mxu1 %vm12020_vm0, %v14568_v35  ;;  %v7071_v30 = vpack.c.bf16 %v7055_v42, %v7054_v18  ;;  %v7275_v42 = vpack.c.bf16 %v7261_v21, %v7260_v62  ;;  %v7272_v62 = vld [vmem:[#allocation3 + $0x95] sm:$0x1f] }
 0x6c7   : > { %11100 = vmatmul.mubr.bf16.gmra.mrb[48].mxu1 %v13804_v36  ;;  %v11963_v36 = vld [vmem:[%s14541_s5 + $0xc0] sm:$0xff]  }
 0x6c8   : > { %11103 = vmatprep.mubr.msk.bf16.mxu1 %vm12020_vm0, %v14568_v35 }
 0x6cf   : > { %11104 = vmatmul.mubr.bf16.gmra.mrb[52].mxu1 %v13795_v50  ;;  %v11964_v50 = vld [vmem:[%s14541_s5 + $0xc8] sm:$0xff]  }
 0x6d0   : > { %11107 = vmatprep.mubr.msk.bf16.mxu1 %vm12020_vm0, %v14568_v35 }
 0x6d7   : > { %11108 = vmatmul.mubr.bf16.gmra.mrb[56].mxu1 %v6700_v16  ;;  %v11975_v16 = vld [vmem:[%s14541_s5 + $0x120] sm:$0xff]  }
 0x6d8   : > { %11127 = vmatprep.mubr.msk.bf16.mxu1 %vm12020_vm0, %v14568_v35 }
 0x6df   : > { %11128 = vmatmul.mubr.bf16.vlgmr.msra.gmra.mrb[60].mxu1 %v7071_v30 }
 0x6e0   : > { %11164 = vmatpush3.bf16.msra.mxu1 %v11963_v36  ;;  %11131 = vmatprep.mubr.msk.bf16.mxu1 %vm12020_vm0, %v14568_v35  ;;  %v11976_v36 = vld [vmem:[%s14541_s5 + $0x128] sm:$0xff]  }
 0x6e1   : > { %11165 = vmatprep.subr.bf16.mxu1 %v14568_v35 }
 0x6e4   : > { %11166 = vmatpush3.bf16.msra.mxu1 %v11964_v50  ;;  %v7262_v50 = vld [vmem:[#allocation3 + $0x45] sm:$0xff] }
 0x6e5   : > { %11167 = vmatprep.subr.bf16.mxu1 %v14568_v35  ;;  %v7276_v59 = vpack.c.bf16 %v7263_v27, %v7262_v50  ;;  %v7459_v50 = vld [vmem:[#allocation3 + $0x1e] sm:$0xff] }
 0x6e7   : > { %11132 = vmatmul.mubr.bf16.gmra.mrb[64].mxu1 %v7072_v38  ;;  %v11977_v38 = vld [vmem:[%s14541_s5 + $0x130] sm:$0xff]  }
 0x6e8   : > { %11135 = vmatprep.mubr.msk.bf16.mxu1 %vm12020_vm0, %v14568_v35  ;;  %11168 = vmatpush3.bf16.msra.mxu1 %v11965_v12 }
 0x6e9   : > { %11169 = vmatprep.subr.bf16.mxu1 %v14568_v35 }
 0x6ec   : > { %11170 = vmatpush3.bf16.msra.mxu1 %v11966_v48 }
 0x6ed   : > { %11171 = vmatprep.subr.bf16.mxu1 %v14568_v35 }
 0x6ef   : > { %11136 = vmatmul.mubr.bf16.gmra.mrb[68].mxu1 %v7073_v44 }
 0x6f0   : > { %11139 = vmatprep.mubr.msk.bf16.mxu1 %vm12020_vm0, %v14568_v35  ;;  %11172 = vmatpush3.bf16.msra.mxu1 %v11967_v39  ;;  %v11978_v39 = vld [vmem:[%s14541_s5 + $0x138] sm:$0xff]  }
 0x6f1   : > { %11173 = vmatprep.subr.bf16.mxu1 %v14568_v35 }
 0x6f4   : > { %11174 = vmatpush3.bf16.msra.mxu1 %v11968_v61  ;;  %v7265_v61 = vld [vmem:[#allocation3 + $0x5d] sm:$0xff] }
 0x6f5   : > { %11175 = vmatprep.subr.bf16.mxu1 %v14568_v35 }
 0x6f7   : > { %11140 = vmatmul.mubr.bf16.gmra.mrb[72].mxu1 %v7074_v5 }
 0x6f8   : > { %11143 = vmatprep.mubr.msk.bf16.mxu1 %vm12020_vm0, %v14568_v35  ;;  %11176 = vmatpush3.bf16.msra.mxu1 %v11969_v37 }
 0x6f9   : > { %11177 = vmatprep.subr.bf16.mxu1 %v14568_v35 }
 0x6fc   : > { %11178 = vmatpush3.bf16.msra.mxu1 %v11970_v13  ;;  %v7264_v13 = vld [vmem:[#allocation3 + $0x55] sm:$0xff] }
 0x6fd   : > { %11215 = vmatprep.subr.bf16.mxu1 %v14568_v35 }
 0x6ff   : > { %11144 = vmatmul.mubr.bf16.gmra.mrb[76].mxu1 %v7075_v8 }
 0x700   : > { %11147 = vmatprep.mubr.msk.bf16.mxu1 %vm12020_vm0, %v14568_v35 }
 0x707   : > { %11148 = vmatmul.mubr.bf16.gmra.mrb[80].mxu1 %v7076_v41  ;;  %v7277_v41 = vpack.c.bf16 %v7265_v61, %v7264_v13  ;;  %v7460_v13 = vld [vmem:[#allocation3 + $0x26] sm:$0xff] }
 0x708   : > { %11151 = vmatprep.mubr.msk.bf16.mxu1 %vm12020_vm0, %v14568_v35 }
 0x70f   : > { %11152 = vmatmul.mubr.bf16.gmra.mrb[84].mxu1 %v7077_v6 }
 0x710   : > { %11155 = vmatprep.mubr.msk.bf16.mxu1 %vm12020_vm0, %v14568_v35 }
 0x717   : > { %11156 = vmatmul.mubr.bf16.gmra.mrb[88].mxu1 %v7078_v4  ;;  %v7266_v4 = vld [vmem:[#allocation3 + $0x65] sm:$0xff] }
 0x718   : > { %11159 = vmatprep.mubr.msk.bf16.mxu1 %vm12020_vm0, %v14568_v35  ;;  %v7278_v1 = vpack.c.bf16 %v7267_v9, %v7266_v4 }
 0x71f   : > { %11160 = vmatmul.mubr.bf16.gmra.mrb[92].mxu1 %v7079_v19 }
 0x720   : > { %11179 = vmatprep.mubr.msk.bf16.mxu1 %vm12020_vm0, %v14568_v35 }
 0x722   : > { %v13983_v0 = vpop.f32.mrb[244].mxu1 }
 0x723   : > { %v11025_v11 = vpop.f32.mrb[245].mxu1 }
 0x724   : > { %v6845_v29 = vpop.f32.mrb[246].mxu1 }
 0x725   : > { %v11026_v25 = vpop.f32.mrb[247].mxu1 }
 0x727   : > { %11180 = vmatmul.mubr.bf16.vlgmr.msra.gmra.mrb[96].mxu1 %v7273_v60 }
 0x728   : > { %11216 = vmatpush3.bf16.msra.mxu1 %v11971_v54  ;;  %11183 = vmatprep.mubr.msk.bf16.mxu1 %vm12020_vm0, %v14568_v35  ;;  %v7269_v54 = vld [vmem:[#allocation3 + $0x7d] sm:$0xff] }
 0x729   : > { %11217 = vmatprep.subr.bf16.mxu1 %v14568_v35 }
 0x72a   : > { %v13994_v46 = vpop.f32.mrb[248].mxu1 }
 0x72b   : > { %v11029_v2 = vpop.f32.mrb[249].mxu1 }
 0x72c   : > { %v13996_v55 = vpop.f32.mrb[250].mxu1  ;;  %11218 = vmatpush3.bf16.msra.mxu1 %v11972_v24  ;;  %v7268_v24 = vld [vmem:[#allocation3 + $0x75] sm:$0xff] }
 0x72d   : > { %v11030_v17 = vpop.f32.mrb[251].mxu1  ;;  %11219 = vmatprep.subr.bf16.mxu1 %v14568_v35  ;;  %v7279_v33 = vpack.c.bf16 %v7269_v54, %v7268_v24 }
 0x72e   : > { %v7271_v17 = vld [vmem:[#allocation3 + $0x8d] sm:$0xff] }
 0x72f   : > { %11184 = vmatmul.mubr.bf16.gmra.mrb[100].mxu1 %v7274_v31 }
 0x730   : > { %11187 = vmatprep.mubr.msk.bf16.mxu1 %vm12020_vm0, %v14568_v35  ;;  %11220 = vmatpush3.bf16.msra.mxu1 %v11973_v51  ;;  %v7270_v51 = vld [vmem:[#allocation3 + $0x85] sm:$0xff] }
 0x731   : > { %11221 = vmatprep.subr.bf16.mxu1 %v14568_v35  ;;  %v7280_v21 = vpack.c.bf16 %v7271_v17, %v7270_v51 }
 0x732   : > { %v6857_v23 = vpop.f32.mrb[252].mxu1 }
 0x733   : > { %v11033_v49 = vpop.f32.mrb[253].mxu1 }
 0x734   : > { %v14008_v53 = vpop.f32.mrb[254].mxu1  ;;  %11222 = vmatpush3.bf16.msra.mxu1 %v11974_v28 }
 0x735   : > { %v11034_v18 = vpop.f32.mrb[255].mxu1  ;;  %11223 = vmatprep.subr.bf16.mxu1 %v14568_v35 }
 0x737   : > { %11188 = vmatmul.mubr.bf16.gmra.mrb[104].mxu1 %v7275_v42 }
 0x738   : > { %11191 = vmatprep.mubr.msk.bf16.mxu1 %vm12020_vm0, %v14568_v35  ;;  %11224 = vmatpush3.bf16.msra.mxu1 %v11975_v16 }
 0x739   : > { %11225 = vmatprep.subr.bf16.mxu1 %v14568_v35 }
 0x73a   : > { %v14020_v30 = vpop.f32.mrb[0].mxu1 }
 0x73b   : > { %v11037_v57 = vpop.f32.mrb[1].mxu1 }
 0x73c   : > { %v14022_v12 = vpop.f32.mrb[2].mxu1  ;;  %11226 = vmatpush3.bf16.msra.mxu1 %v11976_v36  ;;  %v7281_v36 = vpack.c.bf16 %v7272_v62, %v7272_v62  ;;  %v7465_v62 = vld [vmem:[#allocation3 + $0x4e] sm:$0xff] }
 0x73d   : > { %v11038_v48 = vpop.f32.mrb[3].mxu1  ;;  %11227 = vmatprep.subr.bf16.mxu1 %v14568_v35 }
 0x73e   : > { %v7458_v48 = vld [vmem:[#allocation3 + $0x16] sm:$0xff] }
 0x73f   : > { %11192 = vmatmul.mubr.bf16.gmra.mrb[108].mxu1 %v7276_v59  ;;  %v7475_v61 = vpack.c.bf16 %v7459_v50, %v7458_v48  ;;  %v7467_v48 = vld [vmem:[#allocation3 + $0x5e] sm:$0xff] }
 0x740   : > { %11195 = vmatprep.mubr.msk.bf16.mxu1 %vm12020_vm0, %v14568_v35  ;;  %11228 = vmatpush3.bf16.msra.mxu1 %v11977_v38 }
 0x741   : > { %11229 = vmatprep.subr.bf16.mxu1 %v14568_v35 }
 0x742   : > { %v14034_v44 = vpop.f32.mrb[4].mxu1 }
 0x743   : > { %v11041_v37 = vpop.f32.mrb[5].mxu1 }
 0x744   : > { %v6875_v5 = vpop.f32.mrb[6].mxu1  ;;  %11230 = vmatpush3.bf16.msra.mxu1 %v11978_v39  ;;  %v11979_v39 = vld [vmem:[%s14541_s5 + $0x140] sm:$0xff]  }
 0x745   : > { %v11042_v8 = vpop.f32.mrb[7].mxu1  ;;  %11267 = vmatprep.subr.bf16.mxu1 %v14568_v35  ;;  %v11980_v5 = vld [vmem:[%s14541_s5 + $0x148] sm:$0xff]  }
 0x746   : > { %v7461_v8 = vld [vmem:[#allocation3 + $0x2e] sm:$0xff] }
 0x747   : > { %11196 = vmatmul.mubr.bf16.gmra.mrb[112].mxu1 %v7277_v41 }
 0x748   : > { %11199 = vmatprep.mubr.msk.bf16.mxu1 %vm12020_vm0, %v14568_v35 }
 0x74a   : > { %v14039_v6 = vpop.f32.mrb[8].mxu1 }
 0x74b   : > { %v11045_v19 = vpop.f32.mrb[9].mxu1 }
 0x74c   : > { %v14041_v56 = vpop.f32.mrb[10].mxu1  ;;  %v11981_v19 = vld [vmem:[%s14541_s5 + $0x150] sm:$0xff]  }
 0x74d   : > { %v11046_v11 = vpop.f32.mrb[11].mxu1 }
 0x74f   : > { %11200 = vmatmul.mubr.bf16.gmra.mrb[116].mxu1 %v7278_v1  ;;  %v7476_v1 = vpack.c.bf16 %v7461_v8, %v7460_v13  ;;  %v7468_v13 = vld [vmem:[#allocation3 + $0x66] sm:$0xff]  ;;  %v7469_v8 = vld [vmem:[#allocation3 + $0x6e] sm:$0xff] }
 0x750   : > { %11203 = vmatprep.mubr.msk.bf16.mxu1 %vm12020_vm0, %v14568_v35 }
 0x752   : > { %v6887_v29 = vpop.f32.mrb[12].mxu1 }
 0x753   : > { %v11049_v60 = vpop.f32.mrb[13].mxu1 }
 0x754   : > { %v14045_v25 = vpop.f32.mrb[14].mxu1  ;;  %v7463_v60 = vld [vmem:[#allocation3 + $0x3e] sm:$0xff] }
 0x755   : > { %v11050_v40 = vpop.f32.mrb[15].mxu1 }
 0x757   : > { %11204 = vmatmul.mubr.bf16.gmra.mrb[120].mxu1 %v7279_v33  ;;  %v7462_v33 = vld [vmem:[#allocation3 + $0x36] sm:$0xff] }
 0x758   : > { %11207 = vmatprep.mubr.msk.bf16.mxu1 %vm12020_vm0, %v14568_v35  ;;  %v7477_v51 = vpack.c.bf16 %v7463_v60, %v7462_v33 }
 0x75a   : > { %v6894_v2 = vpop.f32.mrb[16].mxu1 }
 0x75b   : > { %v11053_v31 = vpop.f32.mrb[17].mxu1 }
 0x75c   : > { %v14049_v28 = vpop.f32.mrb[18].mxu1  ;;  %v11984_v31 = vld [vmem:[%s14541_s5 + $0x168] sm:$0xff]  }
 0x75d   : > { %v11054_v23 = vpop.f32.mrb[19].mxu1 }
 0x75f   : > { %11208 = vmatmul.mubr.bf16.gmra.mrb[124].mxu1 %v7280_v21  ;;  %v7464_v21 = vld [vmem:[#allocation3 + $0x46] sm:$0xff] }
 0x760   : > { %11211 = vmatprep.mubr.msk.bf16.mxu1 %vm12020_vm0, %v14568_v35  ;;  %v7478_v50 = vpack.c.bf16 %v7465_v62, %v7464_v21 }
 0x762   : > { %v14053_v49 = vpop.f32.mrb[20].mxu1 }
 0x763   : > { %v11057_v16 = vpop.f32.mrb[21].mxu1 }
 0x764   : > { %v6904_v18 = vpop.f32.mrb[22].mxu1 }
 0x765   : > { %v11058_v42 = vpop.f32.mrb[23].mxu1 }
 0x766   : > { %v11985_v42 = vld [vmem:[%s14541_s5 + $0x170] sm:$0xff]  }
 0x767   : > { %11212 = vmatmul.mubr.bf16.gmra.mrb[128].mxu1 %v7281_v36 }
 0x768   : > { %11231 = vmatprep.mubr.msk.bf16.mxu1 %vm12020_vm0, %v14568_v35 }
 0x76a   : > { %v6989_v27 = vpop.f32.mrb[24].mxu1 }
 0x76b   : > { %v11077_v57 = vpop.f32.mrb[25].mxu1  ;;  %v14058_v38 = vadd.f32 %v6989_v27, %v13983_v0 }
 0x76c   : > { %v6992_v59 = vpop.f32.mrb[26].mxu1 }
 0x76d   : > { %v11078_v37 = vpop.f32.mrb[27].mxu1 }
 0x76f   : > { %11232 = vmatmul.mubr.bf16.vlgmr.msra.gmra.mrb[132].mxu1 %v7475_v61 }
 0x770   : > { %11268 = vmatpush3.bf16.msra.mxu1 %v11979_v39  ;;  %11235 = vmatprep.mubr.msk.bf16.mxu1 %vm12020_vm0, %v14568_v35 }
 0x771   : > { %11269 = vmatprep.subr.bf16.mxu1 %v14568_v35 }
 0x772   : > { %v6996_v0 = vpop.f32.mrb[28].mxu1 }
 0x773   : > { %v11081_v41 = vpop.f32.mrb[29].mxu1  ;;  %v14070_v4 = vadd.f32 %v6996_v0, %v13994_v46  ;;  %v11982_v46 = vld [vmem:[%s14541_s5 + $0x158] sm:$0xff]  }
 0x774   : > { %v6999_v9 = vpop.f32.mrb[30].mxu1  ;;  %11270 = vmatpush3.bf16.msra.mxu1 %v11980_v5 }
 0x775   : > { %v11082_v11 = vpop.f32.mrb[31].mxu1  ;;  %11271 = vmatprep.subr.bf16.mxu1 %v14568_v35  ;;  %v14077_v29 = vadd.f32 %v6999_v9, %v13996_v55  ;;  %v11983_v55 = vld [vmem:[%s14541_s5 + $0x160] sm:$0xff]  }
 0x776   : > { %v7480_v11 = vpack.c.bf16 %v7469_v8, %v7468_v13  ;;  %v11988_v13 = vld [vmem:[%s14541_s5 + $0x188] sm:$0xff]  }
 0x777   : > { %11236 = vmatmul.mubr.bf16.gmra.mrb[136].mxu1 %v7476_v1  ;;  %v7662_v8 = vld [vmem:[#allocation3 + $0x27] sm:$0xff] }
 0x778   : > { %11239 = vmatprep.mubr.msk.bf16.mxu1 %vm12020_vm0, %v14568_v35  ;;  %11272 = vmatpush3.bf16.msra.mxu1 %v11981_v19 }
 0x779   : > { %11273 = vmatprep.subr.bf16.mxu1 %v14568_v35 }
 0x77a   : > { %v7004_v54 = vpop.f32.mrb[32].mxu1 }
 0x77b   : > { %v11085_v24 = vpop.f32.mrb[33].mxu1  ;;  %v7471_v54 = vld [vmem:[#allocation3 + $0x7e] sm:$0xff] }
 0x77c   : > { %v7006_v40 = vpop.f32.mrb[34].mxu1  ;;  %11274 = vmatpush3.bf16.msra.mxu1 %v11982_v46 }
 0x77d   : > { %v11086_v2 = vpop.f32.mrb[35].mxu1  ;;  %11275 = vmatprep.subr.bf16.mxu1 %v14568_v35  ;;  %v14090_v17 = vadd.f32 %v7006_v40, %v14008_v53  ;;  %v7470_v40 = vld [vmem:[#allocation3 + $0x76] sm:$0xff] }
 0x77e   : > { %v7472_v2 = vld [vmem:[#allocation3 + $0x86] sm:$0xff] }
 0x77f   : > { %11240 = vmatmul.mubr.bf16.gmra.mrb[140].mxu1 %v7477_v51  ;;  %v7473_v51 = vld [vmem:[#allocation3 + $0x8e] sm:$0xff] }
 0x780   : > { %11243 = vmatprep.mubr.msk.bf16.mxu1 %vm12020_vm0, %v14568_v35  ;;  %11276 = vmatpush3.bf16.msra.mxu1 %v11983_v55  ;;  %v7481_v55 = vpack.c.bf16 %v7471_v54, %v7470_v40  ;;  %v7482_v62 = vpack.c.bf16 %v7473_v51, %v7472_v2  ;;  %v11991_v2 = vld [vmem:[%s14541_s5 + $0x1a0] sm:$0xff]  }
 0x781   : > { %11277 = vmatprep.subr.bf16.mxu1 %v14568_v35 }
 0x782   : > { %v7011_v23 = vpop.f32.mrb[36].mxu1 }
 0x783   : > { %v11089_v16 = vpop.f32.mrb[37].mxu1  ;;  %v14099_v18 = vadd.f32 %v7011_v23, %v14020_v30  ;;  %v11986_v30 = vld [vmem:[%s14541_s5 + $0x178] sm:$0xff]  }
 0x784   : > { %v7014_v53 = vpop.f32.mrb[38].mxu1  ;;  %11278 = vmatpush3.bf16.msra.mxu1 %v11984_v31 }
 0x785   : > { %v11090_v36 = vpop.f32.mrb[39].mxu1  ;;  %11279 = vmatprep.subr.bf16.mxu1 %v14568_v35  ;;  %v14106_v27 = vadd.f32 %v7014_v53, %v14022_v12  ;;  %v7466_v12 = vld [vmem:[#allocation3 + $0x56] sm:$0xff] }
 0x786   : > { %v7479_v5 = vpack.c.bf16 %v7467_v48, %v7466_v12  ;;  %v7474_v53 = vld [vmem:[#allocation3 + $0x96] sm:$0x1f]  ;;  %v7661_v48 = vld [vmem:[#allocation3 + $0x1f] sm:$0xff] }
 0x787   : > { %11244 = vmatmul.mubr.bf16.gmra.mrb[144].mxu1 %v7478_v50  ;;  %v7660_v12 = vld [vmem:[#allocation3 + $0x17] sm:$0xff] }
 0x788   : > { %11247 = vmatprep.mubr.msk.bf16.mxu1 %vm12020_vm0, %v14568_v35  ;;  %11280 = vmatpush3.bf16.msra.mxu1 %v11985_v42 }
 0x789   : > { %11281 = vmatprep.subr.bf16.mxu1 %v14568_v35 }
 0x78a   : > { %v7019_v57 = vpop.f32.mrb[40].mxu1 }
 0x78b   : > { %v11093_v59 = vpop.f32.mrb[41].mxu1  ;;  %v14115_v39 = vadd.f32 %v7019_v57, %v14034_v44  ;;  %v7483_v57 = vpack.c.bf16 %v7474_v53, %v7474_v53  ;;  %v7667_v53 = vld [vmem:[#allocation3 + $0x4f] sm:$0xff] }
 0x78c   : > { %v7022_v61 = vpop.f32.mrb[42].mxu1  ;;  %11282 = vmatpush3.bf16.msra.mxu1 %v11986_v30 }
 0x78d   : > { %v11094_v37 = vpop.f32.mrb[43].mxu1  ;;  %11319 = vmatprep.subr.bf16.mxu1 %v14568_v35 }
 0x78f   : > { %11248 = vmatmul.mubr.bf16.gmra.mrb[148].mxu1 %v7479_v5  ;;  %v7677_v5 = vpack.c.bf16 %v7661_v48, %v7660_v12  ;;  %v7669_v12 = vld [vmem:[#allocation3 + $0x5f] sm:$0xff] }
 0x790   : > { %11251 = vmatprep.mubr.msk.bf16.mxu1 %vm12020_vm0, %v14568_v35 }
 0x792   : > { %v7026_v0 = vpop.f32.mrb[44].mxu1 }
 0x793   : > { %v11097_v41 = vpop.f32.mrb[45].mxu1  ;;  %v14121_v9 = vadd.f32 %v7026_v0, %v14039_v6 }
 0x794   : > { %v7029_v44 = vpop.f32.mrb[46].mxu1  ;;  %v7663_v41 = vld [vmem:[#allocation3 + $0x2f] sm:$0xff] }
 0x795   : > { %v11098_v19 = vpop.f32.mrb[47].mxu1  ;;  %v14124_v1 = vadd.f32 %v7029_v44, %v14041_v56 }
 0x797   : > { %11252 = vmatmul.mubr.bf16.gmra.mrb[152].mxu1 %v7480_v11 }
 0x798   : > { %11255 = vmatprep.mubr.msk.bf16.mxu1 %vm12020_vm0, %v14568_v35 }
 0x79a   : > { %v7034_v46 = vpop.f32.mrb[48].mxu1 }
 0x79b   : > { %v11101_v60 = vpop.f32.mrb[49].mxu1  ;;  %v11989_v46 = vld [vmem:[%s14541_s5 + $0x190] sm:$0xff]  }
 0x79c   : > { %v7036_v24 = vpop.f32.mrb[50].mxu1 }
 0x79d   : > { %v11102_v33 = vpop.f32.mrb[51].mxu1  ;;  %v14129_v6 = vadd.f32 %v7036_v24, %v14045_v25  ;;  %v7678_v24 = vpack.c.bf16 %v7663_v41, %v7662_v8  ;;  %v7670_v8 = vld [vmem:[#allocation3 + $0x67] sm:$0xff]  ;;  %v7671_v41 = vld [vmem:[#allocation3 + $0x6f] sm:$0xff] }
 0x79e   : > { %v7665_v33 = vld [vmem:[#allocation3 + $0x3f] sm:$0xff] }
 0x79f   : > { %11256 = vmatmul.mubr.bf16.gmra.mrb[156].mxu1 %v7481_v55 }
 0x7a0   : > { %11259 = vmatprep.mubr.msk.bf16.mxu1 %vm12020_vm0, %v14568_v35 }
 0x7a2   : > { %v7041_v56 = vpop.f32.mrb[52].mxu1 }
 0x7a3   : > { %v11105_v31 = vpop.f32.mrb[53].mxu1  ;;  %v7664_v56 = vld [vmem:[#allocation3 + $0x37] sm:$0xff] }
 0x7a4   : > { %v7043_v23 = vpop.f32.mrb[54].mxu1 }
 0x7a5   : > { %v11106_v21 = vpop.f32.mrb[55].mxu1  ;;  %v14134_v16 = vadd.f32 %v7043_v23, %v14049_v28  ;;  %v7679_v23 = vpack.c.bf16 %v7665_v33, %v7664_v56 }
 0x7a6   : > { %v11992_v21 = vld [vmem:[%s14541_s5 + $0x1a8] sm:$0xff]  }
 0x7a7   : > { %11260 = vmatmul.mubr.bf16.gmra.mrb[160].mxu1 %v7482_v62 }
 0x7a8   : > { %11263 = vmatprep.mubr.msk.bf16.mxu1 %vm12020_vm0, %v14568_v35 }
 0x7aa   : > { %v7048_v25 = vpop.f32.mrb[56].mxu1 }
 0x7ab   : > { %v14139_v42 = vadd.f32 %v7048_v25, %v14053_v49  ;;  %v11109_v36 = vpop.f32.mrb[57].mxu1  ;;  %v11987_v49 = vld [vmem:[%s14541_s5 + $0x180] sm:$0xff]   ;;  %v7666_v25 = vld [vmem:[#allocation3 + $0x47] sm:$0xff] }
 0x7ac   : > { %v7051_v50 = vpop.f32.mrb[58].mxu1 }
 0x7ad   : > { %v11110_v30 = vpop.f32.mrb[59].mxu1 }
 0x7ae   : > { %v11993_v30 = vld [vmem:[%s14541_s5 + $0x1b0] sm:$0xff]  }
 0x7af   : > { %11264 = vmatmul.mubr.bf16.gmra.mrb[164].mxu1 %v7483_v57 }
 0x7b0   : > { %11283 = vmatprep.mubr.msk.bf16.mxu1 %vm12020_vm0, %v14568_v35 }
 0x7b2   : > { %v7179_v28 = vpop.f32.mrb[60].mxu1 }
 0x7b3   : > { %v14144_v59 = vadd.f32 %v7179_v28, %v14058_v38  ;;  %v11129_v61 = vpop.f32.mrb[61].mxu1  ;;  %v7680_v28 = vpack.c.bf16 %v7667_v53, %v7666_v25 }
 0x7b4   : > { %v7182_v37 = vpop.f32.mrb[62].mxu1 }
 0x7b5   : > { %v11130_v0 = vpop.f32.mrb[63].mxu1 }
 0x7b7   : > { %11284 = vmatmul.mubr.bf16.vlgmr.msra.gmra.mrb[168].mxu1 %v7677_v5  ;;  %v7668_v5 = vld [vmem:[#allocation3 + $0x57] sm:$0xff] }
 0x7b8   : > { %11320 = vmatpush3.bf16.msra.mxu1 %v11987_v49  ;;  %11287 = vmatprep.mubr.msk.bf16.mxu1 %vm12020_vm0, %v14568_v35 }
 0x7b9   : > { %11321 = vmatprep.subr.bf16.mxu1 %v14568_v35 }
 0x7ba   : > { %v7186_v38 = vpop.f32.mrb[64].mxu1 }
 0x7bb   : > { %v14156_v44 = vadd.f32 %v7186_v38, %v14070_v4  ;;  %v11133_v19 = vpop.f32.mrb[65].mxu1  ;;  %v11990_v4 = vld [vmem:[%s14541_s5 + $0x198] sm:$0xff]  }
 0x7bc   : > { %v7189_v11 = vpop.f32.mrb[66].mxu1  ;;  %11322 = vmatpush3.bf16.msra.mxu1 %v11988_v13  ;;  %v7681_v13 = vpack.c.bf16 %v7669_v12, %v7668_v5  ;;  %v11995_v5 = vld [vmem:[%s14541_s5 + $0x1c0] sm:$0xff]  }
 0x7bd   : > { %v14162_v54 = vadd.f32 %v7189_v11, %v14077_v29  ;;  %v11134_v60 = vpop.f32.mrb[67].mxu1  ;;  %11323 = vmatprep.subr.bf16.mxu1 %v14568_v35 }
 0x7bf   : > { %11288 = vmatmul.mubr.bf16.gmra.mrb[172].mxu1 %v7678_v24  ;;  %v7682_v24 = vpack.c.bf16 %v7671_v41, %v7670_v8 }
 0x7c0   : > { %11291 = vmatprep.mubr.msk.bf16.mxu1 %vm12020_vm0, %v14568_v35  ;;  %11324 = vmatpush3.bf16.msra.mxu1 %v11989_v46 }
 0x7c1   : > { %11325 = vmatprep.subr.bf16.mxu1 %v14568_v35 }
 0x7c2   : > { %v7194_v40 = vpop.f32.mrb[68].mxu1 }
 0x7c3   : > { %v11137_v55 = vpop.f32.mrb[69].mxu1  ;;  %v7673_v40 = vld [vmem:[#allocation3 + $0x7f] sm:$0xff] }
 0x7c4   : > { %v7196_v29 = vpop.f32.mrb[70].mxu1  ;;  %11326 = vmatpush3.bf16.msra.mxu1 %v11990_v4 }
 0x7c5   : > { %v14175_v51 = vadd.f32 %v7196_v29, %v14090_v17  ;;  %v11138_v31 = vpop.f32.mrb[71].mxu1  ;;  %11327 = vmatprep.subr.bf16.mxu1 %v14568_v35  ;;  %v7672_v29 = vld [vmem:[#allocation3 + $0x77] sm:$0xff] }
 0x7c6   : > { %v7674_v31 = vld [vmem:[#allocation3 + $0x87] sm:$0xff] }
 0x7c7   : > { %11292 = vmatmul.mubr.bf16.gmra.mrb[176].mxu1 %v7679_v23  ;;  %v7675_v23 = vld [vmem:[#allocation3 + $0x8f] sm:$0xff] }
 0x7c8   : > { %11295 = vmatprep.mubr.msk.bf16.mxu1 %vm12020_vm0, %v14568_v35  ;;  %11328 = vmatpush3.bf16.msra.mxu1 %v11991_v2  ;;  %v7683_v2 = vpack.c.bf16 %v7673_v40, %v7672_v29 }
 0x7c9   : > { %11329 = vmatprep.subr.bf16.mxu1 %v14568_v35 }
 0x7ca   : > { %v7201_v62 = vpop.f32.mrb[72].mxu1 }
 0x7cb   : > { %v14185_v17 = vadd.f32 %v7201_v62, %v14099_v18  ;;  %v11141_v36 = vpop.f32.mrb[73].mxu1  ;;  %v11994_v18 = vld [vmem:[%s14541_s5 + $0x1b8] sm:$0xff]  }
 0x7cc   : > { %v7204_v50 = vpop.f32.mrb[74].mxu1  ;;  %11330 = vmatpush3.bf16.msra.mxu1 %v11992_v21  ;;  %v7684_v36 = vpack.c.bf16 %v7675_v23, %v7674_v31  ;;  %v7884_v31 = vpack.c.bf16 %v7873_v7, %v13975_v34  ;;  %v7877_v34 = vld [vmem:[#allocation3 + $0xa2] sm:$0xff] }
 0x7cd   : > { %v14191_v57 = vadd.f32 %v7204_v50, %v14106_v27  ;;  %v11142_v48 = vpop.f32.mrb[75].mxu1  ;;  %11331 = vmatprep.subr.bf16.mxu1 %v14568_v35  ;;  %v7676_v50 = vld [vmem:[#allocation3 + $0x97] sm:$0x1f] }
 0x7cf   : > { %11296 = vmatmul.mubr.bf16.gmra.mrb[180].mxu1 %v7680_v28 }
 0x7d0   : > { %11299 = vmatprep.mubr.msk.bf16.mxu1 %vm12020_vm0, %v14568_v35  ;;  %11332 = vmatpush3.bf16.msra.mxu1 %v11993_v30 }
 0x7d1   : > { %11333 = vmatprep.subr.bf16.mxu1 %v14568_v35 }
 0x7d2   : > { %v7209_v61 = vpop.f32.mrb[76].mxu1 }
 0x7d3   : > { %v14201_v27 = vadd.f32 %v7209_v61, %v14115_v39  ;;  %v11145_v37 = vpop.f32.mrb[77].mxu1  ;;  %v7685_v61 = vpack.c.bf16 %v7676_v50, %v7676_v50  ;;  %v7876_v50 = vld [vmem:[#allocation3 + $0x9a] sm:$0xff] }
 0x7d4   : > { %v7212_v49 = vpop.f32.mrb[78].mxu1  ;;  %11334 = vmatpush3.bf16.msra.mxu1 %v11994_v18 }
 0x7d5   : > { %v11146_v0 = vpop.f32.mrb[79].mxu1  ;;  %11371 = vmatprep.subr.bf16.mxu1 %v14568_v35 }
 0x7d7   : > { %11300 = vmatmul.mubr.bf16.gmra.mrb[184].mxu1 %v7681_v13 }
 0x7d8   : > { %11303 = vmatprep.mubr.msk.bf16.mxu1 %vm12020_vm0, %v14568_v35 }
 0x7da   : > { %v7216_v38 = vpop.f32.mrb[80].mxu1 }
 0x7db   : > { %v14207_v19 = vadd.f32 %v7216_v38, %v14121_v9  ;;  %v11149_v39 = vpop.f32.mrb[81].mxu1 }
 0x7dc   : > { %v7219_v11 = vpop.f32.mrb[82].mxu1 }
 0x7dd   : > { %v14210_v46 = vadd.f32 %v7219_v11, %v14124_v1  ;;  %v11150_v60 = vpop.f32.mrb[83].mxu1  ;;  %v11999_v11 = vld [vmem:[%s14541_s5 + $0x1e0] sm:$0xff]  }
 0x7df   : > { %11304 = vmatmul.mubr.bf16.gmra.mrb[188].mxu1 %v7682_v24 }
 0x7e0   : > { %11307 = vmatprep.mubr.msk.bf16.mxu1 %vm12020_vm0, %v14568_v35 }
 0x7e2   : > { %v7224_v4 = vpop.f32.mrb[84].mxu1 }
 0x7e3   : > { %v11153_v33 = vpop.f32.mrb[85].mxu1 }
 0x7e4   : > { %v7226_v55 = vpop.f32.mrb[86].mxu1 }
 0x7e5   : > { %v14215_v56 = vadd.f32 %v7226_v55, %v14129_v6  ;;  %v11154_v9 = vpop.f32.mrb[87].mxu1 }
 0x7e7   : > { %11308 = vmatmul.mubr.bf16.gmra.mrb[192].mxu1 %v7683_v2 }
 0x7e8   : > { %11311 = vmatprep.mubr.msk.bf16.mxu1 %vm12020_vm0, %v14568_v35 }
 0x7ea   : > { %v7231_v1 = vpop.f32.mrb[88].mxu1 }
 0x7eb   : > { %v11157_v21 = vpop.f32.mrb[89].mxu1 }
 0x7ec   : > { %v7233_v62 = vpop.f32.mrb[90].mxu1 }
 0x7ed   : > { %v14220_v25 = vadd.f32 %v7233_v62, %v14134_v16  ;;  %v11158_v53 = vpop.f32.mrb[91].mxu1 }
 0x7ef   : > { %11312 = vmatmul.mubr.bf16.gmra.mrb[196].mxu1 %v7684_v36 }
 0x7f0   : > { %11315 = vmatprep.mubr.msk.bf16.mxu1 %vm12020_vm0, %v14568_v35 }
 0x7f2   : > { %v7238_v6 = vpop.f32.mrb[92].mxu1 }
 0x7f3   : > { %v14225_v30 = vadd.f32 %v7238_v6, %v14139_v42  ;;  %v11161_v48 = vpop.f32.mrb[93].mxu1 }
 0x7f4   : > { %v7241_v28 = vpop.f32.mrb[94].mxu1 }
 0x7f5   : > { %v11162_v18 = vpop.f32.mrb[95].mxu1 }
 0x7f6   : > { %v7886_v18 = vpack.c.bf16 %v7877_v34, %v7876_v50  ;;  %v8073_v34 = vld [vmem:[#allocation3 + $0x73] sm:$0xff] }
 0x7f7   : > { %11316 = vmatmul.mubr.bf16.gmra.mrb[200].mxu1 %v7685_v61  ;;  %v7878_v61 = vld [vmem:[#allocation3 + $0xaa] sm:$0x1f] }
 0x7f8   : > { %11335 = vmatprep.mubr.msk.bf16.mxu1 %vm12020_vm0, %v14568_v35 }
 0x7fa   : > { %v7381_v16 = vpop.f32.mrb[96].mxu1 }
 0x7fb   : > { %v14230_v12 = vadd.f32 %v7381_v16, %v14144_v59  ;;  %v11181_v37 = vpop.f32.mrb[97].mxu1  ;;  %v11996_v59 = vld [vmem:[%s14541_s5 + $0x1c8] sm:$0xff]  }
 0x7fc   : > { %v7384_v49 = vpop.f32.mrb[98].mxu1 }
 0x7fd   : > { %v11182_v42 = vpop.f32.mrb[99].mxu1 }
 0x7fe   : > { %v7887_v42 = vpack.c.bf16 %v7878_v61, %v7878_v61 }
 0x7ff   : > { %11336 = vmatmul.mubr.bf16.vlgmr.msra.gmra.mrb[204].mxu1 %v7879_v22 }
 0x800   : > { %11372 = vmatpush3.bf16.msra.mxu1 %v11995_v5  ;;  %11339 = vmatprep.mubr.msk.bf16.mxu1 %vm12020_vm0, %v14568_v35 }
 0x801   : > { %11373 = vmatprep.subr.bf16.mxu1 %v14568_v35 }
 0x802   : > { %v7388_v0 = vpop.f32.mrb[100].mxu1 }
 0x803   : > { %v14245_v13 = vadd.f32 %v7388_v0, %v14156_v44  ;;  %v11185_v38 = vpop.f32.mrb[101].mxu1  ;;  %v11998_v44 = vld [vmem:[%s14541_s5 + $0x1d8] sm:$0xff]  }
 0x804   : > { %v7391_v8 = vpop.f32.mrb[102].mxu1  ;;  %11374 = vmatpush3.bf16.msra.mxu1 %v11996_v59  ;;  %v8064_v59 = vld [vmem:[#allocation3 + $0x2b] sm:$0xff] }
 0x805   : > { %v14251_v63 = vadd.f32 %v7391_v8, %v14162_v54  ;;  %v11186_v22 = vpop.f32.mrb[103].mxu1  ;;  %11375 = vmatprep.subr.bf16.mxu1 %v14568_v35 }
 0x807   : > { %11340 = vmatmul.mubr.bf16.gmra.mrb[208].mxu1 %v7880_v20  ;;  %v12000_v20 = vld [vmem:[%s14541_s5 + $0x1e8] sm:$0xff]  }
 0x808   : > { %11343 = vmatprep.mubr.msk.bf16.mxu1 %vm12020_vm0, %v14568_v35  ;;  %11376 = vmatpush3.bf16.msra.mxu1 %v11997_v3 }
 0x809   : > { %11377 = vmatprep.subr.bf16.mxu1 %v14568_v35 }
 0x80a   : > { %v7396_v41 = vpop.f32.mrb[104].mxu1 }
 0x80b   : > { %v11189_v54 = vpop.f32.mrb[105].mxu1  ;;  %v12004_v41 = vld [vmem:[%s14541_s5 + $0x208] sm:$0xff]  }
 0x80c   : > { %v7398_v39 = vpop.f32.mrb[106].mxu1  ;;  %11378 = vmatpush3.bf16.msra.mxu1 %v11998_v44  ;;  %v8067_v54 = vld [vmem:[#allocation3 + $0x43] sm:$0xff] }
 0x80d   : > { %v14267_v52 = vadd.f32 %v7398_v39, %v14175_v51  ;;  %v11190_v14 = vpop.f32.mrb[107].mxu1  ;;  %11379 = vmatprep.subr.bf16.mxu1 %v14568_v35 }
 0x80f   : > { %11344 = vmatmul.mubr.bf16.gmra.mrb[212].mxu1 %v7881_v43 }
 0x810   : > { %11347 = vmatprep.mubr.msk.bf16.mxu1 %vm12020_vm0, %v14568_v35  ;;  %11380 = vmatpush3.bf16.msra.mxu1 %v11999_v11 }
 0x811   : > { %11381 = vmatprep.subr.bf16.mxu1 %v14568_v35 }
 0x812   : > { %v7403_v60 = vpop.f32.mrb[108].mxu1 }
 0x813   : > { %v14280_v51 = vadd.f32 %v7403_v60, %v14185_v17  ;;  %v11193_v24 = vpop.f32.mrb[109].mxu1  ;;  %v12002_v17 = vld [vmem:[%s14541_s5 + $0x1f8] sm:$0xff]   ;;  %v12005_v60 = vld [vmem:[%s14541_s5 + $0x210] sm:$0xff]  }
 0x814   : > { %v7406_v4 = vpop.f32.mrb[110].mxu1  ;;  %11382 = vmatpush3.bf16.msra.mxu1 %v12000_v20  ;;  %v8066_v20 = vld [vmem:[#allocation3 + $0x3b] sm:$0xff] }
 0x815   : > { %v14286_v15 = vadd.f32 %v7406_v4, %v14191_v57  ;;  %v11194_v43 = vpop.f32.mrb[111].mxu1  ;;  %11383 = vmatprep.subr.bf16.mxu1 %v14568_v35 }
 0x817   : > { %11348 = vmatmul.mubr.bf16.gmra.mrb[216].mxu1 %v7882_v45 }
 0x818   : > { %11351 = vmatprep.mubr.msk.bf16.mxu1 %vm12020_vm0, %v14568_v35  ;;  %11384 = vmatpush3.bf16.msra.mxu1 %v12001_v58  ;;  %v8082_v58 = vpack.c.bf16 %v8067_v54, %v8066_v20 }
 0x819   : > { %11385 = vmatprep.subr.bf16.mxu1 %v14568_v35 }
 0x81a   : > { %v7411_v40 = vpop.f32.mrb[112].mxu1 }
 0x81b   : > { %v14299_v57 = vadd.f32 %v7411_v40, %v14201_v27  ;;  %v11197_v33 = vpop.f32.mrb[113].mxu1  ;;  %v8069_v40 = vld [vmem:[#allocation3 + $0x53] sm:$0xff] }
 0x81c   : > { %v7414_v55 = vpop.f32.mrb[114].mxu1  ;;  %11386 = vmatpush3.bf16.msra.mxu1 %v12002_v17  ;;  %v8068_v17 = vld [vmem:[#allocation3 + $0x4b] sm:$0xff] }
 0x81d   : > { %v11198_v29 = vpop.f32.mrb[115].mxu1  ;;  %11423 = vmatprep.subr.bf16.mxu1 %v14568_v35  ;;  %v12007_v55 = vld [vmem:[%s14541_s5 + $0x220] sm:$0xff]   ;;  %v8083_v7 = vpack.c.bf16 %v8069_v40, %v8068_v17 }
 0x81f   : > { %11352 = vmatmul.mubr.bf16.gmra.mrb[220].mxu1 %v7883_v32  ;;  %v7875_v32 = vld [vmem:[#allocation3 + $0x92] sm:$0xff] }
 0x820   : > { %11355 = vmatprep.mubr.msk.bf16.mxu1 %vm12020_vm0, %v14568_v35  ;;  %v7885_v53 = vpack.c.bf16 %v7875_v32, %v7874_v10  ;;  %v8070_v10 = vld [vmem:[#allocation3 + $0x5b] sm:$0xff]  ;;  %v12009_v32 = vld [vmem:[%s14541_s5 + $0x230] sm:$0xff]  }
 0x822   : > { %v7418_v26 = vpop.f32.mrb[116].mxu1 }
 0x823   : > { %v14308_v45 = vadd.f32 %v7418_v26, %v14207_v19  ;;  %v11201_v27 = vpop.f32.mrb[117].mxu1 }
 0x824   : > { %v7421_v9 = vpop.f32.mrb[118].mxu1  ;;  %v12008_v27 = vld [vmem:[%s14541_s5 + $0x228] sm:$0xff]  }
 0x825   : > { %v14311_v2 = vadd.f32 %v7421_v9, %v14210_v46  ;;  %v11202_v1 = vpop.f32.mrb[119].mxu1 }
 0x826   : > { %v8071_v1 = vld [vmem:[#allocation3 + $0x63] sm:$0xff] }
 0x827   : > { %11356 = vmatmul.mubr.bf16.gmra.mrb[224].mxu1 %v7884_v31 }
 0x828   : > { %11359 = vmatprep.mubr.msk.bf16.mxu1 %vm12020_vm0, %v14568_v35 }
 0x82a   : > { %v7426_v47 = vpop.f32.mrb[120].mxu1 }
 0x82b   : > { %v11205_v23 = vpop.f32.mrb[121].mxu1 }
 0x82c   : > { %v7428_v21 = vpop.f32.mrb[122].mxu1 }
 0x82d   : > { %v14317_v19 = vadd.f32 %v7428_v21, %v14215_v56  ;;  %v11206_v62 = vpop.f32.mrb[123].mxu1 }
 0x82e   : > { %v8084_v62 = vpack.c.bf16 %v8071_v1, %v8070_v10  ;;  %v8269_v1 = vld [vmem:[#allocation3 + $0x44] sm:$0xff] }
 0x82f   : > { %11360 = vmatmul.mubr.bf16.gmra.mrb[228].mxu1 %v7885_v53 }
 0x830   : > { %11363 = vmatprep.mubr.msk.bf16.mxu1 %vm12020_vm0, %v14568_v35 }
 0x832   : > { %v7433_v46 = vpop.f32.mrb[124].mxu1 }
 0x833   : > { %v11209_v36 = vpop.f32.mrb[125].mxu1  ;;  %v8072_v46 = vld [vmem:[#allocation3 + $0x6b] sm:$0xff] }
 0x834   : > { %v7435_v6 = vpop.f32.mrb[126].mxu1 }
 0x835   : > { %v14322_v48 = vadd.f32 %v7435_v6, %v14220_v25  ;;  %v11210_v28 = vpop.f32.mrb[127].mxu1  ;;  %v8065_v25 = vld [vmem:[#allocation3 + $0x33] sm:$0xff] }
 0x836   : > { %v8081_v22 = vpack.c.bf16 %v8065_v25, %v8064_v59  ;;  %v8085_v28 = vpack.c.bf16 %v8073_v34, %v8072_v46  ;;  %v8271_v46 = vld [vmem:[#allocation3 + $0x54] sm:$0xff] }
 0x837   : > { %11364 = vmatmul.mubr.bf16.gmra.mrb[232].mxu1 %v7886_v18 }
 0x838   : > { %11367 = vmatprep.mubr.msk.bf16.mxu1 %vm12020_vm0, %v14568_v35 }
 0x83a   : > { %v7440_v56 = vpop.f32.mrb[128].mxu1 }
 0x83b   : > { %v14327_v16 = vadd.f32 %v7440_v56, %v14225_v30  ;;  %v11213_v37 = vpop.f32.mrb[129].mxu1  ;;  %v12003_v30 = vld [vmem:[%s14541_s5 + $0x200] sm:$0xff]   ;;  %v8075_v56 = vld [vmem:[#allocation3 + $0x83] sm:$0xff] }
 0x83c   : > { %v7443_v49 = vpop.f32.mrb[130].mxu1 }
 0x83d   : > { %v11214_v5 = vpop.f32.mrb[131].mxu1 }
 0x83e   : > { %v8074_v5 = vld [vmem:[#allocation3 + $0x7b] sm:$0xff] }
 0x83f   : > { %11368 = vmatmul.mubr.bf16.gmra.mrb[236].mxu1 %v7887_v42  ;;  %v8086_v25 = vpack.c.bf16 %v8075_v56, %v8074_v5 }
 0x840   : > { %11387 = vmatprep.mubr.msk.bf16.mxu1 %vm12020_vm0, %v14568_v35 }
 0x842   : > { %v7583_v0 = vpop.f32.mrb[132].mxu1 }
 0x843   : > { %v14332_v38 = vadd.f32 %v7583_v0, %v14230_v12  ;;  %v11233_v8 = vpop.f32.mrb[133].mxu1  ;;  %v8076_v0 = vld [vmem:[#allocation3 + $0x8b] sm:$0xff] }
 0x844   : > { %v7586_v3 = vpop.f32.mrb[134].mxu1  ;;  %v8077_v8 = vld [vmem:[#allocation3 + $0x93] sm:$0xff] }
 0x845   : > { %v11234_v44 = vpop.f32.mrb[135].mxu1 }
 0x846   : > { %v8087_v44 = vpack.c.bf16 %v8077_v8, %v8076_v0  ;;  %v8275_v0 = vld [vmem:[#allocation3 + $0x74] sm:$0xff] }
 0x847   : > { %11388 = vmatmul.mubr.bf16.vlgmr.msra.gmra.mrb[240].mxu1 %v8081_v22 }
 0x848   : > { %11424 = vmatpush3.bf16.msra.mxu1 %v12003_v30  ;;  %11391 = vmatprep.mubr.msk.bf16.mxu1 %vm12020_vm0, %v14568_v35 }
 0x849   : > { %11425 = vmatprep.subr.bf16.mxu1 %v14568_v35 }
 0x84a   : > { %v7590_v12 = vpop.f32.mrb[136].mxu1 }
 0x84b   : > { %v14344_v39 = vadd.f32 %v7590_v12, %v14245_v13  ;;  %v11237_v11 = vpop.f32.mrb[137].mxu1  ;;  %v12006_v13 = vld [vmem:[%s14541_s5 + $0x218] sm:$0xff]  }
 0x84c   : > { %v7593_v14 = vpop.f32.mrb[138].mxu1  ;;  %11426 = vmatpush3.bf16.msra.mxu1 %v12004_v41  ;;  %v8079_v41 = vld [vmem:[#allocation3 + $0xa3] sm:$0xff]  ;;  %v8078_v11 = vld [vmem:[#allocation3 + $0x9b] sm:$0xff] }
 0x84d   : > { %v14350_v24 = vadd.f32 %v7593_v14, %v14251_v63  ;;  %v11238_v4 = vpop.f32.mrb[139].mxu1  ;;  %11427 = vmatprep.subr.bf16.mxu1 %v14568_v35 }
 0x84e   : > { %v8080_v4 = vld [vmem:[#allocation3 + $0xab] sm:$0x1f] }
 0x84f   : > { %11392 = vmatmul.mubr.bf16.gmra.mrb[244].mxu1 %v8082_v58  ;;  %v8089_v40 = vpack.c.bf16 %v8080_v4, %v8080_v4  ;;  %v8279_v4 = vld [vmem:[#allocation3 + $0x94] sm:$0xff] }
 0x850   : > { %11395 = vmatprep.mubr.msk.bf16.mxu1 %vm12020_vm0, %v14568_v35  ;;  %11428 = vmatpush3.bf16.msra.mxu1 %v12005_v60  ;;  %v8088_v60 = vpack.c.bf16 %v8079_v41, %v8078_v11 }
 0x851   : > { %11429 = vmatprep.subr.bf16.mxu1 %v14568_v35 }
 0x852   : > { %v7598_v43 = vpop.f32.mrb[140].mxu1 }
 0x853   : > { %v11241_v63 = vpop.f32.mrb[141].mxu1 }
 0x854   : > { %v7600_v33 = vpop.f32.mrb[142].mxu1  ;;  %11430 = vmatpush3.bf16.msra.mxu1 %v12006_v13  ;;  %v8266_v63 = vld [vmem:[#allocation3 + $0x2c] sm:$0xff] }
 0x855   : > { %v14363_v29 = vadd.f32 %v7600_v33, %v14267_v52  ;;  %v11242_v26 = vpop.f32.mrb[143].mxu1  ;;  %11431 = vmatprep.subr.bf16.mxu1 %v14568_v35 }
 0x857   : > { %11396 = vmatmul.mubr.bf16.gmra.mrb[248].mxu1 %v8083_v7 }
 0x858   : > { %11399 = vmatprep.mubr.msk.bf16.mxu1 %vm12020_vm0, %v14568_v35  ;;  %11432 = vmatpush3.bf16.msra.mxu1 %v12007_v55 }
 0x859   : > { %11433 = vmatprep.subr.bf16.mxu1 %v14568_v35 }
 0x85a   : > { %v7605_v9 = vpop.f32.mrb[144].mxu1 }
 0x85b   : > { %v14373_v52 = vadd.f32 %v7605_v9, %v14280_v51  ;;  %v11245_v31 = vpop.f32.mrb[145].mxu1  ;;  %v12010_v51 = vld [vmem:[%s14541_s5 + $0x238] sm:$0xff]  }
 0x85c   : > { %v7608_v47 = vpop.f32.mrb[146].mxu1  ;;  %11434 = vmatpush3.bf16.msra.mxu1 %v12008_v27 }
 0x85d   : > { %v14379_v23 = vadd.f32 %v7608_v47, %v14286_v15  ;;  %v11246_v21 = vpop.f32.mrb[147].mxu1  ;;  %11435 = vmatprep.subr.bf16.mxu1 %v14568_v35 }
 0x85f   : > { %11400 = vmatmul.mubr.bf16.gmra.mrb[252].mxu1 %v8084_v62 }
 0x860   : > { %11403 = vmatprep.mubr.msk.bf16.mxu1 %vm12020_vm0, %v14568_v35  ;;  %11436 = vmatpush3.bf16.msra.mxu1 %v12009_v32  ;;  %v8268_v32 = vld [vmem:[#allocation3 + $0x3c] sm:$0xff] }
 0x861   : > { %11437 = vmatprep.subr.bf16.mxu1 %v14568_v35  ;;  %v8284_v62 = vpack.c.bf16 %v8269_v1, %v8268_v32 }
 0x862   : > { %v7613_v53 = vpop.f32.mrb[148].mxu1 }
 0x863   : > { %v14389_v15 = vadd.f32 %v7613_v53, %v14299_v57  ;;  %v11249_v36 = vpop.f32.mrb[149].mxu1  ;;  %v8270_v53 = vld [vmem:[#allocation3 + $0x4c] sm:$0xff] }
 0x864   : > { %v7616_v6 = vpop.f32.mrb[150].mxu1  ;;  %11438 = vmatpush3.bf16.msra.mxu1 %v12010_v51 }
 0x865   : > { %v11250_v50 = vpop.f32.mrb[151].mxu1 }
 0x866   : > { %v8285_v50 = vpack.c.bf16 %v8271_v46, %v8270_v53 }
 0x867   : > { %11404 = vmatmul.mubr.bf16.gmra.mrb[0].mxu1 %v8085_v28  ;;  %v8273_v28 = vld [vmem:[#allocation3 + $0x64] sm:$0xff] }
 0x868   : > { %11407 = vmatprep.mubr.msk.bf16.mxu1 %vm12020_vm0, %v14568_v35 }
 0x86a   : > { %v7620_v18 = vpop.f32.mrb[152].mxu1 }
 0x86b   : > { %v14394_v61 = vadd.f32 %v7620_v18, %v14308_v45  ;;  %v11253_v37 = vpop.f32.mrb[153].mxu1 }
 0x86c   : > { %v7623_v49 = vpop.f32.mrb[154].mxu1 }
 0x86d   : > { %v14397_v57 = vadd.f32 %v7623_v49, %v14311_v2  ;;  %v11254_v42 = vpop.f32.mrb[155].mxu1  ;;  %v8272_v49 = vld [vmem:[#allocation3 + $0x5c] sm:$0xff] }
 0x86f   : > { %11408 = vmatmul.mubr.bf16.gmra.mrb[4].mxu1 %v8086_v25 }
 0x870   : > { %11411 = vmatprep.mubr.msk.bf16.mxu1 %vm12020_vm0, %v14568_v35 }
 0x872   : > { %v7628_v59 = vpop.f32.mrb[156].mxu1 }
 0x873   : > { %v11257_v3 = vpop.f32.mrb[157].mxu1  ;;  %v8274_v59 = vld [vmem:[#allocation3 + $0x6c] sm:$0xff] }
 0x874   : > { %v7630_v30 = vpop.f32.mrb[158].mxu1 }
 0x875   : > { %v14402_v45 = vadd.f32 %v7630_v30, %v14317_v19  ;;  %v11258_v22 = vpop.f32.mrb[159].mxu1 }
 0x876   : > { %v8287_v22 = vpack.c.bf16 %v8275_v0, %v8274_v59 }
 0x877   : > { %11412 = vmatmul.mubr.bf16.gmra.mrb[8].mxu1 %v8087_v44  ;;  %v8277_v44 = vld [vmem:[#allocation3 + $0x84] sm:$0xff] }
 0x878   : > { %11415 = vmatprep.mubr.msk.bf16.mxu1 %vm12020_vm0, %v14568_v35 }
 0x87a   : > { %v7635_v2 = vpop.f32.mrb[160].mxu1 }
 0x87b   : > { %v11261_v12 = vpop.f32.mrb[161].mxu1 }
 0x87c   : > { %v7637_v54 = vpop.f32.mrb[162].mxu1 }
 0x87d   : > { %v14407_v14 = vadd.f32 %v7637_v54, %v14322_v48  ;;  %v11262_v20 = vpop.f32.mrb[163].mxu1  ;;  %v8267_v48 = vld [vmem:[#allocation3 + $0x34] sm:$0xff]  ;;  %v8276_v54 = vld [vmem:[#allocation3 + $0x7c] sm:$0xff] }
 0x87e   : > { %v8283_v27 = vpack.c.bf16 %v8267_v48, %v8266_v63  ;;  %v8288_v20 = vpack.c.bf16 %v8277_v44, %v8276_v54  ;;  %v8281_v48 = vld [vmem:[#allocation3 + $0xa4] sm:$0xff] }
 0x87f   : > { %11416 = vmatmul.mubr.bf16.gmra.mrb[12].mxu1 %v8088_v60 }
 0x880   : > { %11419 = vmatprep.mubr.msk.bf16.mxu1 %vm12020_vm0, %v14568_v35 }
 0x882   : > { %v7642_v19 = vpop.f32.mrb[164].mxu1 }
 0x883   : > { %v14412_v58 = vadd.f32 %v7642_v19, %v14327_v16  ;;  %v11265_v13 = vpop.f32.mrb[165].mxu1  ;;  %v8278_v19 = vld [vmem:[#allocation3 + $0x8c] sm:$0xff] }
 0x884   : > { %v7645_v43 = vpop.f32.mrb[166].mxu1 }
 0x885   : > { %v11266_v17 = vpop.f32.mrb[167].mxu1 }
 0x887   : > { %11420 = vmatmul.mubr.bf16.gmra.mrb[16].mxu1 %v8089_v40  ;;  %v8289_v40 = vpack.c.bf16 %v8279_v4, %v8278_v19 }
 0x888   : > { %11439 = vmatprep.mubr.msk.bf16.mxu1 %vm12020_vm0, %v14568_v35 }
 0x88a   : > { %v7785_v33 = vpop.f32.mrb[168].mxu1 }
 0x88b   : > { %v14417_v55 = vadd.f32 %v7785_v33, %v14332_v38  ;;  %v11285_v26 = vpop.f32.mrb[169].mxu1 }
 0x88c   : > { %v7788_v7 = vpop.f32.mrb[170].mxu1  ;;  %v8280_v26 = vld [vmem:[#allocation3 + $0x9c] sm:$0xff] }
 0x88d   : > { %v11286_v9 = vpop.f32.mrb[171].mxu1 }
 0x88e   : > { %v8290_v9 = vpack.c.bf16 %v8281_v48, %v8280_v26 }
 0x88f   : > { %11440 = vmatmul.mubr.bf16.vlgmr.msra.gmra.mrb[20].mxu1 %v8283_v27 }
 0x890   : > { %11443 = vmatprep.mubr.msk.bf16.mxu1 %vm12020_vm0, %v14568_v35 }
 0x892   : > { %v7792_v16 = vpop.f32.mrb[172].mxu1 }
 0x893   : > { %v14422_v31 = vadd.f32 %v7792_v16, %v14344_v39  ;;  %v11289_v47 = vpop.f32.mrb[173].mxu1  ;;  %v8282_v16 = vld [vmem:[#allocation3 + $0xac] sm:$0x1f] }
 0x894   : > { %v7795_v10 = vpop.f32.mrb[174].mxu1 }
 0x895   : > { %v14425_v21 = vadd.f32 %v7795_v10, %v14350_v24  ;;  %v11290_v38 = vpop.f32.mrb[175].mxu1 }
 0x896   : > { %v8291_v38 = vpack.c.bf16 %v8282_v16, %v8282_v16 }
 0x897   : > { %11444 = vmatmul.mubr.bf16.gmra.mrb[24].mxu1 %v8284_v62 }
 0x898   : > { %11447 = vmatprep.mubr.msk.bf16.mxu1 %vm12020_vm0, %v14568_v35 }
 0x89a   : > { %v7800_v51 = vpop.f32.mrb[176].mxu1 }
 0x89b   : > { %v11293_v34 = vpop.f32.mrb[177].mxu1 }
 0x89c   : > { %v7802_v36 = vpop.f32.mrb[178].mxu1 }
 0x89d   : > { %v14430_v39 = vadd.f32 %v7802_v36, %v14363_v29  ;;  %v11294_v6 = vpop.f32.mrb[179].mxu1  ;;  %v8286_v29 = vpack.c.bf16 %v8273_v28, %v8272_v49 }
 0x89f   : > { %11448 = vmatmul.mubr.bf16.gmra.mrb[28].mxu1 %v8285_v50 }
 0x8a0   : > { %11451 = vmatprep.mubr.msk.bf16.mxu1 %vm12020_vm0, %v14568_v35 }
 0x8a2   : > { %v7807_v24 = vpop.f32.mrb[180].mxu1 }
 0x8a3   : > { %v14435_v18 = vadd.f32 %v7807_v24, %v14373_v52  ;;  %v11297_v56 = vpop.f32.mrb[181].mxu1 }
 0x8a4   : > { %v7810_v37 = vpop.f32.mrb[182].mxu1 }
 0x8a5   : > { %v14438_v5 = vadd.f32 %v7810_v37, %v14379_v23  ;;  %v11298_v42 = vpop.f32.mrb[183].mxu1 }
 0x8a7   : > { %11452 = vmatmul.mubr.bf16.gmra.mrb[32].mxu1 %v8286_v29 }
 0x8a8   : > { %11455 = vmatprep.mubr.msk.bf16.mxu1 %vm12020_vm0, %v14568_v35 }
 0x8aa   : > { %v7815_v25 = vpop.f32.mrb[184].mxu1 }
 0x8ab   : > { %v14443_v8 = vadd.f32 %v7815_v25, %v14389_v15  ;;  %v11301_v52 = vpop.f32.mrb[185].mxu1 }
 0x8ac   : > { %v7818_v3 = vpop.f32.mrb[186].mxu1 }
 0x8ad   : > { %v11302_v30 = vpop.f32.mrb[187].mxu1 }
 0x8af   : > { %11456 = vmatmul.mubr.bf16.gmra.mrb[36].mxu1 %v8287_v22 }
 0x8b0   : > { %11459 = vmatprep.mubr.msk.bf16.mxu1 %vm12020_vm0, %v14568_v35 }
 0x8b2   : > { %v7822_v23 = vpop.f32.mrb[188].mxu1 }
 0x8b3   : > { %v14448_v2 = vadd.f32 %v7822_v23, %v14394_v61  ;;  %v11305_v41 = vpop.f32.mrb[189].mxu1 }
 0x8b4   : > { %v7825_v12 = vpop.f32.mrb[190].mxu1 }
 0x8b5   : > { %v14451_v11 = vadd.f32 %v7825_v12, %v14397_v57  ;;  %v11306_v15 = vpop.f32.mrb[191].mxu1 }
 0x8b7   : > { %11460 = vmatmul.mubr.bf16.gmra.mrb[40].mxu1 %v8288_v20 }
 0x8b8   : > { %11463 = vmatprep.mubr.msk.bf16.mxu1 %vm12020_vm0, %v14568_v35 }
 0x8ba   : > { %v7830_v60 = vpop.f32.mrb[192].mxu1 }
 0x8bb   : > { %v11309_v13 = vpop.f32.mrb[193].mxu1 }
 0x8bc   : > { %v7832_v43 = vpop.f32.mrb[194].mxu1 }
 0x8bd   : > { %v7859_v61 = vadd.f32 %v7832_v43, %v14402_v45  ;;  %v11310_v17 = vpop.f32.mrb[195].mxu1 }
 0x8bf   : > { %11464 = vmatmul.mubr.bf16.gmra.mrb[44].mxu1 %v8289_v40 }
 0x8c0   : > { %11467 = vmatprep.mubr.msk.bf16.mxu1 %vm12020_vm0, %v14568_v35 }
 0x8c2   : > { %v7837_v57 = vpop.f32.mrb[196].mxu1 }
 0x8c3   : > { %v11313_v63 = vpop.f32.mrb[197].mxu1 }
 0x8c4   : > { %v7839_v33 = vpop.f32.mrb[198].mxu1 }
 0x8c5   : > { %v7860_v7 = vadd.f32 %v7839_v33, %v14407_v14  ;;  %v11314_v27 = vpop.f32.mrb[199].mxu1 }
 0x8c7   : > { %11468 = vmatmul.mubr.bf16.gmra.mrb[48].mxu1 %v8290_v9 }
 0x8c8   : > { %11471 = vmatprep.mubr.msk.bf16.mxu1 %vm12020_vm0, %v14568_v35 }
 0x8ca   : > { %v7844_v45 = vpop.f32.mrb[200].mxu1 }
 0x8cb   : > { %v7861_v1 = vadd.f32 %v7844_v45, %v14412_v58  ;;  %v11317_v47 = vpop.f32.mrb[201].mxu1 }
 0x8cc   : > { %v7847_v10 = vpop.f32.mrb[202].mxu1 }
 0x8cd   : > { %v11318_v32 = vpop.f32.mrb[203].mxu1 }
 0x8cf   : > { %11472 = vmatmul.mubr.bf16.gmra.mrb[52].mxu1 %v8291_v38 }
 0x8d2   : > { %v7987_v62 = vpop.f32.mrb[204].mxu1 }
 0x8d3   : > { %v8052_v51 = vadd.f32 %v7987_v62, %v14417_v55  ;;  %v11337_v53 = vpop.f32.mrb[205].mxu1 }
 0x8d4   : > { %v7990_v14 = vpop.f32.mrb[206].mxu1 }
 0x8d5   : > { %v11338_v46 = vpop.f32.mrb[207].mxu1 }
 0x8da   : > { %v7994_v34 = vpop.f32.mrb[208].mxu1 }
 0x8db   : > { %v8053_v36 = vadd.f32 %v7994_v34, %v14422_v31  ;;  %v11341_v6 = vpop.f32.mrb[209].mxu1 }
 0x8dc   : > { %v7997_v35 = vpop.f32.mrb[210].mxu1 }
 0x8dd   : > { %v8054_v50 = vadd.f32 %v7997_v35, %v14425_v21  ;;  %v11342_v24 = vpop.f32.mrb[211].mxu1 }
 0x8e2   : > { %v8002_v58 = vpop.f32.mrb[212].mxu1 }
 0x8e3   : > { %v11345_v28 = vpop.f32.mrb[213].mxu1 }
 0x8e4   : > { %v8004_v56 = vpop.f32.mrb[214].mxu1 }
 0x8e5   : > { %v8055_v37 = vadd.f32 %v8004_v56, %v14430_v39  ;;  %v11346_v49 = vpop.f32.mrb[215].mxu1 }
 0x8ea   : > { %v8009_v42 = vpop.f32.mrb[216].mxu1 }
 0x8eb   : > { %v8056_v55 = vadd.f32 %v8009_v42, %v14435_v18  ;;  %v11349_v29 = vpop.f32.mrb[217].mxu1 }
 0x8ec   : > { %v8012_v25 = vpop.f32.mrb[218].mxu1 }
 0x8ed   : > { %v8057_v59 = vadd.f32 %v8012_v25, %v14438_v5  ;;  %v11350_v0 = vpop.f32.mrb[219].mxu1 }
 0x8f2   : > { %v8017_v31 = vpop.f32.mrb[220].mxu1 }
 0x8f3   : > { %v8058_v52 = vadd.f32 %v8017_v31, %v14443_v8  ;;  %v11353_v3 = vpop.f32.mrb[221].mxu1 }
 0x8f4   : > { %v8020_v21 = vpop.f32.mrb[222].mxu1 }
 0x8f5   : > { %v11354_v30 = vpop.f32.mrb[223].mxu1 }
 0x8fa   : > { %v8024_v22 = vpop.f32.mrb[224].mxu1 }
 0x8fb   : > { %v8059_v23 = vadd.f32 %v8024_v22, %v14448_v2  ;;  %v11357_v44 = vpop.f32.mrb[225].mxu1 }
 0x8fc   : > { %v8027_v39 = vpop.f32.mrb[226].mxu1 }
 0x8fd   : > { %v8060_v41 = vadd.f32 %v8027_v39, %v14451_v11  ;;  %v11358_v12 = vpop.f32.mrb[227].mxu1 }
 0x902   : > { %v8032_v18 = vpop.f32.mrb[228].mxu1 }
 0x903   : > { %v11361_v54 = vpop.f32.mrb[229].mxu1  ;;  %v14493_v18 = vld [vmem:[%s14542_s6] ss:$0 sm:$0xff] }
 0x904   : > { %v8034_v15 = vpop.f32.mrb[230].mxu1 }
 0x905   : > { %v8061_v20 = vadd.f32 %v8034_v15, %v7859_v61  ;;  %v11362_v5 = vpop.f32.mrb[231].mxu1 }
 0x90a   : > { %v8039_v60 = vpop.f32.mrb[232].mxu1 }
 0x90b   : > { %v11365_v19 = vpop.f32.mrb[233].mxu1 }
 0x90c   : > { %v8041_v4 = vpop.f32.mrb[234].mxu1 }
 0x90d   : > { %v8062_v8 = vadd.f32 %v8041_v4, %v7860_v7  ;;  %v11366_v13 = vpop.f32.mrb[235].mxu1 }
 0x912   : > { %v8046_v43 = vpop.f32.mrb[236].mxu1 }
 0x913   : > { %v8063_v17 = vadd.f32 %v8046_v43, %v7861_v1  ;;  %v11369_v40 = vpop.f32.mrb[237].mxu1 }
 0x914   : > { %v8049_v57 = vpop.f32.mrb[238].mxu1 }
 0x915   : > { %v11370_v2 = vpop.f32.mrb[239].mxu1 }
 0x91a   : > { %v8189_v48 = vpop.f32.mrb[240].mxu1 }
 0x91b   : > { %v8254_v63 = vadd.f32 %v8189_v48, %v8052_v51  ;;  %v11389_v33 = vpop.f32.mrb[241].mxu1 }
 0x91c   : > { %v8192_v11 = vpop.f32.mrb[242].mxu1 }
 0x91d   : > { %v11390_v26 = vpop.f32.mrb[243].mxu1 }
 0x922   : > { %v8196_v27 = vpop.f32.mrb[244].mxu1 }
 0x923   : > { %v8255_v9 = vadd.f32 %v8196_v27, %v8053_v36  ;;  %v11393_v45 = vpop.f32.mrb[245].mxu1 }
 0x924   : > { %v8199_v61 = vpop.f32.mrb[246].mxu1 }
 0x925   : > { %v8256_v16 = vadd.f32 %v8199_v61, %v8054_v50  ;;  %v11394_v47 = vpop.f32.mrb[247].mxu1 }
 0x92a   : > { %v8204_v10 = vpop.f32.mrb[248].mxu1 }
 0x92b   : > { %v11397_v32 = vpop.f32.mrb[249].mxu1 }
 0x92c   : > { %v8206_v7 = vpop.f32.mrb[250].mxu1 }
 0x92d   : > { %v14471_v38 = vadd.f32 %v8206_v7, %v8055_v37  ;;  %v11398_v1 = vpop.f32.mrb[251].mxu1 }
 0x932   : > { %v8211_v62 = vpop.f32.mrb[252].mxu1 }
 0x933   : > { %v14473_v53 = vadd.f32 %v8211_v62, %v8056_v55  ;;  %v11401_v14 = vpop.f32.mrb[253].mxu1 }
 0x934   : > { %v8214_v51 = vpop.f32.mrb[254].mxu1 }
 0x935   : > { %v14475_v46 = vadd.f32 %v8214_v51, %v8057_v59  ;;  %v11402_v34 = vpop.f32.mrb[255].mxu1 }
 0x93a   : > { %v8219_v6 = vpop.f32.mrb[0].mxu1 }
 0x93b   : > { %v14477_v36 = vadd.f32 %v8219_v6, %v8058_v52  ;;  %v11405_v35 = vpop.f32.mrb[1].mxu1 }
 0x93c   : > { %v8222_v50 = vpop.f32.mrb[2].mxu1 }
 0x93d   : > { %v11406_v24 = vpop.f32.mrb[3].mxu1 }
 0x942   : > { %v8226_v58 = vpop.f32.mrb[4].mxu1 }
 0x943   : > { %v14479_v28 = vadd.f32 %v8226_v58, %v8059_v23  ;;  %v11409_v56 = vpop.f32.mrb[5].mxu1 }
 0x944   : > { %v8229_v37 = vpop.f32.mrb[6].mxu1 }
 0x945   : > { %v14481_v49 = vadd.f32 %v8229_v37, %v8060_v41  ;;  %v11410_v42 = vpop.f32.mrb[7].mxu1 }
 0x94a   : > { %v8234_v55 = vpop.f32.mrb[8].mxu1 }
 0x94b   : > { %v11413_v29 = vpop.f32.mrb[9].mxu1 }
 0x94c   : > { %v8236_v25 = vpop.f32.mrb[10].mxu1 }
 0x94d   : > { %v14483_v59 = vadd.f32 %v8236_v25, %v8061_v20  ;;  %v11414_v0 = vpop.f32.mrb[11].mxu1 }
 0x952   : > { %v8241_v31 = vpop.f32.mrb[12].mxu1 }
 0x953   : > { %v11417_v52 = vpop.f32.mrb[13].mxu1 }
 0x954   : > { %v8243_v3 = vpop.f32.mrb[14].mxu1 }
 0x955   : > { %v14485_v21 = vadd.f32 %v8243_v3, %v8062_v8  ;;  %v11418_v30 = vpop.f32.mrb[15].mxu1 }
 0x95a   : > { %v8248_v22 = vpop.f32.mrb[16].mxu1 }
 0x95b   : > { %v14487_v23 = vadd.f32 %v8248_v22, %v8063_v17  ;;  %v11421_v44 = vpop.f32.mrb[17].mxu1 }
 0x95c   : > { %v8251_v39 = vpop.f32.mrb[18].mxu1 }
 0x95d   : > { %v11422_v41 = vpop.f32.mrb[19].mxu1 }
 0x962   : > { %v8391_v12 = vpop.f32.mrb[20].mxu1 }
 0x963   : > { %v8456_v54 = vadd.f32 %v8391_v12, %v8254_v63  ;;  %v11441_v15 = vpop.f32.mrb[21].mxu1 }
 0x964   : > { %v8394_v20 = vpop.f32.mrb[22].mxu1 }
 0x965   : > { %v8475_v5 = vadd.f32 %v14493_v18, %v8456_v54  ;;  %v11442_v60 = vpop.f32.mrb[23].mxu1 }
 0x967   : > { %v8487_v19 = vmax.f32 %v8475_v5, 0.0 }
 0x969   : > { %8500 = vst.msk [vmem:[%s14499_s8] sm:$0x7f] %vm8499_vm2, %v8487_v19 }
 0x96a   : > { %v8398_v4 = vpop.f32.mrb[24].mxu1 }
 0x96b   : > { %v8457_v8 = vadd.f32 %v8398_v4, %v8255_v9  ;;  %v11445_v13 = vpop.f32.mrb[25].mxu1 }
 0x96c   : > { %v8401_v43 = vpop.f32.mrb[26].mxu1 }
 0x96d   : > { %v8476_v17 = vadd.f32 %v14493_v18, %v8457_v8  ;;  %v8458_v40 = vadd.f32 %v8401_v43, %v8256_v16  ;;  %v11446_v57 = vpop.f32.mrb[27].mxu1 }
 0x96f   : > { %v8488_v2 = vmax.f32 %v8476_v17, 0.0  ;;  %v8477_v48 = vadd.f32 %v14493_v18, %v8458_v40 }
 0x971   : > { %8502 = vst.msk [vmem:[%s14499_s8 + $0x2] sm:$0xe0] %vm8501_vm3, %v8488_v2  ;;  %v8489_v63 = vmax.f32 %v8477_v48, 0.0 }
 0x972   : > { %v8406_v33 = vpop.f32.mrb[28].mxu1 }
 0x973   : > { %8504 = vst.msk [vmem:[%s14499_s8 + $0xa] sm:$0xf] %vm8503_vm4, %v8489_v63  ;;  %v11449_v11 = vpop.f32.mrb[29].mxu1 }
 0x974   : > { %v8408_v26 = vpop.f32.mrb[30].mxu1 }
 0x975   : > { %v8459_v27 = vadd.f32 %v8408_v26, %v14471_v38  ;;  %v11450_v9 = vpop.f32.mrb[31].mxu1 }
 0x977   : > { %v8478_v45 = vadd.f32 %v14493_v18, %v8459_v27 }
 0x979   : > { %v8490_v61 = vmax.f32 %v8478_v45, 0.0 }
 0x97a   : > { %v8413_v16 = vpop.f32.mrb[32].mxu1 }
 0x97b   : > { %8506 = vst.msk [vmem:[%s14499_s8 + $0xc] sm:$0xfc] %vm8505_vm5, %v8490_v61  ;;  %v8460_v47 = vadd.f32 %v8413_v16, %v14473_v53  ;;  %v11453_v10 = vpop.f32.mrb[33].mxu1 }
 0x97c   : > { %v8416_v32 = vpop.f32.mrb[34].mxu1 }
 0x97d   : > { %v8479_v7 = vadd.f32 %v14493_v18, %v8460_v47  ;;  %v8461_v1 = vadd.f32 %v8416_v32, %v14475_v46  ;;  %v11454_v62 = vpop.f32.mrb[35].mxu1 }
 0x97f   : > { %v8491_v38 = vmax.f32 %v8479_v7, 0.0  ;;  %v8480_v14 = vadd.f32 %v14493_v18, %v8461_v1 }
 0x981   : > { %8508 = vst.msk [vmem:[%s14499_s8 + $0x14] sm:$0x1] %vm8507_vm6, %v8491_v38  ;;  %v8492_v51 = vmax.f32 %v8480_v14, 0.0 }
 0x982   : > { %v8421_v34 = vpop.f32.mrb[36].mxu1 }
 0x983   : > { %8510 = vst.msk [vmem:[%s14499_s8 + $0xe] sm:$0x80] %vm8509_vm7, %v8492_v51  ;;  %v8462_v6 = vadd.f32 %v8421_v34, %v14477_v36  ;;  %v11457_v53 = vpop.f32.mrb[37].mxu1 }
 0x984   : > { %v8424_v35 = vpop.f32.mrb[38].mxu1 }
 0x985   : > { %v8481_v50 = vadd.f32 %v14493_v18, %v8462_v6  ;;  %v11458_v24 = vpop.f32.mrb[39].mxu1 }
 0x987   : > { %v8493_v46 = vmax.f32 %v8481_v50, 0.0 }
 0x989   : > { %8512 = vst.msk [vmem:[%s14499_s8 + $0x16] sm:$0x3f] %vm8511_vm8, %v8493_v46 }
 0x98a   : > { %v8428_v58 = vpop.f32.mrb[40].mxu1 }
 0x98b   : > { %v8463_v56 = vadd.f32 %v8428_v58, %v14479_v28  ;;  %v11461_v37 = vpop.f32.mrb[41].mxu1 }
 0x98c   : > { %v8431_v42 = vpop.f32.mrb[42].mxu1 }
 0x98d   : > { %v8482_v55 = vadd.f32 %v14493_v18, %v8463_v56  ;;  %v8464_v29 = vadd.f32 %v8431_v42, %v14481_v49  ;;  %v11462_v36 = vpop.f32.mrb[43].mxu1 }
 0x98f   : > { %v8494_v25 = vmax.f32 %v8482_v55, 0.0  ;;  %v8483_v0 = vadd.f32 %v14493_v18, %v8464_v29 }
 0x991   : > { %8514 = vst.msk [vmem:[%s14499_s8 + $0x18] sm:$0xf0] %vm8513_vm9, %v8494_v25  ;;  %v8495_v31 = vmax.f32 %v8483_v0, 0.0 }
 0x992   : > { %v8436_v52 = vpop.f32.mrb[44].mxu1 }
 0x993   : > { %8516 = vst.msk [vmem:[%s14499_s8 + $0x20] sm:$0x7] %vm8515_vm10, %v8495_v31  ;;  %v11465_v3 = vpop.f32.mrb[45].mxu1 }
 0x994   : > { %v8438_v30 = vpop.f32.mrb[46].mxu1 }
 0x995   : > { %v8465_v28 = vadd.f32 %v8438_v30, %v14483_v59  ;;  %v11466_v22 = vpop.f32.mrb[47].mxu1 }
 0x997   : > { %v8484_v44 = vadd.f32 %v14493_v18, %v8465_v28 }
 0x999   : > { %v8496_v49 = vmax.f32 %v8484_v44, 0.0 }
 0x99a   : > { %v8443_v39 = vpop.f32.mrb[48].mxu1 }
 0x99b   : > { %8518 = vst.msk [vmem:[%s14499_s8 + $0x22] sm:$0xfe] %vm8517_vm11, %v8496_v49  ;;  %v11469_v41 = vpop.f32.mrb[49].mxu1 }
 0x99c   : > { %v8445_v12 = vpop.f32.mrb[50].mxu1 }
 0x99d   : > { %v8466_v54 = vadd.f32 %v8445_v12, %v14485_v21  ;;  %v11470_v15 = vpop.f32.mrb[51].mxu1 }
 0x99f   : > { %v8485_v20 = vadd.f32 %v14493_v18, %v8466_v54 }
 0x9a1   : > { %v8497_v5 = vmax.f32 %v8485_v20, 0.0 }
 0x9a2   : > { %v8450_v60 = vpop.f32.mrb[52].mxu1 }
 0x9a3   : > { %8520 = vst.msk [vmem:[%s14499_s8 + $0x24] sm:$0xc0] %vm8519_vm12, %v8497_v5  ;;  %v8467_v59 = vadd.f32 %v8450_v60, %v14487_v23  ;;  %v11473_v19 = vpop.f32.mrb[53].mxu1 }
 0x9a4   : > { %v8453_v4 = vpop.f32.mrb[54].mxu1 }
 0x9a5   : > { %v8486_v8 = vadd.f32 %v14493_v18, %v8467_v59  ;;  %v11474_v13 = vpop.f32.mrb[55].mxu1 }
 0x9a7   : > { %v8498_v43 = vmax.f32 %v8486_v8, 0.0 }
 0x9a9   : > { %8522 = vst.msk [vmem:[%s14499_s8 + $0x2c] sm:$0x1f] %vm8521_vm13, %v8498_v43 }
 0x9aa PF: > { %s17_s24 = sadd.s32 1, %s12017_s24  }
 0x9ab   : > { %p14_p4 = scmp.ge.s32.totalorder %s17_s24, 4  }
 0x9ad   :  { %16 = sbr.rel (!%p14_p4) target bundleno = 1 (0x1), region = 414 }

// kernel: net_forward.3
= control target key start
LH: loop header
LB: loop body
LE: loop exit
PB: predicated region body
PF: predicated region fallthrough
CT: control target
= control target key end

     0   :  { %v8563_v36 = vmov 1983009808   ;;  %v40_v38 = vlaneseq  ;;  %s11195_s0 = inlined_call_operand.vmem [shape: f32[2,3136], index: 0, kind: input, shape index: {}]   ;;  %s11196_s1 = inlined_call_operand.vmem [shape: bf16[3136,512], index: 1, kind: input, shape index: {}]   ;;  %s11197_s2 = inlined_call_operand.vmem [shape: f32[1,512], index: 2, kind: input, shape index: {}]   ;;  %s11198_s3 = inlined_call_operand.vmem [shape: bf16[512,4], index: 3, kind: input, shape index: {}]   ;;  %s11199_s4 = inlined_call_operand.vmem [shape: f32[1,4], index: 4, kind: input, shape index: {}]   ;;  %s11200_s5 = inlined_call_operand.hbm [shape: f32[2,4], index: 5, kind: output, shape index: {}]  }
   0x1   :  { %v7325_v0 = vld [vmem:[%s11196_s1 + $0x4] ss:$16 sps:$4 sm:$0xff]   ;;  %v7327_v1 = vld [vmem:[%s11196_s1 + $0xc] ss:$16 sps:$4 sm:$0xff]   ;;  %v7329_v2 = vld [vmem:[%s11196_s1] ss:$16 sps:$4 sm:$0xff]   ;;  %v38_v37 = vunpack.c.l.s4 %v8563_v36 }
   0x2   :  { %4925 = vmatprep.subr.bf16.mxu0 %v7325_v0  ;;  %v7330_v3 = vld [vmem:[%s11196_s1 + $0x8] ss:$16 sps:$4 sm:$0xff]   ;;  %5458 = vmatprep.subr.bf16.mxu1 %v7327_v1  ;;  %v7331_v4 = vld [vmem:[%s11196_s1 + $0x24] ss:$16 sps:$4 sm:$0xff]   ;;  %v7333_v5 = vld [vmem:[%s11196_s1 + $0x2c] ss:$16 sps:$4 sm:$0xff]  }
   0x3   :  { %4926 = vmatpush1.bf16.msra.mxu0 %v7329_v2  ;;  %5459 = vmatpush1.bf16.msra.mxu1 %v7330_v3  ;;  %v7335_v6 = vld [vmem:[%s11196_s1 + $0x20] ss:$16 sps:$4 sm:$0xff]   ;;  %v7336_v7 = vld [vmem:[%s11196_s1 + $0x28] ss:$16 sps:$4 sm:$0xff]   ;;  %v7337_v8 = vld [vmem:[%s11196_s1 + $0x44] ss:$16 sps:$4 sm:$0xff]   ;;  %v39_v42 = vunpack.c.0.s8 %v38_v37 }
   0x4   :  { %4927 = vmatprep.subr.bf16.mxu0 %v7331_v4  ;;  %5460 = vmatprep.subr.bf16.mxu1 %v7333_v5  ;;  %v7339_v9 = vld [vmem:[%s11196_s1 + $0x4c] ss:$16 sps:$4 sm:$0xff]   ;;  %v7341_v10 = vld [vmem:[%s11196_s1 + $0x40] ss:$16 sps:$4 sm:$0xff]   ;;  %v7342_v11 = vld [vmem:[%s11196_s1 + $0x48] ss:$16 sps:$4 sm:$0xff]  }
   0x5   :  { %v7343_v12 = vld [vmem:[%s11196_s1 + $0x64] ss:$16 sps:$4 sm:$0xff]   ;;  %v7345_v13 = vld [vmem:[%s11196_s1 + $0x6c] ss:$16 sps:$4 sm:$0xff]   ;;  %v7347_v14 = vld [vmem:[%s11196_s1 + $0x60] ss:$16 sps:$4 sm:$0xff]  }
   0x6   :  { %v7348_v15 = vld [vmem:[%s11196_s1 + $0x68] ss:$16 sps:$4 sm:$0xff]   ;;  %v7349_v16 = vld [vmem:[%s11196_s1 + $0x84] ss:$16 sps:$4 sm:$0xff]   ;;  %v7351_v17 = vld [vmem:[%s11196_s1 + $0x8c] ss:$16 sps:$4 sm:$0xff]  }
   0x7   :  { %4928 = vmatpush1.bf16.msra.mxu0 %v7335_v6  ;;  %5461 = vmatpush1.bf16.msra.mxu1 %v7336_v7  ;;  %v7353_v18 = vld [vmem:[%s11196_s1 + $0x80] ss:$16 sps:$4 sm:$0xff]   ;;  %v7354_v19 = vld [vmem:[%s11196_s1 + $0x88] ss:$16 sps:$4 sm:$0xff]   ;;  %v7355_v20 = vld [vmem:[%s11196_s1 + $0xa4] ss:$16 sps:$4 sm:$0xff]  }
   0x8   :  { %4929 = vmatprep.subr.bf16.mxu0 %v7337_v8  ;;  %5462 = vmatprep.subr.bf16.mxu1 %v7339_v9  ;;  %v7357_v21 = vld [vmem:[%s11196_s1 + $0xac] ss:$16 sps:$4 sm:$0xff]   ;;  %v7359_v22 = vld [vmem:[%s11196_s1 + $0xa0] ss:$16 sps:$4 sm:$0xff]   ;;  %v7360_v23 = vld [vmem:[%s11196_s1 + $0xa8] ss:$16 sps:$4 sm:$0xff]  }
   0x9   :  { %v7361_v24 = vld [vmem:[%s11196_s1 + $0xc4] ss:$16 sps:$4 sm:$0xff]   ;;  %v7363_v25 = vld [vmem:[%s11196_s1 + $0xcc] ss:$16 sps:$4 sm:$0xff]   ;;  %v7365_v26 = vld [vmem:[%s11196_s1 + $0xc0] ss:$16 sps:$4 sm:$0xff]  }
   0xa   :  { %v7366_v27 = vld [vmem:[%s11196_s1 + $0xc8] ss:$16 sps:$4 sm:$0xff]   ;;  %v7367_v28 = vld [vmem:[%s11196_s1 + $0xe4] ss:$16 sps:$4 sm:$0xff]   ;;  %v7369_v29 = vld [vmem:[%s11196_s1 + $0xec] ss:$16 sps:$4 sm:$0xff]  }
   0xb   :  { %4930 = vmatpush1.bf16.msra.mxu0 %v7341_v10  ;;  %5463 = vmatpush1.bf16.msra.mxu1 %v7342_v11  ;;  %v7371_v30 = vld [vmem:[%s11196_s1 + $0xe0] ss:$16 sps:$4 sm:$0xff]   ;;  %v7372_v31 = vld [vmem:[%s11196_s1 + $0xe8] ss:$16 sps:$4 sm:$0xff]   ;;  %v7373_v32 = vld [vmem:[%s11196_s1 + $0x104] ss:$16 sps:$4 sm:$0xff]  }
   0xc   :  { %4931 = vmatprep.subr.bf16.mxu0 %v7343_v12  ;;  %5464 = vmatprep.subr.bf16.mxu1 %v7345_v13  ;;  %v7375_v33 = vld [vmem:[%s11196_s1 + $0x10c] ss:$16 sps:$4 sm:$0xff]   ;;  %v7377_v34 = vld [vmem:[%s11196_s1 + $0x100] ss:$16 sps:$4 sm:$0xff]   ;;  %v7378_v35 = vld [vmem:[%s11196_s1 + $0x108] ss:$16 sps:$4 sm:$0xff]  }
   0xd   :  { %v7379_v39 = vld [vmem:[%s11196_s1 + $0x124] ss:$16 sps:$4 sm:$0xff]   ;;  %v7381_v40 = vld [vmem:[%s11196_s1 + $0x12c] ss:$16 sps:$4 sm:$0xff]   ;;  %v7383_v41 = vld [vmem:[%s11196_s1 + $0x120] ss:$16 sps:$4 sm:$0xff]  }
   0xe   :  { %v8713_v43 = vshrl.u32 %v40_v38, 7  ;;  %v7384_v44 = vld [vmem:[%s11196_s1 + $0x128] ss:$16 sps:$4 sm:$0xff]   ;;  %v7385_v45 = vld [vmem:[%s11196_s1 + $0x144] ss:$16 sps:$4 sm:$0xff]  }
   0xf   :  { %4932 = vmatpush1.bf16.msra.mxu0 %v7347_v14  ;;  %5465 = vmatpush1.bf16.msra.mxu1 %v7348_v15  ;;  %v7387_v46 = vld [vmem:[%s11196_s1 + $0x14c] ss:$16 sps:$4 sm:$0xff]   ;;  %v7389_v47 = vld [vmem:[%s11196_s1 + $0x140] ss:$16 sps:$4 sm:$0xff]   ;;  %v7390_v48 = vld [vmem:[%s11196_s1 + $0x148] ss:$16 sps:$4 sm:$0xff]  }
  0x10   :  { %4933 = vmatprep.subr.bf16.mxu0 %v7349_v16  ;;  %5466 = vmatprep.subr.bf16.mxu1 %v7351_v17  ;;  %v8731_v49 = vsub.s32 %v39_v42, %v8713_v43  ;;  %v7391_v50 = vld [vmem:[%s11196_s1 + $0x164] ss:$16 sps:$4 sm:$0xff]   ;;  %v7393_v51 = vld [vmem:[%s11196_s1 + $0x16c] ss:$16 sps:$4 sm:$0xff]   ;;  %v7395_v53 = vld [vmem:[%s11196_s1 + $0x160] ss:$16 sps:$4 sm:$0xff]  }
  0x11   :  { %v22_v52 = vld [vmem:[%s11195_s0] sm:$0xff]  ;;  %v7396_v55 = vld [vmem:[%s11196_s1 + $0x168] ss:$16 sps:$4 sm:$0xff]   ;;  %v7399_v57 = vld [vmem:[%s11196_s1 + $0x18c] ss:$16 sps:$4 sm:$0xff]  }
  0x12   :  { %v43_v54 = vrot.slane %v22_v52, %v8731_v49  ;;  %v7397_v56 = vld [vmem:[%s11196_s1 + $0x184] ss:$16 sps:$4 sm:$0xff]   ;;  %v7401_v59 = vld [vmem:[%s11196_s1 + $0x180] ss:$16 sps:$4 sm:$0xff]   ;;  %v7402_v61 = vld [vmem:[%s11196_s1 + $0x188] ss:$16 sps:$4 sm:$0xff]   ;;  %v36_v4 = vcombine.high %v22_v52, %v22_v52 }
  0x13   :  { %4934 = vmatpush1.bf16.msra.mxu0 %v7353_v18  ;;  %5467 = vmatpush1.bf16.msra.mxu1 %v7354_v19  ;;  %v7403_v62 = vld [vmem:[%s11196_s1 + $0x1a4] ss:$16 sps:$4 sm:$0xff]   ;;  %v7405_v63 = vld [vmem:[%s11196_s1 + $0x1ac] ss:$16 sps:$4 sm:$0xff]   ;;  %v7407_v0 = vld [vmem:[%s11196_s1 + $0x1a0] ss:$16 sps:$4 sm:$0xff]  }
  0x14   :  { %4935 = vmatprep.subr.bf16.mxu0 %v7355_v20  ;;  %5468 = vmatprep.subr.bf16.mxu1 %v7357_v21  ;;  %v51_v58 = vcombine.high %v43_v54, %v43_v54  ;;  %v7408_v1 = vld [vmem:[%s11196_s1 + $0x1a8] ss:$16 sps:$4 sm:$0xff]   ;;  %v7409_v2 = vld [vmem:[%s11196_s1 + $0x1c4] ss:$16 sps:$4 sm:$0xff]   ;;  %v7411_v3 = vld [vmem:[%s11196_s1 + $0x1cc] ss:$16 sps:$4 sm:$0xff]   ;;  %v8792_v9 = vrot.slane %v36_v4, %v8731_v49  ;;  %v170_v16 = vpack.c.bf16 %v43_v54, %v43_v54 }
  0x15   :  { %v7413_v5 = vld [vmem:[%s11196_s1 + $0x1c0] ss:$16 sps:$4 sm:$0xff]   ;;  %v7414_v6 = vld [vmem:[%s11196_s1 + $0x1c8] ss:$16 sps:$4 sm:$0xff]   ;;  %v7415_v7 = vld [vmem:[%s11196_s1 + $0x1e4] ss:$16 sps:$4 sm:$0xff]  }
  0x16   :  { %v171_v60 = vpack.c.bf16 %v51_v58, %v51_v58  ;;  %v7417_v8 = vld [vmem:[%s11196_s1 + $0x1ec] ss:$16 sps:$4 sm:$0xff]   ;;  %v7419_v10 = vld [vmem:[%s11196_s1 + $0x1e0] ss:$16 sps:$4 sm:$0xff]   ;;  %v7420_v11 = vld [vmem:[%s11196_s1 + $0x1e8] ss:$16 sps:$4 sm:$0xff]   ;;  %v52_v14 = vcombine.high %v8792_v9, %v8792_v9 }
  0x17   :  { %4936 = vmatpush1.bf16.msra.mxu0 %v7359_v22  ;;  %5469 = vmatpush1.bf16.msra.mxu1 %v7360_v23  ;;  %v7424_v12 = vld [vmem:[%s11196_s1 + $0x204] ss:$16 sps:$4 sm:$0xff]   ;;  %v7427_v13 = vld [vmem:[%s11196_s1 + $0x20c] ss:$16 sps:$4 sm:$0xff]   ;;  %v7422_v15 = vld [vmem:[%s11196_s1 + $0x200] ss:$16 sps:$4 sm:$0xff]  }
  0x18   :  { %4937 = vmatprep.subr.bf16.mxu0 %v7361_v24  ;;  %5470 = vmatprep.subr.bf16.mxu1 %v7363_v25  ;;  %v7425_v17 = vld [vmem:[%s11196_s1 + $0x208] ss:$16 sps:$4 sm:$0xff]   ;;  %v7430_v18 = vld [vmem:[%s11196_s1 + $0x224] ss:$16 sps:$4 sm:$0xff]   ;;  %v7433_v19 = vld [vmem:[%s11196_s1 + $0x22c] ss:$16 sps:$4 sm:$0xff]   ;;  %v173_v20 = vpack.c.bf16 %v52_v14, %v52_v14 }
  0x19   :  { %4957 = vmatprep.mubr.bf16.mxu0 %v171_v60  ;;  %5490 = vmatprep.mubr.bf16.mxu1 %v171_v60  ;;  %v7428_v21 = vld [vmem:[%s11196_s1 + $0x220] ss:$16 sps:$4 sm:$0xff]   ;;  %v7431_v22 = vld [vmem:[%s11196_s1 + $0x228] ss:$16 sps:$4 sm:$0xff]   ;;  %v7436_v23 = vld [vmem:[%s11196_s1 + $0x244] ss:$16 sps:$4 sm:$0xff]  }
  0x1a   :  { %v7439_v24 = vld [vmem:[%s11196_s1 + $0x24c] ss:$16 sps:$4 sm:$0xff]   ;;  %v7434_v25 = vld [vmem:[%s11196_s1 + $0x240] ss:$16 sps:$4 sm:$0xff]   ;;  %v7455_v38 = vld [vmem:[%s11196_s1 + $0x2a8] ss:$16 sps:$4 sm:$0xff]  }
  0x1b   :  { %4938 = vmatpush1.bf16.msra.mxu0 %v7365_v26  ;;  %5471 = vmatpush1.bf16.msra.mxu1 %v7366_v27  ;;  %v7437_v26 = vld [vmem:[%s11196_s1 + $0x248] ss:$16 sps:$4 sm:$0xff]   ;;  %v7442_v27 = vld [vmem:[%s11196_s1 + $0x264] ss:$16 sps:$4 sm:$0xff]   ;;  %v7457_v36 = vld [vmem:[%s11196_s1 + $0x2ac] ss:$16 sps:$4 sm:$0xff]  }
  0x1c   :  { %4939 = vmatprep.subr.bf16.mxu0 %v7367_v28  ;;  %5472 = vmatprep.subr.bf16.mxu1 %v7369_v29  ;;  %v7445_v28 = vld [vmem:[%s11196_s1 + $0x26c] ss:$16 sps:$4 sm:$0xff]   ;;  %v7440_v29 = vld [vmem:[%s11196_s1 + $0x260] ss:$16 sps:$4 sm:$0xff]   ;;  %v7461_v42 = vld [vmem:[%s11196_s1 + $0x2c8] ss:$16 sps:$4 sm:$0xff]  }
  0x1d   :  { %v7452_v37 = vld [vmem:[%s11196_s1 + $0x2a0] ss:$16 sps:$4 sm:$0xff]   ;;  %v7473_v52 = vld [vmem:[%s11196_s1 + $0x308] ss:$16 sps:$4 sm:$0xff]   ;;  %v7481_v54 = vld [vmem:[%s11196_s1 + $0x32c] ss:$16 sps:$4 sm:$0xff]  }
  0x1e   :  { %v7487_v58 = vld [vmem:[%s11196_s1 + $0x34c] ss:$16 sps:$4 sm:$0xff]   ;;  %v7485_v60 = vld [vmem:[%s11196_s1 + $0x348] ss:$16 sps:$4 sm:$0xff]   ;;  %v7514_v14 = vld [vmem:[%s11196_s1 + $0x3e4] ss:$16 sps:$4 sm:$0xff]  }
  0x1f   :  { %4940 = vmatpush1.bf16.msra.mxu0 %v7371_v30  ;;  %5473 = vmatpush1.bf16.msra.mxu1 %v7372_v31  ;;  %v7443_v30 = vld [vmem:[%s11196_s1 + $0x268] ss:$16 sps:$4 sm:$0xff]   ;;  %v7448_v31 = vld [vmem:[%s11196_s1 + $0x284] ss:$16 sps:$4 sm:$0xff]  }
  0x20   :  { %4941 = vmatprep.subr.bf16.mxu0 %v7373_v32  ;;  %5474 = vmatprep.subr.bf16.mxu1 %v7375_v33  ;;  %v7451_v32 = vld [vmem:[%s11196_s1 + $0x28c] ss:$16 sps:$4 sm:$0xff]   ;;  %v7446_v33 = vld [vmem:[%s11196_s1 + $0x280] ss:$16 sps:$4 sm:$0xff]   ;;  %v7497_v4 = vld [vmem:[%s11196_s1 + $0x388] ss:$16 sps:$4 sm:$0xff]  }
  0x23   :  { %4942 = vmatpush1.bf16.msra.mxu0 %v7377_v34  ;;  %5475 = vmatpush1.bf16.msra.mxu1 %v7378_v35  ;;  %v7449_v34 = vld [vmem:[%s11196_s1 + $0x288] ss:$16 sps:$4 sm:$0xff]   ;;  %v7454_v35 = vld [vmem:[%s11196_s1 + $0x2a4] ss:$16 sps:$4 sm:$0xff]  }
  0x24   :  { %4943 = vmatprep.subr.bf16.mxu0 %v7379_v39  ;;  %5476 = vmatprep.subr.bf16.mxu1 %v7381_v40  ;;  %v7460_v39 = vld [vmem:[%s11196_s1 + $0x2c4] ss:$16 sps:$4 sm:$0xff]   ;;  %v7463_v40 = vld [vmem:[%s11196_s1 + $0x2cc] ss:$16 sps:$4 sm:$0xff]  }
  0x27   :  { %4944 = vmatpush1.bf16.msra.mxu0 %v7383_v41  ;;  %5477 = vmatpush1.bf16.msra.mxu1 %v7384_v44  ;;  %v7458_v41 = vld [vmem:[%s11196_s1 + $0x2c0] ss:$16 sps:$4 sm:$0xff]   ;;  %v7466_v44 = vld [vmem:[%s11196_s1 + $0x2e4] ss:$16 sps:$4 sm:$0xff]  }
  0x28   :  { %4945 = vmatprep.subr.bf16.mxu0 %v7385_v45  ;;  %5478 = vmatprep.subr.bf16.mxu1 %v7387_v46  ;;  %v7469_v45 = vld [vmem:[%s11196_s1 + $0x2ec] ss:$16 sps:$4 sm:$0xff]   ;;  %v7464_v46 = vld [vmem:[%s11196_s1 + $0x2e0] ss:$16 sps:$4 sm:$0xff]  }
  0x2b   :  { %4946 = vmatpush1.bf16.msra.mxu0 %v7389_v47  ;;  %5479 = vmatpush1.bf16.msra.mxu1 %v7390_v48  ;;  %v7467_v47 = vld [vmem:[%s11196_s1 + $0x2e8] ss:$16 sps:$4 sm:$0xff]   ;;  %v7472_v48 = vld [vmem:[%s11196_s1 + $0x304] ss:$16 sps:$4 sm:$0xff]  }
  0x2c   :  { %4947 = vmatprep.subr.bf16.mxu0 %v7391_v50  ;;  %5480 = vmatprep.subr.bf16.mxu1 %v7393_v51  ;;  %v7475_v50 = vld [vmem:[%s11196_s1 + $0x30c] ss:$16 sps:$4 sm:$0xff]   ;;  %v7470_v51 = vld [vmem:[%s11196_s1 + $0x300] ss:$16 sps:$4 sm:$0xff]  }
  0x2f   :  { %4948 = vmatpush1.bf16.msra.mxu0 %v7395_v53  ;;  %5481 = vmatpush1.bf16.msra.mxu1 %v7396_v55  ;;  %v7478_v53 = vld [vmem:[%s11196_s1 + $0x324] ss:$16 sps:$4 sm:$0xff]   ;;  %v7476_v55 = vld [vmem:[%s11196_s1 + $0x320] ss:$16 sps:$4 sm:$0xff]  }
  0x30   :  { %4949 = vmatprep.subr.bf16.mxu0 %v7397_v56  ;;  %5482 = vmatprep.subr.bf16.mxu1 %v7399_v57  ;;  %v7479_v56 = vld [vmem:[%s11196_s1 + $0x328] ss:$16 sps:$4 sm:$0xff]   ;;  %v7484_v57 = vld [vmem:[%s11196_s1 + $0x344] ss:$16 sps:$4 sm:$0xff]  }
  0x33   :  { %4950 = vmatpush1.bf16.msra.mxu0 %v7401_v59  ;;  %5483 = vmatpush1.bf16.msra.mxu1 %v7402_v61  ;;  %v7482_v59 = vld [vmem:[%s11196_s1 + $0x340] ss:$16 sps:$4 sm:$0xff]   ;;  %v7490_v61 = vld [vmem:[%s11196_s1 + $0x364] ss:$16 sps:$4 sm:$0xff]  }
  0x34   :  { %4951 = vmatprep.subr.bf16.mxu0 %v7403_v62  ;;  %5484 = vmatprep.subr.bf16.mxu1 %v7405_v63  ;;  %v7493_v62 = vld [vmem:[%s11196_s1 + $0x36c] ss:$16 sps:$4 sm:$0xff]   ;;  %v7488_v63 = vld [vmem:[%s11196_s1 + $0x360] ss:$16 sps:$4 sm:$0xff]  }
  0x37   :  { %4952 = vmatpush1.bf16.msra.mxu0 %v7407_v0  ;;  %5485 = vmatpush1.bf16.msra.mxu1 %v7408_v1  ;;  %v7491_v0 = vld [vmem:[%s11196_s1 + $0x368] ss:$16 sps:$4 sm:$0xff]   ;;  %v7496_v1 = vld [vmem:[%s11196_s1 + $0x384] ss:$16 sps:$4 sm:$0xff]  }
  0x38   :  { %4953 = vmatprep.subr.bf16.mxu0 %v7409_v2  ;;  %5486 = vmatprep.subr.bf16.mxu1 %v7411_v3  ;;  %v7499_v2 = vld [vmem:[%s11196_s1 + $0x38c] ss:$16 sps:$4 sm:$0xff]   ;;  %v7494_v3 = vld [vmem:[%s11196_s1 + $0x380] ss:$16 sps:$4 sm:$0xff]  }
  0x3b   :  { %4954 = vmatpush1.bf16.msra.mxu0 %v7413_v5  ;;  %5487 = vmatpush1.bf16.msra.mxu1 %v7414_v6  ;;  %v7502_v5 = vld [vmem:[%s11196_s1 + $0x3a4] ss:$16 sps:$4 sm:$0xff]   ;;  %v7505_v6 = vld [vmem:[%s11196_s1 + $0x3ac] ss:$16 sps:$4 sm:$0xff]  }
  0x3c   :  { %4955 = vmatprep.subr.bf16.mxu0 %v7415_v7  ;;  %5488 = vmatprep.subr.bf16.mxu1 %v7417_v8  ;;  %v7500_v7 = vld [vmem:[%s11196_s1 + $0x3a0] ss:$16 sps:$4 sm:$0xff]   ;;  %v7503_v8 = vld [vmem:[%s11196_s1 + $0x3a8] ss:$16 sps:$4 sm:$0xff]  }
  0x3f   :  { %4956 = vmatpush1.bf16.msra.mxu0 %v7419_v10  ;;  %5489 = vmatpush1.bf16.msra.mxu1 %v7420_v11  ;;  %v7508_v10 = vld [vmem:[%s11196_s1 + $0x3c4] ss:$16 sps:$4 sm:$0xff]   ;;  %v7511_v11 = vld [vmem:[%s11196_s1 + $0x3cc] ss:$16 sps:$4 sm:$0xff]  }
  0x40   :  { %4966 = vmatprep.subr.bf16.mxu0 %v7424_v12  ;;  %5499 = vmatprep.subr.bf16.mxu1 %v7427_v13  ;;  %v7506_v12 = vld [vmem:[%s11196_s1 + $0x3c0] ss:$16 sps:$4 sm:$0xff]   ;;  %v7509_v13 = vld [vmem:[%s11196_s1 + $0x3c8] ss:$16 sps:$4 sm:$0xff]  }
  0x42   :  { %4958 = vmatmul.mubr.bf16.vlgmr.msra.gmra.mrb[0].mxu0 %v170_v16  ;;  %5491 = vmatmul.mubr.bf16.vlgmr.msra.gmra.mrb[0].mxu1 %v170_v16  ;;  %v7512_v16 = vld [vmem:[%s11196_s1 + $0x3e0] ss:$16 sps:$4 sm:$0xff]  }
  0x43   :  { %4967 = vmatpush1.bf16.msra.mxu0 %v7422_v15  ;;  %5500 = vmatpush1.bf16.msra.mxu1 %v7425_v17  ;;  %v7517_v15 = vld [vmem:[%s11196_s1 + $0x3ec] ss:$16 sps:$4 sm:$0xff]   ;;  %v7515_v17 = vld [vmem:[%s11196_s1 + $0x3e8] ss:$16 sps:$4 sm:$0xff]  }
  0x44   :  { %4968 = vmatprep.subr.bf16.mxu0 %v7430_v18  ;;  %5501 = vmatprep.subr.bf16.mxu1 %v7433_v19  ;;  %v7520_v18 = vld [vmem:[%s11196_s1 + $0x404] ss:$16 sps:$4 sm:$0xff]   ;;  %v7523_v19 = vld [vmem:[%s11196_s1 + $0x40c] ss:$16 sps:$4 sm:$0xff]  }
  0x45   :  { %4998 = vmatprep.mubr.bf16.mxu0 %v173_v20  ;;  %5531 = vmatprep.mubr.bf16.mxu1 %v173_v20  ;;  %v7518_v20 = vld [vmem:[%s11196_s1 + $0x400] ss:$16 sps:$4 sm:$0xff]  }
  0x47   :  { %4969 = vmatpush1.bf16.msra.mxu0 %v7428_v21  ;;  %5502 = vmatpush1.bf16.msra.mxu1 %v7431_v22  ;;  %v172_v21 = vpack.c.bf16 %v8792_v9, %v8792_v9  ;;  %v7521_v22 = vld [vmem:[%s11196_s1 + $0x408] ss:$16 sps:$4 sm:$0xff]   ;;  %v7529_v9 = vld [vmem:[%s11196_s1 + $0x42c] ss:$16 sps:$4 sm:$0xff]  }
  0x48   :  { %4970 = vmatprep.subr.bf16.mxu0 %v7436_v23  ;;  %5503 = vmatprep.subr.bf16.mxu1 %v7439_v24  ;;  %v9011_v23 = vld [vmem:[%s11195_s0 + $0x8] sm:$0xff]  ;;  %v7526_v24 = vld [vmem:[%s11196_s1 + $0x424] ss:$16 sps:$4 sm:$0xff]  }
  0x4b   :  { %4971 = vmatpush1.bf16.msra.mxu0 %v7434_v25  ;;  %5504 = vmatpush1.bf16.msra.mxu1 %v7437_v26  ;;  %v9021_v25 = vrot.slane %v9011_v23, %v8731_v49 }
  0x4c   :  { %4972 = vmatprep.subr.bf16.mxu0 %v7442_v27  ;;  %5505 = vmatprep.subr.bf16.mxu1 %v7445_v28  ;;  %v7524_v27 = vld [vmem:[%s11196_s1 + $0x420] ss:$16 sps:$4 sm:$0xff]   ;;  %v7527_v28 = vld [vmem:[%s11196_s1 + $0x428] ss:$16 sps:$4 sm:$0xff]  }
  0x4d   :  { %v68_v26 = vcombine.high %v9021_v25, %v9021_v25 }
  0x4f   :  { %4973 = vmatpush1.bf16.msra.mxu0 %v7440_v29  ;;  %5506 = vmatpush1.bf16.msra.mxu1 %v7443_v30  ;;  %v7532_v29 = vld [vmem:[%s11196_s1 + $0x444] ss:$16 sps:$4 sm:$0xff]   ;;  %v7535_v30 = vld [vmem:[%s11196_s1 + $0x44c] ss:$16 sps:$4 sm:$0xff]  }
  0x50   :  { %4974 = vmatprep.subr.bf16.mxu0 %v7448_v31  ;;  %5507 = vmatprep.subr.bf16.mxu1 %v7451_v32  ;;  %v175_v31 = vpack.c.bf16 %v68_v26, %v68_v26  ;;  %v7530_v32 = vld [vmem:[%s11196_s1 + $0x440] ss:$16 sps:$4 sm:$0xff]   ;;  %v7611_v26 = vld [vmem:[%s11196_s1 + $0x5e8] ss:$16 sps:$4 sm:$0xff]  }
  0x53   :  { %4975 = vmatpush1.bf16.msra.mxu0 %v7446_v33  ;;  %5508 = vmatpush1.bf16.msra.mxu1 %v7449_v34  ;;  %v7533_v33 = vld [vmem:[%s11196_s1 + $0x448] ss:$16 sps:$4 sm:$0xff]   ;;  %v7538_v34 = vld [vmem:[%s11196_s1 + $0x464] ss:$16 sps:$4 sm:$0xff]  }
  0x54   :  { %4976 = vmatprep.subr.bf16.mxu0 %v7454_v35  ;;  %5509 = vmatprep.subr.bf16.mxu1 %v7457_v36  ;;  %v7541_v35 = vld [vmem:[%s11196_s1 + $0x46c] ss:$16 sps:$4 sm:$0xff]   ;;  %v7536_v36 = vld [vmem:[%s11196_s1 + $0x460] ss:$16 sps:$4 sm:$0xff]  }
  0x57   :  { %4977 = vmatpush1.bf16.msra.mxu0 %v7452_v37  ;;  %5510 = vmatpush1.bf16.msra.mxu1 %v7455_v38  ;;  %v7539_v37 = vld [vmem:[%s11196_s1 + $0x468] ss:$16 sps:$4 sm:$0xff]   ;;  %v7544_v38 = vld [vmem:[%s11196_s1 + $0x484] ss:$16 sps:$4 sm:$0xff]  }
  0x58   :  { %4978 = vmatprep.subr.bf16.mxu0 %v7460_v39  ;;  %5511 = vmatprep.subr.bf16.mxu1 %v7463_v40  ;;  %v7547_v39 = vld [vmem:[%s11196_s1 + $0x48c] ss:$16 sps:$4 sm:$0xff]   ;;  %v7542_v40 = vld [vmem:[%s11196_s1 + $0x480] ss:$16 sps:$4 sm:$0xff]  }
  0x5b   :  { %4979 = vmatpush1.bf16.msra.mxu0 %v7458_v41  ;;  %5512 = vmatpush1.bf16.msra.mxu1 %v7461_v42  ;;  %v7545_v41 = vld [vmem:[%s11196_s1 + $0x488] ss:$16 sps:$4 sm:$0xff]   ;;  %v7550_v42 = vld [vmem:[%s11196_s1 + $0x4a4] ss:$16 sps:$4 sm:$0xff]  }
  0x5c   :  { %4980 = vmatprep.subr.bf16.mxu0 %v7466_v44  ;;  %5513 = vmatprep.subr.bf16.mxu1 %v7469_v45  ;;  %v7553_v44 = vld [vmem:[%s11196_s1 + $0x4ac] ss:$16 sps:$4 sm:$0xff]   ;;  %v7548_v45 = vld [vmem:[%s11196_s1 + $0x4a0] ss:$16 sps:$4 sm:$0xff]  }
  0x5f   :  { %4981 = vmatpush1.bf16.msra.mxu0 %v7464_v46  ;;  %5514 = vmatpush1.bf16.msra.mxu1 %v7467_v47  ;;  %v7551_v46 = vld [vmem:[%s11196_s1 + $0x4a8] ss:$16 sps:$4 sm:$0xff]   ;;  %v7556_v47 = vld [vmem:[%s11196_s1 + $0x4c4] ss:$16 sps:$4 sm:$0xff]  }
  0x60   :  { %4982 = vmatprep.subr.bf16.mxu0 %v7472_v48  ;;  %5515 = vmatprep.subr.bf16.mxu1 %v7475_v50  ;;  %v7559_v48 = vld [vmem:[%s11196_s1 + $0x4cc] ss:$16 sps:$4 sm:$0xff]   ;;  %v7554_v50 = vld [vmem:[%s11196_s1 + $0x4c0] ss:$16 sps:$4 sm:$0xff]  }
  0x63   :  { %4983 = vmatpush1.bf16.msra.mxu0 %v7470_v51  ;;  %5516 = vmatpush1.bf16.msra.mxu1 %v7473_v52  ;;  %v7557_v51 = vld [vmem:[%s11196_s1 + $0x4c8] ss:$16 sps:$4 sm:$0xff]   ;;  %v7562_v52 = vld [vmem:[%s11196_s1 + $0x4e4] ss:$16 sps:$4 sm:$0xff]  }
  0x64   :  { %4984 = vmatprep.subr.bf16.mxu0 %v7478_v53  ;;  %5517 = vmatprep.subr.bf16.mxu1 %v7481_v54  ;;  %v7565_v53 = vld [vmem:[%s11196_s1 + $0x4ec] ss:$16 sps:$4 sm:$0xff]   ;;  %v7560_v54 = vld [vmem:[%s11196_s1 + $0x4e0] ss:$16 sps:$4 sm:$0xff]  }
  0x67   :  { %4985 = vmatpush1.bf16.msra.mxu0 %v7476_v55  ;;  %5518 = vmatpush1.bf16.msra.mxu1 %v7479_v56  ;;  %v7563_v55 = vld [vmem:[%s11196_s1 + $0x4e8] ss:$16 sps:$4 sm:$0xff]   ;;  %v7568_v56 = vld [vmem:[%s11196_s1 + $0x504] ss:$16 sps:$4 sm:$0xff]  }
  0x68   :  { %4986 = vmatprep.subr.bf16.mxu0 %v7484_v57  ;;  %5519 = vmatprep.subr.bf16.mxu1 %v7487_v58  ;;  %v7571_v57 = vld [vmem:[%s11196_s1 + $0x50c] ss:$16 sps:$4 sm:$0xff]   ;;  %v7566_v58 = vld [vmem:[%s11196_s1 + $0x500] ss:$16 sps:$4 sm:$0xff]  }
  0x6b   :  { %4987 = vmatpush1.bf16.msra.mxu0 %v7482_v59  ;;  %5520 = vmatpush1.bf16.msra.mxu1 %v7485_v60  ;;  %v7569_v59 = vld [vmem:[%s11196_s1 + $0x508] ss:$16 sps:$4 sm:$0xff]   ;;  %v7574_v60 = vld [vmem:[%s11196_s1 + $0x524] ss:$16 sps:$4 sm:$0xff]  }
  0x6c   :  { %4988 = vmatprep.subr.bf16.mxu0 %v7490_v61  ;;  %5521 = vmatprep.subr.bf16.mxu1 %v7493_v62  ;;  %v7577_v61 = vld [vmem:[%s11196_s1 + $0x52c] ss:$16 sps:$4 sm:$0xff]   ;;  %v7572_v62 = vld [vmem:[%s11196_s1 + $0x520] ss:$16 sps:$4 sm:$0xff]  }
  0x6f   :  { %4989 = vmatpush1.bf16.msra.mxu0 %v7488_v63  ;;  %5522 = vmatpush1.bf16.msra.mxu1 %v7491_v0  ;;  %v7575_v63 = vld [vmem:[%s11196_s1 + $0x528] ss:$16 sps:$4 sm:$0xff]   ;;  %v7580_v0 = vld [vmem:[%s11196_s1 + $0x544] ss:$16 sps:$4 sm:$0xff]  }
  0x70   :  { %4990 = vmatprep.subr.bf16.mxu0 %v7496_v1  ;;  %5523 = vmatprep.subr.bf16.mxu1 %v7499_v2  ;;  %v7583_v1 = vld [vmem:[%s11196_s1 + $0x54c] ss:$16 sps:$4 sm:$0xff]   ;;  %v7578_v2 = vld [vmem:[%s11196_s1 + $0x540] ss:$16 sps:$4 sm:$0xff]  }
  0x73   :  { %4991 = vmatpush1.bf16.msra.mxu0 %v7494_v3  ;;  %5524 = vmatpush1.bf16.msra.mxu1 %v7497_v4  ;;  %v7581_v3 = vld [vmem:[%s11196_s1 + $0x548] ss:$16 sps:$4 sm:$0xff]   ;;  %v7586_v4 = vld [vmem:[%s11196_s1 + $0x564] ss:$16 sps:$4 sm:$0xff]  }
  0x74   :  { %4992 = vmatprep.subr.bf16.mxu0 %v7502_v5  ;;  %5525 = vmatprep.subr.bf16.mxu1 %v7505_v6  ;;  %v7589_v5 = vld [vmem:[%s11196_s1 + $0x56c] ss:$16 sps:$4 sm:$0xff]   ;;  %v7584_v6 = vld [vmem:[%s11196_s1 + $0x560] ss:$16 sps:$4 sm:$0xff]  }
  0x77   :  { %4993 = vmatpush1.bf16.msra.mxu0 %v7500_v7  ;;  %5526 = vmatpush1.bf16.msra.mxu1 %v7503_v8  ;;  %v7587_v7 = vld [vmem:[%s11196_s1 + $0x568] ss:$16 sps:$4 sm:$0xff]   ;;  %v7592_v8 = vld [vmem:[%s11196_s1 + $0x584] ss:$16 sps:$4 sm:$0xff]  }
  0x78   :  { %4994 = vmatprep.subr.bf16.mxu0 %v7508_v10  ;;  %5527 = vmatprep.subr.bf16.mxu1 %v7511_v11  ;;  %v7595_v10 = vld [vmem:[%s11196_s1 + $0x58c] ss:$16 sps:$4 sm:$0xff]   ;;  %v7590_v11 = vld [vmem:[%s11196_s1 + $0x580] ss:$16 sps:$4 sm:$0xff]  }
  0x7b   :  { %4995 = vmatpush1.bf16.msra.mxu0 %v7506_v12  ;;  %5528 = vmatpush1.bf16.msra.mxu1 %v7509_v13  ;;  %v7593_v12 = vld [vmem:[%s11196_s1 + $0x588] ss:$16 sps:$4 sm:$0xff]   ;;  %v7598_v13 = vld [vmem:[%s11196_s1 + $0x5a4] ss:$16 sps:$4 sm:$0xff]  }
  0x7c   :  { %4996 = vmatprep.subr.bf16.mxu0 %v7514_v14  ;;  %5529 = vmatprep.subr.bf16.mxu1 %v7517_v15  ;;  %v7601_v14 = vld [vmem:[%s11196_s1 + $0x5ac] ss:$16 sps:$4 sm:$0xff]   ;;  %v7596_v15 = vld [vmem:[%s11196_s1 + $0x5a0] ss:$16 sps:$4 sm:$0xff]  }
  0x7f   :  { %4997 = vmatpush1.bf16.msra.mxu0 %v7512_v16  ;;  %5530 = vmatpush1.bf16.msra.mxu1 %v7515_v17  ;;  %v7599_v16 = vld [vmem:[%s11196_s1 + $0x5a8] ss:$16 sps:$4 sm:$0xff]   ;;  %v7604_v17 = vld [vmem:[%s11196_s1 + $0x5c4] ss:$16 sps:$4 sm:$0xff]  }
  0x80   :  { %5007 = vmatprep.subr.bf16.mxu0 %v7520_v18  ;;  %5540 = vmatprep.subr.bf16.mxu1 %v7523_v19  ;;  %v7607_v18 = vld [vmem:[%s11196_s1 + $0x5cc] ss:$16 sps:$4 sm:$0xff]   ;;  %v53_v19 = vcombine.high %v9011_v23, %v9011_v23 }
  0x81   :  { %v7613_v23 = vld [vmem:[%s11196_s1 + $0x5ec] ss:$16 sps:$4 sm:$0xff]  }
  0x82   :  { %4999 = vmatmul.mubr.bf16.vlgmr.msra.gmra.mrb[0].mxu0 %v172_v21  ;;  %5532 = vmatmul.mubr.bf16.vlgmr.msra.gmra.mrb[0].mxu1 %v172_v21  ;;  %v7605_v21 = vld [vmem:[%s11196_s1 + $0x5c8] ss:$16 sps:$4 sm:$0xff]  }
  0x83   :  { %5008 = vmatpush1.bf16.msra.mxu0 %v7518_v20  ;;  %5541 = vmatpush1.bf16.msra.mxu1 %v7521_v22  ;;  %v7602_v20 = vld [vmem:[%s11196_s1 + $0x5c0] ss:$16 sps:$4 sm:$0xff]   ;;  %v7610_v22 = vld [vmem:[%s11196_s1 + $0x5e4] ss:$16 sps:$4 sm:$0xff]  }
  0x84   :  { %5009 = vmatprep.subr.bf16.mxu0 %v7526_v24  ;;  %5542 = vmatprep.subr.bf16.mxu1 %v7529_v9  ;;  %v9196_v24 = vrot.slane %v53_v19, %v8731_v49  ;;  %v7608_v9 = vld [vmem:[%s11196_s1 + $0x5e0] ss:$16 sps:$4 sm:$0xff]   ;;  %v7689_v19 = vld [vmem:[%s11196_s1 + $0x788] ss:$16 sps:$4 sm:$0xff]  }
  0x85   :  { %5039 = vmatprep.mubr.bf16.mxu0 %v175_v31  ;;  %5572 = vmatprep.mubr.bf16.mxu1 %v175_v31  ;;  %v7614_v31 = vld [vmem:[%s11196_s1 + $0x600] ss:$16 sps:$4 sm:$0xff]  }
  0x87   :  { %5010 = vmatpush1.bf16.msra.mxu0 %v7524_v27  ;;  %5543 = vmatpush1.bf16.msra.mxu1 %v7527_v28  ;;  %v7616_v27 = vld [vmem:[%s11196_s1 + $0x604] ss:$16 sps:$4 sm:$0xff]   ;;  %v7619_v28 = vld [vmem:[%s11196_s1 + $0x60c] ss:$16 sps:$4 sm:$0xff]  }
  0x88   :  { %5011 = vmatprep.subr.bf16.mxu0 %v7532_v29  ;;  %5544 = vmatprep.subr.bf16.mxu1 %v7535_v30  ;;  %v69_v29 = vcombine.high %v9196_v24, %v9196_v24  ;;  %v174_v30 = vpack.c.bf16 %v9021_v25, %v9021_v25  ;;  %v7625_v25 = vld [vmem:[%s11196_s1 + $0x62c] ss:$16 sps:$4 sm:$0xff]  }
  0x8b   :  { %5012 = vmatpush1.bf16.msra.mxu0 %v7530_v32  ;;  %5545 = vmatpush1.bf16.msra.mxu1 %v7533_v33  ;;  %v7617_v32 = vld [vmem:[%s11196_s1 + $0x608] ss:$16 sps:$4 sm:$0xff]   ;;  %v7622_v33 = vld [vmem:[%s11196_s1 + $0x624] ss:$16 sps:$4 sm:$0xff]  }
  0x8c   :  { %5013 = vmatprep.subr.bf16.mxu0 %v7538_v34  ;;  %5546 = vmatprep.subr.bf16.mxu1 %v7541_v35  ;;  %v177_v34 = vpack.c.bf16 %v69_v29, %v69_v29  ;;  %v7620_v35 = vld [vmem:[%s11196_s1 + $0x620] ss:$16 sps:$4 sm:$0xff]   ;;  %v7701_v29 = vld [vmem:[%s11196_s1 + $0x7c8] ss:$16 sps:$4 sm:$0xff]  }
  0x8f   :  { %5014 = vmatpush1.bf16.msra.mxu0 %v7536_v36  ;;  %5547 = vmatpush1.bf16.msra.mxu1 %v7539_v37  ;;  %v7623_v36 = vld [vmem:[%s11196_s1 + $0x628] ss:$16 sps:$4 sm:$0xff]   ;;  %v7628_v37 = vld [vmem:[%s11196_s1 + $0x644] ss:$16 sps:$4 sm:$0xff]  }
  0x90   :  { %5015 = vmatprep.subr.bf16.mxu0 %v7544_v38  ;;  %5548 = vmatprep.subr.bf16.mxu1 %v7547_v39  ;;  %v7631_v38 = vld [vmem:[%s11196_s1 + $0x64c] ss:$16 sps:$4 sm:$0xff]   ;;  %v7626_v39 = vld [vmem:[%s11196_s1 + $0x640] ss:$16 sps:$4 sm:$0xff]  }
  0x93   :  { %5016 = vmatpush1.bf16.msra.mxu0 %v7542_v40  ;;  %5549 = vmatpush1.bf16.msra.mxu1 %v7545_v41  ;;  %v7629_v40 = vld [vmem:[%s11196_s1 + $0x648] ss:$16 sps:$4 sm:$0xff]   ;;  %v7634_v41 = vld [vmem:[%s11196_s1 + $0x664] ss:$16 sps:$4 sm:$0xff]  }
  0x94   :  { %5017 = vmatprep.subr.bf16.mxu0 %v7550_v42  ;;  %5550 = vmatprep.subr.bf16.mxu1 %v7553_v44  ;;  %v7637_v42 = vld [vmem:[%s11196_s1 + $0x66c] ss:$16 sps:$4 sm:$0xff]   ;;  %v7632_v44 = vld [vmem:[%s11196_s1 + $0x660] ss:$16 sps:$4 sm:$0xff]  }
  0x97   :  { %5018 = vmatpush1.bf16.msra.mxu0 %v7548_v45  ;;  %5551 = vmatpush1.bf16.msra.mxu1 %v7551_v46  ;;  %v7635_v45 = vld [vmem:[%s11196_s1 + $0x668] ss:$16 sps:$4 sm:$0xff]   ;;  %v7640_v46 = vld [vmem:[%s11196_s1 + $0x684] ss:$16 sps:$4 sm:$0xff]  }
  0x98   :  { %5019 = vmatprep.subr.bf16.mxu0 %v7556_v47  ;;  %5552 = vmatprep.subr.bf16.mxu1 %v7559_v48  ;;  %v7643_v47 = vld [vmem:[%s11196_s1 + $0x68c] ss:$16 sps:$4 sm:$0xff]   ;;  %v7638_v48 = vld [vmem:[%s11196_s1 + $0x680] ss:$16 sps:$4 sm:$0xff]  }
  0x9b   :  { %5020 = vmatpush1.bf16.msra.mxu0 %v7554_v50  ;;  %5553 = vmatpush1.bf16.msra.mxu1 %v7557_v51  ;;  %v7641_v50 = vld [vmem:[%s11196_s1 + $0x688] ss:$16 sps:$4 sm:$0xff]   ;;  %v7646_v51 = vld [vmem:[%s11196_s1 + $0x6a4] ss:$16 sps:$4 sm:$0xff]  }
  0x9c   :  { %5021 = vmatprep.subr.bf16.mxu0 %v7562_v52  ;;  %5554 = vmatprep.subr.bf16.mxu1 %v7565_v53  ;;  %v7649_v52 = vld [vmem:[%s11196_s1 + $0x6ac] ss:$16 sps:$4 sm:$0xff]   ;;  %v7644_v53 = vld [vmem:[%s11196_s1 + $0x6a0] ss:$16 sps:$4 sm:$0xff]  }
  0x9f   :  { %5022 = vmatpush1.bf16.msra.mxu0 %v7560_v54  ;;  %5555 = vmatpush1.bf16.msra.mxu1 %v7563_v55  ;;  %v7647_v54 = vld [vmem:[%s11196_s1 + $0x6a8] ss:$16 sps:$4 sm:$0xff]   ;;  %v7652_v55 = vld [vmem:[%s11196_s1 + $0x6c4] ss:$16 sps:$4 sm:$0xff]  }
  0xa0   :  { %5023 = vmatprep.subr.bf16.mxu0 %v7568_v56  ;;  %5556 = vmatprep.subr.bf16.mxu1 %v7571_v57  ;;  %v7655_v56 = vld [vmem:[%s11196_s1 + $0x6cc] ss:$16 sps:$4 sm:$0xff]   ;;  %v7650_v57 = vld [vmem:[%s11196_s1 + $0x6c0] ss:$16 sps:$4 sm:$0xff]  }
  0xa3   :  { %5024 = vmatpush1.bf16.msra.mxu0 %v7566_v58  ;;  %5557 = vmatpush1.bf16.msra.mxu1 %v7569_v59  ;;  %v7653_v58 = vld [vmem:[%s11196_s1 + $0x6c8] ss:$16 sps:$4 sm:$0xff]   ;;  %v7658_v59 = vld [vmem:[%s11196_s1 + $0x6e4] ss:$16 sps:$4 sm:$0xff]  }
  0xa4   :  { %5025 = vmatprep.subr.bf16.mxu0 %v7574_v60  ;;  %5558 = vmatprep.subr.bf16.mxu1 %v7577_v61  ;;  %v7661_v60 = vld [vmem:[%s11196_s1 + $0x6ec] ss:$16 sps:$4 sm:$0xff]   ;;  %v7656_v61 = vld [vmem:[%s11196_s1 + $0x6e0] ss:$16 sps:$4 sm:$0xff]  }
  0xa7   :  { %5026 = vmatpush1.bf16.msra.mxu0 %v7572_v62  ;;  %5559 = vmatpush1.bf16.msra.mxu1 %v7575_v63  ;;  %v7659_v62 = vld [vmem:[%s11196_s1 + $0x6e8] ss:$16 sps:$4 sm:$0xff]   ;;  %v7664_v63 = vld [vmem:[%s11196_s1 + $0x704] ss:$16 sps:$4 sm:$0xff]  }
  0xa8   :  { %5027 = vmatprep.subr.bf16.mxu0 %v7580_v0  ;;  %5560 = vmatprep.subr.bf16.mxu1 %v7583_v1  ;;  %v7667_v0 = vld [vmem:[%s11196_s1 + $0x70c] ss:$16 sps:$4 sm:$0xff]   ;;  %v7662_v1 = vld [vmem:[%s11196_s1 + $0x700] ss:$16 sps:$4 sm:$0xff]  }
  0xab   :  { %5028 = vmatpush1.bf16.msra.mxu0 %v7578_v2  ;;  %5561 = vmatpush1.bf16.msra.mxu1 %v7581_v3  ;;  %v7665_v2 = vld [vmem:[%s11196_s1 + $0x708] ss:$16 sps:$4 sm:$0xff]   ;;  %v7670_v3 = vld [vmem:[%s11196_s1 + $0x724] ss:$16 sps:$4 sm:$0xff]  }
  0xac   :  { %5029 = vmatprep.subr.bf16.mxu0 %v7586_v4  ;;  %5562 = vmatprep.subr.bf16.mxu1 %v7589_v5  ;;  %v7673_v4 = vld [vmem:[%s11196_s1 + $0x72c] ss:$16 sps:$4 sm:$0xff]   ;;  %v7668_v5 = vld [vmem:[%s11196_s1 + $0x720] ss:$16 sps:$4 sm:$0xff]  }
  0xaf   :  { %5030 = vmatpush1.bf16.msra.mxu0 %v7584_v6  ;;  %5563 = vmatpush1.bf16.msra.mxu1 %v7587_v7  ;;  %v7671_v6 = vld [vmem:[%s11196_s1 + $0x728] ss:$16 sps:$4 sm:$0xff]   ;;  %v7676_v7 = vld [vmem:[%s11196_s1 + $0x744] ss:$16 sps:$4 sm:$0xff]  }
  0xb0   :  { %5031 = vmatprep.subr.bf16.mxu0 %v7592_v8  ;;  %5564 = vmatprep.subr.bf16.mxu1 %v7595_v10  ;;  %v7679_v8 = vld [vmem:[%s11196_s1 + $0x74c] ss:$16 sps:$4 sm:$0xff]   ;;  %v7674_v10 = vld [vmem:[%s11196_s1 + $0x740] ss:$16 sps:$4 sm:$0xff]  }
  0xb3   :  { %5032 = vmatpush1.bf16.msra.mxu0 %v7590_v11  ;;  %5565 = vmatpush1.bf16.msra.mxu1 %v7593_v12  ;;  %v7677_v11 = vld [vmem:[%s11196_s1 + $0x748] ss:$16 sps:$4 sm:$0xff]   ;;  %v7682_v12 = vld [vmem:[%s11196_s1 + $0x764] ss:$16 sps:$4 sm:$0xff]  }
  0xb4   :  { %5033 = vmatprep.subr.bf16.mxu0 %v7598_v13  ;;  %5566 = vmatprep.subr.bf16.mxu1 %v7601_v14  ;;  %v7685_v13 = vld [vmem:[%s11196_s1 + $0x76c] ss:$16 sps:$4 sm:$0xff]   ;;  %v7680_v14 = vld [vmem:[%s11196_s1 + $0x760] ss:$16 sps:$4 sm:$0xff]  }
  0xb7   :  { %5034 = vmatpush1.bf16.msra.mxu0 %v7596_v15  ;;  %5567 = vmatpush1.bf16.msra.mxu1 %v7599_v16  ;;  %v7683_v15 = vld [vmem:[%s11196_s1 + $0x768] ss:$16 sps:$4 sm:$0xff]   ;;  %v7688_v16 = vld [vmem:[%s11196_s1 + $0x784] ss:$16 sps:$4 sm:$0xff]  }
  0xb8   :  { %5035 = vmatprep.subr.bf16.mxu0 %v7604_v17  ;;  %5568 = vmatprep.subr.bf16.mxu1 %v7607_v18  ;;  %v7691_v17 = vld [vmem:[%s11196_s1 + $0x78c] ss:$16 sps:$4 sm:$0xff]   ;;  %v7686_v18 = vld [vmem:[%s11196_s1 + $0x780] ss:$16 sps:$4 sm:$0xff]  }
  0xbb   :  { %5036 = vmatpush1.bf16.msra.mxu0 %v7602_v20  ;;  %5569 = vmatpush1.bf16.msra.mxu1 %v7605_v21  ;;  %v7694_v20 = vld [vmem:[%s11196_s1 + $0x7a4] ss:$16 sps:$4 sm:$0xff]   ;;  %v7697_v21 = vld [vmem:[%s11196_s1 + $0x7ac] ss:$16 sps:$4 sm:$0xff]  }
  0xbc   :  { %5037 = vmatprep.subr.bf16.mxu0 %v7610_v22  ;;  %5570 = vmatprep.subr.bf16.mxu1 %v7613_v23  ;;  %v7692_v22 = vld [vmem:[%s11196_s1 + $0x7a0] ss:$16 sps:$4 sm:$0xff]   ;;  %v7695_v23 = vld [vmem:[%s11196_s1 + $0x7a8] ss:$16 sps:$4 sm:$0xff]  }
  0xbf   :  { %5038 = vmatpush1.bf16.msra.mxu0 %v7608_v9  ;;  %5571 = vmatpush1.bf16.msra.mxu1 %v7611_v26  ;;  %v7700_v9 = vld [vmem:[%s11196_s1 + $0x7c4] ss:$16 sps:$4 sm:$0xff]   ;;  %v7703_v26 = vld [vmem:[%s11196_s1 + $0x7cc] ss:$16 sps:$4 sm:$0xff]  }
  0xc0   :  { %5048 = vmatprep.subr.bf16.mxu0 %v7616_v27  ;;  %5581 = vmatprep.subr.bf16.mxu1 %v7619_v28  ;;  %v7698_v27 = vld [vmem:[%s11196_s1 + $0x7c0] ss:$16 sps:$4 sm:$0xff]  }
  0xc1   :  { %v9388_v28 = vld [vmem:[%s11195_s0 + $0x10] sm:$0xff] }
  0xc2   :  { %5040 = vmatmul.mubr.bf16.vlgmr.msra.gmra.mrb[0].mxu0 %v174_v30  ;;  %5573 = vmatmul.mubr.bf16.vlgmr.msra.gmra.mrb[0].mxu1 %v174_v30  ;;  %v7706_v30 = vld [vmem:[%s11196_s1 + $0x7e4] ss:$16 sps:$4 sm:$0xff]  }
  0xc3   :  { %5049 = vmatpush1.bf16.msra.mxu0 %v7614_v31  ;;  %5582 = vmatpush1.bf16.msra.mxu1 %v7617_v32  ;;  %v7709_v31 = vld [vmem:[%s11196_s1 + $0x7ec] ss:$16 sps:$4 sm:$0xff]   ;;  %v9401_v32 = vrot.slane %v9388_v28, %v8731_v49 }
  0xc4   :  { %5050 = vmatprep.subr.bf16.mxu0 %v7622_v33  ;;  %5583 = vmatprep.subr.bf16.mxu1 %v7625_v25  ;;  %v7704_v33 = vld [vmem:[%s11196_s1 + $0x7e0] ss:$16 sps:$4 sm:$0xff]   ;;  %v7707_v25 = vld [vmem:[%s11196_s1 + $0x7e8] ss:$16 sps:$4 sm:$0xff]  }
  0xc5   :  { %5080 = vmatprep.mubr.bf16.mxu0 %v177_v34  ;;  %5613 = vmatprep.mubr.bf16.mxu1 %v177_v34  ;;  %v7713_v34 = vld [vmem:[%s11196_s1 + $0x804] ss:$16 sps:$4 sm:$0xff]  }
  0xc7   :  { %5051 = vmatpush1.bf16.msra.mxu0 %v7620_v35  ;;  %5584 = vmatpush1.bf16.msra.mxu1 %v7623_v36  ;;  %v7716_v35 = vld [vmem:[%s11196_s1 + $0x80c] ss:$16 sps:$4 sm:$0xff]   ;;  %v85_v36 = vcombine.high %v9401_v32, %v9401_v32 }
  0xc8   :  { %5052 = vmatprep.subr.bf16.mxu0 %v7628_v37  ;;  %5585 = vmatprep.subr.bf16.mxu1 %v7631_v38  ;;  %v7711_v37 = vld [vmem:[%s11196_s1 + $0x800] ss:$16 sps:$4 sm:$0xff]   ;;  %v176_v38 = vpack.c.bf16 %v9196_v24, %v9196_v24 }
  0xc9   :  { %v7717_v24 = vld [vmem:[%s11196_s1 + $0x820] ss:$16 sps:$4 sm:$0xff]  }
  0xcb   :  { %5053 = vmatpush1.bf16.msra.mxu0 %v7626_v39  ;;  %5586 = vmatpush1.bf16.msra.mxu1 %v7629_v40  ;;  %v7714_v39 = vld [vmem:[%s11196_s1 + $0x808] ss:$16 sps:$4 sm:$0xff]   ;;  %v7719_v40 = vld [vmem:[%s11196_s1 + $0x824] ss:$16 sps:$4 sm:$0xff]  }
  0xcc   :  { %5054 = vmatprep.subr.bf16.mxu0 %v7634_v41  ;;  %5587 = vmatprep.subr.bf16.mxu1 %v7637_v42  ;;  %v7722_v41 = vld [vmem:[%s11196_s1 + $0x82c] ss:$16 sps:$4 sm:$0xff]   ;;  %v179_v42 = vpack.c.bf16 %v85_v36, %v85_v36  ;;  %v7795_v36 = vld [vmem:[%s11196_s1 + $0x9c0] ss:$16 sps:$4 sm:$0xff]  }
  0xcf   :  { %5055 = vmatpush1.bf16.msra.mxu0 %v7632_v44  ;;  %5588 = vmatpush1.bf16.msra.mxu1 %v7635_v45  ;;  %v7720_v44 = vld [vmem:[%s11196_s1 + $0x828] ss:$16 sps:$4 sm:$0xff]   ;;  %v7725_v45 = vld [vmem:[%s11196_s1 + $0x844] ss:$16 sps:$4 sm:$0xff]  }
  0xd0   :  { %5056 = vmatprep.subr.bf16.mxu0 %v7640_v46  ;;  %5589 = vmatprep.subr.bf16.mxu1 %v7643_v47  ;;  %v7728_v46 = vld [vmem:[%s11196_s1 + $0x84c] ss:$16 sps:$4 sm:$0xff]   ;;  %v7723_v47 = vld [vmem:[%s11196_s1 + $0x840] ss:$16 sps:$4 sm:$0xff]  }
  0xd3   :  { %5057 = vmatpush1.bf16.msra.mxu0 %v7638_v48  ;;  %5590 = vmatpush1.bf16.msra.mxu1 %v7641_v50  ;;  %v7726_v48 = vld [vmem:[%s11196_s1 + $0x848] ss:$16 sps:$4 sm:$0xff]   ;;  %v7731_v50 = vld [vmem:[%s11196_s1 + $0x864] ss:$16 sps:$4 sm:$0xff]  }
  0xd4   :  { %5058 = vmatprep.subr.bf16.mxu0 %v7646_v51  ;;  %5591 = vmatprep.subr.bf16.mxu1 %v7649_v52  ;;  %v7734_v51 = vld [vmem:[%s11196_s1 + $0x86c] ss:$16 sps:$4 sm:$0xff]   ;;  %v7729_v52 = vld [vmem:[%s11196_s1 + $0x860] ss:$16 sps:$4 sm:$0xff]  }
  0xd7   :  { %5059 = vmatpush1.bf16.msra.mxu0 %v7644_v53  ;;  %5592 = vmatpush1.bf16.msra.mxu1 %v7647_v54  ;;  %v7732_v53 = vld [vmem:[%s11196_s1 + $0x868] ss:$16 sps:$4 sm:$0xff]   ;;  %v7737_v54 = vld [vmem:[%s11196_s1 + $0x884] ss:$16 sps:$4 sm:$0xff]  }
  0xd8   :  { %5060 = vmatprep.subr.bf16.mxu0 %v7652_v55  ;;  %5593 = vmatprep.subr.bf16.mxu1 %v7655_v56  ;;  %v7740_v55 = vld [vmem:[%s11196_s1 + $0x88c] ss:$16 sps:$4 sm:$0xff]   ;;  %v7735_v56 = vld [vmem:[%s11196_s1 + $0x880] ss:$16 sps:$4 sm:$0xff]  }
  0xdb   :  { %5061 = vmatpush1.bf16.msra.mxu0 %v7650_v57  ;;  %5594 = vmatpush1.bf16.msra.mxu1 %v7653_v58  ;;  %v7738_v57 = vld [vmem:[%s11196_s1 + $0x888] ss:$16 sps:$4 sm:$0xff]   ;;  %v7743_v58 = vld [vmem:[%s11196_s1 + $0x8a4] ss:$16 sps:$4 sm:$0xff]  }
  0xdc   :  { %5062 = vmatprep.subr.bf16.mxu0 %v7658_v59  ;;  %5595 = vmatprep.subr.bf16.mxu1 %v7661_v60  ;;  %v7746_v59 = vld [vmem:[%s11196_s1 + $0x8ac] ss:$16 sps:$4 sm:$0xff]   ;;  %v7741_v60 = vld [vmem:[%s11196_s1 + $0x8a0] ss:$16 sps:$4 sm:$0xff]  }
  0xdf   :  { %5063 = vmatpush1.bf16.msra.mxu0 %v7656_v61  ;;  %5596 = vmatpush1.bf16.msra.mxu1 %v7659_v62  ;;  %v7744_v61 = vld [vmem:[%s11196_s1 + $0x8a8] ss:$16 sps:$4 sm:$0xff]   ;;  %v7749_v62 = vld [vmem:[%s11196_s1 + $0x8c4] ss:$16 sps:$4 sm:$0xff]  }
  0xe0   :  { %5064 = vmatprep.subr.bf16.mxu0 %v7664_v63  ;;  %5597 = vmatprep.subr.bf16.mxu1 %v7667_v0  ;;  %v7752_v63 = vld [vmem:[%s11196_s1 + $0x8cc] ss:$16 sps:$4 sm:$0xff]   ;;  %v7747_v0 = vld [vmem:[%s11196_s1 + $0x8c0] ss:$16 sps:$4 sm:$0xff]  }
  0xe3   :  { %5065 = vmatpush1.bf16.msra.mxu0 %v7662_v1  ;;  %5598 = vmatpush1.bf16.msra.mxu1 %v7665_v2  ;;  %v7750_v1 = vld [vmem:[%s11196_s1 + $0x8c8] ss:$16 sps:$4 sm:$0xff]   ;;  %v7755_v2 = vld [vmem:[%s11196_s1 + $0x8e4] ss:$16 sps:$4 sm:$0xff]  }
  0xe4   :  { %5066 = vmatprep.subr.bf16.mxu0 %v7670_v3  ;;  %5599 = vmatprep.subr.bf16.mxu1 %v7673_v4  ;;  %v7758_v3 = vld [vmem:[%s11196_s1 + $0x8ec] ss:$16 sps:$4 sm:$0xff]   ;;  %v7753_v4 = vld [vmem:[%s11196_s1 + $0x8e0] ss:$16 sps:$4 sm:$0xff]  }
  0xe7   :  { %5067 = vmatpush1.bf16.msra.mxu0 %v7668_v5  ;;  %5600 = vmatpush1.bf16.msra.mxu1 %v7671_v6  ;;  %v7756_v5 = vld [vmem:[%s11196_s1 + $0x8e8] ss:$16 sps:$4 sm:$0xff]   ;;  %v7761_v6 = vld [vmem:[%s11196_s1 + $0x904] ss:$16 sps:$4 sm:$0xff]  }
  0xe8   :  { %5068 = vmatprep.subr.bf16.mxu0 %v7676_v7  ;;  %5601 = vmatprep.subr.bf16.mxu1 %v7679_v8  ;;  %v7764_v7 = vld [vmem:[%s11196_s1 + $0x90c] ss:$16 sps:$4 sm:$0xff]   ;;  %v7759_v8 = vld [vmem:[%s11196_s1 + $0x900] ss:$16 sps:$4 sm:$0xff]  }
  0xeb   :  { %5069 = vmatpush1.bf16.msra.mxu0 %v7674_v10  ;;  %5602 = vmatpush1.bf16.msra.mxu1 %v7677_v11  ;;  %v7762_v10 = vld [vmem:[%s11196_s1 + $0x908] ss:$16 sps:$4 sm:$0xff]   ;;  %v7767_v11 = vld [vmem:[%s11196_s1 + $0x924] ss:$16 sps:$4 sm:$0xff]  }
  0xec   :  { %5070 = vmatprep.subr.bf16.mxu0 %v7682_v12  ;;  %5603 = vmatprep.subr.bf16.mxu1 %v7685_v13  ;;  %v7770_v12 = vld [vmem:[%s11196_s1 + $0x92c] ss:$16 sps:$4 sm:$0xff]   ;;  %v7765_v13 = vld [vmem:[%s11196_s1 + $0x920] ss:$16 sps:$4 sm:$0xff]  }
  0xef   :  { %5071 = vmatpush1.bf16.msra.mxu0 %v7680_v14  ;;  %5604 = vmatpush1.bf16.msra.mxu1 %v7683_v15  ;;  %v7768_v14 = vld [vmem:[%s11196_s1 + $0x928] ss:$16 sps:$4 sm:$0xff]   ;;  %v7773_v15 = vld [vmem:[%s11196_s1 + $0x944] ss:$16 sps:$4 sm:$0xff]  }
  0xf0   :  { %5072 = vmatprep.subr.bf16.mxu0 %v7688_v16  ;;  %5605 = vmatprep.subr.bf16.mxu1 %v7691_v17  ;;  %v7776_v16 = vld [vmem:[%s11196_s1 + $0x94c] ss:$16 sps:$4 sm:$0xff]   ;;  %v7771_v17 = vld [vmem:[%s11196_s1 + $0x940] ss:$16 sps:$4 sm:$0xff]  }
  0xf3   :  { %5073 = vmatpush1.bf16.msra.mxu0 %v7686_v18  ;;  %5606 = vmatpush1.bf16.msra.mxu1 %v7689_v19  ;;  %v7774_v18 = vld [vmem:[%s11196_s1 + $0x948] ss:$16 sps:$4 sm:$0xff]   ;;  %v7779_v19 = vld [vmem:[%s11196_s1 + $0x964] ss:$16 sps:$4 sm:$0xff]  }
  0xf4   :  { %5074 = vmatprep.subr.bf16.mxu0 %v7694_v20  ;;  %5607 = vmatprep.subr.bf16.mxu1 %v7697_v21  ;;  %v7782_v20 = vld [vmem:[%s11196_s1 + $0x96c] ss:$16 sps:$4 sm:$0xff]   ;;  %v7777_v21 = vld [vmem:[%s11196_s1 + $0x960] ss:$16 sps:$4 sm:$0xff]  }
  0xf7   :  { %5075 = vmatpush1.bf16.msra.mxu0 %v7692_v22  ;;  %5608 = vmatpush1.bf16.msra.mxu1 %v7695_v23  ;;  %v7780_v22 = vld [vmem:[%s11196_s1 + $0x968] ss:$16 sps:$4 sm:$0xff]   ;;  %v7785_v23 = vld [vmem:[%s11196_s1 + $0x984] ss:$16 sps:$4 sm:$0xff]  }
  0xf8   :  { %5076 = vmatprep.subr.bf16.mxu0 %v7700_v9  ;;  %5609 = vmatprep.subr.bf16.mxu1 %v7703_v26  ;;  %v7788_v9 = vld [vmem:[%s11196_s1 + $0x98c] ss:$16 sps:$4 sm:$0xff]   ;;  %v7783_v26 = vld [vmem:[%s11196_s1 + $0x980] ss:$16 sps:$4 sm:$0xff]  }
  0xfb   :  { %5077 = vmatpush1.bf16.msra.mxu0 %v7698_v27  ;;  %5610 = vmatpush1.bf16.msra.mxu1 %v7701_v29  ;;  %v7786_v27 = vld [vmem:[%s11196_s1 + $0x988] ss:$16 sps:$4 sm:$0xff]   ;;  %v7791_v29 = vld [vmem:[%s11196_s1 + $0x9a4] ss:$16 sps:$4 sm:$0xff]  }
  0xfc   :  { %5078 = vmatprep.subr.bf16.mxu0 %v7706_v30  ;;  %5611 = vmatprep.subr.bf16.mxu1 %v7709_v31  ;;  %v7794_v30 = vld [vmem:[%s11196_s1 + $0x9ac] ss:$16 sps:$4 sm:$0xff]   ;;  %v7789_v31 = vld [vmem:[%s11196_s1 + $0x9a0] ss:$16 sps:$4 sm:$0xff]  }
  0xff   :  { %5079 = vmatpush1.bf16.msra.mxu0 %v7704_v33  ;;  %5612 = vmatpush1.bf16.msra.mxu1 %v7707_v25  ;;  %v7792_v33 = vld [vmem:[%s11196_s1 + $0x9a8] ss:$16 sps:$4 sm:$0xff]   ;;  %v7797_v25 = vld [vmem:[%s11196_s1 + $0x9c4] ss:$16 sps:$4 sm:$0xff]  }
 0x100   :  { %5089 = vmatprep.subr.bf16.mxu0 %v7713_v34  ;;  %5622 = vmatprep.subr.bf16.mxu1 %v7716_v35  ;;  %v7800_v34 = vld [vmem:[%s11196_s1 + $0x9cc] ss:$16 sps:$4 sm:$0xff]   ;;  %v70_v35 = vcombine.high %v9388_v28, %v9388_v28 }
 0x101   :  { %v7806_v28 = vld [vmem:[%s11196_s1 + $0x9ec] ss:$16 sps:$4 sm:$0xff]  }
 0x102   :  { %5081 = vmatmul.mubr.bf16.vlgmr.msra.gmra.mrb[0].mxu0 %v176_v38  ;;  %5614 = vmatmul.mubr.bf16.vlgmr.msra.gmra.mrb[0].mxu1 %v176_v38  ;;  %v7803_v38 = vld [vmem:[%s11196_s1 + $0x9e4] ss:$16 sps:$4 sm:$0xff]  }
 0x103   :  { %5090 = vmatpush1.bf16.msra.mxu0 %v7711_v37  ;;  %5623 = vmatpush1.bf16.msra.mxu1 %v7714_v39  ;;  %v7798_v37 = vld [vmem:[%s11196_s1 + $0x9c8] ss:$16 sps:$4 sm:$0xff]   ;;  %v9602_v39 = vrot.slane %v70_v35, %v8731_v49 }
 0x104   :  { %5091 = vmatprep.subr.bf16.mxu0 %v7719_v40  ;;  %5624 = vmatprep.subr.bf16.mxu1 %v7722_v41  ;;  %v7801_v40 = vld [vmem:[%s11196_s1 + $0x9e0] ss:$16 sps:$4 sm:$0xff]   ;;  %v7804_v41 = vld [vmem:[%s11196_s1 + $0x9e8] ss:$16 sps:$4 sm:$0xff]  }
 0x105   :  { %5121 = vmatprep.mubr.bf16.mxu0 %v179_v42  ;;  %5654 = vmatprep.mubr.bf16.mxu1 %v179_v42  ;;  %v7809_v42 = vld [vmem:[%s11196_s1 + $0xa04] ss:$16 sps:$4 sm:$0xff]   ;;  %v7882_v35 = vld [vmem:[%s11196_s1 + $0xb88] ss:$16 sps:$4 sm:$0xff]  }
 0x107   :  { %5092 = vmatpush1.bf16.msra.mxu0 %v7717_v24  ;;  %5625 = vmatpush1.bf16.msra.mxu1 %v7720_v44  ;;  %v7812_v24 = vld [vmem:[%s11196_s1 + $0xa0c] ss:$16 sps:$4 sm:$0xff]   ;;  %v86_v44 = vcombine.high %v9602_v39, %v9602_v39 }
 0x108   :  { %5093 = vmatprep.subr.bf16.mxu0 %v7725_v45  ;;  %5626 = vmatprep.subr.bf16.mxu1 %v7728_v46  ;;  %v178_v45 = vpack.c.bf16 %v9401_v32, %v9401_v32  ;;  %v7807_v46 = vld [vmem:[%s11196_s1 + $0xa00] ss:$16 sps:$4 sm:$0xff]   ;;  %v7818_v32 = vld [vmem:[%s11196_s1 + $0xa2c] ss:$16 sps:$4 sm:$0xff]  }
 0x10b   :  { %5094 = vmatpush1.bf16.msra.mxu0 %v7723_v47  ;;  %5627 = vmatpush1.bf16.msra.mxu1 %v7726_v48  ;;  %v7810_v47 = vld [vmem:[%s11196_s1 + $0xa08] ss:$16 sps:$4 sm:$0xff]   ;;  %v7815_v48 = vld [vmem:[%s11196_s1 + $0xa24] ss:$16 sps:$4 sm:$0xff]  }
 0x10c   :  { %5095 = vmatprep.subr.bf16.mxu0 %v7731_v50  ;;  %5628 = vmatprep.subr.bf16.mxu1 %v7734_v51  ;;  %v181_v50 = vpack.c.bf16 %v86_v44, %v86_v44  ;;  %v7813_v51 = vld [vmem:[%s11196_s1 + $0xa20] ss:$16 sps:$4 sm:$0xff]   ;;  %v7894_v44 = vld [vmem:[%s11196_s1 + $0xbc8] ss:$16 sps:$4 sm:$0xff]  }
 0x10f   :  { %5096 = vmatpush1.bf16.msra.mxu0 %v7729_v52  ;;  %5629 = vmatpush1.bf16.msra.mxu1 %v7732_v53  ;;  %v7816_v52 = vld [vmem:[%s11196_s1 + $0xa28] ss:$16 sps:$4 sm:$0xff]   ;;  %v7821_v53 = vld [vmem:[%s11196_s1 + $0xa44] ss:$16 sps:$4 sm:$0xff]  }
 0x110   :  { %5097 = vmatprep.subr.bf16.mxu0 %v7737_v54  ;;  %5630 = vmatprep.subr.bf16.mxu1 %v7740_v55  ;;  %v7824_v54 = vld [vmem:[%s11196_s1 + $0xa4c] ss:$16 sps:$4 sm:$0xff]   ;;  %v7819_v55 = vld [vmem:[%s11196_s1 + $0xa40] ss:$16 sps:$4 sm:$0xff]  }
 0x113   :  { %5098 = vmatpush1.bf16.msra.mxu0 %v7735_v56  ;;  %5631 = vmatpush1.bf16.msra.mxu1 %v7738_v57  ;;  %v7822_v56 = vld [vmem:[%s11196_s1 + $0xa48] ss:$16 sps:$4 sm:$0xff]   ;;  %v7827_v57 = vld [vmem:[%s11196_s1 + $0xa64] ss:$16 sps:$4 sm:$0xff]  }
 0x114   :  { %5099 = vmatprep.subr.bf16.mxu0 %v7743_v58  ;;  %5632 = vmatprep.subr.bf16.mxu1 %v7746_v59  ;;  %v7830_v58 = vld [vmem:[%s11196_s1 + $0xa6c] ss:$16 sps:$4 sm:$0xff]   ;;  %v7825_v59 = vld [vmem:[%s11196_s1 + $0xa60] ss:$16 sps:$4 sm:$0xff]  }
 0x117   :  { %5100 = vmatpush1.bf16.msra.mxu0 %v7741_v60  ;;  %5633 = vmatpush1.bf16.msra.mxu1 %v7744_v61  ;;  %v7828_v60 = vld [vmem:[%s11196_s1 + $0xa68] ss:$16 sps:$4 sm:$0xff]   ;;  %v7833_v61 = vld [vmem:[%s11196_s1 + $0xa84] ss:$16 sps:$4 sm:$0xff]  }
 0x118   :  { %5101 = vmatprep.subr.bf16.mxu0 %v7749_v62  ;;  %5634 = vmatprep.subr.bf16.mxu1 %v7752_v63  ;;  %v7836_v62 = vld [vmem:[%s11196_s1 + $0xa8c] ss:$16 sps:$4 sm:$0xff]   ;;  %v7831_v63 = vld [vmem:[%s11196_s1 + $0xa80] ss:$16 sps:$4 sm:$0xff]  }
 0x11b   :  { %5102 = vmatpush1.bf16.msra.mxu0 %v7747_v0  ;;  %5635 = vmatpush1.bf16.msra.mxu1 %v7750_v1  ;;  %v7834_v0 = vld [vmem:[%s11196_s1 + $0xa88] ss:$16 sps:$4 sm:$0xff]   ;;  %v7839_v1 = vld [vmem:[%s11196_s1 + $0xaa4] ss:$16 sps:$4 sm:$0xff]  }
 0x11c   :  { %5103 = vmatprep.subr.bf16.mxu0 %v7755_v2  ;;  %5636 = vmatprep.subr.bf16.mxu1 %v7758_v3  ;;  %v7842_v2 = vld [vmem:[%s11196_s1 + $0xaac] ss:$16 sps:$4 sm:$0xff]   ;;  %v7837_v3 = vld [vmem:[%s11196_s1 + $0xaa0] ss:$16 sps:$4 sm:$0xff]  }
 0x11f   :  { %5104 = vmatpush1.bf16.msra.mxu0 %v7753_v4  ;;  %5637 = vmatpush1.bf16.msra.mxu1 %v7756_v5  ;;  %v7840_v4 = vld [vmem:[%s11196_s1 + $0xaa8] ss:$16 sps:$4 sm:$0xff]   ;;  %v7845_v5 = vld [vmem:[%s11196_s1 + $0xac4] ss:$16 sps:$4 sm:$0xff]  }
 0x120   :  { %5105 = vmatprep.subr.bf16.mxu0 %v7761_v6  ;;  %5638 = vmatprep.subr.bf16.mxu1 %v7764_v7  ;;  %v7848_v6 = vld [vmem:[%s11196_s1 + $0xacc] ss:$16 sps:$4 sm:$0xff]   ;;  %v7843_v7 = vld [vmem:[%s11196_s1 + $0xac0] ss:$16 sps:$4 sm:$0xff]  }
 0x123   :  { %5106 = vmatpush1.bf16.msra.mxu0 %v7759_v8  ;;  %5639 = vmatpush1.bf16.msra.mxu1 %v7762_v10  ;;  %v7846_v8 = vld [vmem:[%s11196_s1 + $0xac8] ss:$16 sps:$4 sm:$0xff]   ;;  %v7851_v10 = vld [vmem:[%s11196_s1 + $0xae4] ss:$16 sps:$4 sm:$0xff]  }
 0x124   :  { %5107 = vmatprep.subr.bf16.mxu0 %v7767_v11  ;;  %5640 = vmatprep.subr.bf16.mxu1 %v7770_v12  ;;  %v7854_v11 = vld [vmem:[%s11196_s1 + $0xaec] ss:$16 sps:$4 sm:$0xff]   ;;  %v7849_v12 = vld [vmem:[%s11196_s1 + $0xae0] ss:$16 sps:$4 sm:$0xff]  }
 0x127   :  { %5108 = vmatpush1.bf16.msra.mxu0 %v7765_v13  ;;  %5641 = vmatpush1.bf16.msra.mxu1 %v7768_v14  ;;  %v7852_v13 = vld [vmem:[%s11196_s1 + $0xae8] ss:$16 sps:$4 sm:$0xff]   ;;  %v7857_v14 = vld [vmem:[%s11196_s1 + $0xb04] ss:$16 sps:$4 sm:$0xff]  }
 0x128   :  { %5109 = vmatprep.subr.bf16.mxu0 %v7773_v15  ;;  %5642 = vmatprep.subr.bf16.mxu1 %v7776_v16  ;;  %v7860_v15 = vld [vmem:[%s11196_s1 + $0xb0c] ss:$16 sps:$4 sm:$0xff]   ;;  %v7855_v16 = vld [vmem:[%s11196_s1 + $0xb00] ss:$16 sps:$4 sm:$0xff]  }
 0x12b   :  { %5110 = vmatpush1.bf16.msra.mxu0 %v7771_v17  ;;  %5643 = vmatpush1.bf16.msra.mxu1 %v7774_v18  ;;  %v7858_v17 = vld [vmem:[%s11196_s1 + $0xb08] ss:$16 sps:$4 sm:$0xff]   ;;  %v7863_v18 = vld [vmem:[%s11196_s1 + $0xb24] ss:$16 sps:$4 sm:$0xff]  }
 0x12c   :  { %5111 = vmatprep.subr.bf16.mxu0 %v7779_v19  ;;  %5644 = vmatprep.subr.bf16.mxu1 %v7782_v20  ;;  %v7866_v19 = vld [vmem:[%s11196_s1 + $0xb2c] ss:$16 sps:$4 sm:$0xff]   ;;  %v7861_v20 = vld [vmem:[%s11196_s1 + $0xb20] ss:$16 sps:$4 sm:$0xff]  }
 0x12f   :  { %5112 = vmatpush1.bf16.msra.mxu0 %v7777_v21  ;;  %5645 = vmatpush1.bf16.msra.mxu1 %v7780_v22  ;;  %v7864_v21 = vld [vmem:[%s11196_s1 + $0xb28] ss:$16 sps:$4 sm:$0xff]   ;;  %v7869_v22 = vld [vmem:[%s11196_s1 + $0xb44] ss:$16 sps:$4 sm:$0xff]  }
 0x130   :  { %5113 = vmatprep.subr.bf16.mxu0 %v7785_v23  ;;  %5646 = vmatprep.subr.bf16.mxu1 %v7788_v9  ;;  %v7872_v23 = vld [vmem:[%s11196_s1 + $0xb4c] ss:$16 sps:$4 sm:$0xff]   ;;  %v7867_v9 = vld [vmem:[%s11196_s1 + $0xb40] ss:$16 sps:$4 sm:$0xff]  }
 0x133   :  { %5114 = vmatpush1.bf16.msra.mxu0 %v7783_v26  ;;  %5647 = vmatpush1.bf16.msra.mxu1 %v7786_v27  ;;  %v7870_v26 = vld [vmem:[%s11196_s1 + $0xb48] ss:$16 sps:$4 sm:$0xff]   ;;  %v7875_v27 = vld [vmem:[%s11196_s1 + $0xb64] ss:$16 sps:$4 sm:$0xff]  }
 0x134   :  { %5115 = vmatprep.subr.bf16.mxu0 %v7791_v29  ;;  %5648 = vmatprep.subr.bf16.mxu1 %v7794_v30  ;;  %v7878_v29 = vld [vmem:[%s11196_s1 + $0xb6c] ss:$16 sps:$4 sm:$0xff]   ;;  %v7873_v30 = vld [vmem:[%s11196_s1 + $0xb60] ss:$16 sps:$4 sm:$0xff]  }
 0x137   :  { %5116 = vmatpush1.bf16.msra.mxu0 %v7789_v31  ;;  %5649 = vmatpush1.bf16.msra.mxu1 %v7792_v33  ;;  %v7876_v31 = vld [vmem:[%s11196_s1 + $0xb68] ss:$16 sps:$4 sm:$0xff]   ;;  %v7881_v33 = vld [vmem:[%s11196_s1 + $0xb84] ss:$16 sps:$4 sm:$0xff]  }
 0x138   :  { %5117 = vmatprep.subr.bf16.mxu0 %v7797_v25  ;;  %5650 = vmatprep.subr.bf16.mxu1 %v7800_v34  ;;  %v7884_v25 = vld [vmem:[%s11196_s1 + $0xb8c] ss:$16 sps:$4 sm:$0xff]   ;;  %v7879_v34 = vld [vmem:[%s11196_s1 + $0xb80] ss:$16 sps:$4 sm:$0xff]  }
 0x13b   :  { %5118 = vmatpush1.bf16.msra.mxu0 %v7795_v36  ;;  %5651 = vmatpush1.bf16.msra.mxu1 %v7798_v37  ;;  %v7887_v36 = vld [vmem:[%s11196_s1 + $0xba4] ss:$16 sps:$4 sm:$0xff]   ;;  %v7890_v37 = vld [vmem:[%s11196_s1 + $0xbac] ss:$16 sps:$4 sm:$0xff]  }
 0x13c   :  { %5119 = vmatprep.subr.bf16.mxu0 %v7803_v38  ;;  %5652 = vmatprep.subr.bf16.mxu1 %v7806_v28  ;;  %v7885_v38 = vld [vmem:[%s11196_s1 + $0xba0] ss:$16 sps:$4 sm:$0xff]   ;;  %v7888_v28 = vld [vmem:[%s11196_s1 + $0xba8] ss:$16 sps:$4 sm:$0xff]  }
 0x13f   :  { %5120 = vmatpush1.bf16.msra.mxu0 %v7801_v40  ;;  %5653 = vmatpush1.bf16.msra.mxu1 %v7804_v41  ;;  %v7893_v40 = vld [vmem:[%s11196_s1 + $0xbc4] ss:$16 sps:$4 sm:$0xff]   ;;  %v7896_v41 = vld [vmem:[%s11196_s1 + $0xbcc] ss:$16 sps:$4 sm:$0xff]  }
 0x140   :  { %5130 = vmatprep.subr.bf16.mxu0 %v7809_v42  ;;  %5663 = vmatprep.subr.bf16.mxu1 %v7812_v24  ;;  %v9791_v42 = vld [vmem:[%s11195_s0 + $0x18] sm:$0xff]  ;;  %v7891_v24 = vld [vmem:[%s11196_s1 + $0xbc0] ss:$16 sps:$4 sm:$0xff]  }
 0x142   :  { %5122 = vmatmul.mubr.bf16.vlgmr.msra.gmra.mrb[0].mxu0 %v178_v45  ;;  %5655 = vmatmul.mubr.bf16.vlgmr.msra.gmra.mrb[0].mxu1 %v178_v45  ;;  %v7899_v45 = vld [vmem:[%s11196_s1 + $0xbe4] ss:$16 sps:$4 sm:$0xff]  }
 0x143   :  { %5131 = vmatpush1.bf16.msra.mxu0 %v7807_v46  ;;  %5664 = vmatpush1.bf16.msra.mxu1 %v7810_v47  ;;  %v7902_v46 = vld [vmem:[%s11196_s1 + $0xbec] ss:$16 sps:$4 sm:$0xff]   ;;  %v9807_v47 = vrot.slane %v9791_v42, %v8731_v49 }
 0x144   :  { %5132 = vmatprep.subr.bf16.mxu0 %v7815_v48  ;;  %5665 = vmatprep.subr.bf16.mxu1 %v7818_v32  ;;  %v7897_v48 = vld [vmem:[%s11196_s1 + $0xbe0] ss:$16 sps:$4 sm:$0xff]   ;;  %v7900_v32 = vld [vmem:[%s11196_s1 + $0xbe8] ss:$16 sps:$4 sm:$0xff]  }
 0x145   :  { %5162 = vmatprep.mubr.bf16.mxu0 %v181_v50  ;;  %5695 = vmatprep.mubr.bf16.mxu1 %v181_v50  ;;  %v7906_v50 = vld [vmem:[%s11196_s1 + $0xc04] ss:$16 sps:$4 sm:$0xff]  }
 0x147   :  { %5133 = vmatpush1.bf16.msra.mxu0 %v7813_v51  ;;  %5666 = vmatpush1.bf16.msra.mxu1 %v7816_v52  ;;  %v7909_v51 = vld [vmem:[%s11196_s1 + $0xc0c] ss:$16 sps:$4 sm:$0xff]   ;;  %v102_v52 = vcombine.high %v9807_v47, %v9807_v47 }
 0x148   :  { %5134 = vmatprep.subr.bf16.mxu0 %v7821_v53  ;;  %5667 = vmatprep.subr.bf16.mxu1 %v7824_v54  ;;  %v180_v53 = vpack.c.bf16 %v9602_v39, %v9602_v39  ;;  %v7904_v54 = vld [vmem:[%s11196_s1 + $0xc00] ss:$16 sps:$4 sm:$0xff]   ;;  %v7915_v39 = vld [vmem:[%s11196_s1 + $0xc2c] ss:$16 sps:$4 sm:$0xff]  }
 0x14b   :  { %5135 = vmatpush1.bf16.msra.mxu0 %v7819_v55  ;;  %5668 = vmatpush1.bf16.msra.mxu1 %v7822_v56  ;;  %v7907_v55 = vld [vmem:[%s11196_s1 + $0xc08] ss:$16 sps:$4 sm:$0xff]   ;;  %v7912_v56 = vld [vmem:[%s11196_s1 + $0xc24] ss:$16 sps:$4 sm:$0xff]  }
 0x14c   :  { %5136 = vmatprep.subr.bf16.mxu0 %v7827_v57  ;;  %5669 = vmatprep.subr.bf16.mxu1 %v7830_v58  ;;  %v183_v57 = vpack.c.bf16 %v102_v52, %v102_v52  ;;  %v7910_v58 = vld [vmem:[%s11196_s1 + $0xc20] ss:$16 sps:$4 sm:$0xff]  }
 0x14d   :  { %v7988_v52 = vld [vmem:[%s11196_s1 + $0xdc0] ss:$16 sps:$4 sm:$0xff]  }
 0x14f   :  { %5137 = vmatpush1.bf16.msra.mxu0 %v7825_v59  ;;  %5670 = vmatpush1.bf16.msra.mxu1 %v7828_v60  ;;  %v7913_v59 = vld [vmem:[%s11196_s1 + $0xc28] ss:$16 sps:$4 sm:$0xff]   ;;  %v7918_v60 = vld [vmem:[%s11196_s1 + $0xc44] ss:$16 sps:$4 sm:$0xff]  }
 0x150   :  { %5138 = vmatprep.subr.bf16.mxu0 %v7833_v61  ;;  %5671 = vmatprep.subr.bf16.mxu1 %v7836_v62  ;;  %v7921_v61 = vld [vmem:[%s11196_s1 + $0xc4c] ss:$16 sps:$4 sm:$0xff]   ;;  %v7916_v62 = vld [vmem:[%s11196_s1 + $0xc40] ss:$16 sps:$4 sm:$0xff]  }
 0x153   :  { %5139 = vmatpush1.bf16.msra.mxu0 %v7831_v63  ;;  %5672 = vmatpush1.bf16.msra.mxu1 %v7834_v0  ;;  %v7919_v63 = vld [vmem:[%s11196_s1 + $0xc48] ss:$16 sps:$4 sm:$0xff]   ;;  %v7924_v0 = vld [vmem:[%s11196_s1 + $0xc64] ss:$16 sps:$4 sm:$0xff]  }
 0x154   :  { %5140 = vmatprep.subr.bf16.mxu0 %v7839_v1  ;;  %5673 = vmatprep.subr.bf16.mxu1 %v7842_v2  ;;  %v7927_v1 = vld [vmem:[%s11196_s1 + $0xc6c] ss:$16 sps:$4 sm:$0xff]   ;;  %v7922_v2 = vld [vmem:[%s11196_s1 + $0xc60] ss:$16 sps:$4 sm:$0xff]  }
 0x157   :  { %5141 = vmatpush1.bf16.msra.mxu0 %v7837_v3  ;;  %5674 = vmatpush1.bf16.msra.mxu1 %v7840_v4  ;;  %v7925_v3 = vld [vmem:[%s11196_s1 + $0xc68] ss:$16 sps:$4 sm:$0xff]   ;;  %v7930_v4 = vld [vmem:[%s11196_s1 + $0xc84] ss:$16 sps:$4 sm:$0xff]  }
 0x158   :  { %5142 = vmatprep.subr.bf16.mxu0 %v7845_v5  ;;  %5675 = vmatprep.subr.bf16.mxu1 %v7848_v6  ;;  %v7933_v5 = vld [vmem:[%s11196_s1 + $0xc8c] ss:$16 sps:$4 sm:$0xff]   ;;  %v7928_v6 = vld [vmem:[%s11196_s1 + $0xc80] ss:$16 sps:$4 sm:$0xff]  }
 0x15b   :  { %5143 = vmatpush1.bf16.msra.mxu0 %v7843_v7  ;;  %5676 = vmatpush1.bf16.msra.mxu1 %v7846_v8  ;;  %v7931_v7 = vld [vmem:[%s11196_s1 + $0xc88] ss:$16 sps:$4 sm:$0xff]   ;;  %v7936_v8 = vld [vmem:[%s11196_s1 + $0xca4] ss:$16 sps:$4 sm:$0xff]  }
 0x15c   :  { %5144 = vmatprep.subr.bf16.mxu0 %v7851_v10  ;;  %5677 = vmatprep.subr.bf16.mxu1 %v7854_v11  ;;  %v7939_v10 = vld [vmem:[%s11196_s1 + $0xcac] ss:$16 sps:$4 sm:$0xff]   ;;  %v7934_v11 = vld [vmem:[%s11196_s1 + $0xca0] ss:$16 sps:$4 sm:$0xff]  }
 0x15f   :  { %5145 = vmatpush1.bf16.msra.mxu0 %v7849_v12  ;;  %5678 = vmatpush1.bf16.msra.mxu1 %v7852_v13  ;;  %v7937_v12 = vld [vmem:[%s11196_s1 + $0xca8] ss:$16 sps:$4 sm:$0xff]   ;;  %v7942_v13 = vld [vmem:[%s11196_s1 + $0xcc4] ss:$16 sps:$4 sm:$0xff]  }
 0x160   :  { %5146 = vmatprep.subr.bf16.mxu0 %v7857_v14  ;;  %5679 = vmatprep.subr.bf16.mxu1 %v7860_v15  ;;  %v7945_v14 = vld [vmem:[%s11196_s1 + $0xccc] ss:$16 sps:$4 sm:$0xff]   ;;  %v7940_v15 = vld [vmem:[%s11196_s1 + $0xcc0] ss:$16 sps:$4 sm:$0xff]  }
 0x163   :  { %5147 = vmatpush1.bf16.msra.mxu0 %v7855_v16  ;;  %5680 = vmatpush1.bf16.msra.mxu1 %v7858_v17  ;;  %v7943_v16 = vld [vmem:[%s11196_s1 + $0xcc8] ss:$16 sps:$4 sm:$0xff]   ;;  %v7948_v17 = vld [vmem:[%s11196_s1 + $0xce4] ss:$16 sps:$4 sm:$0xff]  }
 0x164   :  { %5148 = vmatprep.subr.bf16.mxu0 %v7863_v18  ;;  %5681 = vmatprep.subr.bf16.mxu1 %v7866_v19  ;;  %v7951_v18 = vld [vmem:[%s11196_s1 + $0xcec] ss:$16 sps:$4 sm:$0xff]   ;;  %v7946_v19 = vld [vmem:[%s11196_s1 + $0xce0] ss:$16 sps:$4 sm:$0xff]  }
 0x167   :  { %5149 = vmatpush1.bf16.msra.mxu0 %v7861_v20  ;;  %5682 = vmatpush1.bf16.msra.mxu1 %v7864_v21  ;;  %v7949_v20 = vld [vmem:[%s11196_s1 + $0xce8] ss:$16 sps:$4 sm:$0xff]   ;;  %v7954_v21 = vld [vmem:[%s11196_s1 + $0xd04] ss:$16 sps:$4 sm:$0xff]  }
 0x168   :  { %5150 = vmatprep.subr.bf16.mxu0 %v7869_v22  ;;  %5683 = vmatprep.subr.bf16.mxu1 %v7872_v23  ;;  %v7957_v22 = vld [vmem:[%s11196_s1 + $0xd0c] ss:$16 sps:$4 sm:$0xff]   ;;  %v7952_v23 = vld [vmem:[%s11196_s1 + $0xd00] ss:$16 sps:$4 sm:$0xff]  }
 0x16b   :  { %5151 = vmatpush1.bf16.msra.mxu0 %v7867_v9  ;;  %5684 = vmatpush1.bf16.msra.mxu1 %v7870_v26  ;;  %v7955_v9 = vld [vmem:[%s11196_s1 + $0xd08] ss:$16 sps:$4 sm:$0xff]   ;;  %v7960_v26 = vld [vmem:[%s11196_s1 + $0xd24] ss:$16 sps:$4 sm:$0xff]  }
 0x16c   :  { %5152 = vmatprep.subr.bf16.mxu0 %v7875_v27  ;;  %5685 = vmatprep.subr.bf16.mxu1 %v7878_v29  ;;  %v7963_v27 = vld [vmem:[%s11196_s1 + $0xd2c] ss:$16 sps:$4 sm:$0xff]   ;;  %v7958_v29 = vld [vmem:[%s11196_s1 + $0xd20] ss:$16 sps:$4 sm:$0xff]  }
 0x16f   :  { %5153 = vmatpush1.bf16.msra.mxu0 %v7873_v30  ;;  %5686 = vmatpush1.bf16.msra.mxu1 %v7876_v31  ;;  %v7961_v30 = vld [vmem:[%s11196_s1 + $0xd28] ss:$16 sps:$4 sm:$0xff]   ;;  %v7966_v31 = vld [vmem:[%s11196_s1 + $0xd44] ss:$16 sps:$4 sm:$0xff]  }
 0x170   :  { %5154 = vmatprep.subr.bf16.mxu0 %v7881_v33  ;;  %5687 = vmatprep.subr.bf16.mxu1 %v7884_v25  ;;  %v7969_v33 = vld [vmem:[%s11196_s1 + $0xd4c] ss:$16 sps:$4 sm:$0xff]   ;;  %v7964_v25 = vld [vmem:[%s11196_s1 + $0xd40] ss:$16 sps:$4 sm:$0xff]  }
 0x173   :  { %5155 = vmatpush1.bf16.msra.mxu0 %v7879_v34  ;;  %5688 = vmatpush1.bf16.msra.mxu1 %v7882_v35  ;;  %v7967_v34 = vld [vmem:[%s11196_s1 + $0xd48] ss:$16 sps:$4 sm:$0xff]   ;;  %v7972_v35 = vld [vmem:[%s11196_s1 + $0xd64] ss:$16 sps:$4 sm:$0xff]  }
 0x174   :  { %5156 = vmatprep.subr.bf16.mxu0 %v7887_v36  ;;  %5689 = vmatprep.subr.bf16.mxu1 %v7890_v37  ;;  %v7975_v36 = vld [vmem:[%s11196_s1 + $0xd6c] ss:$16 sps:$4 sm:$0xff]   ;;  %v7970_v37 = vld [vmem:[%s11196_s1 + $0xd60] ss:$16 sps:$4 sm:$0xff]  }
 0x177   :  { %5157 = vmatpush1.bf16.msra.mxu0 %v7885_v38  ;;  %5690 = vmatpush1.bf16.msra.mxu1 %v7888_v28  ;;  %v7973_v38 = vld [vmem:[%s11196_s1 + $0xd68] ss:$16 sps:$4 sm:$0xff]   ;;  %v7978_v28 = vld [vmem:[%s11196_s1 + $0xd84] ss:$16 sps:$4 sm:$0xff]  }
 0x178   :  { %5158 = vmatprep.subr.bf16.mxu0 %v7893_v40  ;;  %5691 = vmatprep.subr.bf16.mxu1 %v7896_v41  ;;  %v7981_v40 = vld [vmem:[%s11196_s1 + $0xd8c] ss:$16 sps:$4 sm:$0xff]   ;;  %v7976_v41 = vld [vmem:[%s11196_s1 + $0xd80] ss:$16 sps:$4 sm:$0xff]  }
 0x17b   :  { %5159 = vmatpush1.bf16.msra.mxu0 %v7891_v24  ;;  %5692 = vmatpush1.bf16.msra.mxu1 %v7894_v44  ;;  %v7979_v24 = vld [vmem:[%s11196_s1 + $0xd88] ss:$16 sps:$4 sm:$0xff]   ;;  %v7984_v44 = vld [vmem:[%s11196_s1 + $0xda4] ss:$16 sps:$4 sm:$0xff]  }
 0x17c   :  { %5160 = vmatprep.subr.bf16.mxu0 %v7899_v45  ;;  %5693 = vmatprep.subr.bf16.mxu1 %v7902_v46  ;;  %v7987_v45 = vld [vmem:[%s11196_s1 + $0xdac] ss:$16 sps:$4 sm:$0xff]   ;;  %v7982_v46 = vld [vmem:[%s11196_s1 + $0xda0] ss:$16 sps:$4 sm:$0xff]  }
 0x17f   :  { %5161 = vmatpush1.bf16.msra.mxu0 %v7897_v48  ;;  %5694 = vmatpush1.bf16.msra.mxu1 %v7900_v32  ;;  %v7985_v48 = vld [vmem:[%s11196_s1 + $0xda8] ss:$16 sps:$4 sm:$0xff]   ;;  %v7990_v32 = vld [vmem:[%s11196_s1 + $0xdc4] ss:$16 sps:$4 sm:$0xff]  }
 0x180   :  { %5171 = vmatprep.subr.bf16.mxu0 %v7906_v50  ;;  %5704 = vmatprep.subr.bf16.mxu1 %v7909_v51  ;;  %v7993_v50 = vld [vmem:[%s11196_s1 + $0xdcc] ss:$16 sps:$4 sm:$0xff]   ;;  %v87_v51 = vcombine.high %v9791_v42, %v9791_v42 }
 0x181   :  { %v7999_v42 = vld [vmem:[%s11196_s1 + $0xdec] ss:$16 sps:$4 sm:$0xff]  }
 0x182   :  { %5163 = vmatmul.mubr.bf16.vlgmr.msra.gmra.mrb[0].mxu0 %v180_v53  ;;  %5696 = vmatmul.mubr.bf16.vlgmr.msra.gmra.mrb[0].mxu1 %v180_v53  ;;  %v7991_v53 = vld [vmem:[%s11196_s1 + $0xdc8] ss:$16 sps:$4 sm:$0xff]  }
 0x183   :  { %5172 = vmatpush1.bf16.msra.mxu0 %v7904_v54  ;;  %5705 = vmatpush1.bf16.msra.mxu1 %v7907_v55  ;;  %v7996_v54 = vld [vmem:[%s11196_s1 + $0xde4] ss:$16 sps:$4 sm:$0xff]   ;;  %v10008_v55 = vrot.slane %v87_v51, %v8731_v49 }
 0x184   :  { %5173 = vmatprep.subr.bf16.mxu0 %v7912_v56  ;;  %5706 = vmatprep.subr.bf16.mxu1 %v7915_v39  ;;  %v7994_v56 = vld [vmem:[%s11196_s1 + $0xde0] ss:$16 sps:$4 sm:$0xff]   ;;  %v7997_v39 = vld [vmem:[%s11196_s1 + $0xde8] ss:$16 sps:$4 sm:$0xff]  }
 0x185   :  { %5203 = vmatprep.mubr.bf16.mxu0 %v183_v57  ;;  %5736 = vmatprep.mubr.bf16.mxu1 %v183_v57  ;;  %v8002_v57 = vld [vmem:[%s11196_s1 + $0xe04] ss:$16 sps:$4 sm:$0xff]  }
 0x187   :  { %5174 = vmatpush1.bf16.msra.mxu0 %v7910_v58  ;;  %5707 = vmatpush1.bf16.msra.mxu1 %v7913_v59  ;;  %v8005_v58 = vld [vmem:[%s11196_s1 + $0xe0c] ss:$16 sps:$4 sm:$0xff]   ;;  %v103_v59 = vcombine.high %v10008_v55, %v10008_v55 }
 0x188   :  { %5175 = vmatprep.subr.bf16.mxu0 %v7918_v60  ;;  %5708 = vmatprep.subr.bf16.mxu1 %v7921_v61  ;;  %v182_v60 = vpack.c.bf16 %v9807_v47, %v9807_v47  ;;  %v8000_v61 = vld [vmem:[%s11196_s1 + $0xe00] ss:$16 sps:$4 sm:$0xff]   ;;  %v8011_v47 = vld [vmem:[%s11196_s1 + $0xe2c] ss:$16 sps:$4 sm:$0xff]  }
 0x18b   :  { %5176 = vmatpush1.bf16.msra.mxu0 %v7916_v62  ;;  %5709 = vmatpush1.bf16.msra.mxu1 %v7919_v63  ;;  %v8003_v62 = vld [vmem:[%s11196_s1 + $0xe08] ss:$16 sps:$4 sm:$0xff]   ;;  %v8008_v63 = vld [vmem:[%s11196_s1 + $0xe24] ss:$16 sps:$4 sm:$0xff]  }
 0x18c   :  { %5177 = vmatprep.subr.bf16.mxu0 %v7924_v0  ;;  %5710 = vmatprep.subr.bf16.mxu1 %v7927_v1  ;;  %v185_v0 = vpack.c.bf16 %v103_v59, %v103_v59  ;;  %v8006_v1 = vld [vmem:[%s11196_s1 + $0xe20] ss:$16 sps:$4 sm:$0xff]  }
 0x18f   :  { %5178 = vmatpush1.bf16.msra.mxu0 %v7922_v2  ;;  %5711 = vmatpush1.bf16.msra.mxu1 %v7925_v3  ;;  %v8009_v2 = vld [vmem:[%s11196_s1 + $0xe28] ss:$16 sps:$4 sm:$0xff]   ;;  %v8014_v3 = vld [vmem:[%s11196_s1 + $0xe44] ss:$16 sps:$4 sm:$0xff]  }
 0x190   :  { %5179 = vmatprep.subr.bf16.mxu0 %v7930_v4  ;;  %5712 = vmatprep.subr.bf16.mxu1 %v7933_v5  ;;  %v8017_v4 = vld [vmem:[%s11196_s1 + $0xe4c] ss:$16 sps:$4 sm:$0xff]   ;;  %v8012_v5 = vld [vmem:[%s11196_s1 + $0xe40] ss:$16 sps:$4 sm:$0xff]  }
 0x193   :  { %5180 = vmatpush1.bf16.msra.mxu0 %v7928_v6  ;;  %5713 = vmatpush1.bf16.msra.mxu1 %v7931_v7  ;;  %v8015_v6 = vld [vmem:[%s11196_s1 + $0xe48] ss:$16 sps:$4 sm:$0xff]   ;;  %v8020_v7 = vld [vmem:[%s11196_s1 + $0xe64] ss:$16 sps:$4 sm:$0xff]  }
 0x194   :  { %5181 = vmatprep.subr.bf16.mxu0 %v7936_v8  ;;  %5714 = vmatprep.subr.bf16.mxu1 %v7939_v10  ;;  %v8023_v8 = vld [vmem:[%s11196_s1 + $0xe6c] ss:$16 sps:$4 sm:$0xff]   ;;  %v8018_v10 = vld [vmem:[%s11196_s1 + $0xe60] ss:$16 sps:$4 sm:$0xff]  }
 0x197   :  { %5182 = vmatpush1.bf16.msra.mxu0 %v7934_v11  ;;  %5715 = vmatpush1.bf16.msra.mxu1 %v7937_v12  ;;  %v8021_v11 = vld [vmem:[%s11196_s1 + $0xe68] ss:$16 sps:$4 sm:$0xff]   ;;  %v8026_v12 = vld [vmem:[%s11196_s1 + $0xe84] ss:$16 sps:$4 sm:$0xff]  }
 0x198   :  { %5183 = vmatprep.subr.bf16.mxu0 %v7942_v13  ;;  %5716 = vmatprep.subr.bf16.mxu1 %v7945_v14  ;;  %v8029_v13 = vld [vmem:[%s11196_s1 + $0xe8c] ss:$16 sps:$4 sm:$0xff]   ;;  %v8024_v14 = vld [vmem:[%s11196_s1 + $0xe80] ss:$16 sps:$4 sm:$0xff]  }
 0x19b   :  { %5184 = vmatpush1.bf16.msra.mxu0 %v7940_v15  ;;  %5717 = vmatpush1.bf16.msra.mxu1 %v7943_v16  ;;  %v8027_v15 = vld [vmem:[%s11196_s1 + $0xe88] ss:$16 sps:$4 sm:$0xff]   ;;  %v8032_v16 = vld [vmem:[%s11196_s1 + $0xea4] ss:$16 sps:$4 sm:$0xff]  }
 0x19c   :  { %5185 = vmatprep.subr.bf16.mxu0 %v7948_v17  ;;  %5718 = vmatprep.subr.bf16.mxu1 %v7951_v18  ;;  %v8035_v17 = vld [vmem:[%s11196_s1 + $0xeac] ss:$16 sps:$4 sm:$0xff]   ;;  %v8030_v18 = vld [vmem:[%s11196_s1 + $0xea0] ss:$16 sps:$4 sm:$0xff]  }
 0x19f   :  { %5186 = vmatpush1.bf16.msra.mxu0 %v7946_v19  ;;  %5719 = vmatpush1.bf16.msra.mxu1 %v7949_v20  ;;  %v8033_v19 = vld [vmem:[%s11196_s1 + $0xea8] ss:$16 sps:$4 sm:$0xff]   ;;  %v8038_v20 = vld [vmem:[%s11196_s1 + $0xec4] ss:$16 sps:$4 sm:$0xff]  }
 0x1a0   :  { %5187 = vmatprep.subr.bf16.mxu0 %v7954_v21  ;;  %5720 = vmatprep.subr.bf16.mxu1 %v7957_v22  ;;  %v8041_v21 = vld [vmem:[%s11196_s1 + $0xecc] ss:$16 sps:$4 sm:$0xff]   ;;  %v8036_v22 = vld [vmem:[%s11196_s1 + $0xec0] ss:$16 sps:$4 sm:$0xff]  }
 0x1a3   :  { %5188 = vmatpush1.bf16.msra.mxu0 %v7952_v23  ;;  %5721 = vmatpush1.bf16.msra.mxu1 %v7955_v9  ;;  %v8039_v23 = vld [vmem:[%s11196_s1 + $0xec8] ss:$16 sps:$4 sm:$0xff]   ;;  %v8044_v9 = vld [vmem:[%s11196_s1 + $0xee4] ss:$16 sps:$4 sm:$0xff]  }
 0x1a4   :  { %5189 = vmatprep.subr.bf16.mxu0 %v7960_v26  ;;  %5722 = vmatprep.subr.bf16.mxu1 %v7963_v27  ;;  %v8047_v26 = vld [vmem:[%s11196_s1 + $0xeec] ss:$16 sps:$4 sm:$0xff]   ;;  %v8042_v27 = vld [vmem:[%s11196_s1 + $0xee0] ss:$16 sps:$4 sm:$0xff]  }
 0x1a7   :  { %5190 = vmatpush1.bf16.msra.mxu0 %v7958_v29  ;;  %5723 = vmatpush1.bf16.msra.mxu1 %v7961_v30  ;;  %v8045_v29 = vld [vmem:[%s11196_s1 + $0xee8] ss:$16 sps:$4 sm:$0xff]   ;;  %v8050_v30 = vld [vmem:[%s11196_s1 + $0xf04] ss:$16 sps:$4 sm:$0xff]  }
 0x1a8   :  { %5191 = vmatprep.subr.bf16.mxu0 %v7966_v31  ;;  %5724 = vmatprep.subr.bf16.mxu1 %v7969_v33  ;;  %v8053_v31 = vld [vmem:[%s11196_s1 + $0xf0c] ss:$16 sps:$4 sm:$0xff]   ;;  %v8048_v33 = vld [vmem:[%s11196_s1 + $0xf00] ss:$16 sps:$4 sm:$0xff]  }
 0x1ab   :  { %5192 = vmatpush1.bf16.msra.mxu0 %v7964_v25  ;;  %5725 = vmatpush1.bf16.msra.mxu1 %v7967_v34  ;;  %v8051_v25 = vld [vmem:[%s11196_s1 + $0xf08] ss:$16 sps:$4 sm:$0xff]   ;;  %v8056_v34 = vld [vmem:[%s11196_s1 + $0xf24] ss:$16 sps:$4 sm:$0xff]  }
 0x1ac   :  { %5193 = vmatprep.subr.bf16.mxu0 %v7972_v35  ;;  %5726 = vmatprep.subr.bf16.mxu1 %v7975_v36  ;;  %v8059_v35 = vld [vmem:[%s11196_s1 + $0xf2c] ss:$16 sps:$4 sm:$0xff]   ;;  %v8054_v36 = vld [vmem:[%s11196_s1 + $0xf20] ss:$16 sps:$4 sm:$0xff]  }
 0x1af   :  { %5194 = vmatpush1.bf16.msra.mxu0 %v7970_v37  ;;  %5727 = vmatpush1.bf16.msra.mxu1 %v7973_v38  ;;  %v8057_v37 = vld [vmem:[%s11196_s1 + $0xf28] ss:$16 sps:$4 sm:$0xff]   ;;  %v8062_v38 = vld [vmem:[%s11196_s1 + $0xf44] ss:$16 sps:$4 sm:$0xff]  }
 0x1b0   :  { %5195 = vmatprep.subr.bf16.mxu0 %v7978_v28  ;;  %5728 = vmatprep.subr.bf16.mxu1 %v7981_v40  ;;  %v8065_v28 = vld [vmem:[%s11196_s1 + $0xf4c] ss:$16 sps:$4 sm:$0xff]   ;;  %v8060_v40 = vld [vmem:[%s11196_s1 + $0xf40] ss:$16 sps:$4 sm:$0xff]  }
 0x1b3   :  { %5196 = vmatpush1.bf16.msra.mxu0 %v7976_v41  ;;  %5729 = vmatpush1.bf16.msra.mxu1 %v7979_v24  ;;  %v8063_v41 = vld [vmem:[%s11196_s1 + $0xf48] ss:$16 sps:$4 sm:$0xff]   ;;  %v8068_v24 = vld [vmem:[%s11196_s1 + $0xf64] ss:$16 sps:$4 sm:$0xff]  }
 0x1b4   :  { %5197 = vmatprep.subr.bf16.mxu0 %v7984_v44  ;;  %5730 = vmatprep.subr.bf16.mxu1 %v7987_v45  ;;  %v8071_v44 = vld [vmem:[%s11196_s1 + $0xf6c] ss:$16 sps:$4 sm:$0xff]  }
 0x1b7   :  { %5198 = vmatpush1.bf16.msra.mxu0 %v7982_v46  ;;  %5731 = vmatpush1.bf16.msra.mxu1 %v7985_v48 }
 0x1b8   :  { %5199 = vmatprep.subr.bf16.mxu0 %v7990_v32  ;;  %5732 = vmatprep.subr.bf16.mxu1 %v7993_v50 }
 0x1bb   :  { %5200 = vmatpush1.bf16.msra.mxu0 %v7988_v52  ;;  %5733 = vmatpush1.bf16.msra.mxu1 %v7991_v53 }
 0x1bc   :  { %5201 = vmatprep.subr.bf16.mxu0 %v7996_v54  ;;  %5734 = vmatprep.subr.bf16.mxu1 %v7999_v42 }
 0x1bf   :  { %5202 = vmatpush1.bf16.msra.mxu0 %v7994_v56  ;;  %5735 = vmatpush1.bf16.msra.mxu1 %v7997_v39 }
 0x1c0   :  { %5212 = vmatprep.subr.bf16.mxu0 %v8002_v57  ;;  %5745 = vmatprep.subr.bf16.mxu1 %v8005_v58 }
 0x1c2   :  { %5204 = vmatmul.mubr.bf16.vlgmr.msra.gmra.mrb[0].mxu0 %v182_v60  ;;  %5737 = vmatmul.mubr.bf16.vlgmr.msra.gmra.mrb[0].mxu1 %v182_v60 }
 0x1c3   :  { %5213 = vmatpush1.bf16.msra.mxu0 %v8000_v61  ;;  %5746 = vmatpush1.bf16.msra.mxu1 %v8003_v62 }
 0x1c4   :  { %5214 = vmatprep.subr.bf16.mxu0 %v8008_v63  ;;  %5747 = vmatprep.subr.bf16.mxu1 %v8011_v47 }
 0x1c5   :  { %5244 = vmatprep.mubr.bf16.mxu0 %v185_v0  ;;  %5777 = vmatprep.mubr.bf16.mxu1 %v185_v0 }
 0x1c7   :  { %5215 = vmatpush1.bf16.msra.mxu0 %v8006_v1  ;;  %5748 = vmatpush1.bf16.msra.mxu1 %v8009_v2 }
 0x1c8   :  { %5216 = vmatprep.subr.bf16.mxu0 %v8014_v3  ;;  %5749 = vmatprep.subr.bf16.mxu1 %v8017_v4 }
 0x1cb   :  { %5217 = vmatpush1.bf16.msra.mxu0 %v8012_v5  ;;  %5750 = vmatpush1.bf16.msra.mxu1 %v8015_v6 }
 0x1cc   :  { %5218 = vmatprep.subr.bf16.mxu0 %v8020_v7  ;;  %5751 = vmatprep.subr.bf16.mxu1 %v8023_v8 }
 0x1cf   :  { %5219 = vmatpush1.bf16.msra.mxu0 %v8018_v10  ;;  %5752 = vmatpush1.bf16.msra.mxu1 %v8021_v11 }
 0x1d0   :  { %5220 = vmatprep.subr.bf16.mxu0 %v8026_v12  ;;  %5753 = vmatprep.subr.bf16.mxu1 %v8029_v13 }
 0x1d3   :  { %5221 = vmatpush1.bf16.msra.mxu0 %v8024_v14  ;;  %5754 = vmatpush1.bf16.msra.mxu1 %v8027_v15 }
 0x1d4   :  { %5222 = vmatprep.subr.bf16.mxu0 %v8032_v16  ;;  %5755 = vmatprep.subr.bf16.mxu1 %v8035_v17 }
 0x1d7   :  { %5223 = vmatpush1.bf16.msra.mxu0 %v8030_v18  ;;  %5756 = vmatpush1.bf16.msra.mxu1 %v8033_v19 }
 0x1d8   :  { %5224 = vmatprep.subr.bf16.mxu0 %v8038_v20  ;;  %5757 = vmatprep.subr.bf16.mxu1 %v8041_v21 }
 0x1db   :  { %5225 = vmatpush1.bf16.msra.mxu0 %v8036_v22  ;;  %5758 = vmatpush1.bf16.msra.mxu1 %v8039_v23 }
 0x1dc   :  { %5226 = vmatprep.subr.bf16.mxu0 %v8044_v9  ;;  %5759 = vmatprep.subr.bf16.mxu1 %v8047_v26 }
 0x1df   :  { %5227 = vmatpush1.bf16.msra.mxu0 %v8042_v27  ;;  %5760 = vmatpush1.bf16.msra.mxu1 %v8045_v29 }
 0x1e0   :  { %5228 = vmatprep.subr.bf16.mxu0 %v8050_v30  ;;  %5761 = vmatprep.subr.bf16.mxu1 %v8053_v31 }
 0x1e3   :  { %5229 = vmatpush1.bf16.msra.mxu0 %v8048_v33  ;;  %5762 = vmatpush1.bf16.msra.mxu1 %v8051_v25 }
 0x1e4   :  { %5230 = vmatprep.subr.bf16.mxu0 %v8056_v34  ;;  %5763 = vmatprep.subr.bf16.mxu1 %v8059_v35 }
 0x1e7   :  { %5231 = vmatpush1.bf16.msra.mxu0 %v8054_v36  ;;  %5764 = vmatpush1.bf16.msra.mxu1 %v8057_v37 }
 0x1e8   :  { %5232 = vmatprep.subr.bf16.mxu0 %v8062_v38  ;;  %5765 = vmatprep.subr.bf16.mxu1 %v8065_v28 }
 0x1e9   :  { %10 = vsyncpa [#allocation3], 0  ;;  %v8066_v45 = vld [vmem:[%s11196_s1 + $0xf60] ss:$16 sps:$4 sm:$0xff]   ;;  %v8069_v46 = vld [vmem:[%s11196_s1 + $0xf68] ss:$16 sps:$4 sm:$0xff]   ;;  %v184_v3 = vpack.c.bf16 %v10008_v55, %v10008_v55 }
 0x1ea   :  { %v8074_v48 = vld [vmem:[%s11196_s1 + $0xf84] ss:$16 sps:$4 sm:$0xff]   ;;  %v8077_v32 = vld [vmem:[%s11196_s1 + $0xf8c] ss:$16 sps:$4 sm:$0xff]   ;;  %v8072_v50 = vld [vmem:[%s11196_s1 + $0xf80] ss:$16 sps:$4 sm:$0xff]  }
 0x1eb   :  { %5233 = vmatpush1.bf16.msra.mxu0 %v8060_v40  ;;  %5766 = vmatpush1.bf16.msra.mxu1 %v8063_v41  ;;  %v8075_v51 = vld [vmem:[%s11196_s1 + $0xf88] ss:$16 sps:$4 sm:$0xff]   ;;  %v8080_v52 = vld [vmem:[%s11196_s1 + $0xfa4] ss:$16 sps:$4 sm:$0xff]   ;;  %v8083_v53 = vld [vmem:[%s11196_s1 + $0xfac] ss:$16 sps:$4 sm:$0xff]  }
 0x1ec   :  { %5234 = vmatprep.subr.bf16.mxu0 %v8068_v24  ;;  %5767 = vmatprep.subr.bf16.mxu1 %v8071_v44  ;;  %v8078_v54 = vld [vmem:[%s11196_s1 + $0xfa0] ss:$16 sps:$4 sm:$0xff]   ;;  %v8081_v42 = vld [vmem:[%s11196_s1 + $0xfa8] ss:$16 sps:$4 sm:$0xff]   ;;  %v8086_v56 = vld [vmem:[%s11196_s1 + $0xfc4] ss:$16 sps:$4 sm:$0xff]  }
 0x1ed   :  { %v8089_v39 = vld [vmem:[%s11196_s1 + $0xfcc] ss:$16 sps:$4 sm:$0xff]   ;;  %v10197_v57 = vld [vmem:[%s11195_s0 + $0x20] sm:$0xff]  ;;  %v8087_v59 = vld [vmem:[%s11196_s1 + $0xfc8] ss:$16 sps:$4 sm:$0xff]   ;;  %vm4921_vm0 = vcmask 523264  }
 0x1ee   :  { %v8084_v58 = vld [vmem:[%s11196_s1 + $0xfc0] ss:$16 sps:$4 sm:$0xff]   ;;  %v8092_v60 = vld [vmem:[%s11196_s1 + $0xfe4] ss:$16 sps:$4 sm:$0xff]   ;;  %v8095_v61 = vld [vmem:[%s11196_s1 + $0xfec] ss:$16 sps:$4 sm:$0xff]   ;;  %v10213_v62 = vrot.slane %v10197_v57, %v8731_v49 }
 0x1ef   :  { %5235 = vmatpush1.bf16.msra.mxu0 %v8066_v45  ;;  %5768 = vmatpush1.bf16.msra.mxu1 %v8069_v46  ;;  %v8090_v63 = vld [vmem:[%s11196_s1 + $0xfe0] ss:$16 sps:$4 sm:$0xff]   ;;  %v8093_v47 = vld [vmem:[%s11196_s1 + $0xfe8] ss:$16 sps:$4 sm:$0xff]   ;;  %v8099_v0 = vld [vmem:[%s11196_s1 + $0x1004] ss:$16 sps:$4 sm:$0xff]  }
 0x1f0   :  { %5236 = vmatprep.subr.bf16.mxu0 %v8074_v48  ;;  %5769 = vmatprep.subr.bf16.mxu1 %v8077_v32  ;;  %v8102_v1 = vld [vmem:[%s11196_s1 + $0x100c] ss:$16 sps:$4 sm:$0xff]   ;;  %v119_v2 = vcombine.high %v10213_v62, %v10213_v62  ;;  %v8097_v4 = vld [vmem:[%s11196_s1 + $0x1000] ss:$16 sps:$4 sm:$0xff]   ;;  %v8100_v5 = vld [vmem:[%s11196_s1 + $0x1008] ss:$16 sps:$4 sm:$0xff]  }
 0x1f1   :  { %v8105_v6 = vld [vmem:[%s11196_s1 + $0x1024] ss:$16 sps:$4 sm:$0xff]   ;;  %v8108_v55 = vld [vmem:[%s11196_s1 + $0x102c] ss:$16 sps:$4 sm:$0xff]   ;;  %v8103_v8 = vld [vmem:[%s11196_s1 + $0x1020] ss:$16 sps:$4 sm:$0xff]  }
 0x1f2   :  { %v187_v7 = vpack.c.bf16 %v119_v2, %v119_v2  ;;  %v8106_v10 = vld [vmem:[%s11196_s1 + $0x1028] ss:$16 sps:$4 sm:$0xff]   ;;  %v8111_v11 = vld [vmem:[%s11196_s1 + $0x1044] ss:$16 sps:$4 sm:$0xff]   ;;  %v8114_v12 = vld [vmem:[%s11196_s1 + $0x104c] ss:$16 sps:$4 sm:$0xff]  }
 0x1f3   :  { %5237 = vmatpush1.bf16.msra.mxu0 %v8072_v50  ;;  %5770 = vmatpush1.bf16.msra.mxu1 %v8075_v51  ;;  %v8109_v13 = vld [vmem:[%s11196_s1 + $0x1040] ss:$16 sps:$4 sm:$0xff]   ;;  %v8112_v14 = vld [vmem:[%s11196_s1 + $0x1048] ss:$16 sps:$4 sm:$0xff]   ;;  %v8117_v15 = vld [vmem:[%s11196_s1 + $0x1064] ss:$16 sps:$4 sm:$0xff]  }
 0x1f4   :  { %5238 = vmatprep.subr.bf16.mxu0 %v8080_v52  ;;  %5771 = vmatprep.subr.bf16.mxu1 %v8083_v53  ;;  %v8120_v16 = vld [vmem:[%s11196_s1 + $0x106c] ss:$16 sps:$4 sm:$0xff]   ;;  %v8115_v17 = vld [vmem:[%s11196_s1 + $0x1060] ss:$16 sps:$4 sm:$0xff]   ;;  %v8118_v18 = vld [vmem:[%s11196_s1 + $0x1068] ss:$16 sps:$4 sm:$0xff]  }
 0x1f5   :  { %v8123_v19 = vld [vmem:[%s11196_s1 + $0x1084] ss:$16 sps:$4 sm:$0xff]   ;;  %v8126_v20 = vld [vmem:[%s11196_s1 + $0x108c] ss:$16 sps:$4 sm:$0xff]   ;;  %v8121_v21 = vld [vmem:[%s11196_s1 + $0x1080] ss:$16 sps:$4 sm:$0xff]  }
 0x1f6   :  { %v8124_v22 = vld [vmem:[%s11196_s1 + $0x1088] ss:$16 sps:$4 sm:$0xff]   ;;  %v8129_v23 = vld [vmem:[%s11196_s1 + $0x10a4] ss:$16 sps:$4 sm:$0xff]   ;;  %v8132_v9 = vld [vmem:[%s11196_s1 + $0x10ac] ss:$16 sps:$4 sm:$0xff]  }
 0x1f7   :  { %5239 = vmatpush1.bf16.msra.mxu0 %v8078_v54  ;;  %5772 = vmatpush1.bf16.msra.mxu1 %v8081_v42  ;;  %v8127_v26 = vld [vmem:[%s11196_s1 + $0x10a0] ss:$16 sps:$4 sm:$0xff]   ;;  %v8130_v27 = vld [vmem:[%s11196_s1 + $0x10a8] ss:$16 sps:$4 sm:$0xff]   ;;  %v8135_v29 = vld [vmem:[%s11196_s1 + $0x10c4] ss:$16 sps:$4 sm:$0xff]  }
 0x1f8   :  { %5240 = vmatprep.subr.bf16.mxu0 %v8086_v56  ;;  %5773 = vmatprep.subr.bf16.mxu1 %v8089_v39  ;;  %v8138_v30 = vld [vmem:[%s11196_s1 + $0x10cc] ss:$16 sps:$4 sm:$0xff]   ;;  %v8133_v31 = vld [vmem:[%s11196_s1 + $0x10c0] ss:$16 sps:$4 sm:$0xff]   ;;  %v8136_v33 = vld [vmem:[%s11196_s1 + $0x10c8] ss:$16 sps:$4 sm:$0xff]  }
 0x1f9   :  { %v8141_v25 = vld [vmem:[%s11196_s1 + $0x10e4] ss:$16 sps:$4 sm:$0xff]   ;;  %v8144_v34 = vld [vmem:[%s11196_s1 + $0x10ec] ss:$16 sps:$4 sm:$0xff]   ;;  %v8139_v35 = vld [vmem:[%s11196_s1 + $0x10e0] ss:$16 sps:$4 sm:$0xff]  }
 0x1fa   :  { %v8142_v36 = vld [vmem:[%s11196_s1 + $0x10e8] ss:$16 sps:$4 sm:$0xff]   ;;  %v8147_v37 = vld [vmem:[%s11196_s1 + $0x1104] ss:$16 sps:$4 sm:$0xff]   ;;  %v8150_v38 = vld [vmem:[%s11196_s1 + $0x110c] ss:$16 sps:$4 sm:$0xff]  }
 0x1fb   :  { %5241 = vmatpush1.bf16.msra.mxu0 %v8084_v58  ;;  %5774 = vmatpush1.bf16.msra.mxu1 %v8087_v59  ;;  %v8145_v28 = vld [vmem:[%s11196_s1 + $0x1100] ss:$16 sps:$4 sm:$0xff]   ;;  %v8148_v40 = vld [vmem:[%s11196_s1 + $0x1108] ss:$16 sps:$4 sm:$0xff]   ;;  %v8153_v41 = vld [vmem:[%s11196_s1 + $0x1124] ss:$16 sps:$4 sm:$0xff]  }
 0x1fc   :  { %5242 = vmatprep.subr.bf16.mxu0 %v8092_v60  ;;  %5775 = vmatprep.subr.bf16.mxu1 %v8095_v61  ;;  %v8156_v24 = vld [vmem:[%s11196_s1 + $0x112c] ss:$16 sps:$4 sm:$0xff]   ;;  %v8151_v44 = vld [vmem:[%s11196_s1 + $0x1120] ss:$16 sps:$4 sm:$0xff]   ;;  %v8154_v45 = vld [vmem:[%s11196_s1 + $0x1128] ss:$16 sps:$4 sm:$0xff]  }
 0x1fd   :  { %v8159_v46 = vld [vmem:[%s11196_s1 + $0x1144] ss:$16 sps:$4 sm:$0xff]   ;;  %v8162_v48 = vld [vmem:[%s11196_s1 + $0x114c] ss:$16 sps:$4 sm:$0xff]   ;;  %v8157_v32 = vld [vmem:[%s11196_s1 + $0x1140] ss:$16 sps:$4 sm:$0xff]  }
 0x1fe   :  { %v8160_v50 = vld [vmem:[%s11196_s1 + $0x1148] ss:$16 sps:$4 sm:$0xff]   ;;  %v8165_v51 = vld [vmem:[%s11196_s1 + $0x1164] ss:$16 sps:$4 sm:$0xff]   ;;  %v8168_v52 = vld [vmem:[%s11196_s1 + $0x116c] ss:$16 sps:$4 sm:$0xff]  }
 0x1ff   :  { %5243 = vmatpush1.bf16.msra.mxu0 %v8090_v63  ;;  %5776 = vmatpush1.bf16.msra.mxu1 %v8093_v47  ;;  %v8163_v53 = vld [vmem:[%s11196_s1 + $0x1160] ss:$16 sps:$4 sm:$0xff]   ;;  %v8166_v54 = vld [vmem:[%s11196_s1 + $0x1168] ss:$16 sps:$4 sm:$0xff]   ;;  %v8171_v42 = vld [vmem:[%s11196_s1 + $0x1184] ss:$16 sps:$4 sm:$0xff]  }
 0x200   :  { %5253 = vmatprep.subr.bf16.mxu0 %v8099_v0  ;;  %5786 = vmatprep.subr.bf16.mxu1 %v8102_v1  ;;  %v8174_v56 = vld [vmem:[%s11196_s1 + $0x118c] ss:$16 sps:$4 sm:$0xff]   ;;  %v8169_v39 = vld [vmem:[%s11196_s1 + $0x1180] ss:$16 sps:$4 sm:$0xff]   ;;  %v8172_v58 = vld [vmem:[%s11196_s1 + $0x1188] ss:$16 sps:$4 sm:$0xff]   ;;  %v104_v1 = vcombine.high %v10197_v57, %v10197_v57 }
 0x201   :  { %v8177_v59 = vld [vmem:[%s11196_s1 + $0x11a4] ss:$16 sps:$4 sm:$0xff]   ;;  %v8180_v60 = vld [vmem:[%s11196_s1 + $0x11ac] ss:$16 sps:$4 sm:$0xff]   ;;  %v8175_v61 = vld [vmem:[%s11196_s1 + $0x11a0] ss:$16 sps:$4 sm:$0xff]  }
 0x202   :  { %5245 = vmatmul.mubr.bf16.vlgmr.msra.gmra.mrb[0].mxu0 %v184_v3  ;;  %5778 = vmatmul.mubr.bf16.vlgmr.msra.gmra.mrb[0].mxu1 %v184_v3  ;;  %v8178_v63 = vld [vmem:[%s11196_s1 + $0x11a8] ss:$16 sps:$4 sm:$0xff]   ;;  %v8183_v47 = vld [vmem:[%s11196_s1 + $0x11c4] ss:$16 sps:$4 sm:$0xff]   ;;  %v8186_v0 = vld [vmem:[%s11196_s1 + $0x11cc] ss:$16 sps:$4 sm:$0xff]  }
 0x203   :  { %5254 = vmatpush1.bf16.msra.mxu0 %v8097_v4  ;;  %5787 = vmatpush1.bf16.msra.mxu1 %v8100_v5  ;;  %v8181_v2 = vld [vmem:[%s11196_s1 + $0x11c0] ss:$16 sps:$4 sm:$0xff]   ;;  %v8184_v3 = vld [vmem:[%s11196_s1 + $0x11c8] ss:$16 sps:$4 sm:$0xff]   ;;  %v8189_v4 = vld [vmem:[%s11196_s1 + $0x11e4] ss:$16 sps:$4 sm:$0xff]   ;;  %v10414_v5 = vrot.slane %v104_v1, %v8731_v49 }
 0x204   :  { %5255 = vmatprep.subr.bf16.mxu0 %v8105_v6  ;;  %5788 = vmatprep.subr.bf16.mxu1 %v8108_v55  ;;  %v8192_v57 = vld [vmem:[%s11196_s1 + $0x11ec] ss:$16 sps:$4 sm:$0xff]   ;;  %v8187_v6 = vld [vmem:[%s11196_s1 + $0x11e0] ss:$16 sps:$4 sm:$0xff]   ;;  %v8190_v55 = vld [vmem:[%s11196_s1 + $0x11e8] ss:$16 sps:$4 sm:$0xff]  }
 0x205   :  { %5285 = vmatprep.mubr.bf16.mxu0 %v187_v7  ;;  %5818 = vmatprep.mubr.bf16.mxu1 %v187_v7  ;;  %v8195_v7 = vld [vmem:[%s11196_s1 + $0x1204] ss:$16 sps:$4 sm:$0xff]   ;;  %v8268_v1 = vld [vmem:[%s11196_s1 + $0x1388] ss:$16 sps:$4 sm:$0xff]   ;;  %s8565_s10 = smov [#allocation2]   ;;  %vm6342_vm1 = vcmask 25600  }
 0x206   :  { %s6350_s11 = sshll.u32 %s8565_s10, 4  ;;  %s6351_s11 = int_to_ptr.vmem [resolvable:$true] %s6350_s11 }
 0x207   :  { %5256 = vmatpush1.bf16.msra.mxu0 %v8103_v8  ;;  %5789 = vmatpush1.bf16.msra.mxu1 %v8106_v10  ;;  %v8198_v8 = vld [vmem:[%s11196_s1 + $0x120c] ss:$16 sps:$4 sm:$0xff]   ;;  %v120_v10 = vcombine.high %v10414_v5, %v10414_v5  ;;  %s8539_s12 = scalar_lea.vmem %s6351_s11, 32  ;;  %p8544_p1 = scmp.lt.s32.totalorder %s6351_s11, %s6351_s11 }
 0x208   :  { %5257 = vmatprep.subr.bf16.mxu0 %v8111_v11  ;;  %5790 = vmatprep.subr.bf16.mxu1 %v8114_v12  ;;  %v186_v11 = vpack.c.bf16 %v10213_v62, %v10213_v62  ;;  %v8193_v12 = vld [vmem:[%s11196_s1 + $0x1200] ss:$16 sps:$4 sm:$0xff]   ;;  %v8204_v62 = vld [vmem:[%s11196_s1 + $0x122c] ss:$16 sps:$4 sm:$0xff]   ;;  %p8540_p0 = scmp.ne.s32.totalorder %s6351_s11, %s8539_s12  ;;  %p8545_p2 = scmp.lt.s32.totalorder %s8539_s12, %s8539_s12 }
 0x20a   :  { %p8546_p3 = por %p8545_p2, %p8544_p1 }
 0x20b   :  { %5258 = vmatpush1.bf16.msra.mxu0 %v8109_v13  ;;  %5791 = vmatpush1.bf16.msra.mxu1 %v8112_v14  ;;  %v8196_v13 = vld [vmem:[%s11196_s1 + $0x1208] ss:$16 sps:$4 sm:$0xff]   ;;  %v8201_v14 = vld [vmem:[%s11196_s1 + $0x1224] ss:$16 sps:$4 sm:$0xff]  }
 0x20c   :  { %5259 = vmatprep.subr.bf16.mxu0 %v8117_v15  ;;  %5792 = vmatprep.subr.bf16.mxu1 %v8120_v16  ;;  %v189_v15 = vpack.c.bf16 %v120_v10, %v120_v10  ;;  %v8199_v16 = vld [vmem:[%s11196_s1 + $0x1220] ss:$16 sps:$4 sm:$0xff]   ;;  %v8280_v10 = vld [vmem:[%s11196_s1 + $0x13c8] ss:$16 sps:$4 sm:$0xff]   ;;  %p8547_p4 = pnand %p8546_p3, %p8540_p0 }
 0x20f   :  { %5260 = vmatpush1.bf16.msra.mxu0 %v8115_v17  ;;  %5793 = vmatpush1.bf16.msra.mxu1 %v8118_v18  ;;  %v8202_v17 = vld [vmem:[%s11196_s1 + $0x1228] ss:$16 sps:$4 sm:$0xff]   ;;  %v8207_v18 = vld [vmem:[%s11196_s1 + $0x1244] ss:$16 sps:$4 sm:$0xff]  }
 0x210   :  { %5261 = vmatprep.subr.bf16.mxu0 %v8123_v19  ;;  %5794 = vmatprep.subr.bf16.mxu1 %v8126_v20  ;;  %v8210_v19 = vld [vmem:[%s11196_s1 + $0x124c] ss:$16 sps:$4 sm:$0xff]   ;;  %v8205_v20 = vld [vmem:[%s11196_s1 + $0x1240] ss:$16 sps:$4 sm:$0xff]  }
 0x213   :  { %5262 = vmatpush1.bf16.msra.mxu0 %v8121_v21  ;;  %5795 = vmatpush1.bf16.msra.mxu1 %v8124_v22  ;;  %v8208_v21 = vld [vmem:[%s11196_s1 + $0x1248] ss:$16 sps:$4 sm:$0xff]   ;;  %v8213_v22 = vld [vmem:[%s11196_s1 + $0x1264] ss:$16 sps:$4 sm:$0xff]  }
 0x214   :  { %5263 = vmatprep.subr.bf16.mxu0 %v8129_v23  ;;  %5796 = vmatprep.subr.bf16.mxu1 %v8132_v9  ;;  %v8216_v23 = vld [vmem:[%s11196_s1 + $0x126c] ss:$16 sps:$4 sm:$0xff]   ;;  %v8211_v9 = vld [vmem:[%s11196_s1 + $0x1260] ss:$16 sps:$4 sm:$0xff]  }
 0x217   :  { %5264 = vmatpush1.bf16.msra.mxu0 %v8127_v26  ;;  %5797 = vmatpush1.bf16.msra.mxu1 %v8130_v27  ;;  %v8214_v26 = vld [vmem:[%s11196_s1 + $0x1268] ss:$16 sps:$4 sm:$0xff]   ;;  %v8219_v27 = vld [vmem:[%s11196_s1 + $0x1284] ss:$16 sps:$4 sm:$0xff]  }
 0x218   :  { %5265 = vmatprep.subr.bf16.mxu0 %v8135_v29  ;;  %5798 = vmatprep.subr.bf16.mxu1 %v8138_v30  ;;  %v8222_v29 = vld [vmem:[%s11196_s1 + $0x128c] ss:$16 sps:$4 sm:$0xff]   ;;  %v8217_v30 = vld [vmem:[%s11196_s1 + $0x1280] ss:$16 sps:$4 sm:$0xff]  }
 0x21b   :  { %5266 = vmatpush1.bf16.msra.mxu0 %v8133_v31  ;;  %5799 = vmatpush1.bf16.msra.mxu1 %v8136_v33  ;;  %v8220_v31 = vld [vmem:[%s11196_s1 + $0x1288] ss:$16 sps:$4 sm:$0xff]   ;;  %v8225_v33 = vld [vmem:[%s11196_s1 + $0x12a4] ss:$16 sps:$4 sm:$0xff]  }
 0x21c   :  { %5267 = vmatprep.subr.bf16.mxu0 %v8141_v25  ;;  %5800 = vmatprep.subr.bf16.mxu1 %v8144_v34  ;;  %v8228_v25 = vld [vmem:[%s11196_s1 + $0x12ac] ss:$16 sps:$4 sm:$0xff]   ;;  %v8223_v34 = vld [vmem:[%s11196_s1 + $0x12a0] ss:$16 sps:$4 sm:$0xff]  }
 0x21f   :  { %5268 = vmatpush1.bf16.msra.mxu0 %v8139_v35  ;;  %5801 = vmatpush1.bf16.msra.mxu1 %v8142_v36  ;;  %v8226_v35 = vld [vmem:[%s11196_s1 + $0x12a8] ss:$16 sps:$4 sm:$0xff]   ;;  %v8231_v36 = vld [vmem:[%s11196_s1 + $0x12c4] ss:$16 sps:$4 sm:$0xff]  }
 0x220   :  { %5269 = vmatprep.subr.bf16.mxu0 %v8147_v37  ;;  %5802 = vmatprep.subr.bf16.mxu1 %v8150_v38  ;;  %v8234_v37 = vld [vmem:[%s11196_s1 + $0x12cc] ss:$16 sps:$4 sm:$0xff]   ;;  %v8229_v38 = vld [vmem:[%s11196_s1 + $0x12c0] ss:$16 sps:$4 sm:$0xff]  }
 0x223   :  { %5270 = vmatpush1.bf16.msra.mxu0 %v8145_v28  ;;  %5803 = vmatpush1.bf16.msra.mxu1 %v8148_v40  ;;  %v8232_v28 = vld [vmem:[%s11196_s1 + $0x12c8] ss:$16 sps:$4 sm:$0xff]   ;;  %v8237_v40 = vld [vmem:[%s11196_s1 + $0x12e4] ss:$16 sps:$4 sm:$0xff]  }
 0x224   :  { %5271 = vmatprep.subr.bf16.mxu0 %v8153_v41  ;;  %5804 = vmatprep.subr.bf16.mxu1 %v8156_v24  ;;  %v8240_v41 = vld [vmem:[%s11196_s1 + $0x12ec] ss:$16 sps:$4 sm:$0xff]   ;;  %v8235_v24 = vld [vmem:[%s11196_s1 + $0x12e0] ss:$16 sps:$4 sm:$0xff]  }
 0x227   :  { %5272 = vmatpush1.bf16.msra.mxu0 %v8151_v44  ;;  %5805 = vmatpush1.bf16.msra.mxu1 %v8154_v45  ;;  %v8238_v44 = vld [vmem:[%s11196_s1 + $0x12e8] ss:$16 sps:$4 sm:$0xff]   ;;  %v8243_v45 = vld [vmem:[%s11196_s1 + $0x1304] ss:$16 sps:$4 sm:$0xff]  }
 0x228   :  { %5273 = vmatprep.subr.bf16.mxu0 %v8159_v46  ;;  %5806 = vmatprep.subr.bf16.mxu1 %v8162_v48  ;;  %v8246_v46 = vld [vmem:[%s11196_s1 + $0x130c] ss:$16 sps:$4 sm:$0xff]   ;;  %v8241_v48 = vld [vmem:[%s11196_s1 + $0x1300] ss:$16 sps:$4 sm:$0xff]  }
 0x22b   :  { %5274 = vmatpush1.bf16.msra.mxu0 %v8157_v32  ;;  %5807 = vmatpush1.bf16.msra.mxu1 %v8160_v50  ;;  %v8244_v32 = vld [vmem:[%s11196_s1 + $0x1308] ss:$16 sps:$4 sm:$0xff]   ;;  %v8249_v50 = vld [vmem:[%s11196_s1 + $0x1324] ss:$16 sps:$4 sm:$0xff]  }
 0x22c   :  { %5275 = vmatprep.subr.bf16.mxu0 %v8165_v51  ;;  %5808 = vmatprep.subr.bf16.mxu1 %v8168_v52  ;;  %v8252_v51 = vld [vmem:[%s11196_s1 + $0x132c] ss:$16 sps:$4 sm:$0xff]   ;;  %v8247_v52 = vld [vmem:[%s11196_s1 + $0x1320] ss:$16 sps:$4 sm:$0xff]  }
 0x22f   :  { %5276 = vmatpush1.bf16.msra.mxu0 %v8163_v53  ;;  %5809 = vmatpush1.bf16.msra.mxu1 %v8166_v54  ;;  %v8250_v53 = vld [vmem:[%s11196_s1 + $0x1328] ss:$16 sps:$4 sm:$0xff]   ;;  %v8255_v54 = vld [vmem:[%s11196_s1 + $0x1344] ss:$16 sps:$4 sm:$0xff]  }
 0x230   :  { %5277 = vmatprep.subr.bf16.mxu0 %v8171_v42  ;;  %5810 = vmatprep.subr.bf16.mxu1 %v8174_v56  ;;  %v8258_v42 = vld [vmem:[%s11196_s1 + $0x134c] ss:$16 sps:$4 sm:$0xff]   ;;  %v8253_v56 = vld [vmem:[%s11196_s1 + $0x1340] ss:$16 sps:$4 sm:$0xff]  }
 0x233   :  { %5278 = vmatpush1.bf16.msra.mxu0 %v8169_v39  ;;  %5811 = vmatpush1.bf16.msra.mxu1 %v8172_v58  ;;  %v8256_v39 = vld [vmem:[%s11196_s1 + $0x1348] ss:$16 sps:$4 sm:$0xff]   ;;  %v8261_v58 = vld [vmem:[%s11196_s1 + $0x1364] ss:$16 sps:$4 sm:$0xff]  }
 0x234   :  { %5279 = vmatprep.subr.bf16.mxu0 %v8177_v59  ;;  %5812 = vmatprep.subr.bf16.mxu1 %v8180_v60  ;;  %v8264_v59 = vld [vmem:[%s11196_s1 + $0x136c] ss:$16 sps:$4 sm:$0xff]   ;;  %v8259_v60 = vld [vmem:[%s11196_s1 + $0x1360] ss:$16 sps:$4 sm:$0xff]  }
 0x237   :  { %5280 = vmatpush1.bf16.msra.mxu0 %v8175_v61  ;;  %5813 = vmatpush1.bf16.msra.mxu1 %v8178_v63  ;;  %v8262_v61 = vld [vmem:[%s11196_s1 + $0x1368] ss:$16 sps:$4 sm:$0xff]   ;;  %v8267_v63 = vld [vmem:[%s11196_s1 + $0x1384] ss:$16 sps:$4 sm:$0xff]  }
 0x238   :  { %5281 = vmatprep.subr.bf16.mxu0 %v8183_v47  ;;  %5814 = vmatprep.subr.bf16.mxu1 %v8186_v0  ;;  %v8270_v47 = vld [vmem:[%s11196_s1 + $0x138c] ss:$16 sps:$4 sm:$0xff]   ;;  %v8265_v0 = vld [vmem:[%s11196_s1 + $0x1380] ss:$16 sps:$4 sm:$0xff]  }
 0x23b   :  { %5282 = vmatpush1.bf16.msra.mxu0 %v8181_v2  ;;  %5815 = vmatpush1.bf16.msra.mxu1 %v8184_v3  ;;  %v8273_v2 = vld [vmem:[%s11196_s1 + $0x13a4] ss:$16 sps:$4 sm:$0xff]   ;;  %v8276_v3 = vld [vmem:[%s11196_s1 + $0x13ac] ss:$16 sps:$4 sm:$0xff]  }
 0x23c   :  { %5283 = vmatprep.subr.bf16.mxu0 %v8189_v4  ;;  %5816 = vmatprep.subr.bf16.mxu1 %v8192_v57  ;;  %v8271_v4 = vld [vmem:[%s11196_s1 + $0x13a0] ss:$16 sps:$4 sm:$0xff]   ;;  %v8274_v57 = vld [vmem:[%s11196_s1 + $0x13a8] ss:$16 sps:$4 sm:$0xff]  }
 0x23f   :  { %5284 = vmatpush1.bf16.msra.mxu0 %v8187_v6  ;;  %5817 = vmatpush1.bf16.msra.mxu1 %v8190_v55  ;;  %v8279_v6 = vld [vmem:[%s11196_s1 + $0x13c4] ss:$16 sps:$4 sm:$0xff]   ;;  %v8282_v55 = vld [vmem:[%s11196_s1 + $0x13cc] ss:$16 sps:$4 sm:$0xff]  }
 0x240   :  { %5294 = vmatprep.subr.bf16.mxu0 %v8195_v7  ;;  %5827 = vmatprep.subr.bf16.mxu1 %v8198_v8  ;;  %v10603_v7 = vld [vmem:[%s11195_s0 + $0x28] sm:$0xff]  ;;  %v8277_v8 = vld [vmem:[%s11196_s1 + $0x13c0] ss:$16 sps:$4 sm:$0xff]  }
 0x242   :  { %5286 = vmatmul.mubr.bf16.vlgmr.msra.gmra.mrb[0].mxu0 %v186_v11  ;;  %5819 = vmatmul.mubr.bf16.vlgmr.msra.gmra.mrb[0].mxu1 %v186_v11  ;;  %v8285_v11 = vld [vmem:[%s11196_s1 + $0x13e4] ss:$16 sps:$4 sm:$0xff]  }
 0x243   :  { %5295 = vmatpush1.bf16.msra.mxu0 %v8193_v12  ;;  %5828 = vmatpush1.bf16.msra.mxu1 %v8196_v13  ;;  %v8288_v12 = vld [vmem:[%s11196_s1 + $0x13ec] ss:$16 sps:$4 sm:$0xff]   ;;  %v10619_v13 = vrot.slane %v10603_v7, %v8731_v49 }
 0x244   :  { %5296 = vmatprep.subr.bf16.mxu0 %v8201_v14  ;;  %5829 = vmatprep.subr.bf16.mxu1 %v8204_v62  ;;  %v8283_v14 = vld [vmem:[%s11196_s1 + $0x13e0] ss:$16 sps:$4 sm:$0xff]   ;;  %v8286_v62 = vld [vmem:[%s11196_s1 + $0x13e8] ss:$16 sps:$4 sm:$0xff]  }
 0x245   :  { %5326 = vmatprep.mubr.bf16.mxu0 %v189_v15  ;;  %5859 = vmatprep.mubr.bf16.mxu1 %v189_v15  ;;  %v8292_v15 = vld [vmem:[%s11196_s1 + $0x1404] ss:$16 sps:$4 sm:$0xff]  }
 0x247   :  { %5297 = vmatpush1.bf16.msra.mxu0 %v8199_v16  ;;  %5830 = vmatpush1.bf16.msra.mxu1 %v8202_v17  ;;  %v8295_v16 = vld [vmem:[%s11196_s1 + $0x140c] ss:$16 sps:$4 sm:$0xff]   ;;  %v136_v17 = vcombine.high %v10619_v13, %v10619_v13 }
 0x248   :  { %5298 = vmatprep.subr.bf16.mxu0 %v8207_v18  ;;  %5831 = vmatprep.subr.bf16.mxu1 %v8210_v19  ;;  %v188_v18 = vpack.c.bf16 %v10414_v5, %v10414_v5  ;;  %v8290_v19 = vld [vmem:[%s11196_s1 + $0x1400] ss:$16 sps:$4 sm:$0xff]   ;;  %v8301_v5 = vld [vmem:[%s11196_s1 + $0x142c] ss:$16 sps:$4 sm:$0xff]  }
 0x24b   :  { %5299 = vmatpush1.bf16.msra.mxu0 %v8205_v20  ;;  %5832 = vmatpush1.bf16.msra.mxu1 %v8208_v21  ;;  %v8293_v20 = vld [vmem:[%s11196_s1 + $0x1408] ss:$16 sps:$4 sm:$0xff]   ;;  %v8298_v21 = vld [vmem:[%s11196_s1 + $0x1424] ss:$16 sps:$4 sm:$0xff]  }
 0x24c   :  { %5300 = vmatprep.subr.bf16.mxu0 %v8213_v22  ;;  %5833 = vmatprep.subr.bf16.mxu1 %v8216_v23  ;;  %v191_v22 = vpack.c.bf16 %v136_v17, %v136_v17  ;;  %v8296_v23 = vld [vmem:[%s11196_s1 + $0x1420] ss:$16 sps:$4 sm:$0xff]  }
 0x24d   :  { %v8374_v17 = vld [vmem:[%s11196_s1 + $0x15c0] ss:$16 sps:$4 sm:$0xff]  }
 0x24f   :  { %5301 = vmatpush1.bf16.msra.mxu0 %v8211_v9  ;;  %5834 = vmatpush1.bf16.msra.mxu1 %v8214_v26  ;;  %v8299_v9 = vld [vmem:[%s11196_s1 + $0x1428] ss:$16 sps:$4 sm:$0xff]   ;;  %v8304_v26 = vld [vmem:[%s11196_s1 + $0x1444] ss:$16 sps:$4 sm:$0xff]  }
 0x250   :  { %5302 = vmatprep.subr.bf16.mxu0 %v8219_v27  ;;  %5835 = vmatprep.subr.bf16.mxu1 %v8222_v29  ;;  %v8307_v27 = vld [vmem:[%s11196_s1 + $0x144c] ss:$16 sps:$4 sm:$0xff]   ;;  %v8302_v29 = vld [vmem:[%s11196_s1 + $0x1440] ss:$16 sps:$4 sm:$0xff]  }
 0x253   :  { %5303 = vmatpush1.bf16.msra.mxu0 %v8217_v30  ;;  %5836 = vmatpush1.bf16.msra.mxu1 %v8220_v31  ;;  %v8305_v30 = vld [vmem:[%s11196_s1 + $0x1448] ss:$16 sps:$4 sm:$0xff]   ;;  %v8310_v31 = vld [vmem:[%s11196_s1 + $0x1464] ss:$16 sps:$4 sm:$0xff]  }
 0x254   :  { %5304 = vmatprep.subr.bf16.mxu0 %v8225_v33  ;;  %5837 = vmatprep.subr.bf16.mxu1 %v8228_v25  ;;  %v8313_v33 = vld [vmem:[%s11196_s1 + $0x146c] ss:$16 sps:$4 sm:$0xff]   ;;  %v8308_v25 = vld [vmem:[%s11196_s1 + $0x1460] ss:$16 sps:$4 sm:$0xff]  }
 0x257   :  { %5305 = vmatpush1.bf16.msra.mxu0 %v8223_v34  ;;  %5838 = vmatpush1.bf16.msra.mxu1 %v8226_v35  ;;  %v8311_v34 = vld [vmem:[%s11196_s1 + $0x1468] ss:$16 sps:$4 sm:$0xff]   ;;  %v8316_v35 = vld [vmem:[%s11196_s1 + $0x1484] ss:$16 sps:$4 sm:$0xff]  }
 0x258   :  { %5306 = vmatprep.subr.bf16.mxu0 %v8231_v36  ;;  %5839 = vmatprep.subr.bf16.mxu1 %v8234_v37  ;;  %v8319_v36 = vld [vmem:[%s11196_s1 + $0x148c] ss:$16 sps:$4 sm:$0xff]   ;;  %v8314_v37 = vld [vmem:[%s11196_s1 + $0x1480] ss:$16 sps:$4 sm:$0xff]  }
 0x25b   :  { %5307 = vmatpush1.bf16.msra.mxu0 %v8229_v38  ;;  %5840 = vmatpush1.bf16.msra.mxu1 %v8232_v28  ;;  %v8317_v38 = vld [vmem:[%s11196_s1 + $0x1488] ss:$16 sps:$4 sm:$0xff]   ;;  %v8322_v28 = vld [vmem:[%s11196_s1 + $0x14a4] ss:$16 sps:$4 sm:$0xff]  }
 0x25c   :  { %5308 = vmatprep.subr.bf16.mxu0 %v8237_v40  ;;  %5841 = vmatprep.subr.bf16.mxu1 %v8240_v41  ;;  %v8325_v40 = vld [vmem:[%s11196_s1 + $0x14ac] ss:$16 sps:$4 sm:$0xff]   ;;  %v8320_v41 = vld [vmem:[%s11196_s1 + $0x14a0] ss:$16 sps:$4 sm:$0xff]  }
 0x25f   :  { %5309 = vmatpush1.bf16.msra.mxu0 %v8235_v24  ;;  %5842 = vmatpush1.bf16.msra.mxu1 %v8238_v44  ;;  %v8323_v24 = vld [vmem:[%s11196_s1 + $0x14a8] ss:$16 sps:$4 sm:$0xff]   ;;  %v8328_v44 = vld [vmem:[%s11196_s1 + $0x14c4] ss:$16 sps:$4 sm:$0xff]  }
 0x260   :  { %5310 = vmatprep.subr.bf16.mxu0 %v8243_v45  ;;  %5843 = vmatprep.subr.bf16.mxu1 %v8246_v46  ;;  %v8331_v45 = vld [vmem:[%s11196_s1 + $0x14cc] ss:$16 sps:$4 sm:$0xff]   ;;  %v8326_v46 = vld [vmem:[%s11196_s1 + $0x14c0] ss:$16 sps:$4 sm:$0xff]  }
 0x263   :  { %5311 = vmatpush1.bf16.msra.mxu0 %v8241_v48  ;;  %5844 = vmatpush1.bf16.msra.mxu1 %v8244_v32  ;;  %v8329_v48 = vld [vmem:[%s11196_s1 + $0x14c8] ss:$16 sps:$4 sm:$0xff]   ;;  %v8334_v32 = vld [vmem:[%s11196_s1 + $0x14e4] ss:$16 sps:$4 sm:$0xff]  }
 0x264   :  { %5312 = vmatprep.subr.bf16.mxu0 %v8249_v50  ;;  %5845 = vmatprep.subr.bf16.mxu1 %v8252_v51  ;;  %v8337_v50 = vld [vmem:[%s11196_s1 + $0x14ec] ss:$16 sps:$4 sm:$0xff]   ;;  %v8332_v51 = vld [vmem:[%s11196_s1 + $0x14e0] ss:$16 sps:$4 sm:$0xff]  }
 0x267   :  { %5313 = vmatpush1.bf16.msra.mxu0 %v8247_v52  ;;  %5846 = vmatpush1.bf16.msra.mxu1 %v8250_v53  ;;  %v8335_v52 = vld [vmem:[%s11196_s1 + $0x14e8] ss:$16 sps:$4 sm:$0xff]   ;;  %v8340_v53 = vld [vmem:[%s11196_s1 + $0x1504] ss:$16 sps:$4 sm:$0xff]  }
 0x268   :  { %5314 = vmatprep.subr.bf16.mxu0 %v8255_v54  ;;  %5847 = vmatprep.subr.bf16.mxu1 %v8258_v42  ;;  %v8343_v54 = vld [vmem:[%s11196_s1 + $0x150c] ss:$16 sps:$4 sm:$0xff]   ;;  %v8338_v42 = vld [vmem:[%s11196_s1 + $0x1500] ss:$16 sps:$4 sm:$0xff]  }
 0x26b   :  { %5315 = vmatpush1.bf16.msra.mxu0 %v8253_v56  ;;  %5848 = vmatpush1.bf16.msra.mxu1 %v8256_v39  ;;  %v8341_v56 = vld [vmem:[%s11196_s1 + $0x1508] ss:$16 sps:$4 sm:$0xff]   ;;  %v8346_v39 = vld [vmem:[%s11196_s1 + $0x1524] ss:$16 sps:$4 sm:$0xff]  }
 0x26c   :  { %5316 = vmatprep.subr.bf16.mxu0 %v8261_v58  ;;  %5849 = vmatprep.subr.bf16.mxu1 %v8264_v59  ;;  %v8349_v58 = vld [vmem:[%s11196_s1 + $0x152c] ss:$16 sps:$4 sm:$0xff]   ;;  %v8344_v59 = vld [vmem:[%s11196_s1 + $0x1520] ss:$16 sps:$4 sm:$0xff]  }
 0x26f   :  { %5317 = vmatpush1.bf16.msra.mxu0 %v8259_v60  ;;  %5850 = vmatpush1.bf16.msra.mxu1 %v8262_v61  ;;  %v8347_v60 = vld [vmem:[%s11196_s1 + $0x1528] ss:$16 sps:$4 sm:$0xff]   ;;  %v8352_v61 = vld [vmem:[%s11196_s1 + $0x1544] ss:$16 sps:$4 sm:$0xff]  }
 0x270   :  { %5318 = vmatprep.subr.bf16.mxu0 %v8267_v63  ;;  %5851 = vmatprep.subr.bf16.mxu1 %v8270_v47  ;;  %v8355_v63 = vld [vmem:[%s11196_s1 + $0x154c] ss:$16 sps:$4 sm:$0xff]   ;;  %v8350_v47 = vld [vmem:[%s11196_s1 + $0x1540] ss:$16 sps:$4 sm:$0xff]  }
 0x273   :  { %5319 = vmatpush1.bf16.msra.mxu0 %v8265_v0  ;;  %5852 = vmatpush1.bf16.msra.mxu1 %v8268_v1  ;;  %v8353_v0 = vld [vmem:[%s11196_s1 + $0x1548] ss:$16 sps:$4 sm:$0xff]   ;;  %v8358_v1 = vld [vmem:[%s11196_s1 + $0x1564] ss:$16 sps:$4 sm:$0xff]  }
 0x274   :  { %5320 = vmatprep.subr.bf16.mxu0 %v8273_v2  ;;  %5853 = vmatprep.subr.bf16.mxu1 %v8276_v3  ;;  %v8361_v2 = vld [vmem:[%s11196_s1 + $0x156c] ss:$16 sps:$4 sm:$0xff]   ;;  %v8356_v3 = vld [vmem:[%s11196_s1 + $0x1560] ss:$16 sps:$4 sm:$0xff]  }
 0x277   :  { %5321 = vmatpush1.bf16.msra.mxu0 %v8271_v4  ;;  %5854 = vmatpush1.bf16.msra.mxu1 %v8274_v57  ;;  %v8359_v4 = vld [vmem:[%s11196_s1 + $0x1568] ss:$16 sps:$4 sm:$0xff]   ;;  %v8364_v57 = vld [vmem:[%s11196_s1 + $0x1584] ss:$16 sps:$4 sm:$0xff]  }
 0x278   :  { %5322 = vmatprep.subr.bf16.mxu0 %v8279_v6  ;;  %5855 = vmatprep.subr.bf16.mxu1 %v8282_v55  ;;  %v8367_v6 = vld [vmem:[%s11196_s1 + $0x158c] ss:$16 sps:$4 sm:$0xff]   ;;  %v8362_v55 = vld [vmem:[%s11196_s1 + $0x1580] ss:$16 sps:$4 sm:$0xff]  }
 0x27b   :  { %5323 = vmatpush1.bf16.msra.mxu0 %v8277_v8  ;;  %5856 = vmatpush1.bf16.msra.mxu1 %v8280_v10  ;;  %v8365_v8 = vld [vmem:[%s11196_s1 + $0x1588] ss:$16 sps:$4 sm:$0xff]   ;;  %v8370_v10 = vld [vmem:[%s11196_s1 + $0x15a4] ss:$16 sps:$4 sm:$0xff]  }
 0x27c   :  { %5324 = vmatprep.subr.bf16.mxu0 %v8285_v11  ;;  %5857 = vmatprep.subr.bf16.mxu1 %v8288_v12  ;;  %v8373_v11 = vld [vmem:[%s11196_s1 + $0x15ac] ss:$16 sps:$4 sm:$0xff]   ;;  %v8368_v12 = vld [vmem:[%s11196_s1 + $0x15a0] ss:$16 sps:$4 sm:$0xff]  }
 0x27f   :  { %5325 = vmatpush1.bf16.msra.mxu0 %v8283_v14  ;;  %5858 = vmatpush1.bf16.msra.mxu1 %v8286_v62  ;;  %v8371_v14 = vld [vmem:[%s11196_s1 + $0x15a8] ss:$16 sps:$4 sm:$0xff]   ;;  %v8376_v62 = vld [vmem:[%s11196_s1 + $0x15c4] ss:$16 sps:$4 sm:$0xff]  }
 0x280   :  { %5335 = vmatprep.subr.bf16.mxu0 %v8292_v15  ;;  %5868 = vmatprep.subr.bf16.mxu1 %v8295_v16  ;;  %v8379_v15 = vld [vmem:[%s11196_s1 + $0x15cc] ss:$16 sps:$4 sm:$0xff]   ;;  %v121_v16 = vcombine.high %v10603_v7, %v10603_v7 }
 0x281   :  { %v8385_v7 = vld [vmem:[%s11196_s1 + $0x15ec] ss:$16 sps:$4 sm:$0xff]  }
 0x282   :  { %5327 = vmatmul.mubr.bf16.vlgmr.msra.gmra.mrb[0].mxu0 %v188_v18  ;;  %5860 = vmatmul.mubr.bf16.vlgmr.msra.gmra.mrb[0].mxu1 %v188_v18  ;;  %v8377_v18 = vld [vmem:[%s11196_s1 + $0x15c8] ss:$16 sps:$4 sm:$0xff]  }
 0x283   :  { %5336 = vmatpush1.bf16.msra.mxu0 %v8290_v19  ;;  %5869 = vmatpush1.bf16.msra.mxu1 %v8293_v20  ;;  %v8382_v19 = vld [vmem:[%s11196_s1 + $0x15e4] ss:$16 sps:$4 sm:$0xff]   ;;  %v10820_v20 = vrot.slane %v121_v16, %v8731_v49  ;;  %v8391_v49 = vld [vmem:[%s11196_s1 + $0x160c] ss:$16 sps:$4 sm:$0xff]  }
 0x284   :  { %5337 = vmatprep.subr.bf16.mxu0 %v8298_v21  ;;  %5870 = vmatprep.subr.bf16.mxu1 %v8301_v5  ;;  %v8380_v21 = vld [vmem:[%s11196_s1 + $0x15e0] ss:$16 sps:$4 sm:$0xff]   ;;  %v8383_v5 = vld [vmem:[%s11196_s1 + $0x15e8] ss:$16 sps:$4 sm:$0xff]   ;;  %v8466_v16 = vld [vmem:[%s11196_s1 + $0x17a4] ss:$16 sps:$4 sm:$0xff]  }
 0x285   :  { %5367 = vmatprep.mubr.bf16.mxu0 %v191_v22  ;;  %5900 = vmatprep.mubr.bf16.mxu1 %v191_v22  ;;  %v8388_v22 = vld [vmem:[%s11196_s1 + $0x1604] ss:$16 sps:$4 sm:$0xff]  }
 0x287   :  { %5338 = vmatpush1.bf16.msra.mxu0 %v8296_v23  ;;  %5871 = vmatpush1.bf16.msra.mxu1 %v8299_v9  ;;  %v137_v23 = vcombine.high %v10820_v20, %v10820_v20  ;;  %v190_v9 = vpack.c.bf16 %v10619_v13, %v10619_v13  ;;  %v8397_v13 = vld [vmem:[%s11196_s1 + $0x162c] ss:$16 sps:$4 sm:$0xff]  }
 0x288   :  { %5339 = vmatprep.subr.bf16.mxu0 %v8304_v26  ;;  %5872 = vmatprep.subr.bf16.mxu1 %v8307_v27  ;;  %v8386_v26 = vld [vmem:[%s11196_s1 + $0x1600] ss:$16 sps:$4 sm:$0xff]   ;;  %v8389_v27 = vld [vmem:[%s11196_s1 + $0x1608] ss:$16 sps:$4 sm:$0xff]  }
 0x28b   :  { %5340 = vmatpush1.bf16.msra.mxu0 %v8302_v29  ;;  %5873 = vmatpush1.bf16.msra.mxu1 %v8305_v30  ;;  %v8394_v29 = vld [vmem:[%s11196_s1 + $0x1624] ss:$16 sps:$4 sm:$0xff]   ;;  %v193_v30 = vpack.c.bf16 %v137_v23, %v137_v23  ;;  %v8481_v23 = vld [vmem:[%s11196_s1 + $0x17ec] ss:$16 sps:$4 sm:$0xff]  }
 0x28c   :  { %5341 = vmatprep.subr.bf16.mxu0 %v8310_v31  ;;  %5874 = vmatprep.subr.bf16.mxu1 %v8313_v33  ;;  %v8392_v31 = vld [vmem:[%s11196_s1 + $0x1620] ss:$16 sps:$4 sm:$0xff]   ;;  %v8395_v33 = vld [vmem:[%s11196_s1 + $0x1628] ss:$16 sps:$4 sm:$0xff]  }
 0x28f   :  { %5342 = vmatpush1.bf16.msra.mxu0 %v8308_v25  ;;  %5875 = vmatpush1.bf16.msra.mxu1 %v8311_v34  ;;  %v8400_v25 = vld [vmem:[%s11196_s1 + $0x1644] ss:$16 sps:$4 sm:$0xff]   ;;  %v8403_v34 = vld [vmem:[%s11196_s1 + $0x164c] ss:$16 sps:$4 sm:$0xff]  }
 0x290   :  { %5343 = vmatprep.subr.bf16.mxu0 %v8316_v35  ;;  %5876 = vmatprep.subr.bf16.mxu1 %v8319_v36  ;;  %v8398_v35 = vld [vmem:[%s11196_s1 + $0x1640] ss:$16 sps:$4 sm:$0xff]   ;;  %v8401_v36 = vld [vmem:[%s11196_s1 + $0x1648] ss:$16 sps:$4 sm:$0xff]  }
 0x293   :  { %5344 = vmatpush1.bf16.msra.mxu0 %v8314_v37  ;;  %5877 = vmatpush1.bf16.msra.mxu1 %v8317_v38  ;;  %v8406_v37 = vld [vmem:[%s11196_s1 + $0x1664] ss:$16 sps:$4 sm:$0xff]   ;;  %v8409_v38 = vld [vmem:[%s11196_s1 + $0x166c] ss:$16 sps:$4 sm:$0xff]  }
 0x294   :  { %5345 = vmatprep.subr.bf16.mxu0 %v8322_v28  ;;  %5878 = vmatprep.subr.bf16.mxu1 %v8325_v40  ;;  %v8404_v28 = vld [vmem:[%s11196_s1 + $0x1660] ss:$16 sps:$4 sm:$0xff]   ;;  %v8407_v40 = vld [vmem:[%s11196_s1 + $0x1668] ss:$16 sps:$4 sm:$0xff]  }
 0x297   :  { %5346 = vmatpush1.bf16.msra.mxu0 %v8320_v41  ;;  %5879 = vmatpush1.bf16.msra.mxu1 %v8323_v24  ;;  %v8412_v41 = vld [vmem:[%s11196_s1 + $0x1684] ss:$16 sps:$4 sm:$0xff]   ;;  %v8415_v24 = vld [vmem:[%s11196_s1 + $0x168c] ss:$16 sps:$4 sm:$0xff]  }
 0x298   :  { %5347 = vmatprep.subr.bf16.mxu0 %v8328_v44  ;;  %5880 = vmatprep.subr.bf16.mxu1 %v8331_v45  ;;  %v8410_v44 = vld [vmem:[%s11196_s1 + $0x1680] ss:$16 sps:$4 sm:$0xff]   ;;  %v8413_v45 = vld [vmem:[%s11196_s1 + $0x1688] ss:$16 sps:$4 sm:$0xff]  }
 0x29b   :  { %5348 = vmatpush1.bf16.msra.mxu0 %v8326_v46  ;;  %5881 = vmatpush1.bf16.msra.mxu1 %v8329_v48  ;;  %v8418_v46 = vld [vmem:[%s11196_s1 + $0x16a4] ss:$16 sps:$4 sm:$0xff]   ;;  %v8421_v48 = vld [vmem:[%s11196_s1 + $0x16ac] ss:$16 sps:$4 sm:$0xff]  }
 0x29c   :  { %5349 = vmatprep.subr.bf16.mxu0 %v8334_v32  ;;  %5882 = vmatprep.subr.bf16.mxu1 %v8337_v50  ;;  %v8416_v32 = vld [vmem:[%s11196_s1 + $0x16a0] ss:$16 sps:$4 sm:$0xff]   ;;  %v8419_v50 = vld [vmem:[%s11196_s1 + $0x16a8] ss:$16 sps:$4 sm:$0xff]  }
 0x29f   :  { %5350 = vmatpush1.bf16.msra.mxu0 %v8332_v51  ;;  %5883 = vmatpush1.bf16.msra.mxu1 %v8335_v52  ;;  %v8424_v51 = vld [vmem:[%s11196_s1 + $0x16c4] ss:$16 sps:$4 sm:$0xff]   ;;  %v8427_v52 = vld [vmem:[%s11196_s1 + $0x16cc] ss:$16 sps:$4 sm:$0xff]  }
 0x2a0   :  { %5351 = vmatprep.subr.bf16.mxu0 %v8340_v53  ;;  %5884 = vmatprep.subr.bf16.mxu1 %v8343_v54  ;;  %v8422_v53 = vld [vmem:[%s11196_s1 + $0x16c0] ss:$16 sps:$4 sm:$0xff]   ;;  %v8425_v54 = vld [vmem:[%s11196_s1 + $0x16c8] ss:$16 sps:$4 sm:$0xff]  }
 0x2a3   :  { %5352 = vmatpush1.bf16.msra.mxu0 %v8338_v42  ;;  %5885 = vmatpush1.bf16.msra.mxu1 %v8341_v56  ;;  %v8430_v42 = vld [vmem:[%s11196_s1 + $0x16e4] ss:$16 sps:$4 sm:$0xff]   ;;  %v8433_v56 = vld [vmem:[%s11196_s1 + $0x16ec] ss:$16 sps:$4 sm:$0xff]  }
 0x2a4   :  { %5353 = vmatprep.subr.bf16.mxu0 %v8346_v39  ;;  %5886 = vmatprep.subr.bf16.mxu1 %v8349_v58  ;;  %v8428_v39 = vld [vmem:[%s11196_s1 + $0x16e0] ss:$16 sps:$4 sm:$0xff]   ;;  %v8431_v58 = vld [vmem:[%s11196_s1 + $0x16e8] ss:$16 sps:$4 sm:$0xff]  }
 0x2a7   :  { %5354 = vmatpush1.bf16.msra.mxu0 %v8344_v59  ;;  %5887 = vmatpush1.bf16.msra.mxu1 %v8347_v60  ;;  %v8436_v59 = vld [vmem:[%s11196_s1 + $0x1704] ss:$16 sps:$4 sm:$0xff]   ;;  %v8439_v60 = vld [vmem:[%s11196_s1 + $0x170c] ss:$16 sps:$4 sm:$0xff]  }
 0x2a8   :  { %5355 = vmatprep.subr.bf16.mxu0 %v8352_v61  ;;  %5888 = vmatprep.subr.bf16.mxu1 %v8355_v63  ;;  %v8434_v61 = vld [vmem:[%s11196_s1 + $0x1700] ss:$16 sps:$4 sm:$0xff]   ;;  %v8437_v63 = vld [vmem:[%s11196_s1 + $0x1708] ss:$16 sps:$4 sm:$0xff]  }
 0x2ab   :  { %5356 = vmatpush1.bf16.msra.mxu0 %v8350_v47  ;;  %5889 = vmatpush1.bf16.msra.mxu1 %v8353_v0  ;;  %v8442_v47 = vld [vmem:[%s11196_s1 + $0x1724] ss:$16 sps:$4 sm:$0xff]   ;;  %v8445_v0 = vld [vmem:[%s11196_s1 + $0x172c] ss:$16 sps:$4 sm:$0xff]  }
 0x2ac   :  { %5357 = vmatprep.subr.bf16.mxu0 %v8358_v1  ;;  %5890 = vmatprep.subr.bf16.mxu1 %v8361_v2  ;;  %v8440_v1 = vld [vmem:[%s11196_s1 + $0x1720] ss:$16 sps:$4 sm:$0xff]   ;;  %v8443_v2 = vld [vmem:[%s11196_s1 + $0x1728] ss:$16 sps:$4 sm:$0xff]  }
 0x2af   :  { %5358 = vmatpush1.bf16.msra.mxu0 %v8356_v3  ;;  %5891 = vmatpush1.bf16.msra.mxu1 %v8359_v4  ;;  %v8448_v3 = vld [vmem:[%s11196_s1 + $0x1744] ss:$16 sps:$4 sm:$0xff]   ;;  %v8451_v4 = vld [vmem:[%s11196_s1 + $0x174c] ss:$16 sps:$4 sm:$0xff]  }
 0x2b0   :  { %5359 = vmatprep.subr.bf16.mxu0 %v8364_v57  ;;  %5892 = vmatprep.subr.bf16.mxu1 %v8367_v6  ;;  %v8446_v57 = vld [vmem:[%s11196_s1 + $0x1740] ss:$16 sps:$4 sm:$0xff]   ;;  %v8449_v6 = vld [vmem:[%s11196_s1 + $0x1748] ss:$16 sps:$4 sm:$0xff]  }
 0x2b3   :  { %5360 = vmatpush1.bf16.msra.mxu0 %v8362_v55  ;;  %5893 = vmatpush1.bf16.msra.mxu1 %v8365_v8  ;;  %v8454_v55 = vld [vmem:[%s11196_s1 + $0x1764] ss:$16 sps:$4 sm:$0xff]   ;;  %v8457_v8 = vld [vmem:[%s11196_s1 + $0x176c] ss:$16 sps:$4 sm:$0xff]  }
 0x2b4   :  { %5361 = vmatprep.subr.bf16.mxu0 %v8370_v10  ;;  %5894 = vmatprep.subr.bf16.mxu1 %v8373_v11  ;;  %v8452_v10 = vld [vmem:[%s11196_s1 + $0x1760] ss:$16 sps:$4 sm:$0xff]   ;;  %v8455_v11 = vld [vmem:[%s11196_s1 + $0x1768] ss:$16 sps:$4 sm:$0xff]  }
 0x2b7   :  { %5362 = vmatpush1.bf16.msra.mxu0 %v8368_v12  ;;  %5895 = vmatpush1.bf16.msra.mxu1 %v8371_v14  ;;  %v8460_v12 = vld [vmem:[%s11196_s1 + $0x1784] ss:$16 sps:$4 sm:$0xff]   ;;  %v8463_v14 = vld [vmem:[%s11196_s1 + $0x178c] ss:$16 sps:$4 sm:$0xff]  }
 0x2b8   :  { %5363 = vmatprep.subr.bf16.mxu0 %v8376_v62  ;;  %5896 = vmatprep.subr.bf16.mxu1 %v8379_v15  ;;  %v8458_v62 = vld [vmem:[%s11196_s1 + $0x1780] ss:$16 sps:$4 sm:$0xff]   ;;  %v8461_v15 = vld [vmem:[%s11196_s1 + $0x1788] ss:$16 sps:$4 sm:$0xff]  }
 0x2bb   :  { %5364 = vmatpush1.bf16.msra.mxu0 %v8374_v17  ;;  %5897 = vmatpush1.bf16.msra.mxu1 %v8377_v18  ;;  %v8469_v17 = vld [vmem:[%s11196_s1 + $0x17ac] ss:$16 sps:$4 sm:$0xff]   ;;  %v8464_v18 = vld [vmem:[%s11196_s1 + $0x17a0] ss:$16 sps:$4 sm:$0xff]  }
 0x2bc   :  { %5365 = vmatprep.subr.bf16.mxu0 %v8382_v19  ;;  %5898 = vmatprep.subr.bf16.mxu1 %v8385_v7  ;;  %v8467_v19 = vld [vmem:[%s11196_s1 + $0x17a8] ss:$16 sps:$4 sm:$0xff]   ;;  %v8472_v7 = vld [vmem:[%s11196_s1 + $0x17c4] ss:$16 sps:$4 sm:$0xff]  }
 0x2bf   :  { %5366 = vmatpush1.bf16.msra.mxu0 %v8380_v21  ;;  %5899 = vmatpush1.bf16.msra.mxu1 %v8383_v5  ;;  %v8475_v21 = vld [vmem:[%s11196_s1 + $0x17cc] ss:$16 sps:$4 sm:$0xff]   ;;  %v8470_v5 = vld [vmem:[%s11196_s1 + $0x17c0] ss:$16 sps:$4 sm:$0xff]  }
 0x2c0   :  { %5376 = vmatprep.subr.bf16.mxu0 %v8388_v22  ;;  %5909 = vmatprep.subr.bf16.mxu1 %v8391_v49  ;;  %v8473_v22 = vld [vmem:[%s11196_s1 + $0x17c8] ss:$16 sps:$4 sm:$0xff]   ;;  %v8478_v49 = vld [vmem:[%s11196_s1 + $0x17e4] ss:$16 sps:$4 sm:$0xff]  }
 0x2c2   :  { %5368 = vmatmul.mubr.bf16.vlgmr.msra.gmra.mrb[0].mxu0 %v190_v9  ;;  %5901 = vmatmul.mubr.bf16.vlgmr.msra.gmra.mrb[0].mxu1 %v190_v9  ;;  %v8476_v9 = vld [vmem:[%s11196_s1 + $0x17e0] ss:$16 sps:$4 sm:$0xff]  }
 0x2c3   :  { %5377 = vmatpush1.bf16.msra.mxu0 %v8386_v26  ;;  %5910 = vmatpush1.bf16.msra.mxu1 %v8389_v27  ;;  %v8479_v26 = vld [vmem:[%s11196_s1 + $0x17e8] ss:$16 sps:$4 sm:$0xff]   ;;  %v8485_v27 = vld [vmem:[%s11196_s1 + $0x1804] ss:$16 sps:$4 sm:$0xff]  }
 0x2c4   :  { %5378 = vmatprep.subr.bf16.mxu0 %v8394_v29  ;;  %5911 = vmatprep.subr.bf16.mxu1 %v8397_v13  ;;  %v8488_v29 = vld [vmem:[%s11196_s1 + $0x180c] ss:$16 sps:$4 sm:$0xff]   ;;  %v192_v13 = vpack.c.bf16 %v10820_v20, %v10820_v20 }
 0x2c5   :  { %5408 = vmatprep.mubr.bf16.mxu0 %v193_v30  ;;  %5941 = vmatprep.mubr.bf16.mxu1 %v193_v30  ;;  %v8483_v30 = vld [vmem:[%s11196_s1 + $0x1800] ss:$16 sps:$4 sm:$0xff]   ;;  %v8494_v20 = vld [vmem:[%s11196_s1 + $0x182c] ss:$16 sps:$4 sm:$0xff]  }
 0x2c7   :  { %5379 = vmatpush1.bf16.msra.mxu0 %v8392_v31  ;;  %5912 = vmatpush1.bf16.msra.mxu1 %v8395_v33  ;;  %v8486_v31 = vld [vmem:[%s11196_s1 + $0x1808] ss:$16 sps:$4 sm:$0xff]   ;;  %v8491_v33 = vld [vmem:[%s11196_s1 + $0x1824] ss:$16 sps:$4 sm:$0xff]  }
 0x2c8   :  { %5380 = vmatprep.subr.bf16.mxu0 %v8400_v25  ;;  %5913 = vmatprep.subr.bf16.mxu1 %v8403_v34  ;;  %v8489_v25 = vld [vmem:[%s11196_s1 + $0x1820] ss:$16 sps:$4 sm:$0xff]   ;;  %v8492_v34 = vld [vmem:[%s11196_s1 + $0x1828] ss:$16 sps:$4 sm:$0xff]  }
 0x2cb   :  { %5381 = vmatpush1.bf16.msra.mxu0 %v8398_v35  ;;  %5914 = vmatpush1.bf16.msra.mxu1 %v8401_v36  ;;  %v8497_v35 = vld [vmem:[%s11196_s1 + $0x1844] ss:$16 sps:$4 sm:$0xff]   ;;  %v8500_v36 = vld [vmem:[%s11196_s1 + $0x184c] ss:$16 sps:$4 sm:$0xff]  }
 0x2cc   :  { %5382 = vmatprep.subr.bf16.mxu0 %v8406_v37  ;;  %5915 = vmatprep.subr.bf16.mxu1 %v8409_v38  ;;  %v8564_v37 = vmov 0   ;;  %v8495_v38 = vld [vmem:[%s11196_s1 + $0x1840] ss:$16 sps:$4 sm:$0xff]  }
 0x2cf   :  { %5383 = vmatpush1.bf16.msra.mxu0 %v8404_v28  ;;  %5916 = vmatpush1.bf16.msra.mxu1 %v8407_v40  ;;  %v8498_v28 = vld [vmem:[%s11196_s1 + $0x1848] ss:$16 sps:$4 sm:$0xff]   ;;  %v8503_v40 = vld [vmem:[%s11196_s1 + $0x1864] ss:$16 sps:$4 sm:$0xff]  }
 0x2d0   :  { %5384 = vmatprep.subr.bf16.mxu0 %v8412_v41  ;;  %5917 = vmatprep.subr.bf16.mxu1 %v8415_v24  ;;  %v8506_v41 = vld [vmem:[%s11196_s1 + $0x186c] ss:$16 sps:$4 sm:$0xff]   ;;  %v8501_v24 = vld [vmem:[%s11196_s1 + $0x1860] ss:$16 sps:$4 sm:$0xff]  }
 0x2d3   :  { %5385 = vmatpush1.bf16.msra.mxu0 %v8410_v44  ;;  %5918 = vmatpush1.bf16.msra.mxu1 %v8413_v45  ;;  %v8504_v44 = vld [vmem:[%s11196_s1 + $0x1868] ss:$16 sps:$4 sm:$0xff]   ;;  %v6358_v45 = vld.sshfl [vmem:[%s11195_s0 + $0x30] sm:$0x3 pattern:$0x76325410] }
 0x2d4   :  { %5386 = vmatprep.subr.bf16.mxu0 %v8418_v46  ;;  %5919 = vmatprep.subr.bf16.mxu1 %v8421_v48  ;;  %v8507_v46 = vld [vmem:[%s11198_s3 + $0x40] sm:$0xff]  }
 0x2d5   :  { %v8508_v48 = vld [vmem:[%s11198_s3 + $0xc0] sm:$0xff]  }
 0x2d7   :  { %5387 = vmatpush1.bf16.msra.mxu0 %v8416_v32  ;;  %5920 = vmatpush1.bf16.msra.mxu1 %v8419_v50  ;;  %v194_v32 = vpack.c.bf16 %v6358_v45, %v6358_v45  ;;  %v8509_v50 = vld [vmem:[%s11198_s3] sm:$0xff]  }
 0x2d8   :  { %5388 = vmatprep.subr.bf16.mxu0 %v8424_v51  ;;  %5921 = vmatprep.subr.bf16.mxu1 %v8427_v52  ;;  %v8510_v51 = vld [vmem:[%s11198_s3 + $0x80] sm:$0xff]   ;;  %v8511_v52 = vld [vmem:[%s11198_s3 + $0x48] sm:$0xff]  }
 0x2db   :  { %5389 = vmatpush1.bf16.msra.mxu0 %v8422_v53  ;;  %5922 = vmatpush1.bf16.msra.mxu1 %v8425_v54  ;;  %v8512_v53 = vld [vmem:[%s11198_s3 + $0xc8] sm:$0xff]  }
 0x2dc   :  { %5390 = vmatprep.subr.bf16.mxu0 %v8430_v42  ;;  %5923 = vmatprep.subr.bf16.mxu1 %v8433_v56  ;;  %v8513_v54 = vld [vmem:[%s11198_s3 + $0x8] sm:$0xff]   ;;  %v8515_v56 = vld [vmem:[%s11198_s3 + $0x50] sm:$0xff]  }
 0x2dd   :  { %v8514_v42 = vld [vmem:[%s11198_s3 + $0x88] sm:$0xff]  }
 0x2df   :  { %5391 = vmatpush1.bf16.msra.mxu0 %v8428_v39  ;;  %5924 = vmatpush1.bf16.msra.mxu1 %v8431_v58  ;;  %v8516_v39 = vld [vmem:[%s11198_s3 + $0xd0] sm:$0xff]  }
 0x2e0   :  { %5392 = vmatprep.subr.bf16.mxu0 %v8436_v59  ;;  %5925 = vmatprep.subr.bf16.mxu1 %v8439_v60  ;;  %v8517_v58 = vld [vmem:[%s11198_s3 + $0x10] sm:$0xff]   ;;  %v8519_v60 = vld [vmem:[%s11198_s3 + $0x58] sm:$0xff]  }
 0x2e1   :  { %v8518_v59 = vld [vmem:[%s11198_s3 + $0x90] sm:$0xff]  }
 0x2e3   :  { %5393 = vmatpush1.bf16.msra.mxu0 %v8434_v61  ;;  %5926 = vmatpush1.bf16.msra.mxu1 %v8437_v63  ;;  %v8520_v61 = vld [vmem:[%s11198_s3 + $0xd8] sm:$0xff]  }
 0x2e4   :  { %5394 = vmatprep.subr.bf16.mxu0 %v8442_v47  ;;  %5927 = vmatprep.subr.bf16.mxu1 %v8445_v0  ;;  %v8521_v63 = vld [vmem:[%s11198_s3 + $0x18] sm:$0xff]   ;;  %v8523_v0 = vld [vmem:[%s11198_s3 + $0x60] sm:$0xff]  }
 0x2e5   :  { %v8522_v47 = vld [vmem:[%s11198_s3 + $0x98] sm:$0xff]  }
 0x2e7   :  { %5395 = vmatpush1.bf16.msra.mxu0 %v8440_v1  ;;  %5928 = vmatpush1.bf16.msra.mxu1 %v8443_v2  ;;  %v8524_v1 = vld [vmem:[%s11198_s3 + $0xe0] sm:$0xff]  }
 0x2e8   :  { %5396 = vmatprep.subr.bf16.mxu0 %v8448_v3  ;;  %5929 = vmatprep.subr.bf16.mxu1 %v8451_v4  ;;  %v8525_v2 = vld [vmem:[%s11198_s3 + $0x20] sm:$0xff]   ;;  %v8527_v4 = vld [vmem:[%s11198_s3 + $0x68] sm:$0xff]  }
 0x2e9   :  { %v8526_v3 = vld [vmem:[%s11198_s3 + $0xa0] sm:$0xff]  }
 0x2eb   :  { %5397 = vmatpush1.bf16.msra.mxu0 %v8446_v57  ;;  %5930 = vmatpush1.bf16.msra.mxu1 %v8449_v6  ;;  %v8528_v57 = vld [vmem:[%s11198_s3 + $0xe8] sm:$0xff]  }
 0x2ec   :  { %5398 = vmatprep.subr.bf16.mxu0 %v8454_v55  ;;  %5931 = vmatprep.subr.bf16.mxu1 %v8457_v8  ;;  %v8529_v6 = vld [vmem:[%s11198_s3 + $0x28] sm:$0xff]   ;;  %v8531_v8 = vld [vmem:[%s11198_s3 + $0x70] sm:$0xff]  }
 0x2ed   :  { %v8530_v55 = vld [vmem:[%s11198_s3 + $0xa8] sm:$0xff]  }
 0x2ef   :  { %5399 = vmatpush1.bf16.msra.mxu0 %v8452_v10  ;;  %5932 = vmatpush1.bf16.msra.mxu1 %v8455_v11  ;;  %v8532_v10 = vld [vmem:[%s11198_s3 + $0xf0] sm:$0xff]  }
 0x2f0   :  { %5400 = vmatprep.subr.bf16.mxu0 %v8460_v12  ;;  %5933 = vmatprep.subr.bf16.mxu1 %v8463_v14  ;;  %v8533_v11 = vld [vmem:[%s11198_s3 + $0x30] sm:$0xff]   ;;  %v8535_v14 = vld [vmem:[%s11198_s3 + $0x78] sm:$0xff]  }
 0x2f1   :  { %v8534_v12 = vld [vmem:[%s11198_s3 + $0xb0] sm:$0xff]  }
 0x2f3   :  { %5401 = vmatpush1.bf16.msra.mxu0 %v8458_v62  ;;  %5934 = vmatpush1.bf16.msra.mxu1 %v8461_v15  ;;  %v8536_v62 = vld [vmem:[%s11198_s3 + $0xf8] sm:$0xff]  }
 0x2f4   :  { %5402 = vmatprep.subr.bf16.mxu0 %v8466_v16  ;;  %5935 = vmatprep.subr.bf16.mxu1 %v8469_v17  ;;  %v8537_v15 = vld [vmem:[%s11198_s3 + $0x38] sm:$0xff]   ;;  %v983_v17 = vsub.s32 0, %v8713_v43 }
 0x2f5   :  { %v8538_v16 = vld [vmem:[%s11198_s3 + $0xb8] sm:$0xff]  }
 0x2f7   :  { %5403 = vmatpush1.bf16.msra.mxu0 %v8464_v18  ;;  %5936 = vmatpush1.bf16.msra.mxu1 %v8467_v19  ;;  %v991_v18 = vsub.s32 2, %v8713_v43  ;;  %v979_v19 = vld [vmem:[%s11197_s2] sm:$0xf] }
 0x2f8   :  { %5404 = vmatprep.subr.bf16.mxu0 %v8472_v7  ;;  %5937 = vmatprep.subr.bf16.mxu1 %v8475_v21  ;;  %v987_v7 = vsub.s32 1, %v8713_v43  ;;  %v995_v21 = vsub.s32 3, %v8713_v43 }
 0x2fb   :  { %5405 = vmatpush1.bf16.msra.mxu0 %v8470_v5  ;;  %5938 = vmatpush1.bf16.msra.mxu1 %v8473_v22  ;;  %v984_v5 = vrot.slane %v979_v19, %v983_v17  ;;  %v992_v22 = vrot.slane %v979_v19, %v991_v18 }
 0x2fc   :  { %5406 = vmatprep.subr.bf16.mxu0 %v8478_v49  ;;  %5939 = vmatprep.subr.bf16.mxu1 %v8481_v23  ;;  %v988_v49 = vrot.slane %v979_v19, %v987_v7  ;;  %v996_v23 = vrot.slane %v979_v19, %v995_v21 }
 0x2ff   :  { %5407 = vmatpush1.bf16.msra.mxu0 %v8476_v9  ;;  %5940 = vmatpush1.bf16.msra.mxu1 %v8479_v26 }
 0x300   :  { %5417 = vmatprep.subr.bf16.mxu0 %v8485_v27  ;;  %5950 = vmatprep.subr.bf16.mxu1 %v8488_v29 }
 0x302   :  { %5409 = vmatmul.mubr.bf16.vlgmr.msra.gmra.mrb[0].mxu0 %v192_v13  ;;  %5942 = vmatmul.mubr.bf16.vlgmr.msra.gmra.mrb[0].mxu1 %v192_v13 }
 0x303   :  { %5418 = vmatpush1.bf16.msra.mxu0 %v8483_v30  ;;  %5951 = vmatpush1.bf16.msra.mxu1 %v8486_v31 }
 0x304   :  { %5419 = vmatprep.subr.bf16.mxu0 %v8491_v33  ;;  %5952 = vmatprep.subr.bf16.mxu1 %v8494_v20 }
 0x305   :  { %5449 = vmatprep.mubr.bf16.mxu0 %v8564_v37  ;;  %5982 = vmatprep.mubr.bf16.mxu1 %v8564_v37 }
 0x307   :  { %5420 = vmatpush1.bf16.msra.mxu0 %v8489_v25  ;;  %5953 = vmatpush1.bf16.msra.mxu1 %v8492_v34 }
 0x308   :  { %5421 = vmatprep.subr.bf16.mxu0 %v8497_v35  ;;  %5954 = vmatprep.subr.bf16.mxu1 %v8500_v36 }
 0x30b   :  { %5422 = vmatpush1.bf16.msra.mxu0 %v8495_v38  ;;  %5955 = vmatpush1.bf16.msra.mxu1 %v8498_v28 }
 0x30c   :  { %5423 = vmatprep.subr.bf16.mxu0 %v8503_v40  ;;  %5956 = vmatprep.subr.bf16.mxu1 %v8506_v41 }
 0x30f   :  { %5424 = vmatpush1.bf16.msra.mxu0 %v8501_v24  ;;  %5957 = vmatpush1.bf16.msra.mxu1 %v8504_v44 }
 0x310   :  { %7178 = vmatprep.subr.bf16.mxu0 %v8507_v46  ;;  %7200 = vmatprep.subr.bf16.mxu1 %v8508_v48  ;;  %v7145_v46 = vld [vmem:[%s11199_s4] ss:$0 sm:$0xff] }
 0x312   :  { %7143 = vmatmul.mubr.msk.bf16.vlgmr.msra.gmra.mrb[0].mxu0 %vm4921_vm0, %v194_v32  ;;  %7144 = vmatmul.mubr.msk.bf16.vlgmr.msra.gmra.mrb[0].mxu1 %vm4921_vm0, %v194_v32 }
 0x313   :  { %7179 = vmatpush3.bf16.msra.mxu0 %v8509_v50  ;;  %7201 = vmatpush3.bf16.msra.mxu1 %v8510_v51 }
 0x314   :  { %7180 = vmatprep.subr.bf16.mxu0 %v8511_v52  ;;  %7202 = vmatprep.subr.bf16.mxu1 %v8512_v53 }
 0x317   :  { %7181 = vmatpush3.bf16.msra.mxu0 %v8513_v54  ;;  %7203 = vmatpush3.bf16.msra.mxu1 %v8514_v42 }
 0x318   :  { %7182 = vmatprep.subr.bf16.mxu0 %v8515_v56  ;;  %7204 = vmatprep.subr.bf16.mxu1 %v8516_v39 }
 0x31b   :  { %7183 = vmatpush3.bf16.msra.mxu0 %v8517_v58  ;;  %7205 = vmatpush3.bf16.msra.mxu1 %v8518_v59 }
 0x31c   :  { %7184 = vmatprep.subr.bf16.mxu0 %v8519_v60  ;;  %7206 = vmatprep.subr.bf16.mxu1 %v8520_v61 }
 0x31f   :  { %7185 = vmatpush3.bf16.msra.mxu0 %v8521_v63  ;;  %7207 = vmatpush3.bf16.msra.mxu1 %v8522_v47 }
 0x320   :  { %7186 = vmatprep.subr.bf16.mxu0 %v8523_v0  ;;  %7208 = vmatprep.subr.bf16.mxu1 %v8524_v1 }
 0x323   :  { %7187 = vmatpush3.bf16.msra.mxu0 %v8525_v2  ;;  %7209 = vmatpush3.bf16.msra.mxu1 %v8526_v3 }
 0x324   :  { %7188 = vmatprep.subr.bf16.mxu0 %v8527_v4  ;;  %7210 = vmatprep.subr.bf16.mxu1 %v8528_v57 }
 0x327   :  { %7189 = vmatpush3.bf16.msra.mxu0 %v8529_v6  ;;  %7211 = vmatpush3.bf16.msra.mxu1 %v8530_v55 }
 0x328   :  { %7190 = vmatprep.subr.bf16.mxu0 %v8531_v8  ;;  %7212 = vmatprep.subr.bf16.mxu1 %v8532_v10 }
 0x32b   :  { %7191 = vmatpush3.bf16.msra.mxu0 %v8533_v11  ;;  %7213 = vmatpush3.bf16.msra.mxu1 %v8534_v12 }
 0x32c   :  { %7192 = vmatprep.subr.bf16.mxu0 %v8535_v14  ;;  %7214 = vmatprep.subr.bf16.mxu1 %v8536_v62 }
 0x32f   :  { %7193 = vmatpush3.bf16.msra.mxu0 %v8537_v15  ;;  %7215 = vmatpush3.bf16.msra.mxu1 %v8538_v16 }
 0x3e5   :  { %v5451_v9 = vpop.f32.mrb[0].mxu0  ;;  %v5984_v26 = vpop.f32.mrb[0].mxu1 }
 0x3e6   :  { %v7222_v27 = vadd.f32 %v5451_v9, %v984_v5  ;;  %v7224_v29 = vadd.f32 %v5984_v26, %v992_v22  ;;  %v5453_v13 = vpop.f32.mrb[1].mxu0  ;;  %v5986_v30 = vpop.f32.mrb[1].mxu1 }
 0x3e7   :  { %v7223_v31 = vadd.f32 %v5453_v13, %v988_v49  ;;  %v7225_v33 = vadd.f32 %v5986_v30, %v996_v23  ;;  %v5455_v20 = vpop.f32.mrb[2].mxu0  ;;  %v5988_v25 = vpop.f32.mrb[2].mxu1 }
 0x3e8   :  { %v5991_v34 = vmax.f32 %v7222_v27, 0.0  ;;  %v5993_v35 = vmax.f32 %v7224_v29, 0.0  ;;  %v5456_v36 = vpop.f32.mrb[3].mxu0  ;;  %v5989_v37 = vpop.f32.mrb[3].mxu1 }
 0x3e9   :  { %v5992_v38 = vmax.f32 %v7223_v31, 0.0  ;;  %v5994_v43 = vmax.f32 %v7225_v33, 0.0 }
 0x3ea   :  { %v5995_v41 = vpack.c.bf16 %v5991_v34, %v5991_v34  ;;  %v5997_v24 = vpack.c.bf16 %v5993_v35, %v5993_v35 }
 0x3eb   :  { %v5996_v28 = vpack.c.bf16 %v5992_v38, %v5992_v38  ;;  %v5998_v40 = vpack.c.bf16 %v5994_v43, %v5994_v43 }
 0x3ed   :  { %6294 = vmatprep.mubr.bf16.mxu0 %v5996_v28  ;;  %6334 = vmatprep.mubr.bf16.mxu1 %v5998_v40 }
 0x3ee   :  { %6295 = vmatmul.mubr.bf16.vlgmr.msra.gmra.mrb[4].mxu0 %v5995_v41  ;;  %6335 = vmatmul.mubr.bf16.vlgmr.msra.gmra.mrb[4].mxu1 %v5997_v24 }
 0x4c1   :  { %v7194_v44 = vpop.f32.mrb[4].mxu0  ;;  %v7216_v45 = vpop.f32.mrb[4].mxu1 }
 0x4c2   :  { %v7195_v48 = vpop.f32.mrb[5].mxu0  ;;  %v7217_v32 = vpop.f32.mrb[5].mxu1 }
 0x4c3   :  { %v7196_v50 = vadd.f32 %v7195_v48, %v7194_v44  ;;  %v7218_v51 = vadd.f32 %v7217_v32, %v7216_v45  ;;  %v7197_v52 = vpop.f32.mrb[6].mxu0  ;;  %v7219_v53 = vpop.f32.mrb[6].mxu1 }
 0x4c4   :  { %v7198_v54 = vpop.f32.mrb[7].mxu0  ;;  %v7220_v42 = vpop.f32.mrb[7].mxu1 }
 0x4c5   :  { %v6297_v56 = vadd.f32 %v7196_v50, %v7145_v46 }
 0x4c7   :  { %v6337_v39 = vadd.f32 %v7218_v51, %v6297_v56 }
 0x4c9   :  { %6343 = vst.msk [vmem:[#allocation2] sm:$0x3] %vm6342_vm1, %v6337_v39 }
 0x4ca   :  { %8550 = shalt.err (!%p8547_p4)
}
 0x4cb   :  { %s8551_s14 = scalar_lea.hbm %s11200_s5, 32 }
 0x4cc   :  { %p8552_p5 = scmp.ne.s32.totalorder %s11200_s5, %s8551_s14  ;;  %p8555_p6 = scmp.lt.u32.totalorder %s8551_s14, %s11200_s5 }
 0x4ce   :  { %p8557_p7 = pnand %p8555_p6, %p8552_p5 }
 0x4d0   :  { %8560 = shalt.err (!%p8557_p7)
}
 0x4d1   :  { %6353 = dma.vmem_to_hbm [thread:$0]  %s6351_s11, 32, %s11200_s5, [#allocation3]  }
 0x4d2   :  { %8561 = dma.done.wait [#allocation3], 32  }
 0x4d3   :  { %8562 = vsyncadd [#allocation3], 4294967264 }
 0x4d4   :  { %6357 = vsyncpa [#allocation3], 1 }

</bundles_post_ra>
